<compile_context>
chip_gen: v5e
topology: v5e:2x2
jax: 0.10.0
libtpu: 0.0.40
codegen_flags: <defaults>
</compile_context>

<pallas_src>
import functools

import jax
import jax.numpy as jnp
from jax.experimental import pallas as pl
from jax.experimental.pallas import tpu as pltpu


def _round_up(x, m):
    return ((x + m - 1) // m) * m


def _largest_divisor_leq(n, target, align=1):
    """Largest multiple of `align` that divides `n` and is <= max(align, target)."""
    target = max(align, min(n, target))
    best, d = align, align
    while d <= target:
        if n % d == 0:
            best = d
        d += align
    return best


@functools.lru_cache(maxsize=None)
def _vmem_limit_bytes():
    """Per-generation scoped VMEM budget (keep ~1/8 headroom for pipelining)."""
    default = 64 * 1024 * 1024
    try:
        cap = getattr(pltpu.get_tpu_info(), "vmem_capacity_bytes", None)
        if not cap:
            return default
        return int(cap) * 7 // 8          # ~56 MiB on v7x, ~112 MiB on v5e/v6e
    except Exception:                      # pragma: no cover - defensive fallback
        return default


# ---------------------- batched input projection (MXU) -----------------------
def _proj_kernel(x_ref, w_ref, b_ref, o_ref):
    # (tm, K) bf16 @ (K, tn) bf16 on the MXU, f32 accumulation, + f32 bias,
    # stored back as bf16 (gates_x intermediate).
    o_ref[...] = (
        jnp.dot(x_ref[...], w_ref[...], preferred_element_type=jnp.float32)
        + b_ref[...]
    ).astype(o_ref.dtype)


def input_projection(x2d_bf16, wih_t_bf16, bias_f32):
    """x2d: (M, K) bf16 with M = T * B_pad  ->  gates_x: (M, 4H) bf16."""
    M, K = x2d_bf16.shape
    N = wih_t_bf16.shape[1]

    # M tiling: big tiles for the HBM-bound projection; pad M up to the tile.
    if M >= 512:
        tm = 512
    elif M >= 128:
        tm = 128
    else:
        tm = _round_up(M, 8)
    m_pad = _round_up(M, tm)
    if m_pad != M:
        x2d_bf16 = jnp.pad(x2d_bf16, ((0, m_pad - M), (0, 0)))

    # N (=4H) tiling: bound the W_ih block residency (required to fit v7x).
    tn = _largest_divisor_leq(N, 2048, align=128) if N % 128 == 0 else N

    out = pl.pallas_call(
        _proj_kernel,
        out_shape=jax.ShapeDtypeStruct((m_pad, N), jnp.bfloat16),
        grid_spec=pltpu.PrefetchScalarGridSpec(
            num_scalar_prefetch=0,
            grid=(m_pad // tm, N // tn),
            in_specs=[
                pl.BlockSpec((tm, K), lambda i, j: (i, 0)),
                pl.BlockSpec((K, tn), lambda i, j: (0, j)),
                pl.BlockSpec((1, tn), lambda i, j: (0, j)),
            ],
            out_specs=pl.BlockSpec((tm, tn), lambda i, j: (i, j)),
        ),
        compiler_params=pltpu.CompilerParams(
            dimension_semantics=("parallel", "parallel"),
            vmem_limit_bytes=_vmem_limit_bytes(),
        ),
    )(x2d_bf16, wih_t_bf16, bias_f32)
    return out[:M] if m_pad != M else out


# --------------------------- LSTM recurrence kernels --------------------------
def _lstm_gate_update(gates, c_prev, H):
    # PyTorch gate order: i, f, g, o.  All math in f32.
    # One sigmoid over the contiguous [i|f] slab (2H lanes, 128-aligned splits).
    if_slab = jax.nn.sigmoid(gates[:, : 2 * H])
    i_g = if_slab[:, :H]
    f_g = if_slab[:, H:]
    g_g = jnp.tanh(gates[:, 2 * H:3 * H])
    o_g = jax.nn.sigmoid(gates[:, 3 * H:4 * H])
    c_new = f_g * c_prev + i_g * g_g
    h_new = o_g * jnp.tanh(c_new)
    return h_new, c_new


def _lstm_seq_kernel(gx_ref, whh_ref, h_seq_ref, h_sc, c_sc):
    """Intermediate layer, one (batch-block, T-chunk) grid step.

    gx_ref: (Tc, Bblk, 4H) bf16, whh_ref: (H, 4H) bf16,
    h_seq_ref: (Tc, Bblk, H) bf16, h_sc/c_sc: (Bblk, H) f32 state carried
    across the T-chunk ("arbitrary") grid axis.
    """
    H = h_sc.shape[-1]
    Tc = gx_ref.shape[0]

    @pl.when(pl.program_id(1) == 0)
    def _():
        h_sc[...] = jnp.zeros_like(h_sc)
        c_sc[...] = jnp.zeros_like(c_sc)

    def step(t, carry):
        gates = gx_ref[t].astype(jnp.float32) + jnp.dot(
            h_sc[...].astype(whh_ref.dtype), whh_ref[...],
            preferred_element_type=jnp.float32)
        h_new, c_new = _lstm_gate_update(gates, c_sc[...], H)
        h_sc[...] = h_new
        c_sc[...] = c_new
        h_seq_ref[t] = h_new.astype(h_seq_ref.dtype)
        return carry

    jax.lax.fori_loop(0, Tc, step, 0, unroll=True)


def _lstm_last_kernel(gx_ref, whh_ref, wd_ref, bd_ref, y_ref, h_sc, c_sc):
    """Last layer: T-chunked recurrence + fused Linear on ht[-1]."""
    H = h_sc.shape[-1]
    Tc = gx_ref.shape[0]

    @pl.when(pl.program_id(1) == 0)
    def _():
        h_sc[...] = jnp.zeros_like(h_sc)
        c_sc[...] = jnp.zeros_like(c_sc)

    def step(t, carry):
        gates = gx_ref[t].astype(jnp.float32) + jnp.dot(
            h_sc[...].astype(whh_ref.dtype), whh_ref[...],
            preferred_element_type=jnp.float32)
        h_new, c_new = _lstm_gate_update(gates, c_sc[...], H)
        h_sc[...] = h_new
        c_sc[...] = c_new
        return carry

    jax.lax.fori_loop(0, Tc, step, 0, unroll=True)

    @pl.when(pl.program_id(1) == pl.num_programs(1) - 1)
    def _():
        # Fused dense: y = ht[-1] @ W_d^T + b_d (output padded to 128 lanes).
        y_ref[...] = (
            jnp.dot(h_sc[...].astype(wd_ref.dtype), wd_ref[...],
                    preferred_element_type=jnp.float32)
            + bd_ref[...]
        ).astype(y_ref.dtype)


def lstm_layer_seq(gates_x, whh_t_bf16, *, t_chunk=8):
    """gates_x: (T, Bp, 4H) bf16 -> h_seq: (T, Bp, H) bf16."""
    T, Bp, G = gates_x.shape
    H = whh_t_bf16.shape[0]
    tc = _largest_divisor_leq(T, t_chunk, align=1)
    bblk = _largest_divisor_leq(Bp, 256, align=8)
    return pl.pallas_call(
        _lstm_seq_kernel,
        out_shape=jax.ShapeDtypeStruct((T, Bp, H), jnp.bfloat16),
        grid_spec=pltpu.PrefetchScalarGridSpec(
            num_scalar_prefetch=0,
            grid=(Bp // bblk, T // tc),
            in_specs=[
                pl.BlockSpec((tc, bblk, G), lambda b, t: (t, b, 0)),
                pl.BlockSpec((H, G), lambda b, t: (0, 0)),
            ],
            out_specs=pl.BlockSpec((tc, bblk, H), lambda b, t: (t, b, 0)),
            scratch_shapes=[
                pltpu.VMEM((bblk, H), jnp.float32),
                pltpu.VMEM((bblk, H), jnp.float32),
            ],
        ),
        compiler_params=pltpu.CompilerParams(
            dimension_semantics=("parallel", "arbitrary"),
            vmem_limit_bytes=_vmem_limit_bytes(),
        ),
    )(gates_x, whh_t_bf16)


def lstm_layer_last(gates_x, whh_t_bf16, wd_t_bf16, bd_f32, *, t_chunk=8):
    """gates_x: (T, Bp, 4H) bf16 -> y_padded: (Bp, F_pad) f32 (dense fused)."""
    T, Bp, G = gates_x.shape
    H = whh_t_bf16.shape[0]
    Fp = wd_t_bf16.shape[1]
    tc = _largest_divisor_leq(T, t_chunk, align=1)
    bblk = _largest_divisor_leq(Bp, 256, align=8)
    return pl.pallas_call(
        _lstm_last_kernel,
        out_shape=jax.ShapeDtypeStruct((Bp, Fp), jnp.float32),
        grid_spec=pltpu.PrefetchScalarGridSpec(
            num_scalar_prefetch=0,
            grid=(Bp // bblk, T // tc),
            in_specs=[
                pl.BlockSpec((tc, bblk, G), lambda b, t: (t, b, 0)),
                pl.BlockSpec((H, G), lambda b, t: (0, 0)),
                pl.BlockSpec((H, Fp), lambda b, t: (0, 0)),
                pl.BlockSpec((1, Fp), lambda b, t: (0, 0)),
            ],
            out_specs=pl.BlockSpec((bblk, Fp), lambda b, t: (b, 0)),
            scratch_shapes=[
                pltpu.VMEM((bblk, H), jnp.float32),
                pltpu.VMEM((bblk, H), jnp.float32),
            ],
        ),
        compiler_params=pltpu.CompilerParams(
            dimension_semantics=("parallel", "arbitrary"),
            vmem_limit_bytes=_vmem_limit_bytes(),
        ),
    )(gates_x, whh_t_bf16, wd_t_bf16, bd_f32)


# ------------------------------ params + forward ------------------------------
def init_qmodel_params(key, vocab_size, embedding_dim, hidden_size, num_layers,
                       out_feature):
    """Returns (params for the Pallas path, f32 master weights for reference)."""
    keys = jax.random.split(key, 1 + 4 * num_layers + 2)
    k_iter = iter(keys)
    master = {"w_ih": [], "w_hh": [], "b_ih": [], "b_hh": []}
    params = {}

    # frozen GloVe-style embedding table (synthetic, deterministic)
    emb = jax.random.normal(next(k_iter), (vocab_size, embedding_dim), jnp.float32)
    master["embedding"] = emb
    e_pad = _round_up(embedding_dim, 128)
    params["embedding"] = jnp.pad(emb, ((0, 0), (0, e_pad - embedding_dim)))

    bound = 1.0 / (hidden_size ** 0.5)   # PyTorch LSTM/Linear uniform init scale
    wih_t, whh_t, bias = [], [], []
    for layer in range(num_layers):
        din = embedding_dim if layer == 0 else hidden_size
        din_pad = _round_up(din, 128)
        w_ih = jax.random.uniform(next(k_iter), (4 * hidden_size, din),
                                  jnp.float32, -bound, bound)
        w_hh = jax.random.uniform(next(k_iter), (4 * hidden_size, hidden_size),
                                  jnp.float32, -bound, bound)
        b_ih = jax.random.uniform(next(k_iter), (4 * hidden_size,),
                                  jnp.float32, -bound, bound)
        b_hh = jax.random.uniform(next(k_iter), (4 * hidden_size,),
                                  jnp.float32, -bound, bound)
        master["w_ih"].append(w_ih)
        master["w_hh"].append(w_hh)
        master["b_ih"].append(b_ih)
        master["b_hh"].append(b_hh)
        # lane-padded, transposed, bf16 copies for the MXU path
        wih_pad = jnp.zeros((din_pad, 4 * hidden_size), jnp.float32)
        wih_pad = wih_pad.at[:din, :].set(w_ih.T)
        wih_t.append(wih_pad.astype(jnp.bfloat16))     # (Din_pad, 4H) bf16
        whh_t.append(w_hh.T.astype(jnp.bfloat16))       # (H,       4H) bf16
        bias.append((b_ih + b_hh)[None, :])              # (1,       4H) f32
    params["wih_t"], params["whh_t"], params["b"] = wih_t, whh_t, bias

    # Dense head, padded to 128 output lanes (zeros beyond out_feature).
    w_d = jax.random.uniform(next(k_iter), (out_feature, hidden_size),
                             jnp.float32, -bound, bound)
    b_d = jax.random.uniform(next(k_iter), (out_feature,),
                             jnp.float32, -bound, bound)
    master["w_d"], master["b_d"] = w_d, b_d
    f_pad = _round_up(out_feature, 128)
    wd_t = jnp.zeros((hidden_size, f_pad), jnp.float32).at[:, :out_feature].set(w_d.T)
    bd = jnp.zeros((1, f_pad), jnp.float32).at[0, :out_feature].set(b_d)
    params["wd_t"] = wd_t.astype(jnp.bfloat16)   # (H, F_pad) bf16
    params["bd"] = bd                            # (1, F_pad) f32
    return params, master


def qmodel_forward(params, token_ids, *, num_layers, out_feature, t_chunk=8):
    B, T = token_ids.shape
    # Embedding lookup (gather) in plain JAX; Dropout(p=0.2) is identity at eval.
    x = jnp.take(params["embedding"], token_ids, axis=0)          # (B, T, E_pad)
    # TODO(synk): at production, stack multiple sequences so Bp >= 128 and the
    # recurrent matmul feeds full MXU rows.
    b_pad = max(8, _round_up(B, 8))                               # sublane pad
    if b_pad != B:
        x = jnp.pad(x, ((0, b_pad - B), (0, 0), (0, 0)))
    x = jnp.transpose(x, (1, 0, 2)).astype(jnp.bfloat16)          # (T, Bp, E_pad)

    h_in = x
    y_pad = None
    for layer in range(num_layers):
        t_, bp, din = h_in.shape
        # hoisted input projection: one big MXU matmul over M = T * B_pad rows
        gx = input_projection(h_in.reshape(t_ * bp, din),
                              params["wih_t"][layer], params["b"][layer])
        gx = gx.reshape(t_, bp, -1)                               # (T, Bp, 4H) bf16
        if layer < num_layers - 1:
            h_in = lstm_layer_seq(gx, params["whh_t"][layer], t_chunk=t_chunk)
        else:
            y_pad = lstm_layer_last(gx, params["whh_t"][layer],
                                    params["wd_t"], params["bd"],
                                    t_chunk=t_chunk)              # (Bp, F_pad)
    return y_pad[:B, :out_feature]


# ------------------------------ f32 reference ---------------------------------
def qmodel_reference(master, token_ids):
    """Pure-JAX f32 reference matching the PyTorch module semantics."""
    x = master["embedding"][token_ids]                            # (B, T, E)
    B, T, _ = x.shape
    h_in = x
    h = None
    for layer in range(len(master["w_ih"])):
        w_ih, w_hh = master["w_ih"][layer], master["w_hh"][layer]
        b = master["b_ih"][layer] + master["b_hh"][layer]
        H = w_hh.shape[1]
        h = jnp.zeros((B, H), jnp.float32)
        c = jnp.zeros((B, H), jnp.float32)
        outs = []
        for t in range(T):
            gates = h_in[:, t, :] @ w_ih.T + h @ w_hh.T + b
            i_g = jax.nn.sigmoid(gates[:, 0 * H:1 * H])
            f_g = jax.nn.sigmoid(gates[:, 1 * H:2 * H])
            g_g = jnp.tanh(gates[:, 2 * H:3 * H])
            o_g = jax.nn.sigmoid(gates[:, 3 * H:4 * H])
            c = f_g * c + i_g * g_g
            h = o_g * jnp.tanh(c)
            outs.append(h)
        h_in = jnp.stack(outs, axis=1)                            # (B, T, H)
    return h @ master["w_d"].T + master["b_d"]


# ----------------------------------- main ------------------------------------
if __name__ == "__main__":
    VOCAB = 50
    EMB_DIM = 300       # as in the module (padded to 384 lanes internally)
    HIDDEN = 128        # module uses 2048; scaled down but kept a 128-multiple
    NUM_LAYERS = 2
    OUT_FEATURE = 8
    BATCH = 2
    SEQ = 16            # two T-chunks of 8 -> exercises the chunked recurrence

    key = jax.random.PRNGKey(0)
    k_params, k_tokens = jax.random.split(key)
    params, master = init_qmodel_params(k_params, VOCAB, EMB_DIM, HIDDEN,
                                        NUM_LAYERS, OUT_FEATURE)
    token_ids = jax.random.randint(k_tokens, (BATCH, SEQ), 0, VOCAB,
                                   dtype=jnp.int32)

    fwd = jax.jit(functools.partial(qmodel_forward,
                                    num_layers=NUM_LAYERS,
                                    out_feature=OUT_FEATURE,
                                    t_chunk=8))
    y = fwd(params, token_ids)
    jax.block_until_ready(y)
    assert y.shape == (BATCH, OUT_FEATURE)

    # Relaxed-tolerance validation vs the f32 reference (weights / gates_x /
    # inter-layer activations are stored bf16 on the kernel path).
    y_ref = qmodel_reference(master, token_ids)
    max_diff = float(jnp.max(jnp.abs(y - y_ref)))
    assert max_diff < 7.5e-2, max_diff
    print("KERNEL_OK")
</pallas_src>

<mosaic_0001>
module attributes {stable_mosaic.version = 11 : i64} {
  func.func @_proj_kernel(%arg0: i32, %arg1: i32, %arg2: memref<128x384xbf16, #tpu.memory_space<vmem>>, %arg3: memref<384x512xbf16, #tpu.memory_space<vmem>>, %arg4: memref<1x512xf32, #tpu.memory_space<vmem>>, %arg5: memref<128x512xbf16, #tpu.memory_space<vmem>>) attributes {dimension_semantics = [#tpu.dimension_semantics<parallel>, #tpu.dimension_semantics<parallel>], iteration_bounds = array<i64: 1, 1>, scalar_prefetch = 0 : i64, scratch_operands = 0 : i64, tpu.core_type = #tpu.core_type<tc>, window_params = [{transform_indices = @transform_0, window_bounds = array<i64: 128, 384>}, {transform_indices = @transform_1, window_bounds = array<i64: 384, 512>}, {transform_indices = @transform_2, window_bounds = array<i64: 1, 512>}, {transform_indices = @transform_3, window_bounds = array<i64: 128, 512>}]} {
    %c0 = arith.constant 0 : index
    %c0_0 = arith.constant 0 : index
    %0 = vector.load %arg2[%c0, %c0_0] : memref<128x384xbf16, #tpu.memory_space<vmem>>, vector<128x384xbf16>
    %c0_1 = arith.constant 0 : index
    %c0_2 = arith.constant 0 : index
    %1 = vector.load %arg3[%c0_1, %c0_2] : memref<384x512xbf16, #tpu.memory_space<vmem>>, vector<384x512xbf16>
    %cst = arith.constant dense<0.000000e+00> : vector<128x512xf32>
    %2 = tpu.matmul %0, %1, %cst {dimension_numbers = #tpu.dot_dimension_numbers<[1], [0], [0], [1], [0, 0, 1, 1], [], []>} : vector<128x384xbf16>, vector<384x512xbf16>, vector<128x512xf32> -> vector<128x512xf32>
    %c0_3 = arith.constant 0 : index
    %c0_4 = arith.constant 0 : index
    %3 = vector.load %arg4[%c0_3, %c0_4] : memref<1x512xf32, #tpu.memory_space<vmem>>, vector<1x512xf32>
    %4 = vector.broadcast %3 : vector<1x512xf32> to vector<128x512xf32>
    %5 = arith.addf %2, %4 : vector<128x512xf32>
    %6 = arith.truncf %5 : vector<128x512xf32> to vector<128x512xbf16>
    %c0_5 = arith.constant 0 : index
    %c0_6 = arith.constant 0 : index
    %7 = vector.load %arg5[%c0_5, %c0_6] : memref<128x512xbf16, #tpu.memory_space<vmem>>, vector<128x512xbf16>
    tpu.vector_store %arg5[%c0_5, %c0_6], %6 {strides = array<i32>} : memref<128x512xbf16, #tpu.memory_space<vmem>>, vector<128x512xbf16>,
    return
  }
  func.func @transform_0(%arg0: i32, %arg1: i32) -> (i32, i32) {
    %c0_i32 = arith.constant 0 : i32
    %c0_i32_0 = arith.constant 0 : i32
    return %arg0, %c0_i32 : i32, i32
  }
  func.func @transform_1(%arg0: i32, %arg1: i32) -> (i32, i32) {
    %c0_i32 = arith.constant 0 : i32
    %c0_i32_0 = arith.constant 0 : i32
    return %c0_i32, %arg1 : i32, i32
  }
  func.func @transform_2(%arg0: i32, %arg1: i32) -> (i32, i32) {
    %c0_i32 = arith.constant 0 : i32
    %c0_i32_0 = arith.constant 0 : i32
    return %c0_i32, %arg1 : i32, i32
  }
  func.func @transform_3(%arg0: i32, %arg1: i32) -> (i32, i32) {
    %c0_i32 = arith.constant 0 : i32
    return %arg0, %arg1 : i32, i32
  }
}

module attributes {stable_mosaic.version = 11 : i64} {
  func.func @_proj_kernel(%arg0: i32, %arg1: i32, %arg2: memref<128x128xbf16, #tpu.memory_space<vmem>>, %arg3: memref<128x512xbf16, #tpu.memory_space<vmem>>, %arg4: memref<1x512xf32, #tpu.memory_space<vmem>>, %arg5: memref<128x512xbf16, #tpu.memory_space<vmem>>) attributes {dimension_semantics = [#tpu.dimension_semantics<parallel>, #tpu.dimension_semantics<parallel>], iteration_bounds = array<i64: 1, 1>, scalar_prefetch = 0 : i64, scratch_operands = 0 : i64, tpu.core_type = #tpu.core_type<tc>, window_params = [{transform_indices = @transform_0, window_bounds = array<i64: 128, 128>}, {transform_indices = @transform_1, window_bounds = array<i64: 128, 512>}, {transform_indices = @transform_2, window_bounds = array<i64: 1, 512>}, {transform_indices = @transform_3, window_bounds = array<i64: 128, 512>}]} {
    %c0 = arith.constant 0 : index
    %c0_0 = arith.constant 0 : index
    %0 = vector.load %arg2[%c0, %c0_0] : memref<128x128xbf16, #tpu.memory_space<vmem>>, vector<128x128xbf16>
    %c0_1 = arith.constant 0 : index
    %c0_2 = arith.constant 0 : index
    %1 = vector.load %arg3[%c0_1, %c0_2] : memref<128x512xbf16, #tpu.memory_space<vmem>>, vector<128x512xbf16>
    %cst = arith.constant dense<0.000000e+00> : vector<128x512xf32>
    %2 = tpu.matmul %0, %1, %cst {dimension_numbers = #tpu.dot_dimension_numbers<[1], [0], [0], [1], [0, 0, 1, 1], [], []>} : vector<128x128xbf16>, vector<128x512xbf16>, vector<128x512xf32> -> vector<128x512xf32>
    %c0_3 = arith.constant 0 : index
    %c0_4 = arith.constant 0 : index
    %3 = vector.load %arg4[%c0_3, %c0_4] : memref<1x512xf32, #tpu.memory_space<vmem>>, vector<1x512xf32>
    %4 = vector.broadcast %3 : vector<1x512xf32> to vector<128x512xf32>
    %5 = arith.addf %2, %4 : vector<128x512xf32>
    %6 = arith.truncf %5 : vector<128x512xf32> to vector<128x512xbf16>
    %c0_5 = arith.constant 0 : index
    %c0_6 = arith.constant 0 : index
    %7 = vector.load %arg5[%c0_5, %c0_6] : memref<128x512xbf16, #tpu.memory_space<vmem>>, vector<128x512xbf16>
    tpu.vector_store %arg5[%c0_5, %c0_6], %6 {strides = array<i32>} : memref<128x512xbf16, #tpu.memory_space<vmem>>, vector<128x512xbf16>,
    return
  }
  func.func @transform_0(%arg0: i32, %arg1: i32) -> (i32, i32) {
    %c0_i32 = arith.constant 0 : i32
    %c0_i32_0 = arith.constant 0 : i32
    return %arg0, %c0_i32 : i32, i32
  }
  func.func @transform_1(%arg0: i32, %arg1: i32) -> (i32, i32) {
    %c0_i32 = arith.constant 0 : i32
    %c0_i32_0 = arith.constant 0 : i32
    return %c0_i32, %arg1 : i32, i32
  }
  func.func @transform_2(%arg0: i32, %arg1: i32) -> (i32, i32) {
    %c0_i32 = arith.constant 0 : i32
    %c0_i32_0 = arith.constant 0 : i32
    return %c0_i32, %arg1 : i32, i32
  }
  func.func @transform_3(%arg0: i32, %arg1: i32) -> (i32, i32) {
    %c0_i32 = arith.constant 0 : i32
    return %arg0, %arg1 : i32, i32
  }
}

module attributes {stable_mosaic.version = 11 : i64} {
  func.func @_lstm_seq_kernel(%arg0: i32, %arg1: i32, %arg2: memref<8x8x512xbf16, #tpu.memory_space<vmem>>, %arg3: memref<128x512xbf16, #tpu.memory_space<vmem>>, %arg4: memref<8x8x128xbf16, #tpu.memory_space<vmem>>, %arg5: memref<8x128xf32, #tpu.memory_space<vmem>>, %arg6: memref<8x128xf32, #tpu.memory_space<vmem>>) attributes {dimension_semantics = [#tpu.dimension_semantics<parallel>, #tpu.dimension_semantics<arbitrary>], iteration_bounds = array<i64: 1, 2>, scalar_prefetch = 0 : i64, scratch_operands = 2 : i64, tpu.core_type = #tpu.core_type<tc>, window_params = [{transform_indices = @transform_0, window_bounds = array<i64: 8, 8, 512>}, {pipeline_mode = #tpu.pipeline_mode<synchronous>, transform_indices = @transform_1, window_bounds = array<i64: 128, 512>}, {transform_indices = @transform_2, window_bounds = array<i64: 8, 8, 128>}]} {
    %c0_i32 = arith.constant 0 : i32
    %0 = arith.cmpi eq, %arg1, %c0_i32 : i32
    %1 = arith.extui %0 : i1 to i32
    %c0_i32_0 = arith.constant 0 : i32
    %2 = arith.cmpi ne, %1, %c0_i32_0 : i32
    scf.if %2 {
      %cst_136 = arith.constant 0.000000e+00 : f32
      %307 = vector.broadcast %cst_136 : f32 to vector<8x128xf32>
      %c0_137 = arith.constant 0 : index
      %c0_138 = arith.constant 0 : index
      %308 = vector.load %arg5[%c0_137, %c0_138] : memref<8x128xf32, #tpu.memory_space<vmem>>, vector<8x128xf32>
      tpu.vector_store %arg5[%c0_137, %c0_138], %307 {strides = array<i32>} : memref<8x128xf32, #tpu.memory_space<vmem>>, vector<8x128xf32>,
      %cst_139 = arith.constant 0.000000e+00 : f32
      %309 = vector.broadcast %cst_139 : f32 to vector<8x128xf32>
      %c0_140 = arith.constant 0 : index
      %c0_141 = arith.constant 0 : index
      %310 = vector.load %arg6[%c0_140, %c0_141] : memref<8x128xf32, #tpu.memory_space<vmem>>, vector<8x128xf32>
      tpu.vector_store %arg6[%c0_140, %c0_141], %309 {strides = array<i32>} : memref<8x128xf32, #tpu.memory_space<vmem>>, vector<8x128xf32>,
    } else {
    }
    %c0_i32_1 = arith.constant 0 : i32
    %3 = arith.index_cast %c0_i32_1 : i32 to index
    %c0 = arith.constant 0 : index
    %c0_2 = arith.constant 0 : index
    %4 = vector.load %arg2[%3, %c0, %c0_2] : memref<8x8x512xbf16, #tpu.memory_space<vmem>>, vector<1x8x512xbf16>
    %5 = vector.shape_cast %4 : vector<1x8x512xbf16> to vector<8x512xbf16>
    %6 = arith.extf %5 : vector<8x512xbf16> to vector<8x512xf32>
    %c0_3 = arith.constant 0 : index
    %c0_4 = arith.constant 0 : index
    %7 = vector.load %arg5[%c0_3, %c0_4] : memref<8x128xf32, #tpu.memory_space<vmem>>, vector<8x128xf32>
    %8 = arith.truncf %7 : vector<8x128xf32> to vector<8x128xbf16>
    %c0_5 = arith.constant 0 : index
    %c0_6 = arith.constant 0 : index
    %9 = vector.load %arg3[%c0_5, %c0_6] : memref<128x512xbf16, #tpu.memory_space<vmem>>, vector<128x512xbf16>
    %cst = arith.constant dense<0.000000e+00> : vector<8x512xf32>
    %10 = tpu.matmul %8, %9, %cst {dimension_numbers = #tpu.dot_dimension_numbers<[1], [0], [0], [1], [0, 0, 1, 1], [], []>} : vector<8x128xbf16>, vector<128x512xbf16>, vector<8x512xf32> -> vector<8x512xf32>
    %11 = arith.addf %6, %10 : vector<8x512xf32>
    %c0_7 = arith.constant 0 : index
    %c0_8 = arith.constant 0 : index
    %12 = vector.load %arg6[%c0_7, %c0_8] : memref<8x128xf32, #tpu.memory_space<vmem>>, vector<8x128xf32>
    %13 = vector.extract_strided_slice %11 {offsets = [0, 0], sizes = [8, 256], strides = [1, 1]} : vector<8x512xf32> to vector<8x256xf32>
    %14 = arith.negf %13 : vector<8x256xf32>
    %15 = math.exp %14 : vector<8x256xf32>
    %cst_9 = arith.constant 1.000000e+00 : f32
    %16 = vector.broadcast %cst_9 : f32 to vector<8x256xf32>
    %17 = arith.addf %16, %15 : vector<8x256xf32>
    %18 = arith.divf %16, %17 : vector<8x256xf32>
    %19 = vector.extract_strided_slice %18 {offsets = [0, 0], sizes = [8, 128], strides = [1, 1]} : vector<8x256xf32> to vector<8x128xf32>
    %20 = vector.extract_strided_slice %18 {offsets = [0, 128], sizes = [8, 128], strides = [1, 1]} : vector<8x256xf32> to vector<8x128xf32>
    %21 = vector.extract_strided_slice %11 {offsets = [0, 256], sizes = [8, 128], strides = [1, 1]} : vector<8x512xf32> to vector<8x128xf32>
    %22 = math.tanh %21 : vector<8x128xf32>
    %23 = vector.extract_strided_slice %11 {offsets = [0, 384], sizes = [8, 128], strides = [1, 1]} : vector<8x512xf32> to vector<8x128xf32>
    %24 = arith.negf %23 : vector<8x128xf32>
    %25 = math.exp %24 : vector<8x128xf32>
    %cst_10 = arith.constant 1.000000e+00 : f32
    %26 = vector.broadcast %cst_10 : f32 to vector<8x128xf32>
    %27 = arith.addf %26, %25 : vector<8x128xf32>
    %28 = arith.divf %26, %27 : vector<8x128xf32>
    %29 = arith.mulf %20, %12 : vector<8x128xf32>
    %30 = arith.mulf %19, %22 : vector<8x128xf32>
    %31 = arith.addf %29, %30 : vector<8x128xf32>
    %32 = math.tanh %31 : vector<8x128xf32>
    %33 = arith.mulf %28, %32 : vector<8x128xf32>
    %c0_11 = arith.constant 0 : index
    %c0_12 = arith.constant 0 : index
    %34 = vector.load %arg5[%c0_11, %c0_12] : memref<8x128xf32, #tpu.memory_space<vmem>>, vector<8x128xf32>
    tpu.vector_store %arg5[%c0_11, %c0_12], %33 {strides = array<i32>} : memref<8x128xf32, #tpu.memory_space<vmem>>, vector<8x128xf32>,
    %c0_13 = arith.constant 0 : index
    %c0_14 = arith.constant 0 : index
    %35 = vector.load %arg6[%c0_13, %c0_14] : memref<8x128xf32, #tpu.memory_space<vmem>>, vector<8x128xf32>
    tpu.vector_store %arg6[%c0_13, %c0_14], %31 {strides = array<i32>} : memref<8x128xf32, #tpu.memory_space<vmem>>, vector<8x128xf32>,
    %36 = arith.truncf %33 : vector<8x128xf32> to vector<8x128xbf16>
    %37 = arith.index_cast %c0_i32_1 : i32 to index
    %c0_15 = arith.constant 0 : index
    %c0_16 = arith.constant 0 : index
    %38 = vector.load %arg4[%37, %c0_15, %c0_16] : memref<8x8x128xbf16, #tpu.memory_space<vmem>>, vector<1x8x128xbf16>
    %39 = vector.shape_cast %38 : vector<1x8x128xbf16> to vector<8x128xbf16>
    %40 = vector.shape_cast %36 : vector<8x128xbf16> to vector<1x8x128xbf16>
    tpu.vector_store %arg4[%37, %c0_15, %c0_16], %40 {strides = array<i32>} : memref<8x8x128xbf16, #tpu.memory_space<vmem>>, vector<1x8x128xbf16>,
    %c1_i32 = arith.constant 1 : i32
    %41 = arith.index_cast %c1_i32 : i32 to index
    %c0_17 = arith.constant 0 : index
    %c0_18 = arith.constant 0 : index
    %42 = vector.load %arg2[%41, %c0_17, %c0_18] : memref<8x8x512xbf16, #tpu.memory_space<vmem>>, vector<1x8x512xbf16>
    %43 = vector.shape_cast %42 : vector<1x8x512xbf16> to vector<8x512xbf16>
    %44 = arith.extf %43 : vector<8x512xbf16> to vector<8x512xf32>
    %c0_19 = arith.constant 0 : index
    %c0_20 = arith.constant 0 : index
    %45 = vector.load %arg5[%c0_19, %c0_20] : memref<8x128xf32, #tpu.memory_space<vmem>>, vector<8x128xf32>
    %46 = arith.truncf %45 : vector<8x128xf32> to vector<8x128xbf16>
    %c0_21 = arith.constant 0 : index
    %c0_22 = arith.constant 0 : index
    %47 = vector.load %arg3[%c0_21, %c0_22] : memref<128x512xbf16, #tpu.memory_space<vmem>>, vector<128x512xbf16>
    %cst_23 = arith.constant dense<0.000000e+00> : vector<8x512xf32>
    %48 = tpu.matmul %46, %47, %cst_23 {dimension_numbers = #tpu.dot_dimension_numbers<[1], [0], [0], [1], [0, 0, 1, 1], [], []>} : vector<8x128xbf16>, vector<128x512xbf16>, vector<8x512xf32> -> vector<8x512xf32>
    %49 = arith.addf %44, %48 : vector<8x512xf32>
    %c0_24 = arith.constant 0 : index
    %c0_25 = arith.constant 0 : index
    %50 = vector.load %arg6[%c0_24, %c0_25] : memref<8x128xf32, #tpu.memory_space<vmem>>, vector<8x128xf32>
    %51 = vector.extract_strided_slice %49 {offsets = [0, 0], sizes = [8, 256], strides = [1, 1]} : vector<8x512xf32> to vector<8x256xf32>
    %52 = arith.negf %51 : vector<8x256xf32>
    %53 = math.exp %52 : vector<8x256xf32>
    %cst_26 = arith.constant 1.000000e+00 : f32
    %54 = vector.broadcast %cst_26 : f32 to vector<8x256xf32>
    %55 = arith.addf %54, %53 : vector<8x256xf32>
    %56 = arith.divf %54, %55 : vector<8x256xf32>
    %57 = vector.extract_strided_slice %56 {offsets = [0, 0], sizes = [8, 128], strides = [1, 1]} : vector<8x256xf32> to vector<8x128xf32>
    %58 = vector.extract_strided_slice %56 {offsets = [0, 128], sizes = [8, 128], strides = [1, 1]} : vector<8x256xf32> to vector<8x128xf32>
    %59 = vector.extract_strided_slice %49 {offsets = [0, 256], sizes = [8, 128], strides = [1, 1]} : vector<8x512xf32> to vector<8x128xf32>
    %60 = math.tanh %59 : vector<8x128xf32>
    %61 = vector.extract_strided_slice %49 {offsets = [0, 384], sizes = [8, 128], strides = [1, 1]} : vector<8x512xf32> to vector<8x128xf32>
    %62 = arith.negf %61 : vector<8x128xf32>
    %63 = math.exp %62 : vector<8x128xf32>
    %cst_27 = arith.constant 1.000000e+00 : f32
    %64 = vector.broadcast %cst_27 : f32 to vector<8x128xf32>
    %65 = arith.addf %64, %63 : vector<8x128xf32>
    %66 = arith.divf %64, %65 : vector<8x128xf32>
    %67 = arith.mulf %58, %50 : vector<8x128xf32>
    %68 = arith.mulf %57, %60 : vector<8x128xf32>
    %69 = arith.addf %67, %68 : vector<8x128xf32>
    %70 = math.tanh %69 : vector<8x128xf32>
    %71 = arith.mulf %66, %70 : vector<8x128xf32>
    %c0_28 = arith.constant 0 : index
    %c0_29 = arith.constant 0 : index
    %72 = vector.load %arg5[%c0_28, %c0_29] : memref<8x128xf32, #tpu.memory_space<vmem>>, vector<8x128xf32>
    tpu.vector_store %arg5[%c0_28, %c0_29], %71 {strides = array<i32>} : memref<8x128xf32, #tpu.memory_space<vmem>>, vector<8x128xf32>,
    %c0_30 = arith.constant 0 : index
    %c0_31 = arith.constant 0 : index
    %73 = vector.load %arg6[%c0_30, %c0_31] : memref<8x128xf32, #tpu.memory_space<vmem>>, vector<8x128xf32>
    tpu.vector_store %arg6[%c0_30, %c0_31], %69 {strides = array<i32>} : memref<8x128xf32, #tpu.memory_space<vmem>>, vector<8x128xf32>,
    %74 = arith.truncf %71 : vector<8x128xf32> to vector<8x128xbf16>
    %75 = arith.index_cast %c1_i32 : i32 to index
    %c0_32 = arith.constant 0 : index
    %c0_33 = arith.constant 0 : index
    %76 = vector.load %arg4[%75, %c0_32, %c0_33] : memref<8x8x128xbf16, #tpu.memory_space<vmem>>, vector<1x8x128xbf16>
    %77 = vector.shape_cast %76 : vector<1x8x128xbf16> to vector<8x128xbf16>
    %78 = vector.shape_cast %74 : vector<8x128xbf16> to vector<1x8x128xbf16>
    tpu.vector_store %arg4[%75, %c0_32, %c0_33], %78 {strides = array<i32>} : memref<8x8x128xbf16, #tpu.memory_space<vmem>>, vector<1x8x128xbf16>,
    %c2_i32 = arith.constant 2 : i32
    %79 = arith.index_cast %c2_i32 : i32 to index
    %c0_34 = arith.constant 0 : index
    %c0_35 = arith.constant 0 : index
    %80 = vector.load %arg2[%79, %c0_34, %c0_35] : memref<8x8x512xbf16, #tpu.memory_space<vmem>>, vector<1x8x512xbf16>
    %81 = vector.shape_cast %80 : vector<1x8x512xbf16> to vector<8x512xbf16>
    %82 = arith.extf %81 : vector<8x512xbf16> to vector<8x512xf32>
    %c0_36 = arith.constant 0 : index
    %c0_37 = arith.constant 0 : index
    %83 = vector.load %arg5[%c0_36, %c0_37] : memref<8x128xf32, #tpu.memory_space<vmem>>, vector<8x128xf32>
    %84 = arith.truncf %83 : vector<8x128xf32> to vector<8x128xbf16>
    %c0_38 = arith.constant 0 : index
    %c0_39 = arith.constant 0 : index
    %85 = vector.load %arg3[%c0_38, %c0_39] : memref<128x512xbf16, #tpu.memory_space<vmem>>, vector<128x512xbf16>
    %cst_40 = arith.constant dense<0.000000e+00> : vector<8x512xf32>
    %86 = tpu.matmul %84, %85, %cst_40 {dimension_numbers = #tpu.dot_dimension_numbers<[1], [0], [0], [1], [0, 0, 1, 1], [], []>} : vector<8x128xbf16>, vector<128x512xbf16>, vector<8x512xf32> -> vector<8x512xf32>
    %87 = arith.addf %82, %86 : vector<8x512xf32>
    %c0_41 = arith.constant 0 : index
    %c0_42 = arith.constant 0 : index
    %88 = vector.load %arg6[%c0_41, %c0_42] : memref<8x128xf32, #tpu.memory_space<vmem>>, vector<8x128xf32>
    %89 = vector.extract_strided_slice %87 {offsets = [0, 0], sizes = [8, 256], strides = [1, 1]} : vector<8x512xf32> to vector<8x256xf32>
    %90 = arith.negf %89 : vector<8x256xf32>
    %91 = math.exp %90 : vector<8x256xf32>
    %cst_43 = arith.constant 1.000000e+00 : f32
    %92 = vector.broadcast %cst_43 : f32 to vector<8x256xf32>
    %93 = arith.addf %92, %91 : vector<8x256xf32>
    %94 = arith.divf %92, %93 : vector<8x256xf32>
    %95 = vector.extract_strided_slice %94 {offsets = [0, 0], sizes = [8, 128], strides = [1, 1]} : vector<8x256xf32> to vector<8x128xf32>
    %96 = vector.extract_strided_slice %94 {offsets = [0, 128], sizes = [8, 128], strides = [1, 1]} : vector<8x256xf32> to vector<8x128xf32>
    %97 = vector.extract_strided_slice %87 {offsets = [0, 256], sizes = [8, 128], strides = [1, 1]} : vector<8x512xf32> to vector<8x128xf32>
    %98 = math.tanh %97 : vector<8x128xf32>
    %99 = vector.extract_strided_slice %87 {offsets = [0, 384], sizes = [8, 128], strides = [1, 1]} : vector<8x512xf32> to vector<8x128xf32>
    %100 = arith.negf %99 : vector<8x128xf32>
    %101 = math.exp %100 : vector<8x128xf32>
    %cst_44 = arith.constant 1.000000e+00 : f32
    %102 = vector.broadcast %cst_44 : f32 to vector<8x128xf32>
    %103 = arith.addf %102, %101 : vector<8x128xf32>
    %104 = arith.divf %102, %103 : vector<8x128xf32>
    %105 = arith.mulf %96, %88 : vector<8x128xf32>
    %106 = arith.mulf %95, %98 : vector<8x128xf32>
    %107 = arith.addf %105, %106 : vector<8x128xf32>
    %108 = math.tanh %107 : vector<8x128xf32>
    %109 = arith.mulf %104, %108 : vector<8x128xf32>
    %c0_45 = arith.constant 0 : index
    %c0_46 = arith.constant 0 : index
    %110 = vector.load %arg5[%c0_45, %c0_46] : memref<8x128xf32, #tpu.memory_space<vmem>>, vector<8x128xf32>
    tpu.vector_store %arg5[%c0_45, %c0_46], %109 {strides = array<i32>} : memref<8x128xf32, #tpu.memory_space<vmem>>, vector<8x128xf32>,
    %c0_47 = arith.constant 0 : index
    %c0_48 = arith.constant 0 : index
    %111 = vector.load %arg6[%c0_47, %c0_48] : memref<8x128xf32, #tpu.memory_space<vmem>>, vector<8x128xf32>
    tpu.vector_store %arg6[%c0_47, %c0_48], %107 {strides = array<i32>} : memref<8x128xf32, #tpu.memory_space<vmem>>, vector<8x128xf32>,
    %112 = arith.truncf %109 : vector<8x128xf32> to vector<8x128xbf16>
    %113 = arith.index_cast %c2_i32 : i32 to index
    %c0_49 = arith.constant 0 : index
    %c0_50 = arith.constant 0 : index
    %114 = vector.load %arg4[%113, %c0_49, %c0_50] : memref<8x8x128xbf16, #tpu.memory_space<vmem>>, vector<1x8x128xbf16>
    %115 = vector.shape_cast %114 : vector<1x8x128xbf16> to vector<8x128xbf16>
    %116 = vector.shape_cast %112 : vector<8x128xbf16> to vector<1x8x128xbf16>
    tpu.vector_store %arg4[%113, %c0_49, %c0_50], %116 {strides = array<i32>} : memref<8x8x128xbf16, #tpu.memory_space<vmem>>, vector<1x8x128xbf16>,
    %c3_i32 = arith.constant 3 : i32
    %117 = arith.index_cast %c3_i32 : i32 to index
    %c0_51 = arith.constant 0 : index
    %c0_52 = arith.constant 0 : index
    %118 = vector.load %arg2[%117, %c0_51, %c0_52] : memref<8x8x512xbf16, #tpu.memory_space<vmem>>, vector<1x8x512xbf16>
    %119 = vector.shape_cast %118 : vector<1x8x512xbf16> to vector<8x512xbf16>
    %120 = arith.extf %119 : vector<8x512xbf16> to vector<8x512xf32>
    %c0_53 = arith.constant 0 : index
    %c0_54 = arith.constant 0 : index
    %121 = vector.load %arg5[%c0_53, %c0_54] : memref<8x128xf32, #tpu.memory_space<vmem>>, vector<8x128xf32>
    %122 = arith.truncf %121 : vector<8x128xf32> to vector<8x128xbf16>
    %c0_55 = arith.constant 0 : index
    %c0_56 = arith.constant 0 : index
    %123 = vector.load %arg3[%c0_55, %c0_56] : memref<128x512xbf16, #tpu.memory_space<vmem>>, vector<128x512xbf16>
    %cst_57 = arith.constant dense<0.000000e+00> : vector<8x512xf32>
    %124 = tpu.matmul %122, %123, %cst_57 {dimension_numbers = #tpu.dot_dimension_numbers<[1], [0], [0], [1], [0, 0, 1, 1], [], []>} : vector<8x128xbf16>, vector<128x512xbf16>, vector<8x512xf32> -> vector<8x512xf32>
    %125 = arith.addf %120, %124 : vector<8x512xf32>
    %c0_58 = arith.constant 0 : index
    %c0_59 = arith.constant 0 : index
    %126 = vector.load %arg6[%c0_58, %c0_59] : memref<8x128xf32, #tpu.memory_space<vmem>>, vector<8x128xf32>
    %127 = vector.extract_strided_slice %125 {offsets = [0, 0], sizes = [8, 256], strides = [1, 1]} : vector<8x512xf32> to vector<8x256xf32>
    %128 = arith.negf %127 : vector<8x256xf32>
    %129 = math.exp %128 : vector<8x256xf32>
    %cst_60 = arith.constant 1.000000e+00 : f32
    %130 = vector.broadcast %cst_60 : f32 to vector<8x256xf32>
    %131 = arith.addf %130, %129 : vector<8x256xf32>
    %132 = arith.divf %130, %131 : vector<8x256xf32>
    %133 = vector.extract_strided_slice %132 {offsets = [0, 0], sizes = [8, 128], strides = [1, 1]} : vector<8x256xf32> to vector<8x128xf32>
    %134 = vector.extract_strided_slice %132 {offsets = [0, 128], sizes = [8, 128], strides = [1, 1]} : vector<8x256xf32> to vector<8x128xf32>
    %135 = vector.extract_strided_slice %125 {offsets = [0, 256], sizes = [8, 128], strides = [1, 1]} : vector<8x512xf32> to vector<8x128xf32>
    %136 = math.tanh %135 : vector<8x128xf32>
    %137 = vector.extract_strided_slice %125 {offsets = [0, 384], sizes = [8, 128], strides = [1, 1]} : vector<8x512xf32> to vector<8x128xf32>
    %138 = arith.negf %137 : vector<8x128xf32>
    %139 = math.exp %138 : vector<8x128xf32>
    %cst_61 = arith.constant 1.000000e+00 : f32
    %140 = vector.broadcast %cst_61 : f32 to vector<8x128xf32>
    %141 = arith.addf %140, %139 : vector<8x128xf32>
    %142 = arith.divf %140, %141 : vector<8x128xf32>
    %143 = arith.mulf %134, %126 : vector<8x128xf32>
    %144 = arith.mulf %133, %136 : vector<8x128xf32>
    %145 = arith.addf %143, %144 : vector<8x128xf32>
    %146 = math.tanh %145 : vector<8x128xf32>
    %147 = arith.mulf %142, %146 : vector<8x128xf32>
    %c0_62 = arith.constant 0 : index
    %c0_63 = arith.constant 0 : index
    %148 = vector.load %arg5[%c0_62, %c0_63] : memref<8x128xf32, #tpu.memory_space<vmem>>, vector<8x128xf32>
    tpu.vector_store %arg5[%c0_62, %c0_63], %147 {strides = array<i32>} : memref<8x128xf32, #tpu.memory_space<vmem>>, vector<8x128xf32>,
    %c0_64 = arith.constant 0 : index
    %c0_65 = arith.constant 0 : index
    %149 = vector.load %arg6[%c0_64, %c0_65] : memref<8x128xf32, #tpu.memory_space<vmem>>, vector<8x128xf32>
    tpu.vector_store %arg6[%c0_64, %c0_65], %145 {strides = array<i32>} : memref<8x128xf32, #tpu.memory_space<vmem>>, vector<8x128xf32>,
    %150 = arith.truncf %147 : vector<8x128xf32> to vector<8x128xbf16>
    %151 = arith.index_cast %c3_i32 : i32 to index
    %c0_66 = arith.constant 0 : index
    %c0_67 = arith.constant 0 : index
    %152 = vector.load %arg4[%151, %c0_66, %c0_67] : memref<8x8x128xbf16, #tpu.memory_space<vmem>>, vector<1x8x128xbf16>
    %153 = vector.shape_cast %152 : vector<1x8x128xbf16> to vector<8x128xbf16>
    %154 = vector.shape_cast %150 : vector<8x128xbf16> to vector<1x8x128xbf16>
    tpu.vector_store %arg4[%151, %c0_66, %c0_67], %154 {strides = array<i32>} : memref<8x8x128xbf16, #tpu.memory_space<vmem>>, vector<1x8x128xbf16>,
    %c4_i32 = arith.constant 4 : i32
    %155 = arith.index_cast %c4_i32 : i32 to index
    %c0_68 = arith.constant 0 : index
    %c0_69 = arith.constant 0 : index
    %156 = vector.load %arg2[%155, %c0_68, %c0_69] : memref<8x8x512xbf16, #tpu.memory_space<vmem>>, vector<1x8x512xbf16>
    %157 = vector.shape_cast %156 : vector<1x8x512xbf16> to vector<8x512xbf16>
    %158 = arith.extf %157 : vector<8x512xbf16> to vector<8x512xf32>
    %c0_70 = arith.constant 0 : index
    %c0_71 = arith.constant 0 : index
    %159 = vector.load %arg5[%c0_70, %c0_71] : memref<8x128xf32, #tpu.memory_space<vmem>>, vector<8x128xf32>
    %160 = arith.truncf %159 : vector<8x128xf32> to vector<8x128xbf16>
    %c0_72 = arith.constant 0 : index
    %c0_73 = arith.constant 0 : index
    %161 = vector.load %arg3[%c0_72, %c0_73] : memref<128x512xbf16, #tpu.memory_space<vmem>>, vector<128x512xbf16>
    %cst_74 = arith.constant dense<0.000000e+00> : vector<8x512xf32>
    %162 = tpu.matmul %160, %161, %cst_74 {dimension_numbers = #tpu.dot_dimension_numbers<[1], [0], [0], [1], [0, 0, 1, 1], [], []>} : vector<8x128xbf16>, vector<128x512xbf16>, vector<8x512xf32> -> vector<8x512xf32>
    %163 = arith.addf %158, %162 : vector<8x512xf32>
    %c0_75 = arith.constant 0 : index
    %c0_76 = arith.constant 0 : index
    %164 = vector.load %arg6[%c0_75, %c0_76] : memref<8x128xf32, #tpu.memory_space<vmem>>, vector<8x128xf32>
    %165 = vector.extract_strided_slice %163 {offsets = [0, 0], sizes = [8, 256], strides = [1, 1]} : vector<8x512xf32> to vector<8x256xf32>
    %166 = arith.negf %165 : vector<8x256xf32>
    %167 = math.exp %166 : vector<8x256xf32>
    %cst_77 = arith.constant 1.000000e+00 : f32
    %168 = vector.broadcast %cst_77 : f32 to vector<8x256xf32>
    %169 = arith.addf %168, %167 : vector<8x256xf32>
    %170 = arith.divf %168, %169 : vector<8x256xf32>
    %171 = vector.extract_strided_slice %170 {offsets = [0, 0], sizes = [8, 128], strides = [1, 1]} : vector<8x256xf32> to vector<8x128xf32>
    %172 = vector.extract_strided_slice %170 {offsets = [0, 128], sizes = [8, 128], strides = [1, 1]} : vector<8x256xf32> to vector<8x128xf32>
    %173 = vector.extract_strided_slice %163 {offsets = [0, 256], sizes = [8, 128], strides = [1, 1]} : vector<8x512xf32> to vector<8x128xf32>
    %174 = math.tanh %173 : vector<8x128xf32>
    %175 = vector.extract_strided_slice %163 {offsets = [0, 384], sizes = [8, 128], strides = [1, 1]} : vector<8x512xf32> to vector<8x128xf32>
    %176 = arith.negf %175 : vector<8x128xf32>
    %177 = math.exp %176 : vector<8x128xf32>
    %cst_78 = arith.constant 1.000000e+00 : f32
    %178 = vector.broadcast %cst_78 : f32 to vector<8x128xf32>
    %179 = arith.addf %178, %177 : vector<8x128xf32>
    %180 = arith.divf %178, %179 : vector<8x128xf32>
    %181 = arith.mulf %172, %164 : vector<8x128xf32>
    %182 = arith.mulf %171, %174 : vector<8x128xf32>
    %183 = arith.addf %181, %182 : vector<8x128xf32>
    %184 = math.tanh %183 : vector<8x128xf32>
    %185 = arith.mulf %180, %184 : vector<8x128xf32>
    %c0_79 = arith.constant 0 : index
    %c0_80 = arith.constant 0 : index
    %186 = vector.load %arg5[%c0_79, %c0_80] : memref<8x128xf32, #tpu.memory_space<vmem>>, vector<8x128xf32>
    tpu.vector_store %arg5[%c0_79, %c0_80], %185 {strides = array<i32>} : memref<8x128xf32, #tpu.memory_space<vmem>>, vector<8x128xf32>,
    %c0_81 = arith.constant 0 : index
    %c0_82 = arith.constant 0 : index
    %187 = vector.load %arg6[%c0_81, %c0_82] : memref<8x128xf32, #tpu.memory_space<vmem>>, vector<8x128xf32>
    tpu.vector_store %arg6[%c0_81, %c0_82], %183 {strides = array<i32>} : memref<8x128xf32, #tpu.memory_space<vmem>>, vector<8x128xf32>,
    %188 = arith.truncf %185 : vector<8x128xf32> to vector<8x128xbf16>
    %189 = arith.index_cast %c4_i32 : i32 to index
    %c0_83 = arith.constant 0 : index
    %c0_84 = arith.constant 0 : index
    %190 = vector.load %arg4[%189, %c0_83, %c0_84] : memref<8x8x128xbf16, #tpu.memory_space<vmem>>, vector<1x8x128xbf16>
    %191 = vector.shape_cast %190 : vector<1x8x128xbf16> to vector<8x128xbf16>
    %192 = vector.shape_cast %188 : vector<8x128xbf16> to vector<1x8x128xbf16>
    tpu.vector_store %arg4[%189, %c0_83, %c0_84], %192 {strides = array<i32>} : memref<8x8x128xbf16, #tpu.memory_space<vmem>>, vector<1x8x128xbf16>,
    %c5_i32 = arith.constant 5 : i32
    %193 = arith.index_cast %c5_i32 : i32 to index
    %c0_85 = arith.constant 0 : index
    %c0_86 = arith.constant 0 : index
    %194 = vector.load %arg2[%193, %c0_85, %c0_86] : memref<8x8x512xbf16, #tpu.memory_space<vmem>>, vector<1x8x512xbf16>
    %195 = vector.shape_cast %194 : vector<1x8x512xbf16> to vector<8x512xbf16>
    %196 = arith.extf %195 : vector<8x512xbf16> to vector<8x512xf32>
    %c0_87 = arith.constant 0 : index
    %c0_88 = arith.constant 0 : index
    %197 = vector.load %arg5[%c0_87, %c0_88] : memref<8x128xf32, #tpu.memory_space<vmem>>, vector<8x128xf32>
    %198 = arith.truncf %197 : vector<8x128xf32> to vector<8x128xbf16>
    %c0_89 = arith.constant 0 : index
    %c0_90 = arith.constant 0 : index
    %199 = vector.load %arg3[%c0_89, %c0_90] : memref<128x512xbf16, #tpu.memory_space<vmem>>, vector<128x512xbf16>
    %cst_91 = arith.constant dense<0.000000e+00> : vector<8x512xf32>
    %200 = tpu.matmul %198, %199, %cst_91 {dimension_numbers = #tpu.dot_dimension_numbers<[1], [0], [0], [1], [0, 0, 1, 1], [], []>} : vector<8x128xbf16>, vector<128x512xbf16>, vector<8x512xf32> -> vector<8x512xf32>
    %201 = arith.addf %196, %200 : vector<8x512xf32>
    %c0_92 = arith.constant 0 : index
    %c0_93 = arith.constant 0 : index
    %202 = vector.load %arg6[%c0_92, %c0_93] : memref<8x128xf32, #tpu.memory_space<vmem>>, vector<8x128xf32>
    %203 = vector.extract_strided_slice %201 {offsets = [0, 0], sizes = [8, 256], strides = [1, 1]} : vector<8x512xf32> to vector<8x256xf32>
    %204 = arith.negf %203 : vector<8x256xf32>
    %205 = math.exp %204 : vector<8x256xf32>
    %cst_94 = arith.constant 1.000000e+00 : f32
    %206 = vector.broadcast %cst_94 : f32 to vector<8x256xf32>
    %207 = arith.addf %206, %205 : vector<8x256xf32>
    %208 = arith.divf %206, %207 : vector<8x256xf32>
    %209 = vector.extract_strided_slice %208 {offsets = [0, 0], sizes = [8, 128], strides = [1, 1]} : vector<8x256xf32> to vector<8x128xf32>
    %210 = vector.extract_strided_slice %208 {offsets = [0, 128], sizes = [8, 128], strides = [1, 1]} : vector<8x256xf32> to vector<8x128xf32>
    %211 = vector.extract_strided_slice %201 {offsets = [0, 256], sizes = [8, 128], strides = [1, 1]} : vector<8x512xf32> to vector<8x128xf32>
    %212 = math.tanh %211 : vector<8x128xf32>
    %213 = vector.extract_strided_slice %201 {offsets = [0, 384], sizes = [8, 128], strides = [1, 1]} : vector<8x512xf32> to vector<8x128xf32>
    %214 = arith.negf %213 : vector<8x128xf32>
    %215 = math.exp %214 : vector<8x128xf32>
    %cst_95 = arith.constant 1.000000e+00 : f32
    %216 = vector.broadcast %cst_95 : f32 to vector<8x128xf32>
    %217 = arith.addf %216, %215 : vector<8x128xf32>
    %218 = arith.divf %216, %217 : vector<8x128xf32>
    %219 = arith.mulf %210, %202 : vector<8x128xf32>
    %220 = arith.mulf %209, %212 : vector<8x128xf32>
    %221 = arith.addf %219, %220 : vector<8x128xf32>
    %222 = math.tanh %221 : vector<8x128xf32>
    %223 = arith.mulf %218, %222 : vector<8x128xf32>
    %c0_96 = arith.constant 0 : index
    %c0_97 = arith.constant 0 : index
    %224 = vector.load %arg5[%c0_96, %c0_97] : memref<8x128xf32, #tpu.memory_space<vmem>>, vector<8x128xf32>
    tpu.vector_store %arg5[%c0_96, %c0_97], %223 {strides = array<i32>} : memref<8x128xf32, #tpu.memory_space<vmem>>, vector<8x128xf32>,
    %c0_98 = arith.constant 0 : index
    %c0_99 = arith.constant 0 : index
    %225 = vector.load %arg6[%c0_98, %c0_99] : memref<8x128xf32, #tpu.memory_space<vmem>>, vector<8x128xf32>
    tpu.vector_store %arg6[%c0_98, %c0_99], %221 {strides = array<i32>} : memref<8x128xf32, #tpu.memory_space<vmem>>, vector<8x128xf32>,
    %226 = arith.truncf %223 : vector<8x128xf32> to vector<8x128xbf16>
    %227 = arith.index_cast %c5_i32 : i32 to index
    %c0_100 = arith.constant 0 : index
    %c0_101 = arith.constant 0 : index
    %228 = vector.load %arg4[%227, %c0_100, %c0_101] : memref<8x8x128xbf16, #tpu.memory_space<vmem>>, vector<1x8x128xbf16>
    %229 = vector.shape_cast %228 : vector<1x8x128xbf16> to vector<8x128xbf16>
    %230 = vector.shape_cast %226 : vector<8x128xbf16> to vector<1x8x128xbf16>
    tpu.vector_store %arg4[%227, %c0_100, %c0_101], %230 {strides = array<i32>} : memref<8x8x128xbf16, #tpu.memory_space<vmem>>, vector<1x8x128xbf16>,
    %c6_i32 = arith.constant 6 : i32
    %231 = arith.index_cast %c6_i32 : i32 to index
    %c0_102 = arith.constant 0 : index
    %c0_103 = arith.constant 0 : index
    %232 = vector.load %arg2[%231, %c0_102, %c0_103] : memref<8x8x512xbf16, #tpu.memory_space<vmem>>, vector<1x8x512xbf16>
    %233 = vector.shape_cast %232 : vector<1x8x512xbf16> to vector<8x512xbf16>
    %234 = arith.extf %233 : vector<8x512xbf16> to vector<8x512xf32>
    %c0_104 = arith.constant 0 : index
    %c0_105 = arith.constant 0 : index
    %235 = vector.load %arg5[%c0_104, %c0_105] : memref<8x128xf32, #tpu.memory_space<vmem>>, vector<8x128xf32>
    %236 = arith.truncf %235 : vector<8x128xf32> to vector<8x128xbf16>
    %c0_106 = arith.constant 0 : index
    %c0_107 = arith.constant 0 : index
    %237 = vector.load %arg3[%c0_106, %c0_107] : memref<128x512xbf16, #tpu.memory_space<vmem>>, vector<128x512xbf16>
    %cst_108 = arith.constant dense<0.000000e+00> : vector<8x512xf32>
    %238 = tpu.matmul %236, %237, %cst_108 {dimension_numbers = #tpu.dot_dimension_numbers<[1], [0], [0], [1], [0, 0, 1, 1], [], []>} : vector<8x128xbf16>, vector<128x512xbf16>, vector<8x512xf32> -> vector<8x512xf32>
    %239 = arith.addf %234, %238 : vector<8x512xf32>
    %c0_109 = arith.constant 0 : index
    %c0_110 = arith.constant 0 : index
    %240 = vector.load %arg6[%c0_109, %c0_110] : memref<8x128xf32, #tpu.memory_space<vmem>>, vector<8x128xf32>
    %241 = vector.extract_strided_slice %239 {offsets = [0, 0], sizes = [8, 256], strides = [1, 1]} : vector<8x512xf32> to vector<8x256xf32>
    %242 = arith.negf %241 : vector<8x256xf32>
    %243 = math.exp %242 : vector<8x256xf32>
    %cst_111 = arith.constant 1.000000e+00 : f32
    %244 = vector.broadcast %cst_111 : f32 to vector<8x256xf32>
    %245 = arith.addf %244, %243 : vector<8x256xf32>
    %246 = arith.divf %244, %245 : vector<8x256xf32>
    %247 = vector.extract_strided_slice %246 {offsets = [0, 0], sizes = [8, 128], strides = [1, 1]} : vector<8x256xf32> to vector<8x128xf32>
    %248 = vector.extract_strided_slice %246 {offsets = [0, 128], sizes = [8, 128], strides = [1, 1]} : vector<8x256xf32> to vector<8x128xf32>
    %249 = vector.extract_strided_slice %239 {offsets = [0, 256], sizes = [8, 128], strides = [1, 1]} : vector<8x512xf32> to vector<8x128xf32>
    %250 = math.tanh %249 : vector<8x128xf32>
    %251 = vector.extract_strided_slice %239 {offsets = [0, 384], sizes = [8, 128], strides = [1, 1]} : vector<8x512xf32> to vector<8x128xf32>
    %252 = arith.negf %251 : vector<8x128xf32>
    %253 = math.exp %252 : vector<8x128xf32>
    %cst_112 = arith.constant 1.000000e+00 : f32
    %254 = vector.broadcast %cst_112 : f32 to vector<8x128xf32>
    %255 = arith.addf %254, %253 : vector<8x128xf32>
    %256 = arith.divf %254, %255 : vector<8x128xf32>
    %257 = arith.mulf %248, %240 : vector<8x128xf32>
    %258 = arith.mulf %247, %250 : vector<8x128xf32>
    %259 = arith.addf %257, %258 : vector<8x128xf32>
    %260 = math.tanh %259 : vector<8x128xf32>
    %261 = arith.mulf %256, %260 : vector<8x128xf32>
    %c0_113 = arith.constant 0 : index
    %c0_114 = arith.constant 0 : index
    %262 = vector.load %arg5[%c0_113, %c0_114] : memref<8x128xf32, #tpu.memory_space<vmem>>, vector<8x128xf32>
    tpu.vector_store %arg5[%c0_113, %c0_114], %261 {strides = array<i32>} : memref<8x128xf32, #tpu.memory_space<vmem>>, vector<8x128xf32>,
    %c0_115 = arith.constant 0 : index
    %c0_116 = arith.constant 0 : index
    %263 = vector.load %arg6[%c0_115, %c0_116] : memref<8x128xf32, #tpu.memory_space<vmem>>, vector<8x128xf32>
    tpu.vector_store %arg6[%c0_115, %c0_116], %259 {strides = array<i32>} : memref<8x128xf32, #tpu.memory_space<vmem>>, vector<8x128xf32>,
    %264 = arith.truncf %261 : vector<8x128xf32> to vector<8x128xbf16>
    %265 = arith.index_cast %c6_i32 : i32 to index
    %c0_117 = arith.constant 0 : index
    %c0_118 = arith.constant 0 : index
    %266 = vector.load %arg4[%265, %c0_117, %c0_118] : memref<8x8x128xbf16, #tpu.memory_space<vmem>>, vector<1x8x128xbf16>
    %267 = vector.shape_cast %266 : vector<1x8x128xbf16> to vector<8x128xbf16>
    %268 = vector.shape_cast %264 : vector<8x128xbf16> to vector<1x8x128xbf16>
    tpu.vector_store %arg4[%265, %c0_117, %c0_118], %268 {strides = array<i32>} : memref<8x8x128xbf16, #tpu.memory_space<vmem>>, vector<1x8x128xbf16>,
    %c7_i32 = arith.constant 7 : i32
    %269 = arith.index_cast %c7_i32 : i32 to index
    %c0_119 = arith.constant 0 : index
    %c0_120 = arith.constant 0 : index
    %270 = vector.load %arg2[%269, %c0_119, %c0_120] : memref<8x8x512xbf16, #tpu.memory_space<vmem>>, vector<1x8x512xbf16>
    %271 = vector.shape_cast %270 : vector<1x8x512xbf16> to vector<8x512xbf16>
    %272 = arith.extf %271 : vector<8x512xbf16> to vector<8x512xf32>
    %c0_121 = arith.constant 0 : index
    %c0_122 = arith.constant 0 : index
    %273 = vector.load %arg5[%c0_121, %c0_122] : memref<8x128xf32, #tpu.memory_space<vmem>>, vector<8x128xf32>
    %274 = arith.truncf %273 : vector<8x128xf32> to vector<8x128xbf16>
    %c0_123 = arith.constant 0 : index
    %c0_124 = arith.constant 0 : index
    %275 = vector.load %arg3[%c0_123, %c0_124] : memref<128x512xbf16, #tpu.memory_space<vmem>>, vector<128x512xbf16>
    %cst_125 = arith.constant dense<0.000000e+00> : vector<8x512xf32>
    %276 = tpu.matmul %274, %275, %cst_125 {dimension_numbers = #tpu.dot_dimension_numbers<[1], [0], [0], [1], [0, 0, 1, 1], [], []>} : vector<8x128xbf16>, vector<128x512xbf16>, vector<8x512xf32> -> vector<8x512xf32>
    %277 = arith.addf %272, %276 : vector<8x512xf32>
    %c0_126 = arith.constant 0 : index
    %c0_127 = arith.constant 0 : index
    %278 = vector.load %arg6[%c0_126, %c0_127] : memref<8x128xf32, #tpu.memory_space<vmem>>, vector<8x128xf32>
    %279 = vector.extract_strided_slice %277 {offsets = [0, 0], sizes = [8, 256], strides = [1, 1]} : vector<8x512xf32> to vector<8x256xf32>
    %280 = arith.negf %279 : vector<8x256xf32>
    %281 = math.exp %280 : vector<8x256xf32>
    %cst_128 = arith.constant 1.000000e+00 : f32
    %282 = vector.broadcast %cst_128 : f32 to vector<8x256xf32>
    %283 = arith.addf %282, %281 : vector<8x256xf32>
    %284 = arith.divf %282, %283 : vector<8x256xf32>
    %285 = vector.extract_strided_slice %284 {offsets = [0, 0], sizes = [8, 128], strides = [1, 1]} : vector<8x256xf32> to vector<8x128xf32>
    %286 = vector.extract_strided_slice %284 {offsets = [0, 128], sizes = [8, 128], strides = [1, 1]} : vector<8x256xf32> to vector<8x128xf32>
    %287 = vector.extract_strided_slice %277 {offsets = [0, 256], sizes = [8, 128], strides = [1, 1]} : vector<8x512xf32> to vector<8x128xf32>
    %288 = math.tanh %287 : vector<8x128xf32>
    %289 = vector.extract_strided_slice %277 {offsets = [0, 384], sizes = [8, 128], strides = [1, 1]} : vector<8x512xf32> to vector<8x128xf32>
    %290 = arith.negf %289 : vector<8x128xf32>
    %291 = math.exp %290 : vector<8x128xf32>
    %cst_129 = arith.constant 1.000000e+00 : f32
    %292 = vector.broadcast %cst_129 : f32 to vector<8x128xf32>
    %293 = arith.addf %292, %291 : vector<8x128xf32>
    %294 = arith.divf %292, %293 : vector<8x128xf32>
    %295 = arith.mulf %286, %278 : vector<8x128xf32>
    %296 = arith.mulf %285, %288 : vector<8x128xf32>
    %297 = arith.addf %295, %296 : vector<8x128xf32>
    %298 = math.tanh %297 : vector<8x128xf32>
    %299 = arith.mulf %294, %298 : vector<8x128xf32>
    %c0_130 = arith.constant 0 : index
    %c0_131 = arith.constant 0 : index
    %300 = vector.load %arg5[%c0_130, %c0_131] : memref<8x128xf32, #tpu.memory_space<vmem>>, vector<8x128xf32>
    tpu.vector_store %arg5[%c0_130, %c0_131], %299 {strides = array<i32>} : memref<8x128xf32, #tpu.memory_space<vmem>>, vector<8x128xf32>,
    %c0_132 = arith.constant 0 : index
    %c0_133 = arith.constant 0 : index
    %301 = vector.load %arg6[%c0_132, %c0_133] : memref<8x128xf32, #tpu.memory_space<vmem>>, vector<8x128xf32>
    tpu.vector_store %arg6[%c0_132, %c0_133], %297 {strides = array<i32>} : memref<8x128xf32, #tpu.memory_space<vmem>>, vector<8x128xf32>,
    %302 = arith.truncf %299 : vector<8x128xf32> to vector<8x128xbf16>
    %303 = arith.index_cast %c7_i32 : i32 to index
    %c0_134 = arith.constant 0 : index
    %c0_135 = arith.constant 0 : index
    %304 = vector.load %arg4[%303, %c0_134, %c0_135] : memref<8x8x128xbf16, #tpu.memory_space<vmem>>, vector<1x8x128xbf16>
    %305 = vector.shape_cast %304 : vector<1x8x128xbf16> to vector<8x128xbf16>
    %306 = vector.shape_cast %302 : vector<8x128xbf16> to vector<1x8x128xbf16>
    tpu.vector_store %arg4[%303, %c0_134, %c0_135], %306 {strides = array<i32>} : memref<8x8x128xbf16, #tpu.memory_space<vmem>>, vector<1x8x128xbf16>,
    %c8_i32 = arith.constant 8 : i32
    return
  }
  func.func @transform_0(%arg0: i32, %arg1: i32) -> (i32, i32, i32) {
    %c0_i32 = arith.constant 0 : i32
    %c0_i32_0 = arith.constant 0 : i32
    return %arg1, %arg0, %c0_i32 : i32, i32, i32
  }
  func.func @transform_1(%arg0: i32, %arg1: i32) -> (i32, i32) {
    %c0_i32 = arith.constant 0 : i32
    %c0_i32_0 = arith.constant 0 : i32
    %c0_i32_1 = arith.constant 0 : i32
    return %c0_i32, %c0_i32_0 : i32, i32
  }
  func.func @transform_2(%arg0: i32, %arg1: i32) -> (i32, i32, i32) {
    %c0_i32 = arith.constant 0 : i32
    %c0_i32_0 = arith.constant 0 : i32
    return %arg1, %arg0, %c0_i32 : i32, i32, i32
  }
}

module attributes {stable_mosaic.version = 11 : i64} {
  func.func @_lstm_last_kernel(%arg0: i32, %arg1: i32, %arg2: memref<8x8x512xbf16, #tpu.memory_space<vmem>>, %arg3: memref<128x512xbf16, #tpu.memory_space<vmem>>, %arg4: memref<128x128xbf16, #tpu.memory_space<vmem>>, %arg5: memref<1x128xf32, #tpu.memory_space<vmem>>, %arg6: memref<8x128xf32, #tpu.memory_space<vmem>>, %arg7: memref<8x128xf32, #tpu.memory_space<vmem>>, %arg8: memref<8x128xf32, #tpu.memory_space<vmem>>) attributes {dimension_semantics = [#tpu.dimension_semantics<parallel>, #tpu.dimension_semantics<arbitrary>], iteration_bounds = array<i64: 1, 2>, scalar_prefetch = 0 : i64, scratch_operands = 2 : i64, tpu.core_type = #tpu.core_type<tc>, window_params = [{transform_indices = @transform_0, window_bounds = array<i64: 8, 8, 512>}, {pipeline_mode = #tpu.pipeline_mode<synchronous>, transform_indices = @transform_1, window_bounds = array<i64: 128, 512>}, {pipeline_mode = #tpu.pipeline_mode<synchronous>, transform_indices = @transform_2, window_bounds = array<i64: 128, 128>}, {pipeline_mode = #tpu.pipeline_mode<synchronous>, transform_indices = @transform_3, window_bounds = array<i64: 1, 128>}, {transform_indices = @transform_4, window_bounds = array<i64: 8, 128>}]} {
    %c0_i32 = arith.constant 0 : i32
    %0 = arith.cmpi eq, %arg1, %c0_i32 : i32
    %1 = arith.extui %0 : i1 to i32
    %c0_i32_0 = arith.constant 0 : i32
    %2 = arith.cmpi ne, %1, %c0_i32_0 : i32
    scf.if %2 {
      %cst_122 = arith.constant 0.000000e+00 : f32
      %270 = vector.broadcast %cst_122 : f32 to vector<8x128xf32>
      %c0_123 = arith.constant 0 : index
      %c0_124 = arith.constant 0 : index
      %271 = vector.load %arg7[%c0_123, %c0_124] : memref<8x128xf32, #tpu.memory_space<vmem>>, vector<8x128xf32>
      tpu.vector_store %arg7[%c0_123, %c0_124], %270 {strides = array<i32>} : memref<8x128xf32, #tpu.memory_space<vmem>>, vector<8x128xf32>,
      %cst_125 = arith.constant 0.000000e+00 : f32
      %272 = vector.broadcast %cst_125 : f32 to vector<8x128xf32>
      %c0_126 = arith.constant 0 : index
      %c0_127 = arith.constant 0 : index
      %273 = vector.load %arg8[%c0_126, %c0_127] : memref<8x128xf32, #tpu.memory_space<vmem>>, vector<8x128xf32>
      tpu.vector_store %arg8[%c0_126, %c0_127], %272 {strides = array<i32>} : memref<8x128xf32, #tpu.memory_space<vmem>>, vector<8x128xf32>,
    } else {
    }
    %c0_i32_1 = arith.constant 0 : i32
    %3 = arith.index_cast %c0_i32_1 : i32 to index
    %c0 = arith.constant 0 : index
    %c0_2 = arith.constant 0 : index
    %4 = vector.load %arg2[%3, %c0, %c0_2] : memref<8x8x512xbf16, #tpu.memory_space<vmem>>, vector<1x8x512xbf16>
    %5 = vector.shape_cast %4 : vector<1x8x512xbf16> to vector<8x512xbf16>
    %6 = arith.extf %5 : vector<8x512xbf16> to vector<8x512xf32>
    %c0_3 = arith.constant 0 : index
    %c0_4 = arith.constant 0 : index
    %7 = vector.load %arg7[%c0_3, %c0_4] : memref<8x128xf32, #tpu.memory_space<vmem>>, vector<8x128xf32>
    %8 = arith.truncf %7 : vector<8x128xf32> to vector<8x128xbf16>
    %c0_5 = arith.constant 0 : index
    %c0_6 = arith.constant 0 : index
    %9 = vector.load %arg3[%c0_5, %c0_6] : memref<128x512xbf16, #tpu.memory_space<vmem>>, vector<128x512xbf16>
    %cst = arith.constant dense<0.000000e+00> : vector<8x512xf32>
    %10 = tpu.matmul %8, %9, %cst {dimension_numbers = #tpu.dot_dimension_numbers<[1], [0], [0], [1], [0, 0, 1, 1], [], []>} : vector<8x128xbf16>, vector<128x512xbf16>, vector<8x512xf32> -> vector<8x512xf32>
    %11 = arith.addf %6, %10 : vector<8x512xf32>
    %c0_7 = arith.constant 0 : index
    %c0_8 = arith.constant 0 : index
    %12 = vector.load %arg8[%c0_7, %c0_8] : memref<8x128xf32, #tpu.memory_space<vmem>>, vector<8x128xf32>
    %13 = vector.extract_strided_slice %11 {offsets = [0, 0], sizes = [8, 256], strides = [1, 1]} : vector<8x512xf32> to vector<8x256xf32>
    %14 = arith.negf %13 : vector<8x256xf32>
    %15 = math.exp %14 : vector<8x256xf32>
    %cst_9 = arith.constant 1.000000e+00 : f32
    %16 = vector.broadcast %cst_9 : f32 to vector<8x256xf32>
    %17 = arith.addf %16, %15 : vector<8x256xf32>
    %18 = arith.divf %16, %17 : vector<8x256xf32>
    %19 = vector.extract_strided_slice %18 {offsets = [0, 0], sizes = [8, 128], strides = [1, 1]} : vector<8x256xf32> to vector<8x128xf32>
    %20 = vector.extract_strided_slice %18 {offsets = [0, 128], sizes = [8, 128], strides = [1, 1]} : vector<8x256xf32> to vector<8x128xf32>
    %21 = vector.extract_strided_slice %11 {offsets = [0, 256], sizes = [8, 128], strides = [1, 1]} : vector<8x512xf32> to vector<8x128xf32>
    %22 = math.tanh %21 : vector<8x128xf32>
    %23 = vector.extract_strided_slice %11 {offsets = [0, 384], sizes = [8, 128], strides = [1, 1]} : vector<8x512xf32> to vector<8x128xf32>
    %24 = arith.negf %23 : vector<8x128xf32>
    %25 = math.exp %24 : vector<8x128xf32>
    %cst_10 = arith.constant 1.000000e+00 : f32
    %26 = vector.broadcast %cst_10 : f32 to vector<8x128xf32>
    %27 = arith.addf %26, %25 : vector<8x128xf32>
    %28 = arith.divf %26, %27 : vector<8x128xf32>
    %29 = arith.mulf %20, %12 : vector<8x128xf32>
    %30 = arith.mulf %19, %22 : vector<8x128xf32>
    %31 = arith.addf %29, %30 : vector<8x128xf32>
    %32 = math.tanh %31 : vector<8x128xf32>
    %33 = arith.mulf %28, %32 : vector<8x128xf32>
    %c0_11 = arith.constant 0 : index
    %c0_12 = arith.constant 0 : index
    %34 = vector.load %arg7[%c0_11, %c0_12] : memref<8x128xf32, #tpu.memory_space<vmem>>, vector<8x128xf32>
    tpu.vector_store %arg7[%c0_11, %c0_12], %33 {strides = array<i32>} : memref<8x128xf32, #tpu.memory_space<vmem>>, vector<8x128xf32>,
    %c0_13 = arith.constant 0 : index
    %c0_14 = arith.constant 0 : index
    %35 = vector.load %arg8[%c0_13, %c0_14] : memref<8x128xf32, #tpu.memory_space<vmem>>, vector<8x128xf32>
    tpu.vector_store %arg8[%c0_13, %c0_14], %31 {strides = array<i32>} : memref<8x128xf32, #tpu.memory_space<vmem>>, vector<8x128xf32>,
    %c1_i32 = arith.constant 1 : i32
    %36 = arith.index_cast %c1_i32 : i32 to index
    %c0_15 = arith.constant 0 : index
    %c0_16 = arith.constant 0 : index
    %37 = vector.load %arg2[%36, %c0_15, %c0_16] : memref<8x8x512xbf16, #tpu.memory_space<vmem>>, vector<1x8x512xbf16>
    %38 = vector.shape_cast %37 : vector<1x8x512xbf16> to vector<8x512xbf16>
    %39 = arith.extf %38 : vector<8x512xbf16> to vector<8x512xf32>
    %c0_17 = arith.constant 0 : index
    %c0_18 = arith.constant 0 : index
    %40 = vector.load %arg7[%c0_17, %c0_18] : memref<8x128xf32, #tpu.memory_space<vmem>>, vector<8x128xf32>
    %41 = arith.truncf %40 : vector<8x128xf32> to vector<8x128xbf16>
    %c0_19 = arith.constant 0 : index
    %c0_20 = arith.constant 0 : index
    %42 = vector.load %arg3[%c0_19, %c0_20] : memref<128x512xbf16, #tpu.memory_space<vmem>>, vector<128x512xbf16>
    %cst_21 = arith.constant dense<0.000000e+00> : vector<8x512xf32>
    %43 = tpu.matmul %41, %42, %cst_21 {dimension_numbers = #tpu.dot_dimension_numbers<[1], [0], [0], [1], [0, 0, 1, 1], [], []>} : vector<8x128xbf16>, vector<128x512xbf16>, vector<8x512xf32> -> vector<8x512xf32>
    %44 = arith.addf %39, %43 : vector<8x512xf32>
    %c0_22 = arith.constant 0 : index
    %c0_23 = arith.constant 0 : index
    %45 = vector.load %arg8[%c0_22, %c0_23] : memref<8x128xf32, #tpu.memory_space<vmem>>, vector<8x128xf32>
    %46 = vector.extract_strided_slice %44 {offsets = [0, 0], sizes = [8, 256], strides = [1, 1]} : vector<8x512xf32> to vector<8x256xf32>
    %47 = arith.negf %46 : vector<8x256xf32>
    %48 = math.exp %47 : vector<8x256xf32>
    %cst_24 = arith.constant 1.000000e+00 : f32
    %49 = vector.broadcast %cst_24 : f32 to vector<8x256xf32>
    %50 = arith.addf %49, %48 : vector<8x256xf32>
    %51 = arith.divf %49, %50 : vector<8x256xf32>
    %52 = vector.extract_strided_slice %51 {offsets = [0, 0], sizes = [8, 128], strides = [1, 1]} : vector<8x256xf32> to vector<8x128xf32>
    %53 = vector.extract_strided_slice %51 {offsets = [0, 128], sizes = [8, 128], strides = [1, 1]} : vector<8x256xf32> to vector<8x128xf32>
    %54 = vector.extract_strided_slice %44 {offsets = [0, 256], sizes = [8, 128], strides = [1, 1]} : vector<8x512xf32> to vector<8x128xf32>
    %55 = math.tanh %54 : vector<8x128xf32>
    %56 = vector.extract_strided_slice %44 {offsets = [0, 384], sizes = [8, 128], strides = [1, 1]} : vector<8x512xf32> to vector<8x128xf32>
    %57 = arith.negf %56 : vector<8x128xf32>
    %58 = math.exp %57 : vector<8x128xf32>
    %cst_25 = arith.constant 1.000000e+00 : f32
    %59 = vector.broadcast %cst_25 : f32 to vector<8x128xf32>
    %60 = arith.addf %59, %58 : vector<8x128xf32>
    %61 = arith.divf %59, %60 : vector<8x128xf32>
    %62 = arith.mulf %53, %45 : vector<8x128xf32>
    %63 = arith.mulf %52, %55 : vector<8x128xf32>
    %64 = arith.addf %62, %63 : vector<8x128xf32>
    %65 = math.tanh %64 : vector<8x128xf32>
    %66 = arith.mulf %61, %65 : vector<8x128xf32>
    %c0_26 = arith.constant 0 : index
    %c0_27 = arith.constant 0 : index
    %67 = vector.load %arg7[%c0_26, %c0_27] : memref<8x128xf32, #tpu.memory_space<vmem>>, vector<8x128xf32>
    tpu.vector_store %arg7[%c0_26, %c0_27], %66 {strides = array<i32>} : memref<8x128xf32, #tpu.memory_space<vmem>>, vector<8x128xf32>,
    %c0_28 = arith.constant 0 : index
    %c0_29 = arith.constant 0 : index
    %68 = vector.load %arg8[%c0_28, %c0_29] : memref<8x128xf32, #tpu.memory_space<vmem>>, vector<8x128xf32>
    tpu.vector_store %arg8[%c0_28, %c0_29], %64 {strides = array<i32>} : memref<8x128xf32, #tpu.memory_space<vmem>>, vector<8x128xf32>,
    %c2_i32 = arith.constant 2 : i32
    %69 = arith.index_cast %c2_i32 : i32 to index
    %c0_30 = arith.constant 0 : index
    %c0_31 = arith.constant 0 : index
    %70 = vector.load %arg2[%69, %c0_30, %c0_31] : memref<8x8x512xbf16, #tpu.memory_space<vmem>>, vector<1x8x512xbf16>
    %71 = vector.shape_cast %70 : vector<1x8x512xbf16> to vector<8x512xbf16>
    %72 = arith.extf %71 : vector<8x512xbf16> to vector<8x512xf32>
    %c0_32 = arith.constant 0 : index
    %c0_33 = arith.constant 0 : index
    %73 = vector.load %arg7[%c0_32, %c0_33] : memref<8x128xf32, #tpu.memory_space<vmem>>, vector<8x128xf32>
    %74 = arith.truncf %73 : vector<8x128xf32> to vector<8x128xbf16>
    %c0_34 = arith.constant 0 : index
    %c0_35 = arith.constant 0 : index
    %75 = vector.load %arg3[%c0_34, %c0_35] : memref<128x512xbf16, #tpu.memory_space<vmem>>, vector<128x512xbf16>
    %cst_36 = arith.constant dense<0.000000e+00> : vector<8x512xf32>
    %76 = tpu.matmul %74, %75, %cst_36 {dimension_numbers = #tpu.dot_dimension_numbers<[1], [0], [0], [1], [0, 0, 1, 1], [], []>} : vector<8x128xbf16>, vector<128x512xbf16>, vector<8x512xf32> -> vector<8x512xf32>
    %77 = arith.addf %72, %76 : vector<8x512xf32>
    %c0_37 = arith.constant 0 : index
    %c0_38 = arith.constant 0 : index
    %78 = vector.load %arg8[%c0_37, %c0_38] : memref<8x128xf32, #tpu.memory_space<vmem>>, vector<8x128xf32>
    %79 = vector.extract_strided_slice %77 {offsets = [0, 0], sizes = [8, 256], strides = [1, 1]} : vector<8x512xf32> to vector<8x256xf32>
    %80 = arith.negf %79 : vector<8x256xf32>
    %81 = math.exp %80 : vector<8x256xf32>
    %cst_39 = arith.constant 1.000000e+00 : f32
    %82 = vector.broadcast %cst_39 : f32 to vector<8x256xf32>
    %83 = arith.addf %82, %81 : vector<8x256xf32>
    %84 = arith.divf %82, %83 : vector<8x256xf32>
    %85 = vector.extract_strided_slice %84 {offsets = [0, 0], sizes = [8, 128], strides = [1, 1]} : vector<8x256xf32> to vector<8x128xf32>
    %86 = vector.extract_strided_slice %84 {offsets = [0, 128], sizes = [8, 128], strides = [1, 1]} : vector<8x256xf32> to vector<8x128xf32>
    %87 = vector.extract_strided_slice %77 {offsets = [0, 256], sizes = [8, 128], strides = [1, 1]} : vector<8x512xf32> to vector<8x128xf32>
    %88 = math.tanh %87 : vector<8x128xf32>
    %89 = vector.extract_strided_slice %77 {offsets = [0, 384], sizes = [8, 128], strides = [1, 1]} : vector<8x512xf32> to vector<8x128xf32>
    %90 = arith.negf %89 : vector<8x128xf32>
    %91 = math.exp %90 : vector<8x128xf32>
    %cst_40 = arith.constant 1.000000e+00 : f32
    %92 = vector.broadcast %cst_40 : f32 to vector<8x128xf32>
    %93 = arith.addf %92, %91 : vector<8x128xf32>
    %94 = arith.divf %92, %93 : vector<8x128xf32>
    %95 = arith.mulf %86, %78 : vector<8x128xf32>
    %96 = arith.mulf %85, %88 : vector<8x128xf32>
    %97 = arith.addf %95, %96 : vector<8x128xf32>
    %98 = math.tanh %97 : vector<8x128xf32>
    %99 = arith.mulf %94, %98 : vector<8x128xf32>
    %c0_41 = arith.constant 0 : index
    %c0_42 = arith.constant 0 : index
    %100 = vector.load %arg7[%c0_41, %c0_42] : memref<8x128xf32, #tpu.memory_space<vmem>>, vector<8x128xf32>
    tpu.vector_store %arg7[%c0_41, %c0_42], %99 {strides = array<i32>} : memref<8x128xf32, #tpu.memory_space<vmem>>, vector<8x128xf32>,
    %c0_43 = arith.constant 0 : index
    %c0_44 = arith.constant 0 : index
    %101 = vector.load %arg8[%c0_43, %c0_44] : memref<8x128xf32, #tpu.memory_space<vmem>>, vector<8x128xf32>
    tpu.vector_store %arg8[%c0_43, %c0_44], %97 {strides = array<i32>} : memref<8x128xf32, #tpu.memory_space<vmem>>, vector<8x128xf32>,
    %c3_i32 = arith.constant 3 : i32
    %102 = arith.index_cast %c3_i32 : i32 to index
    %c0_45 = arith.constant 0 : index
    %c0_46 = arith.constant 0 : index
    %103 = vector.load %arg2[%102, %c0_45, %c0_46] : memref<8x8x512xbf16, #tpu.memory_space<vmem>>, vector<1x8x512xbf16>
    %104 = vector.shape_cast %103 : vector<1x8x512xbf16> to vector<8x512xbf16>
    %105 = arith.extf %104 : vector<8x512xbf16> to vector<8x512xf32>
    %c0_47 = arith.constant 0 : index
    %c0_48 = arith.constant 0 : index
    %106 = vector.load %arg7[%c0_47, %c0_48] : memref<8x128xf32, #tpu.memory_space<vmem>>, vector<8x128xf32>
    %107 = arith.truncf %106 : vector<8x128xf32> to vector<8x128xbf16>
    %c0_49 = arith.constant 0 : index
    %c0_50 = arith.constant 0 : index
    %108 = vector.load %arg3[%c0_49, %c0_50] : memref<128x512xbf16, #tpu.memory_space<vmem>>, vector<128x512xbf16>
    %cst_51 = arith.constant dense<0.000000e+00> : vector<8x512xf32>
    %109 = tpu.matmul %107, %108, %cst_51 {dimension_numbers = #tpu.dot_dimension_numbers<[1], [0], [0], [1], [0, 0, 1, 1], [], []>} : vector<8x128xbf16>, vector<128x512xbf16>, vector<8x512xf32> -> vector<8x512xf32>
    %110 = arith.addf %105, %109 : vector<8x512xf32>
    %c0_52 = arith.constant 0 : index
    %c0_53 = arith.constant 0 : index
    %111 = vector.load %arg8[%c0_52, %c0_53] : memref<8x128xf32, #tpu.memory_space<vmem>>, vector<8x128xf32>
    %112 = vector.extract_strided_slice %110 {offsets = [0, 0], sizes = [8, 256], strides = [1, 1]} : vector<8x512xf32> to vector<8x256xf32>
    %113 = arith.negf %112 : vector<8x256xf32>
    %114 = math.exp %113 : vector<8x256xf32>
    %cst_54 = arith.constant 1.000000e+00 : f32
    %115 = vector.broadcast %cst_54 : f32 to vector<8x256xf32>
    %116 = arith.addf %115, %114 : vector<8x256xf32>
    %117 = arith.divf %115, %116 : vector<8x256xf32>
    %118 = vector.extract_strided_slice %117 {offsets = [0, 0], sizes = [8, 128], strides = [1, 1]} : vector<8x256xf32> to vector<8x128xf32>
    %119 = vector.extract_strided_slice %117 {offsets = [0, 128], sizes = [8, 128], strides = [1, 1]} : vector<8x256xf32> to vector<8x128xf32>
    %120 = vector.extract_strided_slice %110 {offsets = [0, 256], sizes = [8, 128], strides = [1, 1]} : vector<8x512xf32> to vector<8x128xf32>
    %121 = math.tanh %120 : vector<8x128xf32>
    %122 = vector.extract_strided_slice %110 {offsets = [0, 384], sizes = [8, 128], strides = [1, 1]} : vector<8x512xf32> to vector<8x128xf32>
    %123 = arith.negf %122 : vector<8x128xf32>
    %124 = math.exp %123 : vector<8x128xf32>
    %cst_55 = arith.constant 1.000000e+00 : f32
    %125 = vector.broadcast %cst_55 : f32 to vector<8x128xf32>
    %126 = arith.addf %125, %124 : vector<8x128xf32>
    %127 = arith.divf %125, %126 : vector<8x128xf32>
    %128 = arith.mulf %119, %111 : vector<8x128xf32>
    %129 = arith.mulf %118, %121 : vector<8x128xf32>
    %130 = arith.addf %128, %129 : vector<8x128xf32>
    %131 = math.tanh %130 : vector<8x128xf32>
    %132 = arith.mulf %127, %131 : vector<8x128xf32>
    %c0_56 = arith.constant 0 : index
    %c0_57 = arith.constant 0 : index
    %133 = vector.load %arg7[%c0_56, %c0_57] : memref<8x128xf32, #tpu.memory_space<vmem>>, vector<8x128xf32>
    tpu.vector_store %arg7[%c0_56, %c0_57], %132 {strides = array<i32>} : memref<8x128xf32, #tpu.memory_space<vmem>>, vector<8x128xf32>,
    %c0_58 = arith.constant 0 : index
    %c0_59 = arith.constant 0 : index
    %134 = vector.load %arg8[%c0_58, %c0_59] : memref<8x128xf32, #tpu.memory_space<vmem>>, vector<8x128xf32>
    tpu.vector_store %arg8[%c0_58, %c0_59], %130 {strides = array<i32>} : memref<8x128xf32, #tpu.memory_space<vmem>>, vector<8x128xf32>,
    %c4_i32 = arith.constant 4 : i32
    %135 = arith.index_cast %c4_i32 : i32 to index
    %c0_60 = arith.constant 0 : index
    %c0_61 = arith.constant 0 : index
    %136 = vector.load %arg2[%135, %c0_60, %c0_61] : memref<8x8x512xbf16, #tpu.memory_space<vmem>>, vector<1x8x512xbf16>
    %137 = vector.shape_cast %136 : vector<1x8x512xbf16> to vector<8x512xbf16>
    %138 = arith.extf %137 : vector<8x512xbf16> to vector<8x512xf32>
    %c0_62 = arith.constant 0 : index
    %c0_63 = arith.constant 0 : index
    %139 = vector.load %arg7[%c0_62, %c0_63] : memref<8x128xf32, #tpu.memory_space<vmem>>, vector<8x128xf32>
    %140 = arith.truncf %139 : vector<8x128xf32> to vector<8x128xbf16>
    %c0_64 = arith.constant 0 : index
    %c0_65 = arith.constant 0 : index
    %141 = vector.load %arg3[%c0_64, %c0_65] : memref<128x512xbf16, #tpu.memory_space<vmem>>, vector<128x512xbf16>
    %cst_66 = arith.constant dense<0.000000e+00> : vector<8x512xf32>
    %142 = tpu.matmul %140, %141, %cst_66 {dimension_numbers = #tpu.dot_dimension_numbers<[1], [0], [0], [1], [0, 0, 1, 1], [], []>} : vector<8x128xbf16>, vector<128x512xbf16>, vector<8x512xf32> -> vector<8x512xf32>
    %143 = arith.addf %138, %142 : vector<8x512xf32>
    %c0_67 = arith.constant 0 : index
    %c0_68 = arith.constant 0 : index
    %144 = vector.load %arg8[%c0_67, %c0_68] : memref<8x128xf32, #tpu.memory_space<vmem>>, vector<8x128xf32>
    %145 = vector.extract_strided_slice %143 {offsets = [0, 0], sizes = [8, 256], strides = [1, 1]} : vector<8x512xf32> to vector<8x256xf32>
    %146 = arith.negf %145 : vector<8x256xf32>
    %147 = math.exp %146 : vector<8x256xf32>
    %cst_69 = arith.constant 1.000000e+00 : f32
    %148 = vector.broadcast %cst_69 : f32 to vector<8x256xf32>
    %149 = arith.addf %148, %147 : vector<8x256xf32>
    %150 = arith.divf %148, %149 : vector<8x256xf32>
    %151 = vector.extract_strided_slice %150 {offsets = [0, 0], sizes = [8, 128], strides = [1, 1]} : vector<8x256xf32> to vector<8x128xf32>
    %152 = vector.extract_strided_slice %150 {offsets = [0, 128], sizes = [8, 128], strides = [1, 1]} : vector<8x256xf32> to vector<8x128xf32>
    %153 = vector.extract_strided_slice %143 {offsets = [0, 256], sizes = [8, 128], strides = [1, 1]} : vector<8x512xf32> to vector<8x128xf32>
    %154 = math.tanh %153 : vector<8x128xf32>
    %155 = vector.extract_strided_slice %143 {offsets = [0, 384], sizes = [8, 128], strides = [1, 1]} : vector<8x512xf32> to vector<8x128xf32>
    %156 = arith.negf %155 : vector<8x128xf32>
    %157 = math.exp %156 : vector<8x128xf32>
    %cst_70 = arith.constant 1.000000e+00 : f32
    %158 = vector.broadcast %cst_70 : f32 to vector<8x128xf32>
    %159 = arith.addf %158, %157 : vector<8x128xf32>
    %160 = arith.divf %158, %159 : vector<8x128xf32>
    %161 = arith.mulf %152, %144 : vector<8x128xf32>
    %162 = arith.mulf %151, %154 : vector<8x128xf32>
    %163 = arith.addf %161, %162 : vector<8x128xf32>
    %164 = math.tanh %163 : vector<8x128xf32>
    %165 = arith.mulf %160, %164 : vector<8x128xf32>
    %c0_71 = arith.constant 0 : index
    %c0_72 = arith.constant 0 : index
    %166 = vector.load %arg7[%c0_71, %c0_72] : memref<8x128xf32, #tpu.memory_space<vmem>>, vector<8x128xf32>
    tpu.vector_store %arg7[%c0_71, %c0_72], %165 {strides = array<i32>} : memref<8x128xf32, #tpu.memory_space<vmem>>, vector<8x128xf32>,
    %c0_73 = arith.constant 0 : index
    %c0_74 = arith.constant 0 : index
    %167 = vector.load %arg8[%c0_73, %c0_74] : memref<8x128xf32, #tpu.memory_space<vmem>>, vector<8x128xf32>
    tpu.vector_store %arg8[%c0_73, %c0_74], %163 {strides = array<i32>} : memref<8x128xf32, #tpu.memory_space<vmem>>, vector<8x128xf32>,
    %c5_i32 = arith.constant 5 : i32
    %168 = arith.index_cast %c5_i32 : i32 to index
    %c0_75 = arith.constant 0 : index
    %c0_76 = arith.constant 0 : index
    %169 = vector.load %arg2[%168, %c0_75, %c0_76] : memref<8x8x512xbf16, #tpu.memory_space<vmem>>, vector<1x8x512xbf16>
    %170 = vector.shape_cast %169 : vector<1x8x512xbf16> to vector<8x512xbf16>
    %171 = arith.extf %170 : vector<8x512xbf16> to vector<8x512xf32>
    %c0_77 = arith.constant 0 : index
    %c0_78 = arith.constant 0 : index
    %172 = vector.load %arg7[%c0_77, %c0_78] : memref<8x128xf32, #tpu.memory_space<vmem>>, vector<8x128xf32>
    %173 = arith.truncf %172 : vector<8x128xf32> to vector<8x128xbf16>
    %c0_79 = arith.constant 0 : index
    %c0_80 = arith.constant 0 : index
    %174 = vector.load %arg3[%c0_79, %c0_80] : memref<128x512xbf16, #tpu.memory_space<vmem>>, vector<128x512xbf16>
    %cst_81 = arith.constant dense<0.000000e+00> : vector<8x512xf32>
    %175 = tpu.matmul %173, %174, %cst_81 {dimension_numbers = #tpu.dot_dimension_numbers<[1], [0], [0], [1], [0, 0, 1, 1], [], []>} : vector<8x128xbf16>, vector<128x512xbf16>, vector<8x512xf32> -> vector<8x512xf32>
    %176 = arith.addf %171, %175 : vector<8x512xf32>
    %c0_82 = arith.constant 0 : index
    %c0_83 = arith.constant 0 : index
    %177 = vector.load %arg8[%c0_82, %c0_83] : memref<8x128xf32, #tpu.memory_space<vmem>>, vector<8x128xf32>
    %178 = vector.extract_strided_slice %176 {offsets = [0, 0], sizes = [8, 256], strides = [1, 1]} : vector<8x512xf32> to vector<8x256xf32>
    %179 = arith.negf %178 : vector<8x256xf32>
    %180 = math.exp %179 : vector<8x256xf32>
    %cst_84 = arith.constant 1.000000e+00 : f32
    %181 = vector.broadcast %cst_84 : f32 to vector<8x256xf32>
    %182 = arith.addf %181, %180 : vector<8x256xf32>
    %183 = arith.divf %181, %182 : vector<8x256xf32>
    %184 = vector.extract_strided_slice %183 {offsets = [0, 0], sizes = [8, 128], strides = [1, 1]} : vector<8x256xf32> to vector<8x128xf32>
    %185 = vector.extract_strided_slice %183 {offsets = [0, 128], sizes = [8, 128], strides = [1, 1]} : vector<8x256xf32> to vector<8x128xf32>
    %186 = vector.extract_strided_slice %176 {offsets = [0, 256], sizes = [8, 128], strides = [1, 1]} : vector<8x512xf32> to vector<8x128xf32>
    %187 = math.tanh %186 : vector<8x128xf32>
    %188 = vector.extract_strided_slice %176 {offsets = [0, 384], sizes = [8, 128], strides = [1, 1]} : vector<8x512xf32> to vector<8x128xf32>
    %189 = arith.negf %188 : vector<8x128xf32>
    %190 = math.exp %189 : vector<8x128xf32>
    %cst_85 = arith.constant 1.000000e+00 : f32
    %191 = vector.broadcast %cst_85 : f32 to vector<8x128xf32>
    %192 = arith.addf %191, %190 : vector<8x128xf32>
    %193 = arith.divf %191, %192 : vector<8x128xf32>
    %194 = arith.mulf %185, %177 : vector<8x128xf32>
    %195 = arith.mulf %184, %187 : vector<8x128xf32>
    %196 = arith.addf %194, %195 : vector<8x128xf32>
    %197 = math.tanh %196 : vector<8x128xf32>
    %198 = arith.mulf %193, %197 : vector<8x128xf32>
    %c0_86 = arith.constant 0 : index
    %c0_87 = arith.constant 0 : index
    %199 = vector.load %arg7[%c0_86, %c0_87] : memref<8x128xf32, #tpu.memory_space<vmem>>, vector<8x128xf32>
    tpu.vector_store %arg7[%c0_86, %c0_87], %198 {strides = array<i32>} : memref<8x128xf32, #tpu.memory_space<vmem>>, vector<8x128xf32>,
    %c0_88 = arith.constant 0 : index
    %c0_89 = arith.constant 0 : index
    %200 = vector.load %arg8[%c0_88, %c0_89] : memref<8x128xf32, #tpu.memory_space<vmem>>, vector<8x128xf32>
    tpu.vector_store %arg8[%c0_88, %c0_89], %196 {strides = array<i32>} : memref<8x128xf32, #tpu.memory_space<vmem>>, vector<8x128xf32>,
    %c6_i32 = arith.constant 6 : i32
    %201 = arith.index_cast %c6_i32 : i32 to index
    %c0_90 = arith.constant 0 : index
    %c0_91 = arith.constant 0 : index
    %202 = vector.load %arg2[%201, %c0_90, %c0_91] : memref<8x8x512xbf16, #tpu.memory_space<vmem>>, vector<1x8x512xbf16>
    %203 = vector.shape_cast %202 : vector<1x8x512xbf16> to vector<8x512xbf16>
    %204 = arith.extf %203 : vector<8x512xbf16> to vector<8x512xf32>
    %c0_92 = arith.constant 0 : index
    %c0_93 = arith.constant 0 : index
    %205 = vector.load %arg7[%c0_92, %c0_93] : memref<8x128xf32, #tpu.memory_space<vmem>>, vector<8x128xf32>
    %206 = arith.truncf %205 : vector<8x128xf32> to vector<8x128xbf16>
    %c0_94 = arith.constant 0 : index
    %c0_95 = arith.constant 0 : index
    %207 = vector.load %arg3[%c0_94, %c0_95] : memref<128x512xbf16, #tpu.memory_space<vmem>>, vector<128x512xbf16>
    %cst_96 = arith.constant dense<0.000000e+00> : vector<8x512xf32>
    %208 = tpu.matmul %206, %207, %cst_96 {dimension_numbers = #tpu.dot_dimension_numbers<[1], [0], [0], [1], [0, 0, 1, 1], [], []>} : vector<8x128xbf16>, vector<128x512xbf16>, vector<8x512xf32> -> vector<8x512xf32>
    %209 = arith.addf %204, %208 : vector<8x512xf32>
    %c0_97 = arith.constant 0 : index
    %c0_98 = arith.constant 0 : index
    %210 = vector.load %arg8[%c0_97, %c0_98] : memref<8x128xf32, #tpu.memory_space<vmem>>, vector<8x128xf32>
    %211 = vector.extract_strided_slice %209 {offsets = [0, 0], sizes = [8, 256], strides = [1, 1]} : vector<8x512xf32> to vector<8x256xf32>
    %212 = arith.negf %211 : vector<8x256xf32>
    %213 = math.exp %212 : vector<8x256xf32>
    %cst_99 = arith.constant 1.000000e+00 : f32
    %214 = vector.broadcast %cst_99 : f32 to vector<8x256xf32>
    %215 = arith.addf %214, %213 : vector<8x256xf32>
    %216 = arith.divf %214, %215 : vector<8x256xf32>
    %217 = vector.extract_strided_slice %216 {offsets = [0, 0], sizes = [8, 128], strides = [1, 1]} : vector<8x256xf32> to vector<8x128xf32>
    %218 = vector.extract_strided_slice %216 {offsets = [0, 128], sizes = [8, 128], strides = [1, 1]} : vector<8x256xf32> to vector<8x128xf32>
    %219 = vector.extract_strided_slice %209 {offsets = [0, 256], sizes = [8, 128], strides = [1, 1]} : vector<8x512xf32> to vector<8x128xf32>
    %220 = math.tanh %219 : vector<8x128xf32>
    %221 = vector.extract_strided_slice %209 {offsets = [0, 384], sizes = [8, 128], strides = [1, 1]} : vector<8x512xf32> to vector<8x128xf32>
    %222 = arith.negf %221 : vector<8x128xf32>
    %223 = math.exp %222 : vector<8x128xf32>
    %cst_100 = arith.constant 1.000000e+00 : f32
    %224 = vector.broadcast %cst_100 : f32 to vector<8x128xf32>
    %225 = arith.addf %224, %223 : vector<8x128xf32>
    %226 = arith.divf %224, %225 : vector<8x128xf32>
    %227 = arith.mulf %218, %210 : vector<8x128xf32>
    %228 = arith.mulf %217, %220 : vector<8x128xf32>
    %229 = arith.addf %227, %228 : vector<8x128xf32>
    %230 = math.tanh %229 : vector<8x128xf32>
    %231 = arith.mulf %226, %230 : vector<8x128xf32>
    %c0_101 = arith.constant 0 : index
    %c0_102 = arith.constant 0 : index
    %232 = vector.load %arg7[%c0_101, %c0_102] : memref<8x128xf32, #tpu.memory_space<vmem>>, vector<8x128xf32>
    tpu.vector_store %arg7[%c0_101, %c0_102], %231 {strides = array<i32>} : memref<8x128xf32, #tpu.memory_space<vmem>>, vector<8x128xf32>,
    %c0_103 = arith.constant 0 : index
    %c0_104 = arith.constant 0 : index
    %233 = vector.load %arg8[%c0_103, %c0_104] : memref<8x128xf32, #tpu.memory_space<vmem>>, vector<8x128xf32>
    tpu.vector_store %arg8[%c0_103, %c0_104], %229 {strides = array<i32>} : memref<8x128xf32, #tpu.memory_space<vmem>>, vector<8x128xf32>,
    %c7_i32 = arith.constant 7 : i32
    %234 = arith.index_cast %c7_i32 : i32 to index
    %c0_105 = arith.constant 0 : index
    %c0_106 = arith.constant 0 : index
    %235 = vector.load %arg2[%234, %c0_105, %c0_106] : memref<8x8x512xbf16, #tpu.memory_space<vmem>>, vector<1x8x512xbf16>
    %236 = vector.shape_cast %235 : vector<1x8x512xbf16> to vector<8x512xbf16>
    %237 = arith.extf %236 : vector<8x512xbf16> to vector<8x512xf32>
    %c0_107 = arith.constant 0 : index
    %c0_108 = arith.constant 0 : index
    %238 = vector.load %arg7[%c0_107, %c0_108] : memref<8x128xf32, #tpu.memory_space<vmem>>, vector<8x128xf32>
    %239 = arith.truncf %238 : vector<8x128xf32> to vector<8x128xbf16>
    %c0_109 = arith.constant 0 : index
    %c0_110 = arith.constant 0 : index
    %240 = vector.load %arg3[%c0_109, %c0_110] : memref<128x512xbf16, #tpu.memory_space<vmem>>, vector<128x512xbf16>
    %cst_111 = arith.constant dense<0.000000e+00> : vector<8x512xf32>
    %241 = tpu.matmul %239, %240, %cst_111 {dimension_numbers = #tpu.dot_dimension_numbers<[1], [0], [0], [1], [0, 0, 1, 1], [], []>} : vector<8x128xbf16>, vector<128x512xbf16>, vector<8x512xf32> -> vector<8x512xf32>
    %242 = arith.addf %237, %241 : vector<8x512xf32>
    %c0_112 = arith.constant 0 : index
    %c0_113 = arith.constant 0 : index
    %243 = vector.load %arg8[%c0_112, %c0_113] : memref<8x128xf32, #tpu.memory_space<vmem>>, vector<8x128xf32>
    %244 = vector.extract_strided_slice %242 {offsets = [0, 0], sizes = [8, 256], strides = [1, 1]} : vector<8x512xf32> to vector<8x256xf32>
    %245 = arith.negf %244 : vector<8x256xf32>
    %246 = math.exp %245 : vector<8x256xf32>
    %cst_114 = arith.constant 1.000000e+00 : f32
    %247 = vector.broadcast %cst_114 : f32 to vector<8x256xf32>
    %248 = arith.addf %247, %246 : vector<8x256xf32>
    %249 = arith.divf %247, %248 : vector<8x256xf32>
    %250 = vector.extract_strided_slice %249 {offsets = [0, 0], sizes = [8, 128], strides = [1, 1]} : vector<8x256xf32> to vector<8x128xf32>
    %251 = vector.extract_strided_slice %249 {offsets = [0, 128], sizes = [8, 128], strides = [1, 1]} : vector<8x256xf32> to vector<8x128xf32>
    %252 = vector.extract_strided_slice %242 {offsets = [0, 256], sizes = [8, 128], strides = [1, 1]} : vector<8x512xf32> to vector<8x128xf32>
    %253 = math.tanh %252 : vector<8x128xf32>
    %254 = vector.extract_strided_slice %242 {offsets = [0, 384], sizes = [8, 128], strides = [1, 1]} : vector<8x512xf32> to vector<8x128xf32>
    %255 = arith.negf %254 : vector<8x128xf32>
    %256 = math.exp %255 : vector<8x128xf32>
    %cst_115 = arith.constant 1.000000e+00 : f32
    %257 = vector.broadcast %cst_115 : f32 to vector<8x128xf32>
    %258 = arith.addf %257, %256 : vector<8x128xf32>
    %259 = arith.divf %257, %258 : vector<8x128xf32>
    %260 = arith.mulf %251, %243 : vector<8x128xf32>
    %261 = arith.mulf %250, %253 : vector<8x128xf32>
    %262 = arith.addf %260, %261 : vector<8x128xf32>
    %263 = math.tanh %262 : vector<8x128xf32>
    %264 = arith.mulf %259, %263 : vector<8x128xf32>
    %c0_116 = arith.constant 0 : index
    %c0_117 = arith.constant 0 : index
    %265 = vector.load %arg7[%c0_116, %c0_117] : memref<8x128xf32, #tpu.memory_space<vmem>>, vector<8x128xf32>
    tpu.vector_store %arg7[%c0_116, %c0_117], %264 {strides = array<i32>} : memref<8x128xf32, #tpu.memory_space<vmem>>, vector<8x128xf32>,
    %c0_118 = arith.constant 0 : index
    %c0_119 = arith.constant 0 : index
    %266 = vector.load %arg8[%c0_118, %c0_119] : memref<8x128xf32, #tpu.memory_space<vmem>>, vector<8x128xf32>
    tpu.vector_store %arg8[%c0_118, %c0_119], %262 {strides = array<i32>} : memref<8x128xf32, #tpu.memory_space<vmem>>, vector<8x128xf32>,
    %c8_i32 = arith.constant 8 : i32
    %c1_i32_120 = arith.constant 1 : i32
    %267 = arith.cmpi eq, %arg1, %c1_i32_120 : i32
    %268 = arith.extui %267 : i1 to i32
    %c0_i32_121 = arith.constant 0 : i32
    %269 = arith.cmpi ne, %268, %c0_i32_121 : i32
    scf.if %269 {
      %c0_122 = arith.constant 0 : index
      %c0_123 = arith.constant 0 : index
      %270 = vector.load %arg7[%c0_122, %c0_123] : memref<8x128xf32, #tpu.memory_space<vmem>>, vector<8x128xf32>
      %271 = arith.truncf %270 : vector<8x128xf32> to vector<8x128xbf16>
      %c0_124 = arith.constant 0 : index
      %c0_125 = arith.constant 0 : index
      %272 = vector.load %arg4[%c0_124, %c0_125] : memref<128x128xbf16, #tpu.memory_space<vmem>>, vector<128x128xbf16>
      %cst_126 = arith.constant dense<0.000000e+00> : vector<8x128xf32>
      %273 = tpu.matmul %271, %272, %cst_126 {dimension_numbers = #tpu.dot_dimension_numbers<[1], [0], [0], [1], [0, 0, 1, 1], [], []>} : vector<8x128xbf16>, vector<128x128xbf16>, vector<8x128xf32> -> vector<8x128xf32>
      %c0_127 = arith.constant 0 : index
      %c0_128 = arith.constant 0 : index
      %274 = vector.load %arg5[%c0_127, %c0_128] : memref<1x128xf32, #tpu.memory_space<vmem>>, vector<1x128xf32>
      %275 = vector.broadcast %274 : vector<1x128xf32> to vector<8x128xf32>
      %276 = arith.addf %273, %275 : vector<8x128xf32>
      %c0_129 = arith.constant 0 : index
      %c0_130 = arith.constant 0 : index
      %277 = vector.load %arg6[%c0_129, %c0_130] : memref<8x128xf32, #tpu.memory_space<vmem>>, vector<8x128xf32>
      tpu.vector_store %arg6[%c0_129, %c0_130], %276 {strides = array<i32>} : memref<8x128xf32, #tpu.memory_space<vmem>>, vector<8x128xf32>,
    } else {
    }
    return
  }
  func.func @transform_0(%arg0: i32, %arg1: i32) -> (i32, i32, i32) {
    %c0_i32 = arith.constant 0 : i32
    %c0_i32_0 = arith.constant 0 : i32
    return %arg1, %arg0, %c0_i32 : i32, i32, i32
  }
  func.func @transform_1(%arg0: i32, %arg1: i32) -> (i32, i32) {
    %c0_i32 = arith.constant 0 : i32
    %c0_i32_0 = arith.constant 0 : i32
    %c0_i32_1 = arith.constant 0 : i32
    return %c0_i32, %c0_i32_0 : i32, i32
  }
  func.func @transform_2(%arg0: i32, %arg1: i32) -> (i32, i32) {
    %c0_i32 = arith.constant 0 : i32
    %c0_i32_0 = arith.constant 0 : i32
    %c0_i32_1 = arith.constant 0 : i32
    return %c0_i32, %c0_i32_0 : i32, i32
  }
  func.func @transform_3(%arg0: i32, %arg1: i32) -> (i32, i32) {
    %c0_i32 = arith.constant 0 : i32
    %c0_i32_0 = arith.constant 0 : i32
    %c0_i32_1 = arith.constant 0 : i32
    return %c0_i32, %c0_i32_0 : i32, i32
  }
  func.func @transform_4(%arg0: i32, %arg1: i32) -> (i32, i32) {
    %c0_i32 = arith.constant 0 : i32
    %c0_i32_0 = arith.constant 0 : i32
    return %arg0, %c0_i32 : i32, i32
  }
}

</mosaic_0001>

<bundles_post_ra>
// kernel: qmodel_forward.6
= control target key start
LH: loop header
LB: loop body
LE: loop exit
PB: predicated region body
PF: predicated region fallthrough
CT: control target
= control target key end

     0   :  { %8 = vsyncpa [#allocation3], 0  ;;  %s790_s15 = smov [#allocation2]   ;;  %s791_s17 = smov 256   ;;  %s1011_s0 = inlined_call_operand.vmem [shape: bf16[128,128], index: 0, kind: input, shape index: {}]   ;;  %s1012_s1 = inlined_call_operand.hbm [shape: bf16[128,512], index: 1, kind: input, shape index: {}]   ;;  %s1013_s2 = inlined_call_operand.vmem [shape: f32[1,512], index: 2, kind: input, shape index: {}]   ;;  %s1014_s3 = inlined_call_operand.vmem [shape: bf16[128,512], index: 3, kind: output, shape index: {}]  }
   0x1   :  { %s15_s14 = sshll.u32 %s1012_s1, 4  ;;  %s17_s16 = sshll.u32 %s790_s15, 4  ;;  %s16_s14 = int_to_ptr.hbm [resolvable:$true] %s15_s14  ;;  %s18_s16 = int_to_ptr.vmem [resolvable:$true] %s17_s16 }
   0x2   :  { %s792_s18 = smov 16  }
   0x3   :  { %23 = dma.hbm_to_vmem [thread:$0]  %s16_s14, 4096, %s18_s16, [#allocation3], %s791_s17, %s791_s17, %s792_s18  }
   0x4   :  { %788 = dma.done.wait [#allocation3], 4096  }
   0x5   :  { %789 = vsyncadd [#allocation3], 4294963200  ;;  %v707_v0 = vld [vmem:[#allocation2 + $0xe0] sm:$0xf]  ;;  %v759_v1 = vld [vmem:[#allocation2 + $0xec] sm:$0xf0] }
   0x6   :  { %v757_v2 = vld [vmem:[#allocation2 + $0xe4] sm:$0xf]  ;;  %v708_v3 = vor.u32 %v759_v1, %v707_v0  ;;  %v709_v4 = vld [vmem:[#allocation2 + $0xf0] sm:$0xf0]  ;;  %v715_v5 = vld [vmem:[#allocation2 + $0xe8] sm:$0xf] }
   0x7   :  { %v760_v6 = vld [vmem:[#allocation2 + $0xf4] sm:$0xf0]  ;;  %v712_v7 = vor.u32 %v757_v2, %v709_v4  ;;  %v758_v9 = vld [vmem:[#allocation2 + $0xec] sm:$0xf]  ;;  %v717_v10 = vld [vmem:[#allocation2 + $0xf8] sm:$0xf0] }
   0x8   :  { %v716_v8 = vor.u32 %v760_v6, %v715_v5  ;;  %v691_v11 = vld [vmem:[#allocation2 + $0xc0] sm:$0xf]  ;;  %296 = vmatpush.bf16.msra.mxu0 %v708_v3  ;;  %v720_v12 = vor.u32 %v758_v9, %v717_v10  ;;  %v755_v13 = vld [vmem:[#allocation2 + $0xcc] sm:$0xf0]  ;;  %v753_v14 = vld [vmem:[#allocation2 + $0xc4] sm:$0xf] }
   0x9   :  { %v693_v15 = vld [vmem:[#allocation2 + $0xd0] sm:$0xf0]  ;;  %345 = vmatpush.bf16.msra.mxu1 %v712_v7  ;;  %v692_v16 = vor.u32 %v755_v13, %v691_v11  ;;  %v699_v18 = vld [vmem:[#allocation2 + $0xc8] sm:$0xf]  ;;  %v756_v19 = vld [vmem:[#allocation2 + $0xd4] sm:$0xf0] }
   0xa   :  { %394 = vmatpush.bf16.msra.mxu2 %v716_v8  ;;  %v696_v17 = vor.u32 %v753_v14, %v693_v15  ;;  %v754_v20 = vld [vmem:[#allocation2 + $0xcc] sm:$0xf]  ;;  %443 = vmatpush.bf16.msra.mxu3 %v720_v12  ;;  %v700_v21 = vor.u32 %v756_v19, %v699_v18  ;;  %v701_v22 = vld [vmem:[#allocation2 + $0xd8] sm:$0xf0]  ;;  %v675_v23 = vld [vmem:[#allocation2 + $0xa0] sm:$0xf] }
   0xb   :  { %v751_v24 = vld [vmem:[#allocation2 + $0xac] sm:$0xf0]  ;;  %v704_v25 = vor.u32 %v754_v20, %v701_v22  ;;  %v749_v26 = vld [vmem:[#allocation2 + $0xa4] sm:$0xf]  ;;  %v677_v27 = vld [vmem:[#allocation2 + $0xb0] sm:$0xf0] }
   0xc   :  { %v683_v28 = vld [vmem:[#allocation2 + $0xa8] sm:$0xf]  ;;  %297 = vmatpush.bf16.msra.mxu0 %v692_v16  ;;  %v676_v29 = vor.u32 %v751_v24, %v675_v23  ;;  %v752_v30 = vld [vmem:[#allocation2 + $0xb4] sm:$0xf0]  ;;  %v750_v31 = vld [vmem:[#allocation2 + $0xac] sm:$0xf]  ;;  %v680_v33 = vor.u32 %v749_v26, %v677_v27 }
   0xd   :  { %v685_v32 = vld [vmem:[#allocation2 + $0xb8] sm:$0xf0]  ;;  %346 = vmatpush.bf16.msra.mxu1 %v696_v17  ;;  %v684_v34 = vor.u32 %v752_v30, %v683_v28  ;;  %v659_v35 = vld [vmem:[#allocation2 + $0x80] sm:$0xf]  ;;  %v747_v36 = vld [vmem:[#allocation2 + $0x8c] sm:$0xf0] }
   0xe   :  { %395 = vmatpush.bf16.msra.mxu2 %v700_v21  ;;  %v745_v37 = vld [vmem:[#allocation2 + $0x84] sm:$0xf]  ;;  %444 = vmatpush.bf16.msra.mxu3 %v704_v25  ;;  %v688_v38 = vor.u32 %v750_v31, %v685_v32  ;;  %v661_v39 = vld [vmem:[#allocation2 + $0x90] sm:$0xf0]  ;;  %v667_v40 = vld [vmem:[#allocation2 + $0x88] sm:$0xf]  ;;  %v660_v44 = vor.u32 %v747_v36, %v659_v35 }
   0xf   :  { %v748_v41 = vld [vmem:[#allocation2 + $0x94] sm:$0xf0]  ;;  %v746_v42 = vld [vmem:[#allocation2 + $0x8c] sm:$0xf]  ;;  %v669_v43 = vld [vmem:[#allocation2 + $0x98] sm:$0xf0]  ;;  %v664_v45 = vor.u32 %v745_v37, %v661_v39 }
  0x10   :  { %298 = vmatpush.bf16.msra.mxu0 %v676_v29  ;;  %v668_v46 = vor.u32 %v748_v41, %v667_v40  ;;  %v643_v47 = vld [vmem:[#allocation2 + $0x60] sm:$0xf]  ;;  %v743_v48 = vld [vmem:[#allocation2 + $0x6c] sm:$0xf0]  ;;  %v741_v49 = vld [vmem:[#allocation2 + $0x64] sm:$0xf]  ;;  %v672_v50 = vor.u32 %v746_v42, %v669_v43 }
  0x11   :  { %347 = vmatpush.bf16.msra.mxu1 %v680_v33  ;;  %v645_v51 = vld [vmem:[#allocation2 + $0x70] sm:$0xf0]  ;;  %v651_v52 = vld [vmem:[#allocation2 + $0x68] sm:$0xf]  ;;  %v744_v53 = vld [vmem:[#allocation2 + $0x74] sm:$0xf0]  ;;  %v644_v56 = vor.u32 %v743_v48, %v643_v47 }
  0x12   :  { %396 = vmatpush.bf16.msra.mxu2 %v684_v34  ;;  %445 = vmatpush.bf16.msra.mxu3 %v688_v38  ;;  %v742_v54 = vld [vmem:[#allocation2 + $0x6c] sm:$0xf]  ;;  %v653_v55 = vld [vmem:[#allocation2 + $0x78] sm:$0xf0]  ;;  %v648_v57 = vor.u32 %v741_v49, %v645_v51  ;;  %v652_v58 = vor.u32 %v744_v53, %v651_v52  ;;  %v627_v59 = vld [vmem:[#allocation2 + $0x40] sm:$0xf] }
  0x13   :  { %v739_v60 = vld [vmem:[#allocation2 + $0x4c] sm:$0xf0]  ;;  %v737_v61 = vld [vmem:[#allocation2 + $0x44] sm:$0xf]  ;;  %v656_v62 = vor.u32 %v742_v54, %v653_v55  ;;  %v629_v63 = vld [vmem:[#allocation2 + $0x50] sm:$0xf0] }
  0x14   :  { %299 = vmatpush.bf16.msra.mxu0 %v660_v44  ;;  %v635_v0 = vld [vmem:[#allocation2 + $0x48] sm:$0xf]  ;;  %v740_v1 = vld [vmem:[#allocation2 + $0x54] sm:$0xf0]  ;;  %v738_v2 = vld [vmem:[#allocation2 + $0x4c] sm:$0xf]  ;;  %v628_v4 = vor.u32 %v739_v60, %v627_v59  ;;  %v632_v5 = vor.u32 %v737_v61, %v629_v63 }
  0x15   :  { %348 = vmatpush.bf16.msra.mxu1 %v664_v45  ;;  %v637_v3 = vld [vmem:[#allocation2 + $0x58] sm:$0xf0]  ;;  %v636_v6 = vor.u32 %v740_v1, %v635_v0  ;;  %v611_v7 = vld [vmem:[#allocation2 + $0x20] sm:$0xf]  ;;  %v735_v8 = vld [vmem:[#allocation2 + $0x2c] sm:$0xf0] }
  0x16   :  { %397 = vmatpush.bf16.msra.mxu2 %v668_v46  ;;  %446 = vmatpush.bf16.msra.mxu3 %v672_v50  ;;  %v733_v9 = vld [vmem:[#allocation2 + $0x24] sm:$0xf]  ;;  %v640_v10 = vor.u32 %v738_v2, %v637_v3  ;;  %v613_v11 = vld [vmem:[#allocation2 + $0x30] sm:$0xf0]  ;;  %v619_v12 = vld [vmem:[#allocation2 + $0x28] sm:$0xf]  ;;  %v612_v16 = vor.u32 %v735_v8, %v611_v7 }
  0x17   :  { %v736_v13 = vld [vmem:[#allocation2 + $0x34] sm:$0xf0]  ;;  %v734_v14 = vld [vmem:[#allocation2 + $0x2c] sm:$0xf]  ;;  %v621_v15 = vld [vmem:[#allocation2 + $0x38] sm:$0xf0]  ;;  %v616_v17 = vor.u32 %v733_v9, %v613_v11 }
  0x18   :  { %300 = vmatpush.bf16.msra.mxu0 %v644_v56  ;;  %v620_v18 = vor.u32 %v736_v13, %v619_v12  ;;  %v595_v19 = vld [vmem:[#allocation2] sm:$0xf]  ;;  %v731_v20 = vld [vmem:[#allocation2 + $0xc] sm:$0xf0]  ;;  %v729_v21 = vld [vmem:[#allocation2 + $0x4] sm:$0xf]  ;;  %v624_v22 = vor.u32 %v734_v14, %v621_v15 }
  0x19   :  { %349 = vmatpush.bf16.msra.mxu1 %v648_v57  ;;  %v597_v23 = vld [vmem:[#allocation2 + $0x10] sm:$0xf0]  ;;  %v603_v24 = vld [vmem:[#allocation2 + $0x8] sm:$0xf]  ;;  %v732_v25 = vld [vmem:[#allocation2 + $0x14] sm:$0xf0]  ;;  %v596_v28 = vor.u32 %v731_v20, %v595_v19 }
  0x1a   :  { %398 = vmatpush.bf16.msra.mxu2 %v652_v58  ;;  %447 = vmatpush.bf16.msra.mxu3 %v656_v62  ;;  %v730_v26 = vld [vmem:[#allocation2 + $0xc] sm:$0xf]  ;;  %v605_v27 = vld [vmem:[#allocation2 + $0x18] sm:$0xf0]  ;;  %v600_v29 = vor.u32 %v729_v21, %v597_v23  ;;  %v604_v30 = vor.u32 %v732_v25, %v603_v24  ;;  %v721_v32 = vld [vmem:[%s1011_s0] sm:$0xff] }
  0x1b   :  { %v608_v31 = vor.u32 %v730_v26, %v605_v27  ;;  %v722_v33 = vld [vmem:[%s1011_s0 + $0x8] sm:$0xff]  ;;  %v723_v34 = vld [vmem:[%s1011_s0 + $0x10] sm:$0xff]  ;;  %v724_v35 = vld [vmem:[%s1011_s0 + $0x18] sm:$0xff] }
  0x1c   :  { %301 = vmatpush.bf16.msra.mxu0 %v628_v4  ;;  %v725_v36 = vld [vmem:[%s1011_s0 + $0x20] sm:$0xff]  ;;  %v726_v37 = vld [vmem:[%s1011_s0 + $0x28] sm:$0xff]  ;;  %v727_v38 = vld [vmem:[%s1011_s0 + $0x30] sm:$0xff] }
  0x1d   :  { %350 = vmatpush.bf16.msra.mxu1 %v632_v5  ;;  %v728_v39 = vld [vmem:[%s1011_s0 + $0x38] sm:$0xff]  ;;  %v78_v40 = vld [vmem:[%s1013_s2] sm:$0xf] }
  0x1e   :  { %399 = vmatpush.bf16.msra.mxu2 %v636_v6  ;;  %448 = vmatpush.bf16.msra.mxu3 %v640_v10  ;;  %v843_v41 = vperm.slane %v78_v40, 0  ;;  %v845_v42 = vperm.slane %v78_v40, 1  ;;  %v849_v48 = vperm.slane %v78_v40, 2  ;;  %v851_v49 = vperm.slane %v78_v40, 3 }
  0x20   :  { %302 = vmatpush.bf16.msra.mxu0 %v612_v16 }
  0x21   :  { %351 = vmatpush.bf16.msra.mxu1 %v616_v17 }
  0x22   :  { %400 = vmatpush.bf16.msra.mxu2 %v620_v18  ;;  %449 = vmatpush.bf16.msra.mxu3 %v624_v22 }
  0x24   :  { %303 = vmatpush.bf16.msra.mxu0 %v596_v28 }
  0x25   :  { %352 = vmatpush.bf16.msra.mxu1 %v600_v29 }
  0x26   :  { %401 = vmatpush.bf16.msra.mxu2 %v604_v30  ;;  %450 = vmatpush.bf16.msra.mxu3 %v608_v31 }
  0x27   :  { %304 = vmatmul.bf16.vlgmr.msra.gmra.mxu0 %v721_v32 }
  0x28   :  { %353 = vmatmul.bf16.vlgmr.msra.gmra.mxu1 %v721_v32 }
  0x29   :  { %402 = vmatmul.bf16.vlgmr.msra.gmra.mxu2 %v721_v32  ;;  %451 = vmatmul.bf16.vlgmr.msra.gmra.mxu3 %v721_v32 }
  0x37   :  { %309 = vmatmul.bf16.gmra.mxu0 %v722_v33 }
  0x38   :  { %358 = vmatmul.bf16.gmra.mxu1 %v722_v33 }
  0x39   :  { %407 = vmatmul.bf16.gmra.mxu2 %v722_v33  ;;  %456 = vmatmul.bf16.gmra.mxu3 %v722_v33 }
  0x47   :  { %314 = vmatmul.bf16.gmra.mxu0 %v723_v34 }
  0x48   :  { %363 = vmatmul.bf16.gmra.mxu1 %v723_v34 }
  0x49   :  { %412 = vmatmul.bf16.gmra.mxu2 %v723_v34  ;;  %461 = vmatmul.bf16.gmra.mxu3 %v723_v34 }
  0x57   :  { %319 = vmatmul.bf16.gmra.mxu0 %v724_v35 }
  0x58   :  { %368 = vmatmul.bf16.gmra.mxu1 %v724_v35 }
  0x59   :  { %417 = vmatmul.bf16.gmra.mxu2 %v724_v35  ;;  %466 = vmatmul.bf16.gmra.mxu3 %v724_v35 }
  0x67   :  { %324 = vmatmul.bf16.gmra.mxu0 %v725_v36 }
  0x68   :  { %373 = vmatmul.bf16.gmra.mxu1 %v725_v36 }
  0x69   :  { %422 = vmatmul.bf16.gmra.mxu2 %v725_v36  ;;  %471 = vmatmul.bf16.gmra.mxu3 %v725_v36 }
  0x77   :  { %329 = vmatmul.bf16.gmra.mxu0 %v726_v37 }
  0x78   :  { %378 = vmatmul.bf16.gmra.mxu1 %v726_v37 }
  0x79   :  { %427 = vmatmul.bf16.gmra.mxu2 %v726_v37  ;;  %476 = vmatmul.bf16.gmra.mxu3 %v726_v37 }
  0x87   :  { %334 = vmatmul.bf16.gmra.mxu0 %v727_v38 }
  0x88   :  { %383 = vmatmul.bf16.gmra.mxu1 %v727_v38 }
  0x89   :  { %432 = vmatmul.bf16.gmra.mxu2 %v727_v38  ;;  %481 = vmatmul.bf16.gmra.mxu3 %v727_v38 }
  0x97   :  { %339 = vmatmul.bf16.gmra.mxu0 %v728_v39 }
  0x98   :  { %388 = vmatmul.bf16.gmra.mxu1 %v728_v39 }
  0x99   :  { %437 = vmatmul.bf16.gmra.mxu2 %v728_v39  ;;  %486 = vmatmul.bf16.gmra.mxu3 %v728_v39 }
  0xa4   :  { %v305_v43 = vpop.f32.mrf.mxu0 }
  0xa5   :  { %v306_v44 = vadd.f32 %v305_v43, %v843_v41  ;;  %v354_v45 = vpop.f32.mrf.mxu1 }
  0xa6   :  { %v355_v46 = vadd.f32 %v354_v45, %v845_v42 }
  0xa8   :  { %v492_v47 = vpack.c.bf16 %v355_v46, %v306_v44 }
  0xaa   :  { %524 = vst [vmem:[%s1014_s3] sm:$0xff] %v492_v47 }
  0xac   :  { %v403_v50 = vpop.f32.mrf.mxu2  ;;  %v452_v52 = vpop.f32.mrf.mxu3 }
  0xad   :  { %v404_v51 = vadd.f32 %v403_v50, %v849_v48  ;;  %v307_v53 = vpop.f32.mrf.mxu0  ;;  %v453_v54 = vadd.f32 %v452_v52, %v851_v49  ;;  %v356_v56 = vpop.f32.mrf.mxu1 }
  0xae   :  { %v308_v55 = vadd.f32 %v307_v53, %v843_v41  ;;  %v357_v57 = vadd.f32 %v356_v56, %v845_v42 }
  0xaf   :  { %v493_v58 = vpack.c.bf16 %v453_v54, %v404_v51 }
  0xb0   :  { %v494_v59 = vpack.c.bf16 %v357_v57, %v308_v55 }
  0xb1   :  { %525 = vst [vmem:[%s1014_s3 + $0x8] sm:$0xff] %v493_v58 }
  0xb2   :  { %526 = vst [vmem:[%s1014_s3 + $0x10] sm:$0xff] %v494_v59 }
  0xb4   :  { %v405_v60 = vpop.f32.mrf.mxu2  ;;  %v454_v62 = vpop.f32.mrf.mxu3 }
  0xb5   :  { %v406_v61 = vadd.f32 %v405_v60, %v849_v48  ;;  %v310_v63 = vpop.f32.mrf.mxu0  ;;  %v455_v0 = vadd.f32 %v454_v62, %v851_v49  ;;  %v359_v2 = vpop.f32.mrf.mxu1 }
  0xb6   :  { %v311_v1 = vadd.f32 %v310_v63, %v843_v41  ;;  %v360_v3 = vadd.f32 %v359_v2, %v845_v42 }
  0xb7   :  { %v495_v4 = vpack.c.bf16 %v455_v0, %v406_v61 }
  0xb8   :  { %v496_v5 = vpack.c.bf16 %v360_v3, %v311_v1 }
  0xb9   :  { %527 = vst [vmem:[%s1014_s3 + $0x18] sm:$0xff] %v495_v4 }
  0xba   :  { %528 = vst [vmem:[%s1014_s3 + $0x20] sm:$0xff] %v496_v5 }
  0xbc   :  { %v408_v6 = vpop.f32.mrf.mxu2  ;;  %v457_v8 = vpop.f32.mrf.mxu3 }
  0xbd   :  { %v409_v7 = vadd.f32 %v408_v6, %v849_v48  ;;  %v312_v9 = vpop.f32.mrf.mxu0  ;;  %v458_v10 = vadd.f32 %v457_v8, %v851_v49  ;;  %v361_v12 = vpop.f32.mrf.mxu1 }
  0xbe   :  { %v313_v11 = vadd.f32 %v312_v9, %v843_v41  ;;  %v362_v13 = vadd.f32 %v361_v12, %v845_v42 }
  0xbf   :  { %v497_v14 = vpack.c.bf16 %v458_v10, %v409_v7 }
  0xc0   :  { %v498_v15 = vpack.c.bf16 %v362_v13, %v313_v11 }
  0xc1   :  { %529 = vst [vmem:[%s1014_s3 + $0x28] sm:$0xff] %v497_v14 }
  0xc2   :  { %530 = vst [vmem:[%s1014_s3 + $0x30] sm:$0xff] %v498_v15 }
  0xc4   :  { %v410_v16 = vpop.f32.mrf.mxu2  ;;  %v459_v18 = vpop.f32.mrf.mxu3 }
  0xc5   :  { %v411_v17 = vadd.f32 %v410_v16, %v849_v48  ;;  %v315_v19 = vpop.f32.mrf.mxu0  ;;  %v460_v20 = vadd.f32 %v459_v18, %v851_v49  ;;  %v364_v22 = vpop.f32.mrf.mxu1 }
  0xc6   :  { %v316_v21 = vadd.f32 %v315_v19, %v843_v41  ;;  %v365_v23 = vadd.f32 %v364_v22, %v845_v42 }
  0xc7   :  { %v499_v24 = vpack.c.bf16 %v460_v20, %v411_v17 }
  0xc8   :  { %v500_v25 = vpack.c.bf16 %v365_v23, %v316_v21 }
  0xc9   :  { %531 = vst [vmem:[%s1014_s3 + $0x38] sm:$0xff] %v499_v24 }
  0xca   :  { %532 = vst [vmem:[%s1014_s3 + $0x40] sm:$0xff] %v500_v25 }
  0xcc   :  { %v413_v26 = vpop.f32.mrf.mxu2  ;;  %v462_v28 = vpop.f32.mrf.mxu3 }
  0xcd   :  { %v414_v27 = vadd.f32 %v413_v26, %v849_v48  ;;  %v317_v29 = vpop.f32.mrf.mxu0  ;;  %v463_v30 = vadd.f32 %v462_v28, %v851_v49  ;;  %v366_v32 = vpop.f32.mrf.mxu1 }
  0xce   :  { %v318_v31 = vadd.f32 %v317_v29, %v843_v41  ;;  %v367_v33 = vadd.f32 %v366_v32, %v845_v42 }
  0xcf   :  { %v501_v34 = vpack.c.bf16 %v463_v30, %v414_v27 }
  0xd0   :  { %v502_v35 = vpack.c.bf16 %v367_v33, %v318_v31 }
  0xd1   :  { %533 = vst [vmem:[%s1014_s3 + $0x48] sm:$0xff] %v501_v34 }
  0xd2   :  { %534 = vst [vmem:[%s1014_s3 + $0x50] sm:$0xff] %v502_v35 }
  0xd4   :  { %v415_v36 = vpop.f32.mrf.mxu2  ;;  %v464_v38 = vpop.f32.mrf.mxu3 }
  0xd5   :  { %v416_v37 = vadd.f32 %v415_v36, %v849_v48  ;;  %v320_v39 = vpop.f32.mrf.mxu0  ;;  %v465_v40 = vadd.f32 %v464_v38, %v851_v49  ;;  %v369_v44 = vpop.f32.mrf.mxu1 }
  0xd6   :  { %v321_v43 = vadd.f32 %v320_v39, %v843_v41  ;;  %v370_v45 = vadd.f32 %v369_v44, %v845_v42 }
  0xd7   :  { %v503_v46 = vpack.c.bf16 %v465_v40, %v416_v37 }
  0xd8   :  { %v504_v47 = vpack.c.bf16 %v370_v45, %v321_v43 }
  0xd9   :  { %535 = vst [vmem:[%s1014_s3 + $0x58] sm:$0xff] %v503_v46 }
  0xda   :  { %536 = vst [vmem:[%s1014_s3 + $0x60] sm:$0xff] %v504_v47 }
  0xdc   :  { %v418_v50 = vpop.f32.mrf.mxu2  ;;  %v467_v52 = vpop.f32.mrf.mxu3 }
  0xdd   :  { %v419_v51 = vadd.f32 %v418_v50, %v849_v48  ;;  %v322_v53 = vpop.f32.mrf.mxu0  ;;  %v468_v54 = vadd.f32 %v467_v52, %v851_v49  ;;  %v371_v56 = vpop.f32.mrf.mxu1 }
  0xde   :  { %v323_v55 = vadd.f32 %v322_v53, %v843_v41  ;;  %v372_v57 = vadd.f32 %v371_v56, %v845_v42 }
  0xdf   :  { %v505_v58 = vpack.c.bf16 %v468_v54, %v419_v51 }
  0xe0   :  { %v506_v59 = vpack.c.bf16 %v372_v57, %v323_v55 }
  0xe1   :  { %537 = vst [vmem:[%s1014_s3 + $0x68] sm:$0xff] %v505_v58 }
  0xe2   :  { %538 = vst [vmem:[%s1014_s3 + $0x70] sm:$0xff] %v506_v59 }
  0xe4   :  { %v420_v60 = vpop.f32.mrf.mxu2  ;;  %v469_v62 = vpop.f32.mrf.mxu3 }
  0xe5   :  { %v421_v61 = vadd.f32 %v420_v60, %v849_v48  ;;  %v325_v63 = vpop.f32.mrf.mxu0  ;;  %v470_v0 = vadd.f32 %v469_v62, %v851_v49  ;;  %v374_v2 = vpop.f32.mrf.mxu1 }
  0xe6   :  { %v326_v1 = vadd.f32 %v325_v63, %v843_v41  ;;  %v375_v3 = vadd.f32 %v374_v2, %v845_v42 }
  0xe7   :  { %v507_v4 = vpack.c.bf16 %v470_v0, %v421_v61 }
  0xe8   :  { %v508_v5 = vpack.c.bf16 %v375_v3, %v326_v1 }
  0xe9   :  { %539 = vst [vmem:[%s1014_s3 + $0x78] sm:$0xff] %v507_v4 }
  0xea   :  { %540 = vst [vmem:[%s1014_s3 + $0x80] sm:$0xff] %v508_v5 }
  0xec   :  { %v423_v6 = vpop.f32.mrf.mxu2  ;;  %v472_v8 = vpop.f32.mrf.mxu3 }
  0xed   :  { %v424_v7 = vadd.f32 %v423_v6, %v849_v48  ;;  %v327_v9 = vpop.f32.mrf.mxu0  ;;  %v473_v10 = vadd.f32 %v472_v8, %v851_v49  ;;  %v376_v12 = vpop.f32.mrf.mxu1 }
  0xee   :  { %v328_v11 = vadd.f32 %v327_v9, %v843_v41  ;;  %v377_v13 = vadd.f32 %v376_v12, %v845_v42 }
  0xef   :  { %v509_v14 = vpack.c.bf16 %v473_v10, %v424_v7 }
  0xf0   :  { %v510_v15 = vpack.c.bf16 %v377_v13, %v328_v11 }
  0xf1   :  { %541 = vst [vmem:[%s1014_s3 + $0x88] sm:$0xff] %v509_v14 }
  0xf2   :  { %542 = vst [vmem:[%s1014_s3 + $0x90] sm:$0xff] %v510_v15 }
  0xf4   :  { %v425_v16 = vpop.f32.mrf.mxu2  ;;  %v474_v18 = vpop.f32.mrf.mxu3 }
  0xf5   :  { %v426_v17 = vadd.f32 %v425_v16, %v849_v48  ;;  %v330_v19 = vpop.f32.mrf.mxu0  ;;  %v475_v20 = vadd.f32 %v474_v18, %v851_v49  ;;  %v379_v22 = vpop.f32.mrf.mxu1 }
  0xf6   :  { %v331_v21 = vadd.f32 %v330_v19, %v843_v41  ;;  %v380_v23 = vadd.f32 %v379_v22, %v845_v42 }
  0xf7   :  { %v511_v24 = vpack.c.bf16 %v475_v20, %v426_v17 }
  0xf8   :  { %v512_v25 = vpack.c.bf16 %v380_v23, %v331_v21 }
  0xf9   :  { %543 = vst [vmem:[%s1014_s3 + $0x98] sm:$0xff] %v511_v24 }
  0xfa   :  { %544 = vst [vmem:[%s1014_s3 + $0xa0] sm:$0xff] %v512_v25 }
  0xfc   :  { %v428_v26 = vpop.f32.mrf.mxu2  ;;  %v477_v28 = vpop.f32.mrf.mxu3 }
  0xfd   :  { %v429_v27 = vadd.f32 %v428_v26, %v849_v48  ;;  %v332_v29 = vpop.f32.mrf.mxu0  ;;  %v478_v30 = vadd.f32 %v477_v28, %v851_v49  ;;  %v381_v32 = vpop.f32.mrf.mxu1 }
  0xfe   :  { %v333_v31 = vadd.f32 %v332_v29, %v843_v41  ;;  %v382_v33 = vadd.f32 %v381_v32, %v845_v42 }
  0xff   :  { %v513_v34 = vpack.c.bf16 %v478_v30, %v429_v27 }
 0x100   :  { %v514_v35 = vpack.c.bf16 %v382_v33, %v333_v31 }
 0x101   :  { %545 = vst [vmem:[%s1014_s3 + $0xa8] sm:$0xff] %v513_v34 }
 0x102   :  { %546 = vst [vmem:[%s1014_s3 + $0xb0] sm:$0xff] %v514_v35 }
 0x104   :  { %v430_v36 = vpop.f32.mrf.mxu2  ;;  %v479_v38 = vpop.f32.mrf.mxu3 }
 0x105   :  { %v431_v37 = vadd.f32 %v430_v36, %v849_v48  ;;  %v335_v39 = vpop.f32.mrf.mxu0  ;;  %v480_v40 = vadd.f32 %v479_v38, %v851_v49  ;;  %v384_v44 = vpop.f32.mrf.mxu1 }
 0x106   :  { %v336_v43 = vadd.f32 %v335_v39, %v843_v41  ;;  %v385_v45 = vadd.f32 %v384_v44, %v845_v42 }
 0x107   :  { %v515_v46 = vpack.c.bf16 %v480_v40, %v431_v37 }
 0x108   :  { %v516_v47 = vpack.c.bf16 %v385_v45, %v336_v43 }
 0x109   :  { %547 = vst [vmem:[%s1014_s3 + $0xb8] sm:$0xff] %v515_v46 }
 0x10a   :  { %548 = vst [vmem:[%s1014_s3 + $0xc0] sm:$0xff] %v516_v47 }
 0x10c   :  { %v433_v50 = vpop.f32.mrf.mxu2  ;;  %v482_v52 = vpop.f32.mrf.mxu3 }
 0x10d   :  { %v434_v51 = vadd.f32 %v433_v50, %v849_v48  ;;  %v337_v53 = vpop.f32.mrf.mxu0  ;;  %v483_v54 = vadd.f32 %v482_v52, %v851_v49  ;;  %v386_v56 = vpop.f32.mrf.mxu1 }
 0x10e   :  { %v338_v55 = vadd.f32 %v337_v53, %v843_v41  ;;  %v387_v57 = vadd.f32 %v386_v56, %v845_v42 }
 0x10f   :  { %v517_v58 = vpack.c.bf16 %v483_v54, %v434_v51 }
 0x110   :  { %v518_v59 = vpack.c.bf16 %v387_v57, %v338_v55 }
 0x111   :  { %549 = vst [vmem:[%s1014_s3 + $0xc8] sm:$0xff] %v517_v58 }
 0x112   :  { %550 = vst [vmem:[%s1014_s3 + $0xd0] sm:$0xff] %v518_v59 }
 0x114   :  { %v435_v60 = vpop.f32.mrf.mxu2  ;;  %v484_v62 = vpop.f32.mrf.mxu3 }
 0x115   :  { %v436_v61 = vadd.f32 %v435_v60, %v849_v48  ;;  %v340_v63 = vpop.f32.mrf.mxu0  ;;  %v485_v0 = vadd.f32 %v484_v62, %v851_v49  ;;  %v389_v2 = vpop.f32.mrf.mxu1 }
 0x116   :  { %v341_v1 = vadd.f32 %v340_v63, %v843_v41  ;;  %v390_v3 = vadd.f32 %v389_v2, %v845_v42 }
 0x117   :  { %v519_v4 = vpack.c.bf16 %v485_v0, %v436_v61 }
 0x118   :  { %v520_v5 = vpack.c.bf16 %v390_v3, %v341_v1 }
 0x119   :  { %551 = vst [vmem:[%s1014_s3 + $0xd8] sm:$0xff] %v519_v4 }
 0x11a   :  { %552 = vst [vmem:[%s1014_s3 + $0xe0] sm:$0xff] %v520_v5 }
 0x11c   :  { %v438_v6 = vpop.f32.mrf.mxu2  ;;  %v487_v8 = vpop.f32.mrf.mxu3 }
 0x11d   :  { %v439_v7 = vadd.f32 %v438_v6, %v849_v48  ;;  %v342_v9 = vpop.f32.mrf.mxu0  ;;  %v488_v10 = vadd.f32 %v487_v8, %v851_v49  ;;  %v391_v12 = vpop.f32.mrf.mxu1 }
 0x11e   :  { %v343_v11 = vadd.f32 %v342_v9, %v843_v41  ;;  %v392_v13 = vadd.f32 %v391_v12, %v845_v42 }
 0x11f   :  { %v521_v14 = vpack.c.bf16 %v488_v10, %v439_v7 }
 0x120   :  { %v522_v15 = vpack.c.bf16 %v392_v13, %v343_v11 }
 0x121   :  { %553 = vst [vmem:[%s1014_s3 + $0xe8] sm:$0xff] %v521_v14 }
 0x122   :  { %554 = vst [vmem:[%s1014_s3 + $0xf0] sm:$0xff] %v522_v15 }
 0x124   :  { %v440_v16 = vpop.f32.mrf.mxu2  ;;  %v489_v18 = vpop.f32.mrf.mxu3 }
 0x125   :  { %v441_v17 = vadd.f32 %v440_v16, %v849_v48  ;;  %v490_v19 = vadd.f32 %v489_v18, %v851_v49 }
 0x127   :  { %v523_v41 = vpack.c.bf16 %v490_v19, %v441_v17 }
 0x129   :  { %555 = vst [vmem:[%s1014_s3 + $0xf8] sm:$0xff] %v523_v41 }
 0x12a   :  { %560 = vsyncpa [#allocation3], 1 }

// kernel: qmodel_forward.4
= control target key start
LH: loop header
LB: loop body
LE: loop exit
PB: predicated region body
PF: predicated region fallthrough
CT: control target
= control target key end

     0   :  { %s3221_s1 = inlined_call_operand.vmem [shape: bf16[384,512], index: 1, kind: input, shape index: {}]   ;;  %s3222_s0 = inlined_call_operand.vmem [shape: bf16[128,384], index: 0, kind: input, shape index: {}]   ;;  %s3223_s2 = inlined_call_operand.vmem [shape: f32[1,512], index: 2, kind: input, shape index: {}]   ;;  %s3224_s3 = inlined_call_operand.vmem [shape: bf16[128,512], index: 3, kind: output, shape index: {}]  }
   0x1   :  { %v1626_v0 = vld [vmem:[%s3221_s1 + $0xe0] sm:$0xf]  ;;  %v1950_v1 = vld [vmem:[%s3221_s1 + $0xec] sm:$0xf0]  ;;  %v1948_v9 = vld [vmem:[%s3221_s1 + $0xe4] sm:$0xf] }
   0x2   :  { %v1754_v2 = vld [vmem:[%s3221_s1 + $0x1e0] sm:$0xf]  ;;  %v1627_v3 = vor.u32 %v1950_v1, %v1626_v0  ;;  %v1982_v4 = vld [vmem:[%s3221_s1 + $0x1ec] sm:$0xf0]  ;;  %v1628_v10 = vld [vmem:[%s3221_s1 + $0xf0] sm:$0xf0] }
   0x3   :  { %v1882_v5 = vld [vmem:[%s3221_s1 + $0x2e0] sm:$0xf]  ;;  %v2014_v6 = vld [vmem:[%s3221_s1 + $0x2ec] sm:$0xf0]  ;;  %v1755_v7 = vor.u32 %v1982_v4, %v1754_v2  ;;  %v1631_v12 = vor.u32 %v1948_v9, %v1628_v10  ;;  %v1944_v20 = vld [vmem:[%s3221_s1 + $0xc4] sm:$0xf] }
   0x4   :  { %v1883_v8 = vor.u32 %v2014_v6, %v1882_v5  ;;  %v1610_v11 = vld [vmem:[%s3221_s1 + $0xc0] sm:$0xf]  ;;  %760 = vmatpush.bf16.msra.mxu0 %v1627_v3  ;;  %v1946_v13 = vld [vmem:[%s3221_s1 + $0xcc] sm:$0xf0]  ;;  %v1612_v22 = vld [vmem:[%s3221_s1 + $0xd0] sm:$0xf0] }
   0x5   :  { %v1738_v14 = vld [vmem:[%s3221_s1 + $0x1c0] sm:$0xf]  ;;  %v1978_v15 = vld [vmem:[%s3221_s1 + $0x1cc] sm:$0xf0]  ;;  %809 = vmatpush.bf16.msra.mxu1 %v1755_v7  ;;  %v1611_v16 = vor.u32 %v1946_v13, %v1610_v11  ;;  %907 = vmatpush.bf16.msra.mxu3 %v1631_v12  ;;  %v1615_v25 = vor.u32 %v1944_v20, %v1612_v22  ;;  %v1940_v31 = vld [vmem:[%s3221_s1 + $0xa4] sm:$0xf] }
   0x6   :  { %858 = vmatpush.bf16.msra.mxu2 %v1883_v8  ;;  %v1739_v17 = vor.u32 %v1978_v15, %v1738_v14  ;;  %v1866_v18 = vld [vmem:[%s3221_s1 + $0x2c0] sm:$0xf]  ;;  %v2010_v19 = vld [vmem:[%s3221_s1 + $0x2cc] sm:$0xf0]  ;;  %v1596_v32 = vld [vmem:[%s3221_s1 + $0xb0] sm:$0xf0] }
   0x7   :  { %v1867_v21 = vor.u32 %v2010_v19, %v1866_v18  ;;  %v1594_v23 = vld [vmem:[%s3221_s1 + $0xa0] sm:$0xf]  ;;  %v1942_v24 = vld [vmem:[%s3221_s1 + $0xac] sm:$0xf0]  ;;  %v1599_v38 = vor.u32 %v1940_v31, %v1596_v32  ;;  %v1936_v42 = vld [vmem:[%s3221_s1 + $0x84] sm:$0xf] }
   0x8   :  { %v1722_v26 = vld [vmem:[%s3221_s1 + $0x1a0] sm:$0xf]  ;;  %v1974_v27 = vld [vmem:[%s3221_s1 + $0x1ac] sm:$0xf0]  ;;  %761 = vmatpush.bf16.msra.mxu0 %v1611_v16  ;;  %v1595_v29 = vor.u32 %v1942_v24, %v1594_v23  ;;  %v1580_v43 = vld [vmem:[%s3221_s1 + $0x90] sm:$0xf0] }
   0x9   :  { %v1850_v28 = vld [vmem:[%s3221_s1 + $0x2a0] sm:$0xf]  ;;  %v2006_v30 = vld [vmem:[%s3221_s1 + $0x2ac] sm:$0xf0]  ;;  %810 = vmatpush.bf16.msra.mxu1 %v1739_v17  ;;  %v1723_v33 = vor.u32 %v1974_v27, %v1722_v26  ;;  %908 = vmatpush.bf16.msra.mxu3 %v1615_v25  ;;  %v1583_v50 = vor.u32 %v1936_v42, %v1580_v43  ;;  %v1932_v54 = vld [vmem:[%s3221_s1 + $0x64] sm:$0xf] }
   0xa   :  { %859 = vmatpush.bf16.msra.mxu2 %v1867_v21  ;;  %v1851_v34 = vor.u32 %v2006_v30, %v1850_v28  ;;  %v1578_v35 = vld [vmem:[%s3221_s1 + $0x80] sm:$0xf]  ;;  %v1938_v36 = vld [vmem:[%s3221_s1 + $0x8c] sm:$0xf0]  ;;  %v1564_v55 = vld [vmem:[%s3221_s1 + $0x70] sm:$0xf0] }
   0xb   :  { %v1706_v37 = vld [vmem:[%s3221_s1 + $0x180] sm:$0xf]  ;;  %v1970_v39 = vld [vmem:[%s3221_s1 + $0x18c] sm:$0xf0]  ;;  %v1579_v44 = vor.u32 %v1938_v36, %v1578_v35  ;;  %v1567_v62 = vor.u32 %v1932_v54, %v1564_v55  ;;  %v1928_v2 = vld [vmem:[%s3221_s1 + $0x44] sm:$0xf] }
   0xc   :  { %v1834_v40 = vld [vmem:[%s3221_s1 + $0x280] sm:$0xf]  ;;  %v2002_v41 = vld [vmem:[%s3221_s1 + $0x28c] sm:$0xf0]  ;;  %762 = vmatpush.bf16.msra.mxu0 %v1595_v29  ;;  %v1707_v45 = vor.u32 %v1970_v39, %v1706_v37  ;;  %v1548_v3 = vld [vmem:[%s3221_s1 + $0x50] sm:$0xf0] }
   0xd   :  { %811 = vmatpush.bf16.msra.mxu1 %v1723_v33  ;;  %v1835_v46 = vor.u32 %v2002_v41, %v1834_v40  ;;  %v1562_v47 = vld [vmem:[%s3221_s1 + $0x60] sm:$0xf]  ;;  %v1934_v48 = vld [vmem:[%s3221_s1 + $0x6c] sm:$0xf0]  ;;  %909 = vmatpush.bf16.msra.mxu3 %v1599_v38  ;;  %v1551_v10 = vor.u32 %v1928_v2, %v1548_v3  ;;  %v1924_v14 = vld [vmem:[%s3221_s1 + $0x24] sm:$0xf] }
   0xe   :  { %860 = vmatpush.bf16.msra.mxu2 %v1851_v34  ;;  %v1690_v49 = vld [vmem:[%s3221_s1 + $0x160] sm:$0xf]  ;;  %v1966_v51 = vld [vmem:[%s3221_s1 + $0x16c] sm:$0xf0]  ;;  %v1563_v56 = vor.u32 %v1934_v48, %v1562_v47  ;;  %v1532_v15 = vld [vmem:[%s3221_s1 + $0x30] sm:$0xf0] }
   0xf   :  { %v1818_v52 = vld [vmem:[%s3221_s1 + $0x260] sm:$0xf]  ;;  %v1998_v53 = vld [vmem:[%s3221_s1 + $0x26c] sm:$0xf0]  ;;  %v1691_v57 = vor.u32 %v1966_v51, %v1690_v49  ;;  %v1535_v25 = vor.u32 %v1924_v14, %v1532_v15  ;;  %v1920_v26 = vld [vmem:[%s3221_s1 + $0x4] sm:$0xf] }
  0x10   :  { %763 = vmatpush.bf16.msra.mxu0 %v1579_v44  ;;  %v1819_v58 = vor.u32 %v1998_v53, %v1818_v52  ;;  %v1546_v59 = vld [vmem:[%s3221_s1 + $0x40] sm:$0xf]  ;;  %v1930_v60 = vld [vmem:[%s3221_s1 + $0x4c] sm:$0xf0]  ;;  %v1516_v27 = vld [vmem:[%s3221_s1 + $0x10] sm:$0xf0] }
  0x11   :  { %812 = vmatpush.bf16.msra.mxu1 %v1707_v45  ;;  %v1674_v61 = vld [vmem:[%s3221_s1 + $0x140] sm:$0xf]  ;;  %910 = vmatpush.bf16.msra.mxu3 %v1583_v50  ;;  %v1962_v63 = vld [vmem:[%s3221_s1 + $0x14c] sm:$0xf0]  ;;  %v1547_v4 = vor.u32 %v1930_v60, %v1546_v59  ;;  %v1897_v29 = vld [vmem:[%s3222_s0 + $0x8] sm:$0xf0]  ;;  %v1519_v41 = vor.u32 %v1920_v26, %v1516_v27 }
  0x12   :  { %861 = vmatpush.bf16.msra.mxu2 %v1835_v46  ;;  %v1802_v0 = vld [vmem:[%s3221_s1 + $0x240] sm:$0xf]  ;;  %v1994_v1 = vld [vmem:[%s3221_s1 + $0x24c] sm:$0xf0]  ;;  %v1675_v5 = vor.u32 %v1962_v63, %v1674_v61  ;;  %v1634_v30 = vld [vmem:[%s3221_s1 + $0xe8] sm:$0xf] }
  0x13   :  { %v1803_v6 = vor.u32 %v1994_v1, %v1802_v0  ;;  %v1530_v7 = vld [vmem:[%s3221_s1 + $0x20] sm:$0xf]  ;;  %v1926_v8 = vld [vmem:[%s3221_s1 + $0x2c] sm:$0xf0]  ;;  %v1951_v31 = vld [vmem:[%s3221_s1 + $0xf4] sm:$0xf0] }
  0x14   :  { %764 = vmatpush.bf16.msra.mxu0 %v1563_v56  ;;  %v1658_v9 = vld [vmem:[%s3221_s1 + $0x120] sm:$0xf]  ;;  %v1958_v11 = vld [vmem:[%s3221_s1 + $0x12c] sm:$0xf0]  ;;  %v1531_v16 = vor.u32 %v1926_v8, %v1530_v7  ;;  %v1896_v33 = vld [vmem:[%s3222_s0 + $0x4] sm:$0xf]  ;;  %v1635_v42 = vor.u32 %v1951_v31, %v1634_v30 }
  0x15   :  { %813 = vmatpush.bf16.msra.mxu1 %v1691_v57  ;;  %911 = vmatpush.bf16.msra.mxu3 %v1567_v62  ;;  %v1786_v12 = vld [vmem:[%s3221_s1 + $0x220] sm:$0xf]  ;;  %v1990_v13 = vld [vmem:[%s3221_s1 + $0x22c] sm:$0xf0]  ;;  %v1659_v20 = vor.u32 %v1958_v11, %v1658_v9  ;;  %v1762_v34 = vld [vmem:[%s3221_s1 + $0x1e8] sm:$0xf] }
  0x16   :  { %862 = vmatpush.bf16.msra.mxu2 %v1819_v58  ;;  %v1514_v17 = vld [vmem:[%s3221_s1] sm:$0xf]  ;;  %v1922_v18 = vld [vmem:[%s3221_s1 + $0xc] sm:$0xf0]  ;;  %v1787_v21 = vor.u32 %v1990_v13, %v1786_v12  ;;  %v1983_v35 = vld [vmem:[%s3221_s1 + $0x1f4] sm:$0xf0] }
  0x17   :  { %v1642_v19 = vld [vmem:[%s3221_s1 + $0x100] sm:$0xf]  ;;  %v1954_v22 = vld [vmem:[%s3221_s1 + $0x10c] sm:$0xf0]  ;;  %v1515_v32 = vor.u32 %v1922_v18, %v1514_v17  ;;  %v1426_v39 = vld [vmem:[%s3222_s0 + $0x8] sm:$0xf]  ;;  %v1763_v47 = vor.u32 %v1983_v35, %v1762_v34 }
  0x18   :  { %765 = vmatpush.bf16.msra.mxu0 %v1547_v4  ;;  %v1770_v23 = vld [vmem:[%s3221_s1 + $0x200] sm:$0xf]  ;;  %v1986_v24 = vld [vmem:[%s3221_s1 + $0x20c] sm:$0xf0]  ;;  %v1643_v36 = vor.u32 %v1954_v22, %v1642_v19  ;;  %v1898_v40 = vld [vmem:[%s3222_s0 + $0x10] sm:$0xf0] }
  0x19   :  { %814 = vmatpush.bf16.msra.mxu1 %v1675_v5  ;;  %912 = vmatpush.bf16.msra.mxu3 %v1551_v10  ;;  %v1418_v28 = vld [vmem:[%s3222_s0] sm:$0xf]  ;;  %v1771_v37 = vor.u32 %v1986_v24, %v1770_v23  ;;  %v1420_v38 = vld [vmem:[%s3222_s0 + $0xc] sm:$0xf0]  ;;  %v2012_v43 = vld [vmem:[%s3221_s1 + $0x2e4] sm:$0xf]  ;;  %v2280_v52 = vor.u32 %v1898_v40, %v1426_v39 }
  0x1a   :  { %863 = vmatpush.bf16.msra.mxu2 %v1803_v6  ;;  %v1884_v44 = vld [vmem:[%s3221_s1 + $0x2f0] sm:$0xf0]  ;;  %v1980_v45 = vld [vmem:[%s3221_s1 + $0x1e4] sm:$0xf]  ;;  %v2267_v46 = vor.u32 %v1897_v29, %v1418_v28  ;;  %v1618_v49 = vld [vmem:[%s3221_s1 + $0xc8] sm:$0xf]  ;;  %v2278_v51 = vor.u32 %v1896_v33, %v1420_v38 }
  0x1b   :  { %v1756_v48 = vld [vmem:[%s3221_s1 + $0x1f0] sm:$0xf0]  ;;  %v1947_v50 = vld [vmem:[%s3221_s1 + $0xd4] sm:$0xf0]  ;;  %v1746_v53 = vld [vmem:[%s3221_s1 + $0x1c8] sm:$0xf]  ;;  %v1887_v55 = vor.u32 %v2012_v43, %v1884_v44 }
  0x1c   :  { %766 = vmatpush.bf16.msra.mxu0 %v1531_v16  ;;  %v1979_v54 = vld [vmem:[%s3221_s1 + $0x1d4] sm:$0xf0]  ;;  %v1759_v56 = vor.u32 %v1980_v45, %v1756_v48  ;;  %v1619_v57 = vor.u32 %v1947_v50, %v1618_v49  ;;  %v2008_v58 = vld [vmem:[%s3221_s1 + $0x2c4] sm:$0xf]  ;;  %v1868_v59 = vld [vmem:[%s3221_s1 + $0x2d0] sm:$0xf0] }
  0x1d   :  { %815 = vmatpush.bf16.msra.mxu1 %v1659_v20  ;;  %913 = vmatpush.bf16.msra.mxu3 %v1535_v25  ;;  %v1747_v60 = vor.u32 %v1979_v54, %v1746_v53  ;;  %v1976_v61 = vld [vmem:[%s3221_s1 + $0x1c4] sm:$0xf]  ;;  %v1740_v62 = vld [vmem:[%s3221_s1 + $0x1d0] sm:$0xf0]  ;;  %v1871_v63 = vor.u32 %v2008_v58, %v1868_v59  ;;  %v1602_v0 = vld [vmem:[%s3221_s1 + $0xa8] sm:$0xf] }
  0x1e   :  { %864 = vmatpush.bf16.msra.mxu2 %v1787_v21  ;;  %v1943_v1 = vld [vmem:[%s3221_s1 + $0xb4] sm:$0xf0]  ;;  %v1730_v2 = vld [vmem:[%s3221_s1 + $0x1a8] sm:$0xf]  ;;  %v1743_v3 = vor.u32 %v1976_v61, %v1740_v62  ;;  %v2004_v6 = vld [vmem:[%s3221_s1 + $0x2a4] sm:$0xf] }
  0x1f   :  { %v1603_v4 = vor.u32 %v1943_v1, %v1602_v0  ;;  %v1975_v5 = vld [vmem:[%s3221_s1 + $0x1b4] sm:$0xf0]  ;;  %v1852_v7 = vld [vmem:[%s3221_s1 + $0x2b0] sm:$0xf0]  ;;  %v1972_v9 = vld [vmem:[%s3221_s1 + $0x1a4] sm:$0xf] }
  0x20   :  { %767 = vmatpush.bf16.msra.mxu0 %v1515_v32  ;;  %v1731_v8 = vor.u32 %v1975_v5, %v1730_v2  ;;  %v1724_v10 = vld [vmem:[%s3221_s1 + $0x1b0] sm:$0xf0]  ;;  %v1855_v11 = vor.u32 %v2004_v6, %v1852_v7  ;;  %v1430_v13 = vld [vmem:[%s3222_s0 + $0x18] sm:$0xf]  ;;  %v1900_v14 = vld [vmem:[%s3222_s0 + $0x20] sm:$0xf0] }
  0x21   :  { %816 = vmatpush.bf16.msra.mxu1 %v1643_v36  ;;  %914 = vmatpush.bf16.msra.mxu3 %v1519_v41  ;;  %v1727_v12 = vor.u32 %v1972_v9, %v1724_v10  ;;  %v1899_v15 = vld [vmem:[%s3222_s0 + $0x1c] sm:$0xf]  ;;  %v1432_v16 = vld [vmem:[%s3222_s0 + $0x24] sm:$0xf0]  ;;  %v1438_v17 = vld [vmem:[%s3222_s0 + $0x20] sm:$0xf]  ;;  %v2346_v19 = vor.u32 %v1900_v14, %v1430_v13 }
  0x22   :  { %865 = vmatpush.bf16.msra.mxu2 %v1771_v37  ;;  %v1901_v18 = vld [vmem:[%s3222_s0 + $0x28] sm:$0xf0]  ;;  %v2348_v20 = vor.u32 %v1899_v15, %v1432_v16  ;;  %v1586_v22 = vld [vmem:[%s3221_s1 + $0x88] sm:$0xf]  ;;  %v1939_v23 = vld [vmem:[%s3221_s1 + $0x94] sm:$0xf0] }
  0x23   :  { %768 = vmatmul.bf16.vlgmr.msra.gmra.mxu0 %v2267_v46  ;;  %v2350_v21 = vor.u32 %v1901_v18, %v1438_v17  ;;  %v1714_v24 = vld [vmem:[%s3221_s1 + $0x188] sm:$0xf]  ;;  %v1587_v25 = vor.u32 %v1939_v23, %v1586_v22  ;;  %v1971_v26 = vld [vmem:[%s3221_s1 + $0x194] sm:$0xf0]  ;;  %v2000_v27 = vld [vmem:[%s3221_s1 + $0x284] sm:$0xf] }
  0x24   :  { %817 = vmatmul.bf16.vlgmr.msra.gmra.mxu1 %v2278_v51  ;;  %915 = vmatmul.bf16.vlgmr.msra.gmra.mxu3 %v2267_v46  ;;  %v1836_v28 = vld [vmem:[%s3221_s1 + $0x290] sm:$0xf0]  ;;  %v1715_v29 = vor.u32 %v1971_v26, %v1714_v24  ;;  %v1968_v31 = vld [vmem:[%s3221_s1 + $0x184] sm:$0xf]  ;;  %v1442_v34 = vld [vmem:[%s3222_s0 + $0x30] sm:$0xf] }
  0x25   :  { %1103 = vmatpush.bf16.msrb.mxu3 %v1763_v47  ;;  %866 = vmatmul.bf16.vlgmr.msra.gmra.mxu2 %v2280_v52  ;;  %v1839_v30 = vor.u32 %v2000_v27, %v1836_v28  ;;  %v1708_v32 = vld [vmem:[%s3221_s1 + $0x190] sm:$0xf0]  ;;  %v1903_v35 = vld [vmem:[%s3222_s0 + $0x38] sm:$0xf0]  ;;  %v1444_v37 = vld [vmem:[%s3222_s0 + $0x3c] sm:$0xf0] }
  0x26   :  { %1054 = vmatpush.bf16.msrb.mxu2 %v1635_v42  ;;  %1005 = vmatpush.bf16.msrb.mxu1 %v1887_v55  ;;  %v1711_v33 = vor.u32 %v1968_v31, %v1708_v32  ;;  %v1902_v36 = vld [vmem:[%s3222_s0 + $0x34] sm:$0xf]  ;;  %v1450_v38 = vld [vmem:[%s3222_s0 + $0x38] sm:$0xf]  ;;  %v1904_v39 = vld [vmem:[%s3222_s0 + $0x40] sm:$0xf0]  ;;  %v2398_v40 = vor.u32 %v1903_v35, %v1442_v34 }
  0x27   :  { %956 = vmatpush.bf16.msrb.mxu0 %v1759_v56  ;;  %v2400_v41 = vor.u32 %v1902_v36, %v1444_v37  ;;  %v2402_v42 = vor.u32 %v1904_v39, %v1450_v38  ;;  %v1570_v43 = vld [vmem:[%s3221_s1 + $0x68] sm:$0xf]  ;;  %v1935_v44 = vld [vmem:[%s3221_s1 + $0x74] sm:$0xf0]  ;;  %v1996_v49 = vld [vmem:[%s3221_s1 + $0x264] sm:$0xf] }
  0x28   :  { %v1698_v45 = vld [vmem:[%s3221_s1 + $0x168] sm:$0xf]  ;;  %v1571_v47 = vor.u32 %v1935_v44, %v1570_v43  ;;  %v1967_v48 = vld [vmem:[%s3221_s1 + $0x174] sm:$0xf0]  ;;  %v1820_v50 = vld [vmem:[%s3221_s1 + $0x270] sm:$0xf0] }
  0x29   :  { %1104 = vmatpush.bf16.msrb.mxu3 %v1747_v60  ;;  %v1699_v53 = vor.u32 %v1967_v48, %v1698_v45  ;;  %v1823_v54 = vor.u32 %v1996_v49, %v1820_v50  ;;  %v1964_v55 = vld [vmem:[%s3221_s1 + $0x164] sm:$0xf]  ;;  %v1692_v56 = vld [vmem:[%s3221_s1 + $0x170] sm:$0xf0]  ;;  %v1454_v58 = vld [vmem:[%s3222_s0 + $0x48] sm:$0xf] }
  0x2a   :  { %1055 = vmatpush.bf16.msrb.mxu2 %v1619_v57  ;;  %1006 = vmatpush.bf16.msrb.mxu1 %v1871_v63  ;;  %v1695_v57 = vor.u32 %v1964_v55, %v1692_v56  ;;  %v1906_v59 = vld [vmem:[%s3222_s0 + $0x50] sm:$0xf0]  ;;  %v1905_v60 = vld [vmem:[%s3222_s0 + $0x4c] sm:$0xf]  ;;  %v1456_v61 = vld [vmem:[%s3222_s0 + $0x54] sm:$0xf0] }
  0x2b   :  { %957 = vmatpush.bf16.msrb.mxu0 %v1743_v3  ;;  %v1462_v62 = vld [vmem:[%s3222_s0 + $0x50] sm:$0xf]  ;;  %v1907_v63 = vld [vmem:[%s3222_s0 + $0x58] sm:$0xf0]  ;;  %v2450_v0 = vor.u32 %v1906_v59, %v1454_v58  ;;  %v2452_v1 = vor.u32 %v1905_v60, %v1456_v61  ;;  %v1554_v3 = vld [vmem:[%s3221_s1 + $0x48] sm:$0xf] }
  0x2c   :  { %v2454_v2 = vor.u32 %v1907_v63, %v1462_v62  ;;  %v1682_v5 = vld [vmem:[%s3221_s1 + $0x148] sm:$0xf]  ;;  %v1963_v7 = vld [vmem:[%s3221_s1 + $0x154] sm:$0xf0]  ;;  %v1804_v9 = vld [vmem:[%s3221_s1 + $0x250] sm:$0xf0] }
  0x2d   :  { %1105 = vmatpush.bf16.msrb.mxu3 %v1731_v8  ;;  %v1992_v8 = vld [vmem:[%s3221_s1 + $0x244] sm:$0xf]  ;;  %v1683_v10 = vor.u32 %v1963_v7, %v1682_v5  ;;  %v1676_v13 = vld [vmem:[%s3221_s1 + $0x150] sm:$0xf0]  ;;  %v1466_v15 = vld [vmem:[%s3222_s0 + $0x60] sm:$0xf] }
  0x2e   :  { %1056 = vmatpush.bf16.msrb.mxu2 %v1603_v4  ;;  %1007 = vmatpush.bf16.msrb.mxu1 %v1855_v11  ;;  %v1931_v4 = vld [vmem:[%s3221_s1 + $0x54] sm:$0xf0]  ;;  %v1807_v11 = vor.u32 %v1992_v8, %v1804_v9  ;;  %v1909_v16 = vld [vmem:[%s3222_s0 + $0x68] sm:$0xf0]  ;;  %v1908_v17 = vld [vmem:[%s3222_s0 + $0x64] sm:$0xf] }
  0x2f   :  { %958 = vmatpush.bf16.msrb.mxu0 %v1727_v12  ;;  %v1555_v6 = vor.u32 %v1931_v4, %v1554_v3  ;;  %v1960_v12 = vld [vmem:[%s3221_s1 + $0x144] sm:$0xf]  ;;  %v1468_v18 = vld [vmem:[%s3222_s0 + $0x6c] sm:$0xf0]  ;;  %v1474_v22 = vld [vmem:[%s3222_s0 + $0x68] sm:$0xf]  ;;  %v2502_v24 = vor.u32 %v1909_v16, %v1466_v15 }
  0x30   :  { %v1679_v14 = vor.u32 %v1960_v12, %v1676_v13  ;;  %v1910_v23 = vld [vmem:[%s3222_s0 + $0x70] sm:$0xf0]  ;;  %v1538_v27 = vld [vmem:[%s3221_s1 + $0x28] sm:$0xf]  ;;  %v1927_v28 = vld [vmem:[%s3221_s1 + $0x34] sm:$0xf0] }
  0x31   :  { %1106 = vmatpush.bf16.msrb.mxu3 %v1715_v29  ;;  %v2506_v26 = vor.u32 %v1910_v23, %v1474_v22  ;;  %v1666_v29 = vld [vmem:[%s3221_s1 + $0x128] sm:$0xf]  ;;  %v1959_v31 = vld [vmem:[%s3221_s1 + $0x134] sm:$0xf0]  ;;  %v1988_v32 = vld [vmem:[%s3221_s1 + $0x224] sm:$0xf] }
  0x32   :  { %1057 = vmatpush.bf16.msrb.mxu2 %v1587_v25  ;;  %1008 = vmatpush.bf16.msrb.mxu1 %v1839_v30  ;;  %v2504_v25 = vor.u32 %v1908_v17, %v1468_v18  ;;  %v1539_v30 = vor.u32 %v1927_v28, %v1538_v27  ;;  %v1667_v34 = vor.u32 %v1959_v31, %v1666_v29  ;;  %v1956_v36 = vld [vmem:[%s3221_s1 + $0x124] sm:$0xf]  ;;  %v1660_v37 = vld [vmem:[%s3221_s1 + $0x130] sm:$0xf0]  ;;  %v1478_v39 = vld [vmem:[%s3222_s0 + $0x78] sm:$0xf] }
  0x33   :  { %773 = vmatmul.bf16.gmra.mxu0 %v2346_v19  ;;  %v1663_v38 = vor.u32 %v1956_v36, %v1660_v37  ;;  %v1912_v43 = vld [vmem:[%s3222_s0 + $0x80] sm:$0xf0]  ;;  %v1911_v44 = vld [vmem:[%s3222_s0 + $0x7c] sm:$0xf]  ;;  %v1480_v45 = vld [vmem:[%s3222_s0 + $0x84] sm:$0xf0] }
  0x34   :  { %822 = vmatmul.bf16.gmra.mxu1 %v2348_v20  ;;  %920 = vmatmul.bf16.gmra.mxu3 %v2346_v19  ;;  %v1913_v48 = vld [vmem:[%s3222_s0 + $0x88] sm:$0xf0]  ;;  %v2554_v49 = vor.u32 %v1912_v43, %v1478_v39  ;;  %v2556_v50 = vor.u32 %v1911_v44, %v1480_v45  ;;  %v1923_v55 = vld [vmem:[%s3221_s1 + $0x14] sm:$0xf0]  ;;  %v1650_v56 = vld [vmem:[%s3221_s1 + $0x108] sm:$0xf] }
  0x35   :  { %871 = vmatmul.bf16.gmra.mxu2 %v2350_v21  ;;  %959 = vmatpush.bf16.msrb.mxu0 %v1711_v33  ;;  %v1788_v33 = vld [vmem:[%s3221_s1 + $0x230] sm:$0xf0]  ;;  %v1955_v58 = vld [vmem:[%s3221_s1 + $0x114] sm:$0xf0]  ;;  %v1984_v59 = vld [vmem:[%s3221_s1 + $0x204] sm:$0xf] }
  0x36   :  { %1058 = vmatpush.bf16.msrb.mxu2 %v1571_v47  ;;  %1107 = vmatpush.bf16.msrb.mxu3 %v1699_v53  ;;  %v1791_v35 = vor.u32 %v1988_v32, %v1788_v33  ;;  %v1486_v47 = vld [vmem:[%s3222_s0 + $0x80] sm:$0xf]  ;;  %v1772_v60 = vld [vmem:[%s3221_s1 + $0x210] sm:$0xf0]  ;;  %v1651_v61 = vor.u32 %v1955_v58, %v1650_v56  ;;  %v1952_v63 = vld [vmem:[%s3221_s1 + $0x104] sm:$0xf] }
  0x37   :  { %1009 = vmatpush.bf16.msrb.mxu1 %v1823_v54  ;;  %v2558_v53 = vor.u32 %v1913_v48, %v1486_v47  ;;  %v1522_v54 = vld [vmem:[%s3221_s1 + $0x8] sm:$0xf]  ;;  %v1775_v62 = vor.u32 %v1984_v59, %v1772_v60  ;;  %v1644_v3 = vld [vmem:[%s3221_s1 + $0x110] sm:$0xf0]  ;;  %v1490_v5 = vld [vmem:[%s3222_s0 + $0x90] sm:$0xf] }
  0x38   :  { %v1647_v4 = vor.u32 %v1952_v63, %v1644_v3  ;;  %v1914_v7 = vld [vmem:[%s3222_s0 + $0x94] sm:$0xf]  ;;  %v1492_v8 = vld [vmem:[%s3222_s0 + $0x9c] sm:$0xf0]  ;;  %v1498_v9 = vld [vmem:[%s3222_s0 + $0x98] sm:$0xf] }
  0x39   :  { %960 = vmatpush.bf16.msrb.mxu0 %v1695_v57  ;;  %v1523_v57 = vor.u32 %v1923_v55, %v1522_v54  ;;  %v2608_v12 = vor.u32 %v1914_v7, %v1492_v8  ;;  %v1764_v15 = vld [vmem:[%s3221_s1 + $0x1f8] sm:$0xf0]  ;;  %v2013_v16 = vld [vmem:[%s3221_s1 + $0x2ec] sm:$0xf]  ;;  %v1890_v29 = vld [vmem:[%s3221_s1 + $0x2e8] sm:$0xf] }
  0x3a   :  { %1059 = vmatpush.bf16.msrb.mxu2 %v1555_v6  ;;  %1108 = vmatpush.bf16.msrb.mxu3 %v1683_v10  ;;  %v1915_v6 = vld [vmem:[%s3222_s0 + $0x98] sm:$0xf0]  ;;  %v1916_v10 = vld [vmem:[%s3222_s0 + $0xa0] sm:$0xf0]  ;;  %v1949_v23 = vld [vmem:[%s3221_s1 + $0xec] sm:$0xf] }
  0x3b   :  { %1010 = vmatpush.bf16.msrb.mxu1 %v1807_v11  ;;  %v2606_v11 = vor.u32 %v1915_v6, %v1490_v5  ;;  %3230 = vst [vmem:[#allocation2_spill] sm:$0xff] %v2608_v12  ;;  %v2610_v13 = vor.u32 %v1916_v10, %v1498_v9  ;;  %v1892_v18 = vld [vmem:[%s3221_s1 + $0x2f8] sm:$0xf0]  ;;  %v1502_v31 = vld [vmem:[%s3222_s0 + $0xa8] sm:$0xf] }
  0x3c   :  { %v1895_v22 = vor.u32 %v2013_v16, %v1892_v18  ;;  %v1636_v27 = vld [vmem:[%s3221_s1 + $0xf8] sm:$0xf0]  ;;  %v1918_v32 = vld [vmem:[%s3222_s0 + $0xb0] sm:$0xf0]  ;;  %v1917_v33 = vld [vmem:[%s3222_s0 + $0xac] sm:$0xf] }
  0x3d   :  { %961 = vmatpush.bf16.msrb.mxu0 %v1679_v14  ;;  %v1981_v14 = vld [vmem:[%s3221_s1 + $0x1ec] sm:$0xf]  ;;  %v1639_v28 = vor.u32 %v1949_v23, %v1636_v27  ;;  %v1510_v36 = vld [vmem:[%s3222_s0 + $0xb0] sm:$0xf]  ;;  %v1919_v37 = vld [vmem:[%s3222_s0 + $0xb8] sm:$0xf0] }
  0x3e   :  { %1060 = vmatpush.bf16.msrb.mxu2 %v1539_v30  ;;  %1109 = vmatpush.bf16.msrb.mxu3 %v1667_v34  ;;  %v1767_v17 = vor.u32 %v1981_v14, %v1764_v15  ;;  %v2015_v30 = vld [vmem:[%s3221_s1 + $0x2f4] sm:$0xf0]  ;;  %v2662_v43 = vor.u32 %v1919_v37, %v1510_v36  ;;  %v1977_v44 = vld [vmem:[%s3221_s1 + $0x1cc] sm:$0xf]  ;;  %v1748_v45 = vld [vmem:[%s3221_s1 + $0x1d8] sm:$0xf0] }
  0x3f   :  { %1011 = vmatpush.bf16.msrb.mxu1 %v1791_v35  ;;  %v1891_v34 = vor.u32 %v2015_v30, %v1890_v29  ;;  %v1504_v35 = vld [vmem:[%s3222_s0 + $0xb4] sm:$0xf0]  ;;  %v2009_v47 = vld [vmem:[%s3221_s1 + $0x2cc] sm:$0xf]  ;;  %v1751_v48 = vor.u32 %v1977_v44, %v1748_v45  ;;  %v1876_v54 = vld [vmem:[%s3221_s1 + $0x2d8] sm:$0xf0] }
  0x40   :  { %v2660_v39 = vor.u32 %v1917_v33, %v1504_v35  ;;  %3233 = vst [vmem:[#allocation5_spill] sm:$0xff] %v2662_v43  ;;  %v1879_v55 = vor.u32 %v2009_v47, %v1876_v54  ;;  %v1945_v56 = vld [vmem:[%s3221_s1 + $0xcc] sm:$0xf]  ;;  %v2689_v58 = vld [vmem:[%s3223_s2] sm:$0xf] }
  0x41   :  { %962 = vmatpush.bf16.msrb.mxu0 %v1663_v38  ;;  %v2658_v38 = vor.u32 %v1918_v32, %v1502_v31  ;;  %v1874_v60 = vld [vmem:[%s3221_s1 + $0x2c8] sm:$0xf]  ;;  %v2698_v63 = vperm.slane %v2689_v58, 0  ;;  %v1973_v7 = vld [vmem:[%s3221_s1 + $0x1ac] sm:$0xf] }
  0x42   :  { %1061 = vmatpush.bf16.msrb.mxu2 %v1523_v57  ;;  %1110 = vmatpush.bf16.msrb.mxu3 %v1651_v61  ;;  %3232 = vst [vmem:[#allocation4_spill] sm:$0xff] %v2660_v39  ;;  %v1620_v57 = vld [vmem:[%s3221_s1 + $0xd8] sm:$0xf0]  ;;  %v2011_v61 = vld [vmem:[%s3221_s1 + $0x2d4] sm:$0xf0] }
  0x43   :  { %778 = vmatmul.bf16.gmra.mxu0 %v2398_v40  ;;  %1012 = vmatpush.bf16.msrb.mxu1 %v1775_v62  ;;  %3231 = vst [vmem:[#allocation3_spill] sm:$0xff] %v2658_v38  ;;  %v1623_v59 = vor.u32 %v1945_v56, %v1620_v57  ;;  %v1875_v62 = vor.u32 %v2011_v61, %v1874_v60  ;;  %v1732_v8 = vld [vmem:[%s3221_s1 + $0x1b8] sm:$0xf0]  ;;  %v2005_v9 = vld [vmem:[%s3221_s1 + $0x2ac] sm:$0xf] }
  0x44   :  { %827 = vmatmul.bf16.gmra.mxu1 %v2400_v41  ;;  %925 = vmatmul.bf16.gmra.mxu3 %v2398_v40  ;;  %v1735_v10 = vor.u32 %v1973_v7, %v1732_v8  ;;  %v1860_v14 = vld [vmem:[%s3221_s1 + $0x2b8] sm:$0xf0]  ;;  %v1858_v32 = vld [vmem:[%s3221_s1 + $0x2a8] sm:$0xf]  ;;  %v2007_v33 = vld [vmem:[%s3221_s1 + $0x2b4] sm:$0xf0] }
  0x45   :  { %876 = vmatmul.bf16.gmra.mxu2 %v2402_v42  ;;  %963 = vmatpush.bf16.msrb.mxu0 %v1647_v4  ;;  %v1863_v16 = vor.u32 %v2005_v9, %v1860_v14  ;;  %v1604_v29 = vld [vmem:[%s3221_s1 + $0xb8] sm:$0xf0]  ;;  %v1969_v54 = vld [vmem:[%s3221_s1 + $0x18c] sm:$0xf]  ;;  %v1842_v14 = vld [vmem:[%s3221_s1 + $0x288] sm:$0xf] }
  0x46   :  { %1250 = vmatpush.bf16.msra.mxu2 %v1767_v17  ;;  %1299 = vmatpush.bf16.msra.mxu3 %v1895_v22  ;;  %v2001_v56 = vld [vmem:[%s3221_s1 + $0x28c] sm:$0xf]  ;;  %v1588_v8 = vld [vmem:[%s3221_s1 + $0x98] sm:$0xf0] }
  0x47   :  { %1201 = vmatpush.bf16.msra.mxu1 %v1639_v28  ;;  %v1941_v28 = vld [vmem:[%s3221_s1 + $0xac] sm:$0xf] }
  0x48   :  { %v1607_v30 = vor.u32 %v1941_v28, %v1604_v29  ;;  %v1937_v7 = vld [vmem:[%s3221_s1 + $0x8c] sm:$0xf] }
  0x49   :  { %1152 = vmatpush.bf16.msra.mxu0 %v1891_v34  ;;  %v1859_v34 = vor.u32 %v2007_v33, %v1858_v32  ;;  %v1591_v9 = vor.u32 %v1937_v7, %v1588_v8  ;;  %v1965_v32 = vld [vmem:[%s3221_s1 + $0x16c] sm:$0xf]  ;;  %v1700_v33 = vld [vmem:[%s3221_s1 + $0x178] sm:$0xf0] }
  0x4a   :  { %1251 = vmatpush.bf16.msra.mxu2 %v1751_v48  ;;  %1300 = vmatpush.bf16.msra.mxu3 %v1879_v55  ;;  %v1716_v55 = vld [vmem:[%s3221_s1 + $0x198] sm:$0xf0] }
  0x4b   :  { %1202 = vmatpush.bf16.msra.mxu1 %v1623_v59  ;;  %v1719_v57 = vor.u32 %v1969_v54, %v1716_v55  ;;  %v1844_v59 = vld [vmem:[%s3221_s1 + $0x298] sm:$0xf0] }
  0x4c   :  { %v1847_v61 = vor.u32 %v2001_v56, %v1844_v59  ;;  %v1933_v59 = vld [vmem:[%s3221_s1 + $0x6c] sm:$0xf] }
  0x4d   :  { %1153 = vmatpush.bf16.msra.mxu0 %v1875_v62 }
  0x4e   :  { %1252 = vmatpush.bf16.msra.mxu2 %v1735_v10  ;;  %1301 = vmatpush.bf16.msra.mxu3 %v1863_v16 }
  0x4f   :  { %1203 = vmatpush.bf16.msra.mxu1 %v1607_v30 }
  0x51   :  { %1154 = vmatpush.bf16.msra.mxu0 %v1859_v34  ;;  %v1997_v34 = vld [vmem:[%s3221_s1 + $0x26c] sm:$0xf] }
  0x52   :  { %1253 = vmatpush.bf16.msra.mxu2 %v1719_v57  ;;  %1302 = vmatpush.bf16.msra.mxu3 %v1847_v61 }
  0x53   :  { %783 = vmatmul.bf16.gmra.mxu0 %v2450_v0  ;;  %1204 = vmatpush.bf16.msra.mxu1 %v1591_v9 }
  0x54   :  { %832 = vmatmul.bf16.gmra.mxu1 %v2452_v1  ;;  %930 = vmatmul.bf16.gmra.mxu3 %v2450_v0 }
  0x55   :  { %881 = vmatmul.bf16.gmra.mxu2 %v2454_v2 }
  0x63   :  { %788 = vmatmul.bf16.gmra.mxu0 %v2502_v24 }
  0x64   :  { %837 = vmatmul.bf16.gmra.mxu1 %v2504_v25  ;;  %935 = vmatmul.bf16.gmra.mxu3 %v2502_v24 }
  0x65   :  { %886 = vmatmul.bf16.gmra.mxu2 %v2506_v26 }
  0x73   :  { %793 = vmatmul.bf16.gmra.mxu0 %v2554_v49 }
  0x74   :  { %842 = vmatmul.bf16.gmra.mxu1 %v2556_v50  ;;  %940 = vmatmul.bf16.gmra.mxu3 %v2554_v49 }
  0x75   :  { %891 = vmatmul.bf16.gmra.mxu2 %v2558_v53 }
  0x83   :  { %798 = vmatmul.bf16.gmra.mxu0 %v2606_v11 }
  0x84   :  { %847 = vmatmul.bf16.gmra.mxu1 %v2608_v12  ;;  %945 = vmatmul.bf16.gmra.mxu3 %v2606_v11 }
  0x85   :  { %896 = vmatmul.bf16.gmra.mxu2 %v2610_v13 }
  0x93   :  { %803 = vmatmul.bf16.gmra.mxu0 %v2658_v38 }
  0x94   :  { %852 = vmatmul.bf16.gmra.mxu1 %v2660_v39  ;;  %950 = vmatmul.bf16.gmra.mxu3 %v2658_v38 }
  0x95   :  { %901 = vmatmul.bf16.gmra.mxu2 %v2662_v43 }
  0xa0   :  { %v769_v3 = vpop.f32.mrf.mxu0 }
  0xa1   :  { %v770_v4 = vadd.f32 %v769_v3, %v2698_v63  ;;  %v818_v5 = vpop.f32.mrf.mxu1 }
  0xa3   :  { %v819_v6 = vadd.f32 %v818_v5, %v770_v4  ;;  %964 = vmatmul.bf16.vlgmr.msrb.gmra.mxu0 %v2278_v51 }
  0xa4   :  { %1013 = vmatmul.bf16.vlgmr.msrb.gmra.mxu1 %v2280_v52  ;;  %1111 = vmatmul.bf16.vlgmr.msrb.gmra.mxu3 %v2278_v51 }
  0xa5   :  { %1062 = vmatmul.bf16.vlgmr.msrb.gmra.mxu2 %v2267_v46 }
  0xa7   :  { %v2719_v18 = vpop.f32.mrf.mxu3 }
  0xa8   :  { %v867_v15 = vpop.f32.mrf.mxu2  ;;  %v771_v22 = vpop.f32.mrf.mxu0 }
  0xa9   :  { %v2717_v17 = vadd.f32 %v867_v15, %v819_v6  ;;  %v772_v23 = vadd.f32 %v771_v22, %v2698_v63  ;;  %v820_v27 = vpop.f32.mrf.mxu1  ;;  %v2003_v15 = vld [vmem:[%s3221_s1 + $0x294] sm:$0xf0] }
  0xaa   :  { %v1843_v16 = vor.u32 %v2003_v15, %v1842_v14 }
  0xab   :  { %v821_v31 = vadd.f32 %v820_v27, %v772_v23 }
  0xac   :  { %1155 = vmatpush.bf16.msra.mxu0 %v1843_v16 }
  0xaf   :  { %v2736_v37 = vpop.f32.mrf.mxu3 }
  0xb0   :  { %v869_v35 = vpop.f32.mrf.mxu2  ;;  %v774_v44 = vpop.f32.mrf.mxu0 }
  0xb1   :  { %v2734_v36 = vadd.f32 %v869_v35, %v821_v31  ;;  %v775_v45 = vadd.f32 %v774_v44, %v2698_v63  ;;  %v823_v47 = vpop.f32.mrf.mxu1  ;;  %v1703_v35 = vor.u32 %v1965_v32, %v1700_v33  ;;  %v1828_v44 = vld [vmem:[%s3221_s1 + $0x278] sm:$0xf0] }
  0xb2   :  { %v1812_v32 = vld [vmem:[%s3221_s1 + $0x258] sm:$0xf0] }
  0xb3   :  { %v824_v48 = vadd.f32 %v823_v47, %v775_v45  ;;  %969 = vmatmul.bf16.gmra.mxu0 %v2348_v20  ;;  %v1831_v47 = vor.u32 %v1997_v34, %v1828_v44  ;;  %1254 = vmatpush.bf16.msra.mxu2 %v1703_v35 }
  0xb4   :  { %1018 = vmatmul.bf16.gmra.mxu1 %v2350_v21  ;;  %1116 = vmatmul.bf16.gmra.mxu3 %v2348_v20 }
  0xb5   :  { %1067 = vmatmul.bf16.gmra.mxu2 %v2346_v19  ;;  %1303 = vmatpush.bf16.msra.mxu3 %v1831_v47 }
  0xb7   :  { %v2757_v3 = vpop.f32.mrf.mxu3 }
  0xb8   :  { %v872_v60 = vpop.f32.mrf.mxu2  ;;  %v776_v4 = vpop.f32.mrf.mxu0 }
  0xb9   :  { %v2755_v62 = vadd.f32 %v872_v60, %v824_v48  ;;  %v777_v5 = vadd.f32 %v776_v4, %v2698_v63  ;;  %v825_v6 = vpop.f32.mrf.mxu1  ;;  %v1572_v60 = vld [vmem:[%s3221_s1 + $0x78] sm:$0xf0] }
  0xba   :  { %v1575_v61 = vor.u32 %v1933_v59, %v1572_v60 }
  0xbb   :  { %v826_v10 = vadd.f32 %v825_v6, %v777_v5  ;;  %v1826_v5 = vld [vmem:[%s3221_s1 + $0x268] sm:$0xf]  ;;  %v1999_v6 = vld [vmem:[%s3221_s1 + $0x274] sm:$0xf0] }
  0xbc   :  { %1205 = vmatpush.bf16.msra.mxu1 %v1575_v61  ;;  %v1827_v7 = vor.u32 %v1999_v6, %v1826_v5  ;;  %v1810_v61 = vld [vmem:[%s3221_s1 + $0x248] sm:$0xf] }
  0xbe   :  { %1156 = vmatpush.bf16.msra.mxu0 %v1827_v7 }
  0xbf   :  { %v2774_v27 = vpop.f32.mrf.mxu3 }
  0xc0   :  { %v874_v22 = vpop.f32.mrf.mxu2  ;;  %v779_v28 = vpop.f32.mrf.mxu0 }
  0xc1   :  { %v2772_v23 = vadd.f32 %v874_v22, %v826_v10  ;;  %v780_v29 = vadd.f32 %v779_v28, %v2698_v63  ;;  %v828_v30 = vpop.f32.mrf.mxu1  ;;  %v1961_v28 = vld [vmem:[%s3221_s1 + $0x14c] sm:$0xf] }
  0xc3   :  { %v829_v31 = vadd.f32 %v828_v30, %v780_v29  ;;  %974 = vmatmul.bf16.gmra.mxu0 %v2400_v41  ;;  %v1684_v29 = vld [vmem:[%s3221_s1 + $0x158] sm:$0xf0]  ;;  %v1993_v30 = vld [vmem:[%s3221_s1 + $0x24c] sm:$0xf] }
  0xc4   :  { %1023 = vmatmul.bf16.gmra.mxu1 %v2402_v42  ;;  %1121 = vmatmul.bf16.gmra.mxu3 %v2400_v41  ;;  %v1815_v34 = vor.u32 %v1993_v30, %v1812_v32  ;;  %v1989_v30 = vld [vmem:[%s3221_s1 + $0x22c] sm:$0xf]  ;;  %v1796_v32 = vld [vmem:[%s3221_s1 + $0x238] sm:$0xf0] }
  0xc5   :  { %1072 = vmatmul.bf16.gmra.mxu2 %v2398_v40 }
  0xc6   :  { %1304 = vmatpush.bf16.msra.mxu3 %v1815_v34  ;;  %v1799_v34 = vor.u32 %v1989_v30, %v1796_v32  ;;  %v1953_v32 = vld [vmem:[%s3221_s1 + $0x10c] sm:$0xf] }
  0xc7   :  { %v2795_v54 = vpop.f32.mrf.mxu3 }
  0xc8   :  { %v877_v45 = vpop.f32.mrf.mxu2  ;;  %v781_v55 = vpop.f32.mrf.mxu0 }
  0xc9   :  { %v2793_v48 = vadd.f32 %v877_v45, %v829_v31  ;;  %v782_v56 = vadd.f32 %v781_v55, %v2698_v63  ;;  %v830_v57 = vpop.f32.mrf.mxu1  ;;  %v1687_v31 = vor.u32 %v1961_v28, %v1684_v29  ;;  %v1957_v28 = vld [vmem:[%s3221_s1 + $0x12c] sm:$0xf]  ;;  %v1668_v29 = vld [vmem:[%s3221_s1 + $0x138] sm:$0xf0] }
  0xca   :  { %1305 = vmatpush.bf16.msra.mxu3 %v1799_v34  ;;  %v1985_v34 = vld [vmem:[%s3221_s1 + $0x20c] sm:$0xf] }
  0xcb   :  { %v831_v4 = vadd.f32 %v830_v57, %v782_v56  ;;  %1255 = vmatpush.bf16.msra.mxu2 %v1687_v31  ;;  %v1929_v56 = vld [vmem:[%s3221_s1 + $0x4c] sm:$0xf]  ;;  %v1556_v57 = vld [vmem:[%s3221_s1 + $0x58] sm:$0xf0]  ;;  %v1671_v31 = vor.u32 %v1957_v28, %v1668_v29 }
  0xcc   :  { %v1559_v59 = vor.u32 %v1929_v56, %v1556_v57 }
  0xce   :  { %1206 = vmatpush.bf16.msra.mxu1 %v1559_v59  ;;  %v1925_v59 = vld [vmem:[%s3221_s1 + $0x2c] sm:$0xf] }
  0xcf   :  { %v2812_v10 = vpop.f32.mrf.mxu3  ;;  %1256 = vmatpush.bf16.msra.mxu2 %v1671_v31 }
  0xd0   :  { %v879_v8 = vpop.f32.mrf.mxu2  ;;  %v784_v14 = vpop.f32.mrf.mxu0 }
  0xd1   :  { %v2810_v9 = vadd.f32 %v879_v8, %v831_v4  ;;  %v785_v15 = vadd.f32 %v784_v14, %v2698_v63  ;;  %v833_v16 = vpop.f32.mrf.mxu1  ;;  %v1995_v4 = vld [vmem:[%s3221_s1 + $0x254] sm:$0xf0] }
  0xd2   :  { %v1811_v5 = vor.u32 %v1995_v4, %v1810_v61 }
  0xd3   :  { %v834_v22 = vadd.f32 %v833_v16, %v785_v15  ;;  %979 = vmatmul.bf16.gmra.mxu0 %v2452_v1 }
  0xd4   :  { %1028 = vmatmul.bf16.gmra.mxu1 %v2454_v2  ;;  %1126 = vmatmul.bf16.gmra.mxu3 %v2452_v1 }
  0xd5   :  { %1077 = vmatmul.bf16.gmra.mxu2 %v2450_v0  ;;  %1157 = vmatpush.bf16.msra.mxu0 %v1811_v5  ;;  %v1794_v5 = vld [vmem:[%s3221_s1 + $0x228] sm:$0xf] }
  0xd7   :  { %v2833_v44 = vpop.f32.mrf.mxu3 }
  0xd8   :  { %v882_v33 = vpop.f32.mrf.mxu2  ;;  %v786_v45 = vpop.f32.mrf.mxu0 }
  0xd9   :  { %v2831_v35 = vadd.f32 %v882_v33, %v834_v22  ;;  %v787_v47 = vadd.f32 %v786_v45, %v2698_v63  ;;  %v835_v55 = vpop.f32.mrf.mxu1 }
  0xdb   :  { %v836_v60 = vadd.f32 %v835_v55, %v787_v47 }
  0xdf   :  { %v2850_v8 = vpop.f32.mrf.mxu3 }
  0xe0   :  { %v884_v6 = vpop.f32.mrf.mxu2  ;;  %v789_v14 = vpop.f32.mrf.mxu0 }
  0xe1   :  { %v2848_v7 = vadd.f32 %v884_v6, %v836_v60  ;;  %v790_v15 = vadd.f32 %v789_v14, %v2698_v63  ;;  %v838_v16 = vpop.f32.mrf.mxu1  ;;  %v1540_v60 = vld [vmem:[%s3221_s1 + $0x38] sm:$0xf0]  ;;  %v1991_v6 = vld [vmem:[%s3221_s1 + $0x234] sm:$0xf0] }
  0xe2   :  { %v1543_v61 = vor.u32 %v1925_v59, %v1540_v60  ;;  %v1795_v14 = vor.u32 %v1991_v6, %v1794_v5 }
  0xe3   :  { %v839_v22 = vadd.f32 %v838_v16, %v790_v15  ;;  %984 = vmatmul.bf16.gmra.mxu0 %v2504_v25 }
  0xe4   :  { %1033 = vmatmul.bf16.gmra.mxu1 %v2506_v26  ;;  %1131 = vmatmul.bf16.gmra.mxu3 %v2504_v25 }
  0xe5   :  { %1082 = vmatmul.bf16.gmra.mxu2 %v2502_v24  ;;  %1207 = vmatpush.bf16.msra.mxu1 %v1543_v61 }
  0xe6   :  { %1158 = vmatpush.bf16.msra.mxu0 %v1795_v14  ;;  %v1921_v14 = vld [vmem:[%s3221_s1 + $0xc] sm:$0xf] }
  0xe7   :  { %v2871_v47 = vpop.f32.mrf.mxu3 }
  0xe8   :  { %v887_v33 = vpop.f32.mrf.mxu2  ;;  %v791_v55 = vpop.f32.mrf.mxu0 }
  0xe9   :  { %v2869_v45 = vadd.f32 %v887_v33, %v839_v22  ;;  %v792_v56 = vadd.f32 %v791_v55, %v2698_v63  ;;  %v840_v57 = vpop.f32.mrf.mxu1  ;;  %v1652_v33 = vld [vmem:[%s3221_s1 + $0x118] sm:$0xf0] }
  0xea   :  { %v1655_v55 = vor.u32 %v1953_v32, %v1652_v33 }
  0xeb   :  { %v841_v4 = vadd.f32 %v840_v57, %v792_v56  ;;  %v1780_v56 = vld [vmem:[%s3221_s1 + $0x218] sm:$0xf0] }
  0xec   :  { %v1783_v59 = vor.u32 %v1985_v34, %v1780_v56  ;;  %1257 = vmatpush.bf16.msra.mxu2 %v1655_v55 }
  0xee   :  { %1306 = vmatpush.bf16.msra.mxu3 %v1783_v59 }
  0xef   :  { %v2888_v22 = vpop.f32.mrf.mxu3 }
  0xf0   :  { %v889_v15 = vpop.f32.mrf.mxu2  ;;  %v794_v28 = vpop.f32.mrf.mxu0 }
  0xf1   :  { %v2886_v16 = vadd.f32 %v889_v15, %v841_v4  ;;  %v795_v29 = vadd.f32 %v794_v28, %v2698_v63  ;;  %v843_v30 = vpop.f32.mrf.mxu1  ;;  %v1524_v15 = vld [vmem:[%s3221_s1 + $0x18] sm:$0xf0] }
  0xf2   :  { %v1527_v28 = vor.u32 %v1921_v14, %v1524_v15 }
  0xf3   :  { %v844_v31 = vadd.f32 %v843_v30, %v795_v29  ;;  %989 = vmatmul.bf16.gmra.mxu0 %v2556_v50  ;;  %v1778_v30 = vld [vmem:[%s3221_s1 + $0x208] sm:$0xf] }
  0xf4   :  { %1038 = vmatmul.bf16.gmra.mxu1 %v2558_v53  ;;  %1136 = vmatmul.bf16.gmra.mxu3 %v2556_v50 }
  0xf5   :  { %1087 = vmatmul.bf16.gmra.mxu2 %v2554_v49  ;;  %1208 = vmatpush.bf16.msra.mxu1 %v1527_v28 }
  0xf7   :  { %v2909_v61 = vpop.f32.mrf.mxu3 }
  0xf8   :  { %v892_v57 = vpop.f32.mrf.mxu2  ;;  %v796_v4 = vpop.f32.mrf.mxu0 }
  0xf9   :  { %v2907_v60 = vadd.f32 %v892_v57, %v844_v31  ;;  %v797_v5 = vadd.f32 %v796_v4, %v2698_v63  ;;  %v845_v6 = vpop.f32.mrf.mxu1  ;;  %v1987_v31 = vld [vmem:[%s3221_s1 + $0x214] sm:$0xf0] }
  0xfa   :  { %v1779_v32 = vor.u32 %v1987_v31, %v1778_v30 }
  0xfb   :  { %v846_v29 = vadd.f32 %v845_v6, %v797_v5 }
  0xfc   :  { %1159 = vmatpush.bf16.msra.mxu0 %v1779_v32 }
  0xff   :  { %v2926_v55 = vpop.f32.mrf.mxu3 }
 0x100   :  { %v894_v33 = vpop.f32.mrf.mxu2  ;;  %v799_v56 = vpop.f32.mrf.mxu0 }
 0x101   :  { %v2924_v34 = vadd.f32 %v894_v33, %v846_v29  ;;  %v800_v57 = vadd.f32 %v799_v56, %v2698_v63  ;;  %v848_v59 = vpop.f32.mrf.mxu1 }
 0x103   :  { %v849_v4 = vadd.f32 %v848_v59, %v800_v57  ;;  %994 = vmatmul.bf16.gmra.mxu0 %v2608_v12 }
 0x104   :  { %1043 = vmatmul.bf16.gmra.mxu1 %v2610_v13  ;;  %1141 = vmatmul.bf16.gmra.mxu3 %v2608_v12 }
 0x105   :  { %1092 = vmatmul.bf16.gmra.mxu2 %v2606_v11 }
 0x107   :  { %v2935_v14 = vpop.f32.mrf.mxu3 }
 0x108   :  { %v897_v5 = vpop.f32.mrf.mxu2  ;;  %v801_v15 = vpop.f32.mrf.mxu0 }
 0x109   :  { %v2933_v6 = vadd.f32 %v897_v5, %v849_v4  ;;  %v802_v28 = vadd.f32 %v801_v15, %v2698_v63  ;;  %v850_v29 = vpop.f32.mrf.mxu1 }
 0x10b   :  { %v851_v30 = vadd.f32 %v850_v29, %v802_v28 }
 0x10f   :  { %v2940_v33 = vpop.f32.mrf.mxu3 }
 0x110   :  { %v899_v31 = vpop.f32.mrf.mxu2  ;;  %v804_v56 = vpop.f32.mrf.mxu0 }
 0x111   :  { %v2938_v32 = vadd.f32 %v899_v31, %v851_v30  ;;  %v805_v57 = vadd.f32 %v804_v56, %v2698_v63  ;;  %v853_v59 = vpop.f32.mrf.mxu1  ;;  %v2953_v31 = vperm.slane %v2689_v58, 1 }
 0x113   :  { %v854_v12 = vadd.f32 %v853_v59, %v805_v57  ;;  %999 = vmatmul.bf16.gmra.mxu0 %v2660_v39  ;;  %v917_v57 = vadd.f32 %v2719_v18, %v2953_v31 }
 0x114   :  { %1048 = vmatmul.bf16.gmra.mxu1 %v2662_v43  ;;  %1146 = vmatmul.bf16.gmra.mxu3 %v2660_v39 }
 0x115   :  { %1097 = vmatmul.bf16.gmra.mxu2 %v2658_v38 }
 0x117   :  { %v2949_v15 = vpop.f32.mrf.mxu3 }
 0x118   :  { %v902_v4 = vpop.f32.mrf.mxu2  ;;  %v806_v28 = vpop.f32.mrf.mxu0 }
 0x119   :  { %v2947_v5 = vadd.f32 %v902_v4, %v854_v12  ;;  %v807_v29 = vadd.f32 %v806_v28, %v2698_v63  ;;  %v855_v30 = vpop.f32.mrf.mxu1  ;;  %v2965_v63 = vperm.slane %v2689_v58, 2  ;;  %v919_v28 = vadd.f32 %v2736_v37, %v2953_v31 }
 0x11b   :  { %3234 = vst [vmem:[#allocation6_spill] sm:$0xff] %v2947_v5  ;;  %v856_v56 = vadd.f32 %v855_v30, %v807_v29 }
 0x11f   :  { %v2959_v39 = vpop.f32.mrf.mxu3 }
 0x120   :  { %v904_v59 = vpop.f32.mrf.mxu2  ;;  %v965_v12 = vpop.f32.mrf.mxu0 }
 0x121   :  { %v2957_v38 = vadd.f32 %v904_v59, %v856_v56  ;;  %v966_v4 = vadd.f32 %v965_v12, %v917_v57  ;;  %v1014_v5 = vpop.f32.mrf.mxu1 }
 0x123   :  { %v1015_v43 = vadd.f32 %v1014_v5, %v966_v4  ;;  %1160 = vmatmul.bf16.vlgmr.msra.gmra.mxu0 %v2280_v52 }
 0x124   :  { %1209 = vmatmul.bf16.vlgmr.msra.gmra.mxu1 %v2267_v46  ;;  %1307 = vmatmul.bf16.vlgmr.msra.gmra.mxu3 %v2280_v52  ;;  %v922_v52 = vadd.f32 %v2757_v3, %v2953_v31  ;;  %v924_v3 = vadd.f32 %v2774_v27, %v2953_v31 }
 0x125   :  { %1258 = vmatmul.bf16.vlgmr.msra.gmra.mxu2 %v2278_v51  ;;  %v1348_v18 = vpack.c.bf16 %v1015_v43, %v2717_v17 }
 0x127   :  { %1380 = vst [vmem:[%s3224_s3] sm:$0xff] %v1348_v18  ;;  %v1112_v46 = vpop.f32.mrf.mxu3 }
 0x128   :  { %v1063_v5 = vpop.f32.mrf.mxu2  ;;  %v967_v30 = vpop.f32.mrf.mxu0 }
 0x129   :  { %v1064_v29 = vadd.f32 %v1063_v5, %v2965_v63  ;;  %v968_v51 = vadd.f32 %v967_v30, %v919_v28  ;;  %v1016_v56 = vpop.f32.mrf.mxu1 }
 0x12b   :  { %v2975_v57 = vadd.f32 %v1112_v46, %v1064_v29  ;;  %v1017_v59 = vadd.f32 %v1016_v56, %v968_v51 }
 0x12d   :  { %v1350_v43 = vpack.c.bf16 %v1017_v59, %v2734_v36 }
 0x12f   :  { %1382 = vst [vmem:[%s3224_s3 + $0x10] sm:$0xff] %v1350_v43  ;;  %v1114_v12 = vpop.f32.mrf.mxu3 }
 0x130   :  { %v1065_v17 = vpop.f32.mrf.mxu2  ;;  %v970_v4 = vpop.f32.mrf.mxu0 }
 0x131   :  { %v1066_v37 = vadd.f32 %v1065_v17, %v2965_v63  ;;  %v971_v18 = vadd.f32 %v970_v4, %v922_v52  ;;  %v1019_v28 = vpop.f32.mrf.mxu1 }
 0x133   :  { %v2984_v5 = vadd.f32 %v1114_v12, %v1066_v37  ;;  %v1020_v29 = vadd.f32 %v1019_v28, %v971_v18  ;;  %1165 = vmatmul.bf16.gmra.mxu0 %v2350_v21 }
 0x134   :  { %1214 = vmatmul.bf16.gmra.mxu1 %v2346_v19  ;;  %1312 = vmatmul.bf16.gmra.mxu3 %v2350_v21  ;;  %v927_v21 = vadd.f32 %v2795_v54, %v2953_v31  ;;  %v929_v54 = vadd.f32 %v2812_v10, %v2953_v31 }
 0x135   :  { %1263 = vmatmul.bf16.gmra.mxu2 %v2348_v20  ;;  %v1352_v36 = vpack.c.bf16 %v1020_v29, %v2755_v62 }
 0x137   :  { %1384 = vst [vmem:[%s3224_s3 + $0x20] sm:$0xff] %v1352_v36  ;;  %v1117_v51 = vpop.f32.mrf.mxu3 }
 0x138   :  { %v1068_v46 = vpop.f32.mrf.mxu2  ;;  %v972_v56 = vpop.f32.mrf.mxu0 }
 0x139   :  { %v1069_v30 = vadd.f32 %v1068_v46, %v2965_v63  ;;  %v973_v59 = vadd.f32 %v972_v56, %v924_v3  ;;  %v1021_v19 = vpop.f32.mrf.mxu1 }
 0x13b   :  { %v2997_v43 = vadd.f32 %v1117_v51, %v1069_v30  ;;  %v1022_v20 = vadd.f32 %v1021_v19, %v973_v59 }
 0x13d   :  { %v1354_v62 = vpack.c.bf16 %v1022_v20, %v2772_v23 }
 0x13f   :  { %1386 = vst [vmem:[%s3224_s3 + $0x30] sm:$0xff] %v1354_v62  ;;  %v1119_v17 = vpop.f32.mrf.mxu3 }
 0x140   :  { %v1070_v27 = vpop.f32.mrf.mxu2  ;;  %v975_v37 = vpop.f32.mrf.mxu0 }
 0x141   :  { %v1071_v52 = vadd.f32 %v1070_v27, %v2965_v63  ;;  %v976_v12 = vadd.f32 %v975_v37, %v927_v21  ;;  %v1024_v4 = vpop.f32.mrf.mxu1 }
 0x143   :  { %v3006_v18 = vadd.f32 %v1119_v17, %v1071_v52  ;;  %v1025_v28 = vadd.f32 %v1024_v4, %v976_v12  ;;  %1170 = vmatmul.bf16.gmra.mxu0 %v2402_v42 }
 0x144   :  { %1219 = vmatmul.bf16.gmra.mxu1 %v2398_v40  ;;  %1317 = vmatmul.bf16.gmra.mxu3 %v2402_v42  ;;  %v932_v42 = vadd.f32 %v2833_v44, %v2953_v31  ;;  %v934_v44 = vadd.f32 %v2850_v8, %v2953_v31 }
 0x145   :  { %1268 = vmatmul.bf16.gmra.mxu2 %v2400_v41  ;;  %v1356_v23 = vpack.c.bf16 %v1025_v28, %v2793_v48 }
 0x147   :  { %1388 = vst [vmem:[%s3224_s3 + $0x40] sm:$0xff] %v1356_v23  ;;  %v1122_v3 = vpop.f32.mrf.mxu3 }
 0x148   :  { %v1073_v29 = vpop.f32.mrf.mxu2  ;;  %v977_v46 = vpop.f32.mrf.mxu0 }
 0x149   :  { %v1074_v36 = vadd.f32 %v1073_v29, %v2965_v63  ;;  %v978_v30 = vadd.f32 %v977_v46, %v929_v54  ;;  %v1026_v40 = vpop.f32.mrf.mxu1 }
 0x14b   :  { %v3019_v51 = vadd.f32 %v1122_v3, %v1074_v36  ;;  %v1027_v41 = vadd.f32 %v1026_v40, %v978_v30 }
 0x14d   :  { %v1358_v48 = vpack.c.bf16 %v1027_v41, %v2810_v9 }
 0x14f   :  { %1390 = vst [vmem:[%s3224_s3 + $0x50] sm:$0xff] %v1358_v48  ;;  %v1124_v59 = vpop.f32.mrf.mxu3 }
 0x150   :  { %v1075_v10 = vpop.f32.mrf.mxu2  ;;  %v980_v19 = vpop.f32.mrf.mxu0 }
 0x151   :  { %v1076_v56 = vadd.f32 %v1075_v10, %v2965_v63  ;;  %v981_v20 = vadd.f32 %v980_v19, %v932_v42  ;;  %v1029_v62 = vpop.f32.mrf.mxu1 }
 0x153   :  { %v3028_v21 = vadd.f32 %v1124_v59, %v1076_v56  ;;  %v1030_v27 = vadd.f32 %v1029_v62, %v981_v20  ;;  %1175 = vmatmul.bf16.gmra.mxu0 %v2454_v2 }
 0x154   :  { %1224 = vmatmul.bf16.gmra.mxu1 %v2450_v0  ;;  %1322 = vmatmul.bf16.gmra.mxu3 %v2454_v2  ;;  %v937_v2 = vadd.f32 %v2871_v47, %v2953_v31  ;;  %v939_v47 = vadd.f32 %v2888_v22, %v2953_v31 }
 0x155   :  { %1273 = vmatmul.bf16.gmra.mxu2 %v2452_v1  ;;  %v1360_v9 = vpack.c.bf16 %v1030_v27, %v2831_v35 }
 0x157   :  { %1392 = vst [vmem:[%s3224_s3 + $0x60] sm:$0xff] %v1360_v9  ;;  %v1127_v37 = vpop.f32.mrf.mxu3 }
 0x158   :  { %v1078_v52 = vpop.f32.mrf.mxu2  ;;  %v982_v12 = vpop.f32.mrf.mxu0 }
 0x159   :  { %v1079_v17 = vadd.f32 %v1078_v52, %v2965_v63  ;;  %v983_v4 = vadd.f32 %v982_v12, %v934_v44  ;;  %v1031_v0 = vpop.f32.mrf.mxu1 }
 0x15b   :  { %v3041_v28 = vadd.f32 %v1127_v37, %v1079_v17  ;;  %v1032_v1 = vadd.f32 %v1031_v0, %v983_v4 }
 0x15d   :  { %v1362_v35 = vpack.c.bf16 %v1032_v1, %v2848_v7 }
 0x15f   :  { %1394 = vst [vmem:[%s3224_s3 + $0x70] sm:$0xff] %v1362_v35  ;;  %v1129_v54 = vpop.f32.mrf.mxu3 }
 0x160   :  { %v1080_v8 = vpop.f32.mrf.mxu2  ;;  %v985_v29 = vpop.f32.mrf.mxu0 }
 0x161   :  { %v1081_v23 = vadd.f32 %v1080_v8, %v2965_v63  ;;  %v986_v36 = vadd.f32 %v985_v29, %v937_v2  ;;  %v1034_v3 = vpop.f32.mrf.mxu1 }
 0x163   :  { %v3050_v46 = vadd.f32 %v1129_v54, %v1081_v23  ;;  %v1035_v30 = vadd.f32 %v1034_v3, %v986_v36  ;;  %1180 = vmatmul.bf16.gmra.mxu0 %v2506_v26  ;;  %v949_v36 = vadd.f32 %v2940_v33, %v2953_v31 }
 0x164   :  { %1229 = vmatmul.bf16.gmra.mxu1 %v2502_v24  ;;  %1327 = vmatmul.bf16.gmra.mxu3 %v2506_v26  ;;  %v942_v26 = vadd.f32 %v2909_v61, %v2953_v31  ;;  %v944_v61 = vadd.f32 %v2926_v55, %v2953_v31 }
 0x165   :  { %1278 = vmatmul.bf16.gmra.mxu2 %v2504_v25  ;;  %v1364_v7 = vpack.c.bf16 %v1035_v30, %v2869_v45 }
 0x167   :  { %1396 = vst [vmem:[%s3224_s3 + $0x80] sm:$0xff] %v1364_v7  ;;  %v1132_v48 = vpop.f32.mrf.mxu3 }
 0x168   :  { %v1083_v40 = vpop.f32.mrf.mxu2  ;;  %v987_v42 = vpop.f32.mrf.mxu0 }
 0x169   :  { %v1084_v41 = vadd.f32 %v1083_v40, %v2965_v63  ;;  %v988_v10 = vadd.f32 %v987_v42, %v939_v47  ;;  %v1036_v24 = vpop.f32.mrf.mxu1 }
 0x16b   :  { %v3063_v56 = vadd.f32 %v1132_v48, %v1084_v41  ;;  %v1037_v25 = vadd.f32 %v1036_v24, %v988_v10 }
 0x16d   :  { %v1366_v45 = vpack.c.bf16 %v1037_v25, %v2886_v16 }
 0x16f   :  { %1398 = vst [vmem:[%s3224_s3 + $0x90] sm:$0xff] %v1366_v45  ;;  %v1134_v19 = vpop.f32.mrf.mxu3 }
 0x170   :  { %v1085_v22 = vpop.f32.mrf.mxu2  ;;  %v990_v20 = vpop.f32.mrf.mxu0 }
 0x171   :  { %v1086_v59 = vadd.f32 %v1085_v22, %v2965_v63  ;;  %v991_v62 = vadd.f32 %v990_v20, %v942_v26  ;;  %v1039_v27 = vpop.f32.mrf.mxu1 }
 0x173   :  { %v3072_v9 = vadd.f32 %v1134_v19, %v1086_v59  ;;  %v1040_v44 = vadd.f32 %v1039_v27, %v991_v62  ;;  %1185 = vmatmul.bf16.gmra.mxu0 %v2558_v53  ;;  %v3236_v59 = vld [vmem:[#allocation5_spill] sm:$0xff]  ;;  %v3238_v19 = vld [vmem:[#allocation4_spill] sm:$0xff]  ;;  %v954_v62 = vadd.f32 %v2959_v39, %v2953_v31 }
 0x174   :  { %1234 = vmatmul.bf16.gmra.mxu1 %v2554_v49  ;;  %1332 = vmatmul.bf16.gmra.mxu3 %v2558_v53  ;;  %v947_v53 = vadd.f32 %v2935_v14, %v2953_v31 }
 0x175   :  { %1283 = vmatmul.bf16.gmra.mxu2 %v2556_v50  ;;  %v1368_v16 = vpack.c.bf16 %v1040_v44, %v2907_v60 }
 0x177   :  { %1400 = vst [vmem:[%s3224_s3 + $0xa0] sm:$0xff] %v1368_v16  ;;  %v1137_v37 = vpop.f32.mrf.mxu3 }
 0x178   :  { %v1088_v52 = vpop.f32.mrf.mxu2  ;;  %v992_v12 = vpop.f32.mrf.mxu0 }
 0x179   :  { %v1089_v17 = vadd.f32 %v1088_v52, %v2965_v63  ;;  %v993_v4 = vadd.f32 %v992_v12, %v944_v61  ;;  %v1041_v49 = vpop.f32.mrf.mxu1 }
 0x17b   :  { %v3085_v0 = vadd.f32 %v1137_v37, %v1089_v17  ;;  %v1042_v50 = vadd.f32 %v1041_v49, %v993_v4 }
 0x17d   :  { %v1370_v60 = vpack.c.bf16 %v1042_v50, %v2924_v34  ;;  %v3235_v34 = vld [vmem:[#allocation2_spill] sm:$0xff] }
 0x17f   :  { %1402 = vst [vmem:[%s3224_s3 + $0xb0] sm:$0xff] %v1370_v60  ;;  %v1139_v35 = vpop.f32.mrf.mxu3  ;;  %v3137_v60 = vperm.slane %v2689_v58, 3 }
 0x180   :  { %v1090_v55 = vpop.f32.mrf.mxu2  ;;  %v995_v2 = vpop.f32.mrf.mxu0 }
 0x181   :  { %v1091_v1 = vadd.f32 %v1090_v55, %v2965_v63  ;;  %v996_v8 = vadd.f32 %v995_v2, %v947_v53  ;;  %v1044_v23 = vpop.f32.mrf.mxu1 }
 0x183   :  { %v3094_v54 = vadd.f32 %v1139_v35, %v1091_v1  ;;  %v1045_v29 = vadd.f32 %v1044_v23, %v996_v8  ;;  %1190 = vmatmul.bf16.gmra.mxu0 %v2610_v13 }
 0x184   :  { %1239 = vmatmul.bf16.gmra.mxu1 %v2606_v11  ;;  %1337 = vmatmul.bf16.gmra.mxu3 %v2610_v13  ;;  %v952_v13 = vadd.f32 %v2949_v15, %v2953_v31  ;;  %v3239_v15 = vld [vmem:[#allocation6_spill] sm:$0xff] }
 0x185   :  { %1288 = vmatmul.bf16.gmra.mxu2 %v3235_v34  ;;  %v1372_v14 = vpack.c.bf16 %v1045_v29, %v2933_v6 }
 0x187   :  { %1404 = vst [vmem:[%s3224_s3 + $0xc0] sm:$0xff] %v1372_v14  ;;  %v1142_v7 = vpop.f32.mrf.mxu3 }
 0x188   :  { %v1093_v3 = vpop.f32.mrf.mxu2  ;;  %v997_v47 = vpop.f32.mrf.mxu0 }
 0x189   :  { %v1094_v30 = vadd.f32 %v1093_v3, %v2965_v63  ;;  %v998_v40 = vadd.f32 %v997_v47, %v949_v36  ;;  %v1046_v11 = vpop.f32.mrf.mxu1 }
 0x18b   :  { %v3107_v41 = vadd.f32 %v1142_v7, %v1094_v30  ;;  %v1047_v48 = vadd.f32 %v1046_v11, %v998_v40 }
 0x18d   :  { %v1374_v6 = vpack.c.bf16 %v1047_v48, %v2938_v32  ;;  %v3237_v32 = vld [vmem:[#allocation3_spill] sm:$0xff] }
 0x18f   :  { %1406 = vst [vmem:[%s3224_s3 + $0xd0] sm:$0xff] %v1374_v6  ;;  %v1144_v10 = vpop.f32.mrf.mxu3 }
 0x190   :  { %v1095_v33 = vpop.f32.mrf.mxu2  ;;  %v1000_v24 = vpop.f32.mrf.mxu0 }
 0x191   :  { %v1096_v42 = vadd.f32 %v1095_v33, %v2965_v63  ;;  %v1001_v25 = vadd.f32 %v1000_v24, %v952_v13  ;;  %v1049_v45 = vpop.f32.mrf.mxu1 }
 0x193   :  { %v3116_v26 = vadd.f32 %v1144_v10, %v1096_v42  ;;  %v1050_v22 = vadd.f32 %v1049_v45, %v1001_v25  ;;  %1195 = vmatmul.bf16.gmra.mxu0 %v3236_v59 }
 0x194   :  { %1244 = vmatmul.bf16.gmra.mxu1 %v3237_v32  ;;  %1342 = vmatmul.bf16.gmra.mxu3 %v3236_v59 }
 0x195   :  { %1293 = vmatmul.bf16.gmra.mxu2 %v3238_v19  ;;  %v1376_v20 = vpack.c.bf16 %v1050_v22, %v3239_v15 }
 0x197   :  { %1408 = vst [vmem:[%s3224_s3 + $0xe0] sm:$0xff] %v1376_v20  ;;  %v1147_v16 = vpop.f32.mrf.mxu3 }
 0x198   :  { %v1098_v27 = vpop.f32.mrf.mxu2  ;;  %v1002_v61 = vpop.f32.mrf.mxu0 }
 0x199   :  { %v1099_v44 = vadd.f32 %v1098_v27, %v2965_v63  ;;  %v1003_v52 = vadd.f32 %v1002_v61, %v954_v62  ;;  %v1051_v17 = vpop.f32.mrf.mxu1 }
 0x19b   :  { %v3129_v37 = vadd.f32 %v1147_v16, %v1099_v44  ;;  %v1052_v12 = vadd.f32 %v1051_v17, %v1003_v52 }
 0x19d   :  { %v1378_v4 = vpack.c.bf16 %v1052_v12, %v2957_v38 }
 0x19f   :  { %1410 = vst [vmem:[%s3224_s3 + $0xf0] sm:$0xff] %v1378_v4  ;;  %v1149_v49 = vpop.f32.mrf.mxu3 }
 0x1a0   :  { %v1100_v39 = vpop.f32.mrf.mxu2  ;;  %v1161_v50 = vpop.f32.mrf.mxu0 }
 0x1a1   :  { %v1101_v31 = vadd.f32 %v1100_v39, %v2965_v63  ;;  %v1210_v53 = vpop.f32.mrf.mxu1  ;;  %v1162_v29 = vadd.f32 %v1161_v50, %v2975_v57 }
 0x1a2   :  { %v1211_v1 = vadd.f32 %v1210_v53, %v3137_v60 }
 0x1a3   :  { %v3139_v55 = vadd.f32 %v1149_v49, %v1101_v31 }
 0x1a7   :  { %v1308_v38 = vpop.f32.mrf.mxu3 }
 0x1a8   :  { %v1259_v35 = vpop.f32.mrf.mxu2  ;;  %v1163_v8 = vpop.f32.mrf.mxu0 }
 0x1a9   :  { %v1260_v2 = vadd.f32 %v1259_v35, %v1211_v1  ;;  %v1212_v23 = vpop.f32.mrf.mxu1  ;;  %v1164_v47 = vadd.f32 %v1163_v8, %v2984_v5 }
 0x1aa   :  { %v1213_v58 = vadd.f32 %v1212_v23, %v3137_v60 }
 0x1ab   :  { %v1309_v34 = vadd.f32 %v1308_v38, %v1260_v2 }
 0x1ad   :  { %v1349_v14 = vpack.c.bf16 %v1309_v34, %v1162_v29 }
 0x1af   :  { %1381 = vst [vmem:[%s3224_s3 + $0x8] sm:$0xff] %v1349_v14  ;;  %v1310_v3 = vpop.f32.mrf.mxu3 }
 0x1b0   :  { %v1261_v63 = vpop.f32.mrf.mxu2  ;;  %v1166_v30 = vpop.f32.mrf.mxu0 }
 0x1b1   :  { %v1262_v36 = vadd.f32 %v1261_v63, %v1213_v58  ;;  %v1215_v7 = vpop.f32.mrf.mxu1  ;;  %v1167_v10 = vadd.f32 %v1166_v30, %v2997_v43 }
 0x1b2   :  { %v1216_v48 = vadd.f32 %v1215_v7, %v3137_v60 }
 0x1b3   :  { %v1311_v40 = vadd.f32 %v1310_v3, %v1262_v36 }
 0x1b5   :  { %v1351_v11 = vpack.c.bf16 %v1311_v40, %v1164_v47 }
 0x1b7   :  { %1383 = vst [vmem:[%s3224_s3 + $0x18] sm:$0xff] %v1351_v11  ;;  %v1313_v13 = vpop.f32.mrf.mxu3 }
 0x1b8   :  { %v1264_v57 = vpop.f32.mrf.mxu2  ;;  %v1168_v33 = vpop.f32.mrf.mxu0 }
 0x1b9   :  { %v1265_v6 = vadd.f32 %v1264_v57, %v1216_v48  ;;  %v1217_v42 = vpop.f32.mrf.mxu1  ;;  %v1169_v15 = vadd.f32 %v1168_v33, %v3006_v18 }
 0x1ba   :  { %v1218_v5 = vadd.f32 %v1217_v42, %v3137_v60 }
 0x1bb   :  { %v1314_v24 = vadd.f32 %v1313_v13, %v1265_v6 }
 0x1bd   :  { %v1353_v25 = vpack.c.bf16 %v1314_v24, %v1167_v10 }
 0x1bf   :  { %1385 = vst [vmem:[%s3224_s3 + $0x28] sm:$0xff] %v1353_v25  ;;  %v1315_v59 = vpop.f32.mrf.mxu3 }
 0x1c0   :  { %v1266_v45 = vpop.f32.mrf.mxu2  ;;  %v1171_v32 = vpop.f32.mrf.mxu0 }
 0x1c1   :  { %v1267_v22 = vadd.f32 %v1266_v45, %v1218_v5  ;;  %v1220_v19 = vpop.f32.mrf.mxu1  ;;  %v1172_v17 = vadd.f32 %v1171_v32, %v3019_v51 }
 0x1c2   :  { %v1221_v27 = vadd.f32 %v1220_v19, %v3137_v60 }
 0x1c3   :  { %v1316_v20 = vadd.f32 %v1315_v59, %v1267_v22 }
 0x1c5   :  { %v1355_v62 = vpack.c.bf16 %v1316_v20, %v1169_v15 }
 0x1c7   :  { %1387 = vst [vmem:[%s3224_s3 + $0x38] sm:$0xff] %v1355_v62  ;;  %v1318_v16 = vpop.f32.mrf.mxu3 }
 0x1c8   :  { %v1269_v43 = vpop.f32.mrf.mxu2  ;;  %v1173_v61 = vpop.f32.mrf.mxu0 }
 0x1c9   :  { %v1270_v44 = vadd.f32 %v1269_v43, %v1221_v27  ;;  %v1222_v52 = vpop.f32.mrf.mxu1  ;;  %v1174_v1 = vadd.f32 %v1173_v61, %v3028_v21 }
 0x1ca   :  { %v1223_v18 = vadd.f32 %v1222_v52, %v3137_v60 }
 0x1cb   :  { %v1319_v12 = vadd.f32 %v1318_v16, %v1270_v44 }
 0x1cd   :  { %v1357_v4 = vpack.c.bf16 %v1319_v12, %v1172_v17 }
 0x1cf   :  { %1389 = vst [vmem:[%s3224_s3 + $0x48] sm:$0xff] %v1357_v4  ;;  %v1320_v49 = vpop.f32.mrf.mxu3 }
 0x1d0   :  { %v1271_v39 = vpop.f32.mrf.mxu2  ;;  %v1176_v50 = vpop.f32.mrf.mxu0 }
 0x1d1   :  { %v1272_v31 = vadd.f32 %v1271_v39, %v1223_v18  ;;  %v1225_v53 = vpop.f32.mrf.mxu1  ;;  %v1177_v14 = vadd.f32 %v1176_v50, %v3041_v28 }
 0x1d2   :  { %v1226_v38 = vadd.f32 %v1225_v53, %v3137_v60 }
 0x1d3   :  { %v1321_v35 = vadd.f32 %v1320_v49, %v1272_v31 }
 0x1d5   :  { %v1359_v2 = vpack.c.bf16 %v1321_v35, %v1174_v1 }
 0x1d7   :  { %1391 = vst [vmem:[%s3224_s3 + $0x58] sm:$0xff] %v1359_v2  ;;  %v1323_v23 = vpop.f32.mrf.mxu3 }
 0x1d8   :  { %v1274_v51 = vpop.f32.mrf.mxu2  ;;  %v1178_v29 = vpop.f32.mrf.mxu0 }
 0x1d9   :  { %v1275_v8 = vadd.f32 %v1274_v51, %v1226_v38  ;;  %v1227_v34 = vpop.f32.mrf.mxu1  ;;  %v1179_v40 = vadd.f32 %v1178_v29, %v3050_v46 }
 0x1da   :  { %v1228_v21 = vadd.f32 %v1227_v34, %v3137_v60 }
 0x1db   :  { %v1324_v58 = vadd.f32 %v1323_v23, %v1275_v8 }
 0x1dd   :  { %v1361_v63 = vpack.c.bf16 %v1324_v58, %v1177_v14 }
 0x1df   :  { %1393 = vst [vmem:[%s3224_s3 + $0x68] sm:$0xff] %v1361_v63  ;;  %v1325_v30 = vpop.f32.mrf.mxu3 }
 0x1e0   :  { %v1276_v36 = vpop.f32.mrf.mxu2  ;;  %v1181_v7 = vpop.f32.mrf.mxu0 }
 0x1e1   :  { %v1277_v3 = vadd.f32 %v1276_v36, %v1228_v21  ;;  %v1230_v47 = vpop.f32.mrf.mxu1  ;;  %v1182_v10 = vadd.f32 %v1181_v7, %v3063_v56 }
 0x1e2   :  { %v1231_v57 = vadd.f32 %v1230_v47, %v3137_v60 }
 0x1e3   :  { %v1326_v11 = vadd.f32 %v1325_v30, %v1277_v3 }
 0x1e5   :  { %v1363_v48 = vpack.c.bf16 %v1326_v11, %v1179_v40 }
 0x1e7   :  { %1395 = vst [vmem:[%s3224_s3 + $0x78] sm:$0xff] %v1363_v48  ;;  %v1328_v13 = vpop.f32.mrf.mxu3 }
 0x1e8   :  { %v1279_v28 = vpop.f32.mrf.mxu2  ;;  %v1183_v33 = vpop.f32.mrf.mxu0 }
 0x1e9   :  { %v1280_v6 = vadd.f32 %v1279_v28, %v1231_v57  ;;  %v1232_v42 = vpop.f32.mrf.mxu1  ;;  %v1184_v19 = vadd.f32 %v1183_v33, %v3072_v9 }
 0x1ea   :  { %v1233_v46 = vadd.f32 %v1232_v42, %v3137_v60 }
 0x1eb   :  { %v1329_v24 = vadd.f32 %v1328_v13, %v1280_v6 }
 0x1ed   :  { %v1365_v25 = vpack.c.bf16 %v1329_v24, %v1182_v10 }
 0x1ef   :  { %1397 = vst [vmem:[%s3224_s3 + $0x88] sm:$0xff] %v1365_v25  ;;  %v1330_v22 = vpop.f32.mrf.mxu3 }
 0x1f0   :  { %v1281_v5 = vpop.f32.mrf.mxu2  ;;  %v1186_v59 = vpop.f32.mrf.mxu0 }
 0x1f1   :  { %v1282_v45 = vadd.f32 %v1281_v5, %v1233_v46  ;;  %v1235_v32 = vpop.f32.mrf.mxu1  ;;  %v1187_v61 = vadd.f32 %v1186_v59, %v3085_v0 }
 0x1f2   :  { %v1236_v62 = vadd.f32 %v1235_v32, %v3137_v60 }
 0x1f3   :  { %v1331_v15 = vadd.f32 %v1330_v22, %v1282_v45 }
 0x1f5   :  { %v1367_v20 = vpack.c.bf16 %v1331_v15, %v1184_v19 }
 0x1f7   :  { %1399 = vst [vmem:[%s3224_s3 + $0x98] sm:$0xff] %v1367_v20  ;;  %v1333_v43 = vpop.f32.mrf.mxu3 }
 0x1f8   :  { %v1284_v56 = vpop.f32.mrf.mxu2  ;;  %v1188_v44 = vpop.f32.mrf.mxu0 }
 0x1f9   :  { %v1285_v27 = vadd.f32 %v1284_v56, %v1236_v62  ;;  %v1237_v16 = vpop.f32.mrf.mxu1  ;;  %v1189_v49 = vadd.f32 %v1188_v44, %v3094_v54 }
 0x1fa   :  { %v1238_v9 = vadd.f32 %v1237_v16, %v3137_v60 }
 0x1fb   :  { %v1334_v52 = vadd.f32 %v1333_v43, %v1285_v27 }
 0x1fd   :  { %v1369_v17 = vpack.c.bf16 %v1334_v52, %v1187_v61 }
 0x1ff   :  { %1401 = vst [vmem:[%s3224_s3 + $0xa8] sm:$0xff] %v1369_v17  ;;  %v1335_v18 = vpop.f32.mrf.mxu3 }
 0x200   :  { %v1286_v12 = vpop.f32.mrf.mxu2  ;;  %v1191_v39 = vpop.f32.mrf.mxu0 }
 0x201   :  { %v1287_v4 = vadd.f32 %v1286_v12, %v1238_v9  ;;  %v1240_v31 = vpop.f32.mrf.mxu1  ;;  %v1192_v51 = vadd.f32 %v1191_v39, %v3107_v41 }
 0x202   :  { %v1241_v1 = vadd.f32 %v1240_v31, %v3137_v60 }
 0x203   :  { %v1336_v50 = vadd.f32 %v1335_v18, %v1287_v4 }
 0x205   :  { %v1371_v53 = vpack.c.bf16 %v1336_v50, %v1189_v49 }
 0x207   :  { %1403 = vst [vmem:[%s3224_s3 + $0xb8] sm:$0xff] %v1371_v53  ;;  %v1338_v2 = vpop.f32.mrf.mxu3 }
 0x208   :  { %v1289_v0 = vpop.f32.mrf.mxu2  ;;  %v1193_v23 = vpop.f32.mrf.mxu0 }
 0x209   :  { %v1290_v35 = vadd.f32 %v1289_v0, %v1241_v1  ;;  %v1242_v38 = vpop.f32.mrf.mxu1  ;;  %v1194_v21 = vadd.f32 %v1193_v23, %v3116_v26 }
 0x20a   :  { %v1243_v54 = vadd.f32 %v1242_v38, %v3137_v60 }
 0x20b   :  { %v1339_v8 = vadd.f32 %v1338_v2, %v1290_v35 }
 0x20d   :  { %v1373_v29 = vpack.c.bf16 %v1339_v8, %v1192_v51 }
 0x20f   :  { %1405 = vst [vmem:[%s3224_s3 + $0xc8] sm:$0xff] %v1373_v29  ;;  %v1340_v58 = vpop.f32.mrf.mxu3 }
 0x210   :  { %v1291_v34 = vpop.f32.mrf.mxu2  ;;  %v1196_v41 = vpop.f32.mrf.mxu0 }
 0x211   :  { %v1292_v14 = vadd.f32 %v1291_v34, %v1243_v54  ;;  %v1245_v63 = vpop.f32.mrf.mxu1  ;;  %v1197_v11 = vadd.f32 %v1196_v41, %v3129_v37 }
 0x212   :  { %v1246_v30 = vadd.f32 %v1245_v63, %v3137_v60 }
 0x213   :  { %v1341_v36 = vadd.f32 %v1340_v58, %v1292_v14 }
 0x215   :  { %v1375_v3 = vpack.c.bf16 %v1341_v36, %v1194_v21 }
 0x217   :  { %1407 = vst [vmem:[%s3224_s3 + $0xd8] sm:$0xff] %v1375_v3  ;;  %v1343_v40 = vpop.f32.mrf.mxu3 }
 0x218   :  { %v1294_v7 = vpop.f32.mrf.mxu2  ;;  %v1198_v6 = vpop.f32.mrf.mxu0 }
 0x219   :  { %v1295_v47 = vadd.f32 %v1294_v7, %v1246_v30  ;;  %v1247_v57 = vpop.f32.mrf.mxu1  ;;  %v1199_v10 = vadd.f32 %v1198_v6, %v3139_v55 }
 0x21a   :  { %v1248_v26 = vadd.f32 %v1247_v57, %v3137_v60 }
 0x21b   :  { %v1344_v48 = vadd.f32 %v1343_v40, %v1295_v47 }
 0x21d   :  { %v1377_v28 = vpack.c.bf16 %v1344_v48, %v1197_v11 }
 0x21f   :  { %1409 = vst [vmem:[%s3224_s3 + $0xe8] sm:$0xff] %v1377_v28  ;;  %v1345_v42 = vpop.f32.mrf.mxu3 }
 0x220   :  { %v1296_v13 = vpop.f32.mrf.mxu2 }
 0x221   :  { %v1297_v33 = vadd.f32 %v1296_v13, %v1248_v26 }
 0x223   :  { %v1346_v24 = vadd.f32 %v1345_v42, %v1297_v33 }
 0x225   :  { %v1379_v25 = vpack.c.bf16 %v1346_v24, %v1199_v10 }
 0x227   :  { %1411 = vst [vmem:[%s3224_s3 + $0xf8] sm:$0xff] %v1379_v25 }

// kernel: qmodel_forward.5
= control target key start
LH: loop header
LB: loop body
LE: loop exit
PB: predicated region body
PF: predicated region fallthrough
CT: control target
= control target key end

     0   :  { %7 = vsyncpa [#allocation5], 0  ;;  %s4493_s9 = smov 0   ;;  %s4495_s10 = smov 0   ;;  %s4618_s0 = inlined_call_operand.vmem [shape: bf16[16,8,512], index: 0, kind: input, shape index: {}]   ;;  %s4619_s1 = inlined_call_operand.hbm [shape: bf16[128,512], index: 1, kind: input, shape index: {}]   ;;  %s4620_s2 = inlined_call_operand.vmem [shape: bf16[16,8,128], index: 2, kind: output, shape index: {}]  }
   0x1   :  { %s4497_s11 = smov 0  }
   0x2 LB: > { %s2909_s12 = sadd.s32 4294967295, %s4472_s11   ;;  %s22_s13 = sadd.s32 1, %s4468_s10  ;;  %s4472_s11 = sphi %s4497_s11, %s13_s11   ;;  %s4468_s10 = sphi %s4495_s10, %s4622_s10   ;;  %s4464_s9 = sphi %s4493_s9, %s4621_s9  }
   0x3   : > { %p23_p0 = scmp.ge.s32.totalorder %s22_s13, 2  ;;  %p2911_p1 = scmp.ge.s32.totalorder %s4472_s11, 1 }
   0x4   : > { %p107_p2 = scmp.lt.s32.totalorder %s4472_s11, 3  ;;  %p4258_p4 = scmp.eq.s32.totalorder %s2909_s12, 0 }
   0x5   : > { %s4624_s13 = smov (%p23_p0, %s22_s13), 0  ;;  %s118_s16 = sshll.u32 %s4619_s1, 4  ;;  %s119_s16 = int_to_ptr.hbm [resolvable:$true] %s118_s16 }
   0x6   : > { %p108_p3 = pnand %p2911_p1, %p107_p2  ;;  %s4474_s17 = smov [#allocation4]  }
   0x7   : > { %s120_s18 = sshll.u32 %s4474_s17, 4  ;;  %s4475_s19 = smov 256   ;;  %s121_s18 = int_to_ptr.vmem [resolvable:$true] %s120_s18 }
   0x8   : > { %p4254_p5 = pneg %p108_p3  ;;  %s4476_s20 = smov 16  }
   0x9   : > { %150 = sbr.rel (%p108_p3) target bundleno = 1436 (0x59c), region = 28 }
   0xa   : > { %p4255_p6 = pnand %p4258_p4, %p4254_p5 }
   0xc   : > { %4257 = dma.hbm_to_vmem [thread:$0]  (!%p4255_p6), %s119_s16, 4096, %s121_s18, [#allocation5], %s4475_s19, %s4475_s19, %s4476_s20  }
   0xe   : > { %4459 = dma.done.wait (%p4258_p4), [#allocation5], 4096  }
   0xf   : > { %4461 = vsyncadd (%p4258_p4), [#allocation5], 4294963200  ;;  %s2916_s21 = sshll.u32 %s4464_s9, 3  ;;  %p2921_p8 = scmp.ne.s32.totalorder %s4464_s9, 0 }
  0x10   : > { %p182_p7 = scmp.lt.s32.totalorder %s2916_s21, 15 }
  0x11   : > { %204 = sbr.rel (%p2921_p8) target bundleno = 25 (0x19), region = 36 }
  0x12   : > { %s4626_s21 = smov (!%p182_p7, %s2916_s21), 15 }
  0x13   : > { %s3993_s22 = sshll.u32 %s4626_s21, 4  ;;  %s2920_s23 = sshll.u32 %s4626_s21, 2 }
  0x14   : > { %s4521_s26 = scalar_lea.vmem %s4618_s0, %s3993_s22  ;;  %s4526_s29 = scalar_lea.vmem %s4620_s2, %s2920_s23 }
  0x16   : > { %v4477_v0 = vmov 0.0  }
  0x17   : > { %205 = vst [vmem:[#allocation2] sm:$0xff] %v4477_v0 }
  0x18   : > { %206 = vst [vmem:[#allocation3] sm:$0xff] %v4477_v0 }
  0x19 PF: > { %v3036_v1 = vld [vmem:[#allocation4 + $0xe0] sm:$0xf]  ;;  %v4024_v2 = vld [vmem:[#allocation4 + $0xec] sm:$0xf0]  ;;  %v4022_v3 = vld [vmem:[#allocation4 + $0xe4] sm:$0xf] }
  0x1a   : > { %v3037_v4 = vor.u32 %v4024_v2, %v3036_v1  ;;  %v3038_v5 = vld [vmem:[#allocation4 + $0xf0] sm:$0xf0]  ;;  %v4023_v6 = vld [vmem:[#allocation4 + $0xec] sm:$0xf]  ;;  %v3046_v7 = vld [vmem:[#allocation4 + $0xf8] sm:$0xf0] }
  0x1b   : > { %v3041_v8 = vor.u32 %v4022_v3, %v3038_v5  ;;  %v3049_v9 = vor.u32 %v4023_v6, %v3046_v7  ;;  %v3020_v10 = vld [vmem:[#allocation4 + $0xc0] sm:$0xf]  ;;  %v4020_v11 = vld [vmem:[#allocation4 + $0xcc] sm:$0xf0]  ;;  %v4018_v12 = vld [vmem:[#allocation4 + $0xc4] sm:$0xf] }
  0x1c   : > { %407 = vmatpush.bf16.msra.mxu0 %v3037_v4  ;;  %v3021_v13 = vor.u32 %v4020_v11, %v3020_v10  ;;  %v3022_v14 = vld [vmem:[#allocation4 + $0xd0] sm:$0xf0]  ;;  %v4019_v15 = vld [vmem:[#allocation4 + $0xcc] sm:$0xf]  ;;  %v3030_v16 = vld [vmem:[#allocation4 + $0xd8] sm:$0xf0] }
  0x1d   : > { %420 = vmatpush.bf16.msra.mxu1 %v3041_v8  ;;  %446 = vmatpush.bf16.msra.mxu3 %v3049_v9  ;;  %v3025_v17 = vor.u32 %v4018_v12, %v3022_v14  ;;  %v3033_v18 = vor.u32 %v4019_v15, %v3030_v16  ;;  %v3044_v19 = vld [vmem:[#allocation4 + $0xe8] sm:$0xf]  ;;  %v4025_v20 = vld [vmem:[#allocation4 + $0xf4] sm:$0xf0]  ;;  %v3004_v21 = vld [vmem:[#allocation4 + $0xa0] sm:$0xf] }
  0x1e   : > { %v3045_v22 = vor.u32 %v4025_v20, %v3044_v19  ;;  %v4016_v23 = vld [vmem:[#allocation4 + $0xac] sm:$0xf0]  ;;  %v4014_v24 = vld [vmem:[#allocation4 + $0xa4] sm:$0xf]  ;;  %v3006_v25 = vld [vmem:[#allocation4 + $0xb0] sm:$0xf0] }
  0x1f   : > { %v4015_v26 = vld [vmem:[#allocation4 + $0xac] sm:$0xf]  ;;  %v3014_v27 = vld [vmem:[#allocation4 + $0xb8] sm:$0xf0]  ;;  %v3028_v28 = vld [vmem:[#allocation4 + $0xc8] sm:$0xf]  ;;  %v3005_v29 = vor.u32 %v4016_v23, %v3004_v21  ;;  %v3009_v33 = vor.u32 %v4014_v24, %v3006_v25 }
  0x20   : > { %408 = vmatpush.bf16.msra.mxu0 %v3021_v13  ;;  %433 = vmatpush.bf16.msra.mxu2 %v3045_v22  ;;  %v4021_v30 = vld [vmem:[#allocation4 + $0xd4] sm:$0xf0]  ;;  %v2988_v31 = vld [vmem:[#allocation4 + $0x80] sm:$0xf]  ;;  %v4012_v32 = vld [vmem:[#allocation4 + $0x8c] sm:$0xf0]  ;;  %v3017_v34 = vor.u32 %v4015_v26, %v3014_v27 }
  0x21   : > { %421 = vmatpush.bf16.msra.mxu1 %v3025_v17  ;;  %447 = vmatpush.bf16.msra.mxu3 %v3033_v18  ;;  %v3029_v35 = vor.u32 %v4021_v30, %v3028_v28  ;;  %v4010_v36 = vld [vmem:[#allocation4 + $0x84] sm:$0xf]  ;;  %v2990_v37 = vld [vmem:[#allocation4 + $0x90] sm:$0xf0]  ;;  %v4011_v38 = vld [vmem:[#allocation4 + $0x8c] sm:$0xf]  ;;  %v2989_v42 = vor.u32 %v4012_v32, %v2988_v31 }
  0x22   : > { %v2998_v39 = vld [vmem:[#allocation4 + $0x98] sm:$0xf0]  ;;  %v3012_v40 = vld [vmem:[#allocation4 + $0xa8] sm:$0xf]  ;;  %v4017_v41 = vld [vmem:[#allocation4 + $0xb4] sm:$0xf0]  ;;  %v2993_v46 = vor.u32 %v4010_v36, %v2990_v37 }
  0x23   : > { %v3013_v43 = vor.u32 %v4017_v41, %v3012_v40  ;;  %v2972_v44 = vld [vmem:[#allocation4 + $0x60] sm:$0xf]  ;;  %v4008_v45 = vld [vmem:[#allocation4 + $0x6c] sm:$0xf0]  ;;  %v3001_v47 = vor.u32 %v4011_v38, %v2998_v39  ;;  %v4006_v48 = vld [vmem:[#allocation4 + $0x64] sm:$0xf] }
  0x24   : > { %409 = vmatpush.bf16.msra.mxu0 %v3005_v29  ;;  %434 = vmatpush.bf16.msra.mxu2 %v3029_v35  ;;  %v2996_v49 = vld [vmem:[#allocation4 + $0x88] sm:$0xf]  ;;  %v4013_v50 = vld [vmem:[#allocation4 + $0x94] sm:$0xf0]  ;;  %v2974_v51 = vld [vmem:[#allocation4 + $0x70] sm:$0xf0]  ;;  %v2973_v54 = vor.u32 %v4008_v45, %v2972_v44 }
  0x25   : > { %422 = vmatpush.bf16.msra.mxu1 %v3009_v33  ;;  %448 = vmatpush.bf16.msra.mxu3 %v3017_v34  ;;  %v4007_v52 = vld [vmem:[#allocation4 + $0x6c] sm:$0xf]  ;;  %v2982_v53 = vld [vmem:[#allocation4 + $0x78] sm:$0xf0]  ;;  %v2997_v55 = vor.u32 %v4013_v50, %v2996_v49  ;;  %v2956_v56 = vld [vmem:[#allocation4 + $0x40] sm:$0xf]  ;;  %v2977_v58 = vor.u32 %v4006_v48, %v2974_v51 }
  0x26   : > { %v4004_v57 = vld [vmem:[#allocation4 + $0x4c] sm:$0xf0]  ;;  %v2985_v59 = vor.u32 %v4007_v52, %v2982_v53  ;;  %v4002_v60 = vld [vmem:[#allocation4 + $0x44] sm:$0xf]  ;;  %v2980_v61 = vld [vmem:[#allocation4 + $0x68] sm:$0xf] }
  0x27   : > { %v4009_v62 = vld [vmem:[#allocation4 + $0x74] sm:$0xf0]  ;;  %v2958_v63 = vld [vmem:[#allocation4 + $0x50] sm:$0xf0]  ;;  %v4003_v0 = vld [vmem:[#allocation4 + $0x4c] sm:$0xf]  ;;  %v2957_v2 = vor.u32 %v4004_v57, %v2956_v56 }
  0x28   : > { %410 = vmatpush.bf16.msra.mxu0 %v2989_v42  ;;  %435 = vmatpush.bf16.msra.mxu2 %v3013_v43  ;;  %v2966_v1 = vld [vmem:[#allocation4 + $0x58] sm:$0xf0]  ;;  %v2981_v3 = vor.u32 %v4009_v62, %v2980_v61  ;;  %v2940_v4 = vld [vmem:[#allocation4 + $0x20] sm:$0xf]  ;;  %v4000_v5 = vld [vmem:[#allocation4 + $0x2c] sm:$0xf0]  ;;  %v2961_v6 = vor.u32 %v4002_v60, %v2958_v63 }
  0x29   : > { %423 = vmatpush.bf16.msra.mxu1 %v2993_v46  ;;  %449 = vmatpush.bf16.msra.mxu3 %v3001_v47  ;;  %v2969_v7 = vor.u32 %v4003_v0, %v2966_v1  ;;  %v3998_v8 = vld [vmem:[#allocation4 + $0x24] sm:$0xf]  ;;  %v2964_v9 = vld [vmem:[#allocation4 + $0x48] sm:$0xf]  ;;  %v4005_v10 = vld [vmem:[#allocation4 + $0x54] sm:$0xf0]  ;;  %v2941_v14 = vor.u32 %v4000_v5, %v2940_v4 }
  0x2a   : > { %v2942_v11 = vld [vmem:[#allocation4 + $0x30] sm:$0xf0]  ;;  %v3999_v12 = vld [vmem:[#allocation4 + $0x2c] sm:$0xf]  ;;  %v2950_v13 = vld [vmem:[#allocation4 + $0x38] sm:$0xf0]  ;;  %v2965_v15 = vor.u32 %v4005_v10, %v2964_v9 }
  0x2b   : > { %v2924_v16 = vld [vmem:[#allocation4] sm:$0xf]  ;;  %v3996_v17 = vld [vmem:[#allocation4 + $0xc] sm:$0xf0]  ;;  %v2945_v18 = vor.u32 %v3998_v8, %v2942_v11  ;;  %v2953_v19 = vor.u32 %v3999_v12, %v2950_v13  ;;  %v3994_v20 = vld [vmem:[#allocation4 + $0x4] sm:$0xf] }
  0x2c   : > { %411 = vmatpush.bf16.msra.mxu0 %v2973_v54  ;;  %436 = vmatpush.bf16.msra.mxu2 %v2997_v55  ;;  %v2948_v21 = vld [vmem:[#allocation4 + $0x28] sm:$0xf]  ;;  %v4001_v22 = vld [vmem:[#allocation4 + $0x34] sm:$0xf0]  ;;  %v2926_v23 = vld [vmem:[#allocation4 + $0x10] sm:$0xf0]  ;;  %v2925_v26 = vor.u32 %v3996_v17, %v2924_v16 }
  0x2d   : > { %424 = vmatpush.bf16.msra.mxu1 %v2977_v58  ;;  %450 = vmatpush.bf16.msra.mxu3 %v2985_v59  ;;  %v3995_v24 = vld [vmem:[#allocation4 + $0xc] sm:$0xf]  ;;  %v2934_v25 = vld [vmem:[#allocation4 + $0x18] sm:$0xf0]  ;;  %v213_v27 = vld [vmem:[#allocation2] sm:$0xff]  ;;  %v2949_v28 = vor.u32 %v4001_v22, %v2948_v21  ;;  %v2929_v29 = vor.u32 %v3994_v20, %v2926_v23 }
  0x2e   : > { %v2937_v30 = vor.u32 %v3995_v24, %v2934_v25  ;;  %v2932_v31 = vld [vmem:[#allocation4 + $0x8] sm:$0xf]  ;;  %v3997_v32 = vld [vmem:[#allocation4 + $0x14] sm:$0xf0]  ;;  %v214_v33 = vpack.c.bf16 %v213_v27, %v213_v27  ;;  %v3169_v35 = vld [vmem:[#allocation4 + $0xe0] sm:$0xf] }
  0x2f   : > { %v2933_v34 = vor.u32 %v3997_v32, %v2932_v31  ;;  %v4056_v36 = vld [vmem:[#allocation4 + $0xec] sm:$0xf0]  ;;  %v4054_v37 = vld [vmem:[#allocation4 + $0xe4] sm:$0xf]  ;;  %v3171_v39 = vld [vmem:[#allocation4 + $0xf0] sm:$0xf0] }
  0x30   : > { %412 = vmatpush.bf16.msra.mxu0 %v2957_v2  ;;  %437 = vmatpush.bf16.msra.mxu2 %v2981_v3  ;;  %v3170_v38 = vor.u32 %v4056_v36, %v3169_v35  ;;  %v3177_v40 = vld [vmem:[#allocation4 + $0xe8] sm:$0xf]  ;;  %v4057_v41 = vld [vmem:[#allocation4 + $0xf4] sm:$0xf0]  ;;  %v3174_v42 = vor.u32 %v4054_v37, %v3171_v39  ;;  %v4055_v44 = vld [vmem:[#allocation4 + $0xec] sm:$0xf] }
  0x31   : > { %425 = vmatpush.bf16.msra.mxu1 %v2961_v6  ;;  %451 = vmatpush.bf16.msra.mxu3 %v2969_v7  ;;  %v3178_v43 = vor.u32 %v4057_v41, %v3177_v40  ;;  %v3179_v45 = vld [vmem:[#allocation4 + $0xf8] sm:$0xf0]  ;;  %v3153_v47 = vld [vmem:[#allocation4 + $0xc0] sm:$0xf]  ;;  %v4052_v48 = vld [vmem:[#allocation4 + $0xcc] sm:$0xf0] }
  0x32   : > { %v3182_v46 = vor.u32 %v4055_v44, %v3179_v45  ;;  %v4050_v49 = vld [vmem:[#allocation4 + $0xc4] sm:$0xf]  ;;  %v3154_v50 = vor.u32 %v4052_v48, %v3153_v47  ;;  %v3155_v51 = vld [vmem:[#allocation4 + $0xd0] sm:$0xf0]  ;;  %v3161_v52 = vld [vmem:[#allocation4 + $0xc8] sm:$0xf] }
  0x33   : > { %v4053_v53 = vld [vmem:[#allocation4 + $0xd4] sm:$0xf0]  ;;  %v3158_v54 = vor.u32 %v4050_v49, %v3155_v51  ;;  %v4051_v56 = vld [vmem:[#allocation4 + $0xcc] sm:$0xf]  ;;  %v3163_v57 = vld [vmem:[#allocation4 + $0xd8] sm:$0xf0] }
  0x34   : > { %413 = vmatpush.bf16.msra.mxu0 %v2941_v14  ;;  %438 = vmatpush.bf16.msra.mxu2 %v2965_v15  ;;  %v3162_v55 = vor.u32 %v4053_v53, %v3161_v52  ;;  %v3166_v58 = vor.u32 %v4051_v56, %v3163_v57  ;;  %v3137_v59 = vld [vmem:[#allocation4 + $0xa0] sm:$0xf]  ;;  %v4048_v60 = vld [vmem:[#allocation4 + $0xac] sm:$0xf0]  ;;  %v4046_v61 = vld [vmem:[#allocation4 + $0xa4] sm:$0xf] }
  0x35   : > { %426 = vmatpush.bf16.msra.mxu1 %v2945_v18  ;;  %452 = vmatpush.bf16.msra.mxu3 %v2953_v19  ;;  %v3138_v62 = vor.u32 %v4048_v60, %v3137_v59  ;;  %v3139_v63 = vld [vmem:[#allocation4 + $0xb0] sm:$0xf0]  ;;  %v3145_v0 = vld [vmem:[#allocation4 + $0xa8] sm:$0xf]  ;;  %v4049_v1 = vld [vmem:[#allocation4 + $0xb4] sm:$0xf0] }
  0x36   : > { %v3142_v2 = vor.u32 %v4046_v61, %v3139_v63  ;;  %v3146_v3 = vor.u32 %v4049_v1, %v3145_v0  ;;  %v4047_v4 = vld [vmem:[#allocation4 + $0xac] sm:$0xf]  ;;  %v3147_v5 = vld [vmem:[#allocation4 + $0xb8] sm:$0xf0]  ;;  %v207_v6 = vld [vmem:[%s4521_s26] sm:$0xff] }
  0x37   : > { %v3150_v7 = vor.u32 %v4047_v4, %v3147_v5  ;;  %v3121_v8 = vld [vmem:[#allocation4 + $0x80] sm:$0xf]  ;;  %v4044_v9 = vld [vmem:[#allocation4 + $0x8c] sm:$0xf0]  ;;  %v4042_v10 = vld [vmem:[#allocation4 + $0x84] sm:$0xf]  ;;  %v209_v19 = vunpack.c.l.bf16 %v207_v6  ;;  %v210_v21 = vunpack.c.h.bf16 %v207_v6 }
  0x38   : > { %414 = vmatpush.bf16.msra.mxu0 %v2925_v26  ;;  %439 = vmatpush.bf16.msra.mxu2 %v2949_v28  ;;  %v3122_v11 = vor.u32 %v4044_v9, %v3121_v8  ;;  %v3123_v12 = vld [vmem:[#allocation4 + $0x90] sm:$0xf0]  ;;  %v3129_v13 = vld [vmem:[#allocation4 + $0x88] sm:$0xf]  ;;  %v4045_v14 = vld [vmem:[#allocation4 + $0x94] sm:$0xf0] }
  0x39   : > { %427 = vmatpush.bf16.msra.mxu1 %v2929_v29  ;;  %453 = vmatpush.bf16.msra.mxu3 %v2937_v30  ;;  %v3126_v15 = vor.u32 %v4042_v10, %v3123_v12  ;;  %v3130_v16 = vor.u32 %v4045_v14, %v3129_v13  ;;  %v4043_v17 = vld [vmem:[#allocation4 + $0x8c] sm:$0xf]  ;;  %v3131_v18 = vld [vmem:[#allocation4 + $0x98] sm:$0xf0]  ;;  %v3105_v22 = vld [vmem:[#allocation4 + $0x60] sm:$0xf] }
  0x3a   : > { %v3134_v20 = vor.u32 %v4043_v17, %v3131_v18  ;;  %v4040_v23 = vld [vmem:[#allocation4 + $0x6c] sm:$0xf0]  ;;  %v4038_v24 = vld [vmem:[#allocation4 + $0x64] sm:$0xf]  ;;  %v3107_v26 = vld [vmem:[#allocation4 + $0x70] sm:$0xf0] }
  0x3b   : > { %415 = vmatmul.bf16.vlgmr.msra.gmra.mxu0 %v214_v33  ;;  %v3106_v25 = vor.u32 %v4040_v23, %v3105_v22  ;;  %v3113_v27 = vld [vmem:[#allocation4 + $0x68] sm:$0xf]  ;;  %v3110_v29 = vor.u32 %v4038_v24, %v3107_v26  ;;  %v4041_v30 = vld [vmem:[#allocation4 + $0x74] sm:$0xf0]  ;;  %v4039_v31 = vld [vmem:[#allocation4 + $0x6c] sm:$0xf] }
  0x3c   : > { %428 = vmatmul.bf16.vlgmr.msra.gmra.mxu1 %v214_v33  ;;  %454 = vmatmul.bf16.vlgmr.msra.gmra.mxu3 %v214_v33  ;;  %v3115_v32 = vld [vmem:[#allocation4 + $0x78] sm:$0xf0]  ;;  %v3114_v36 = vor.u32 %v4041_v30, %v3113_v27  ;;  %v3089_v39 = vld [vmem:[#allocation4 + $0x40] sm:$0xf]  ;;  %v4036_v40 = vld [vmem:[#allocation4 + $0x4c] sm:$0xf0] }
  0x3d   : > { %440 = vmatpush.bf16.msra.mxu2 %v2933_v34  ;;  %732 = vmatpush.bf16.msrb.mxu0 %v3170_v38  ;;  %v4531_v35 = vld [vmem:[%s4521_s26 + $0x8] sm:$0xff]  ;;  %v3118_v37 = vor.u32 %v4039_v31, %v3115_v32  ;;  %v4034_v41 = vld [vmem:[#allocation4 + $0x44] sm:$0xf]  ;;  %v3091_v44 = vld [vmem:[#allocation4 + $0x50] sm:$0xf0] }
  0x3e   : > { %745 = vmatpush.bf16.msrb.mxu1 %v3174_v42  ;;  %771 = vmatpush.bf16.msrb.mxu3 %v3182_v46  ;;  %v3097_v45 = vld [vmem:[#allocation4 + $0x48] sm:$0xf]  ;;  %v212_v47 = vunpack.c.h.bf16 %v4531_v35  ;;  %v3094_v48 = vor.u32 %v4034_v41, %v3091_v44  ;;  %v4037_v49 = vld [vmem:[#allocation4 + $0x54] sm:$0xf0]  ;;  %v3099_v52 = vld [vmem:[#allocation4 + $0x58] sm:$0xf0]  ;;  %v211_v23 = vunpack.c.l.bf16 %v4531_v35 }
  0x3f   : > { %v3098_v51 = vor.u32 %v4037_v49, %v3097_v45  ;;  %v4030_v56 = vld [vmem:[#allocation4 + $0x24] sm:$0xf]  ;;  %v3075_v59 = vld [vmem:[#allocation4 + $0x30] sm:$0xf0]  ;;  %v3081_v60 = vld [vmem:[#allocation4 + $0x28] sm:$0xf] }
  0x40   : > { %441 = vmatmul.bf16.vlgmr.msra.gmra.mxu2 %v214_v33  ;;  %v4033_v61 = vld [vmem:[#allocation4 + $0x34] sm:$0xf0]  ;;  %v3078_v0 = vor.u32 %v4030_v56, %v3075_v59  ;;  %v4028_v8 = vld [vmem:[#allocation4 + $0xc] sm:$0xf0]  ;;  %v4026_v12 = vld [vmem:[#allocation4 + $0x4] sm:$0xf] }
  0x41   : > { %758 = vmatpush.bf16.msrb.mxu2 %v3178_v43  ;;  %733 = vmatpush.bf16.msrb.mxu0 %v3154_v50  ;;  %v3090_v43 = vor.u32 %v4036_v40, %v3089_v39  ;;  %v4035_v50 = vld [vmem:[#allocation4 + $0x4c] sm:$0xf]  ;;  %v3082_v1 = vor.u32 %v4033_v61, %v3081_v60  ;;  %v3059_v13 = vld [vmem:[#allocation4 + $0x10] sm:$0xf0]  ;;  %v3065_v14 = vld [vmem:[#allocation4 + $0x8] sm:$0xf] }
  0x42   : > { %746 = vmatpush.bf16.msrb.mxu1 %v3158_v54  ;;  %772 = vmatpush.bf16.msrb.mxu3 %v3166_v58  ;;  %v3102_v53 = vor.u32 %v4035_v50, %v3099_v52  ;;  %v3073_v54 = vld [vmem:[#allocation4 + $0x20] sm:$0xf]  ;;  %v3062_v17 = vor.u32 %v4026_v12, %v3059_v13  ;;  %v4029_v18 = vld [vmem:[#allocation4 + $0x14] sm:$0xf0]  ;;  %v3067_v22 = vld [vmem:[#allocation4 + $0x18] sm:$0xf0] }
  0x43   : > { %v463_v49 = vld [vmem:[#allocation3] sm:$0xff]  ;;  %v4087_v13 = vld [vmem:[#allocation4 + $0xec] sm:$0xf] }
  0x45   : > { %759 = vmatpush.bf16.msrb.mxu2 %v3162_v55  ;;  %734 = vmatpush.bf16.msrb.mxu0 %v3138_v62  ;;  %v4032_v55 = vld [vmem:[#allocation4 + $0x2c] sm:$0xf0] }
  0x46   : > { %747 = vmatpush.bf16.msrb.mxu1 %v3142_v2  ;;  %773 = vmatpush.bf16.msrb.mxu3 %v3150_v7  ;;  %v3074_v58 = vor.u32 %v4032_v55, %v3073_v54  ;;  %v4031_v2 = vld [vmem:[#allocation4 + $0x2c] sm:$0xf]  ;;  %v3057_v7 = vld [vmem:[#allocation4] sm:$0xf] }
  0x49   : > { %760 = vmatpush.bf16.msrb.mxu2 %v3146_v3  ;;  %735 = vmatpush.bf16.msrb.mxu0 %v3122_v11  ;;  %v3083_v3 = vld [vmem:[#allocation4 + $0x38] sm:$0xf0]  ;;  %v3058_v11 = vor.u32 %v4028_v8, %v3057_v7  ;;  %v3305_v8 = vld [vmem:[#allocation4 + $0xf0] sm:$0xf0] }
  0x4a   : > { %748 = vmatpush.bf16.msrb.mxu1 %v3126_v15  ;;  %774 = vmatpush.bf16.msrb.mxu3 %v3134_v20  ;;  %v3086_v5 = vor.u32 %v4031_v2, %v3083_v3  ;;  %v3066_v20 = vor.u32 %v4029_v18, %v3065_v14  ;;  %v3313_v14 = vld [vmem:[#allocation4 + $0xf8] sm:$0xf0]  ;;  %v4082_v18 = vld [vmem:[#allocation4 + $0xc4] sm:$0xf] }
  0x4d   : > { %761 = vmatpush.bf16.msrb.mxu2 %v3130_v16  ;;  %736 = vmatpush.bf16.msrb.mxu0 %v3106_v25 }
  0x4e   : > { %749 = vmatpush.bf16.msrb.mxu1 %v3110_v29  ;;  %775 = vmatpush.bf16.msrb.mxu3 %v3118_v37 }
  0x51   : > { %762 = vmatpush.bf16.msrb.mxu2 %v3114_v36  ;;  %737 = vmatpush.bf16.msrb.mxu0 %v3090_v43 }
  0x52   : > { %750 = vmatpush.bf16.msrb.mxu1 %v3094_v48  ;;  %776 = vmatpush.bf16.msrb.mxu3 %v3102_v53 }
  0x55   : > { %763 = vmatpush.bf16.msrb.mxu2 %v3098_v51  ;;  %738 = vmatpush.bf16.msrb.mxu0 %v3074_v58 }
  0x56   : > { %751 = vmatpush.bf16.msrb.mxu1 %v3078_v0  ;;  %777 = vmatpush.bf16.msrb.mxu3 %v3086_v5  ;;  %v4088_v5 = vld [vmem:[#allocation4 + $0xec] sm:$0xf0] }
  0x59   : > { %764 = vmatpush.bf16.msrb.mxu2 %v3082_v1  ;;  %739 = vmatpush.bf16.msrb.mxu0 %v3058_v11 }
  0x5a   : > { %752 = vmatpush.bf16.msrb.mxu1 %v3062_v17  ;;  %v4084_v17 = vld [vmem:[#allocation4 + $0xcc] sm:$0xf0] }
  0x5d   : > { %765 = vmatpush.bf16.msrb.mxu2 %v3066_v20  ;;  %v3289_v20 = vld [vmem:[#allocation4 + $0xd0] sm:$0xf0] }
  0xb8   : > { %v416_v28 = vpop.f32.mrf.mxu0 }
  0xb9   : > { %v459_v33 = vadd.f32 %v416_v28, %v209_v19  ;;  %v429_v34 = vpop.f32.mrf.mxu1 }
  0xba   : > { %v460_v38 = vadd.f32 %v429_v34, %v210_v21  ;;  %v4027_v21 = vld [vmem:[#allocation4 + $0xc] sm:$0xf] }
  0xbb   : > { %v3050_v42 = vmul.f32 -1.442695, %v459_v33  ;;  %v3070_v25 = vor.u32 %v4027_v21, %v3067_v22  ;;  %v3295_v21 = vld [vmem:[#allocation4 + $0xc8] sm:$0xf]  ;;  %v4085_v22 = vld [vmem:[#allocation4 + $0xd4] sm:$0xf0] }
  0xbc   : > { %v3051_v46 = vmul.f32 -1.442695, %v460_v38 }
  0xbd   : > { %4288 = vpow2.f32 %v3050_v42  ;;  %778 = vmatpush.bf16.msrb.mxu3 %v3070_v25  ;;  %v4083_v25 = vld [vmem:[#allocation4 + $0xcc] sm:$0xf] }
  0xbe   : > { %4290 = vpow2.f32 %v3051_v46 }
  0xbf   : > { %v455_v57 = vpop.f32.mrf.mxu3 }
  0xc0   : > { %v462_v62 = vadd.f32 %v455_v57, %v212_v47  ;;  %v418_v63 = vpop.f32.mrf.mxu0 }
  0xc1   : > { %v431_v4 = vpop.f32.mrf.mxu1 }
  0xc2   : > { %v3052_v6 = vmul.f32 -1.442695, %v462_v62  ;;  %v3303_v4 = vld [vmem:[#allocation4 + $0xe0] sm:$0xf] }
  0xc3   : > { %v4289_v9 = vpop.eup %4288  ;;  %v442_v10 = vpop.f32.mrf.mxu2  ;;  %v3304_v7 = vor.u32 %v4088_v5, %v3303_v4  ;;  %v3249_v4 = vld [vmem:[#allocation4 + $0x78] sm:$0xf0] }
  0xc4   : > { %v4291_v15 = vpop.eup %4290  ;;  %v470_v16 = vadd.f32 1.0, %v4289_v9  ;;  %4292 = vpow2.f32 %v3052_v6  ;;  %v461_v27 = vadd.f32 %v442_v10, %v211_v23  ;;  %v4086_v6 = vld [vmem:[#allocation4 + $0xe4] sm:$0xf]  ;;  %v3311_v9 = vld [vmem:[#allocation4 + $0xe8] sm:$0xf]  ;;  %v3292_v23 = vor.u32 %v4082_v18, %v3289_v20 }
  0xc5   : > { %v471_v19 = vadd.f32 1.0, %v4291_v15  ;;  %v4089_v10 = vld [vmem:[#allocation4 + $0xf4] sm:$0xf0]  ;;  %v3308_v11 = vor.u32 %v4086_v6, %v3305_v8  ;;  %1058 = vmatpush.bf16.msra.mxu0 %v3304_v7  ;;  %v3316_v15 = vor.u32 %v4087_v13, %v3313_v14  ;;  %v4541_v7 = vld [vmem:[%s4521_s26 + $0x18] sm:$0xff] }
  0xc6   : > { %4294 = vrcp.f32 %v470_v16  ;;  %v483_v37 = vand.u32 2147483648, %v470_v16  ;;  %v481_v39 = vand.u32 2147483647, %v470_v16  ;;  %vm477_vm2 = vweird.f32 %v470_v16  ;;  %v3231_v18 = vld [vmem:[#allocation4 + $0x48] sm:$0xf] }
  0xc7   : > { %4296 = vrcp.f32 %v471_v19  ;;  %v457_v24 = vpop.f32.mrf.mxu3  ;;  %v498_v35 = vand.u32 2147483648, %v471_v19  ;;  %v496_v41 = vand.u32 2147483647, %v471_v19  ;;  %vm492_vm3 = vweird.f32 %v471_v19  ;;  %1071 = vmatpush.bf16.msra.mxu1 %v3308_v11  ;;  %1097 = vmatpush.bf16.msra.mxu3 %v3316_v15  ;;  %v4066_v11 = vld [vmem:[#allocation4 + $0x44] sm:$0xf] }
  0xc8   : > { %v484_v46 = vor.u32 1.1754944e-38, %v483_v37  ;;  %vm482_vm6 = vcmp.eq.f32.partialorder %v481_v39, 8.507059e+37  ;;  %v3312_v12 = vor.u32 %v4089_v10, %v3311_v9  ;;  %v3296_v24 = vor.u32 %v4085_v22, %v3295_v21  ;;  %v3053_v39 = vld [vmem:[%s4521_s26 + $0x10] sm:$0xff]  ;;  %v4068_v10 = vld [vmem:[#allocation4 + $0x4c] sm:$0xf0] }
  0xc9   : > { %v499_v48 = vor.u32 1.1754944e-38, %v498_v35  ;;  %vm497_vm7 = vcmp.eq.f32.partialorder %v496_v41, 8.507059e+37  ;;  %v4079_v35 = vld [vmem:[#allocation4 + $0xac] sm:$0xf]  ;;  %v3255_v41 = vld [vmem:[#allocation4 + $0x80] sm:$0xf] }
  0xca   : > { %v4293_v26 = vpop.eup %4292  ;;  %1084 = vmatpush.bf16.msra.mxu2 %v3312_v12  ;;  %v3223_v9 = vld [vmem:[#allocation4 + $0x40] sm:$0xf]  ;;  %v3225_v15 = vld [vmem:[#allocation4 + $0x50] sm:$0xf0]  ;;  %v4067_v20 = vld [vmem:[#allocation4 + $0x4c] sm:$0xf] }
  0xcb   : > { %v506_v28 = vadd.f32 1.0, %v4293_v26  ;;  %v444_v29 = vpop.f32.mrf.mxu2  ;;  %v3297_v26 = vld [vmem:[#allocation4 + $0xd8] sm:$0xf0]  ;;  %1072 = vmatpush.bf16.msra.mxu1 %v3292_v23  ;;  %v3224_v14 = vor.u32 %v4068_v10, %v3223_v9 }
  0xcc   : > { %v4295_v30 = vpop.eup %4294  ;;  %v4080_v29 = vld [vmem:[#allocation4 + $0xac] sm:$0xf0]  ;;  %v3233_v22 = vld [vmem:[#allocation4 + $0x58] sm:$0xf0] }
  0xcd   : > { %v4297_v31 = vpop.eup %4296  ;;  %v473_v32 = vmul.f32 %v4295_v30, %v470_v16  ;;  %4298 = vrcp.f32 %v506_v28  ;;  %vm478_vm0 = vweird.f32 %v4295_v30  ;;  %v518_v60 = vand.u32 2147483648, %v506_v28  ;;  %v3287_v16 = vld [vmem:[#allocation4 + $0xc0] sm:$0xf] }
  0xce   : > { %v488_v33 = vmul.f32 %v4297_v31, %v471_v19  ;;  %4300 = vtanh.f32 %v461_v27  ;;  %vm493_vm1 = vweird.f32 %v4297_v31  ;;  %vm479_vm4 = vmor %vm477_vm2, %vm478_vm0  ;;  %vm512_vm9 = vweird.f32 %v506_v28  ;;  %1085 = vmatpush.bf16.msra.mxu2 %v3296_v24  ;;  %v3207_v24 = vld [vmem:[#allocation4 + $0x20] sm:$0xf] }
  0xcf   : > { %v474_v34 = vsub.f32 1.0, %v473_v32  ;;  %vm494_vm5 = vmor %vm492_vm3, %vm493_vm1  ;;  %v516_v61 = vand.u32 2147483647, %v506_v28  ;;  %v519_v63 = vor.u32 1.1754944e-38, %v518_v60  ;;  %v3288_v19 = vor.u32 %v4084_v17, %v3287_v16  ;;  %v3273_v32 = vld [vmem:[#allocation4 + $0xb0] sm:$0xf0] }
  0xd0   : > { %v489_v36 = vsub.f32 1.0, %v488_v33  ;;  %v3300_v27 = vor.u32 %v4083_v25, %v3297_v26  ;;  %v3279_v33 = vld [vmem:[#allocation4 + $0xa8] sm:$0xf]  ;;  %v3241_v60 = vld [vmem:[#allocation4 + $0x70] sm:$0xf0]  ;;  %v537_v16 = vunpack.c.h.bf16 %v4541_v7  ;;  %v3228_v17 = vor.u32 %v4066_v11, %v3225_v15 }
  0xd1   : > { %v475_v38 = vmul.f32 %v4295_v30, %v474_v34  ;;  %vm517_vm11 = vcmp.eq.f32.partialorder %v516_v61, 8.507059e+37  ;;  %1059 = vmatpush.bf16.msra.mxu0 %v3288_v19  ;;  %v4081_v34 = vld [vmem:[#allocation4 + $0xb4] sm:$0xf0]  ;;  %v3247_v61 = vld [vmem:[#allocation4 + $0x68] sm:$0xf]  ;;  %v3236_v23 = vor.u32 %v4067_v20, %v3233_v22 }
  0xd2   : > { %v490_v40 = vmul.f32 %v4297_v31, %v489_v36  ;;  %1098 = vmatpush.bf16.msra.mxu3 %v3300_v27  ;;  %v3280_v37 = vor.u32 %v4081_v34, %v3279_v33  ;;  %v4069_v19 = vld [vmem:[#allocation4 + $0x54] sm:$0xf0]  ;;  %v4064_v25 = vld [vmem:[#allocation4 + $0x2c] sm:$0xf0]  ;;  %v4062_v26 = vld [vmem:[#allocation4 + $0x24] sm:$0xf] }
  0xd3   : > { %v4299_v42 = vpop.eup %4298  ;;  %v476_v43 = vadd.f32 %v4295_v30, %v475_v38  ;;  %v3281_v38 = vld [vmem:[#allocation4 + $0xb8] sm:$0xf0]  ;;  %v3232_v21 = vor.u32 %v4069_v19, %v3231_v18 }
  0xd4   : > { %v4301_v44 = vpop.eup %4300  ;;  %v508_v45 = vmul.f32 %v4299_v42, %v506_v28  ;;  %v491_v47 = vadd.f32 %v4297_v31, %v490_v40  ;;  %vm513_vm8 = vweird.f32 %v4299_v42  ;;  %v3271_v28 = vld [vmem:[#allocation4 + $0xa0] sm:$0xf]  ;;  %v3284_v40 = vor.u32 %v4079_v35, %v3281_v38  ;;  %1086 = vmatpush.bf16.msra.mxu2 %v3280_v37  ;;  %v4063_v38 = vld [vmem:[#allocation4 + $0x2c] sm:$0xf] }
  0xd5   : > { %v480_v50 = vsel %vm479_vm4, %v4295_v30, %v476_v43  ;;  %vm514_vm10 = vmor %vm512_vm9, %vm513_vm8  ;;  %v4078_v30 = vld [vmem:[#allocation4 + $0xa4] sm:$0xf] }
  0xd6   : > { %v509_v51 = vsub.f32 1.0, %v508_v45  ;;  %v485_v52 = vsel %vm482_vm6, %v484_v46, %v480_v50  ;;  %v495_v53 = vsel %vm494_vm5, %v4297_v31, %v491_v47  ;;  %v3272_v31 = vor.u32 %v4080_v29, %v3271_v28  ;;  %v4074_v43 = vld [vmem:[#allocation4 + $0x84] sm:$0xf]  ;;  %1099 = vmatpush.bf16.msra.mxu3 %v3284_v40  ;;  %v3257_v45 = vld [vmem:[#allocation4 + $0x90] sm:$0xf0] }
  0xd7   : > { %v500_v54 = vsel %vm497_vm7, %v499_v48, %v495_v53  ;;  %v523_v55 = vmul.f32 %v4301_v44, %v485_v52  ;;  %v3276_v36 = vor.u32 %v4078_v30, %v3273_v32  ;;  %v3263_v46 = vld [vmem:[#allocation4 + $0x88] sm:$0xf]  ;;  %v4077_v47 = vld [vmem:[#allocation4 + $0x94] sm:$0xf0]  ;;  %v3260_v48 = vor.u32 %v4074_v43, %v3257_v45  ;;  %v4075_v50 = vld [vmem:[#allocation4 + $0x8c] sm:$0xf] }
  0xd8   : > { %v510_v56 = vmul.f32 %v4299_v42, %v509_v51  ;;  %v522_v57 = vmul.f32 %v500_v54, %v463_v49  ;;  %1060 = vmatpush.bf16.msra.mxu0 %v3272_v31  ;;  %v3264_v49 = vor.u32 %v4077_v47, %v3263_v46  ;;  %v3265_v51 = vld [vmem:[#allocation4 + $0x98] sm:$0xf0]  ;;  %v534_v52 = vunpack.c.l.bf16 %v3053_v39  ;;  %v3209_v30 = vld [vmem:[#allocation4 + $0x30] sm:$0xf0]  ;;  %v3215_v31 = vld [vmem:[#allocation4 + $0x28] sm:$0xf] }
  0xd9   : > { %1073 = vmatpush.bf16.msra.mxu1 %v3276_v36  ;;  %v535_v53 = vunpack.c.h.bf16 %v3053_v39  ;;  %v3268_v54 = vor.u32 %v4075_v50, %v3265_v51  ;;  %v3208_v29 = vor.u32 %v4064_v25, %v3207_v24  ;;  %v4065_v32 = vld [vmem:[#allocation4 + $0x34] sm:$0xf0]  ;;  %v3212_v37 = vor.u32 %v4062_v26, %v3209_v30  ;;  %v3217_v39 = vld [vmem:[#allocation4 + $0x38] sm:$0xf0]  ;;  %v4060_v43 = vld [vmem:[#allocation4 + $0xc] sm:$0xf0] }
  0xda   : > { %v4535_v58 = vadd.f32 %v523_v55, %v522_v57  ;;  %v511_v59 = vadd.f32 %v4299_v42, %v510_v56  ;;  %1087 = vmatpush.bf16.msra.mxu2 %v3264_v49  ;;  %v3239_v55 = vld [vmem:[#allocation4 + $0x60] sm:$0xf]  ;;  %v4072_v56 = vld [vmem:[#allocation4 + $0x6c] sm:$0xf0]  ;;  %v4070_v57 = vld [vmem:[#allocation4 + $0x64] sm:$0xf]  ;;  %v3216_v35 = vor.u32 %v4065_v32, %v3215_v31  ;;  %v3220_v40 = vor.u32 %v4063_v38, %v3217_v39 }
  0xdb   : > { %1100 = vmatpush.bf16.msra.mxu3 %v3268_v54  ;;  %v4058_v46 = vld [vmem:[#allocation4 + $0x4] sm:$0xf]  ;;  %v3193_v47 = vld [vmem:[#allocation4 + $0x10] sm:$0xf0]  ;;  %v4120_v38 = vld [vmem:[#allocation4 + $0xec] sm:$0xf0] }
  0xdc   : > { %4302 = vtanh.f32 %v4535_v58  ;;  %v515_v62 = vsel %vm514_vm10, %v4299_v42, %v511_v59  ;;  %v4076_v42 = vld [vmem:[#allocation4 + $0x8c] sm:$0xf0]  ;;  %v3240_v59 = vor.u32 %v4072_v56, %v3239_v55  ;;  %v3196_v51 = vor.u32 %v4058_v46, %v3193_v47  ;;  %v4059_v55 = vld [vmem:[#allocation4 + $0xc] sm:$0xf]  ;;  %v3201_v56 = vld [vmem:[#allocation4 + $0x18] sm:$0xf0] }
  0xdd   : > { %v520_v1 = vsel %vm517_vm11, %v519_v63, %v515_v62  ;;  %v3256_v44 = vor.u32 %v4076_v42, %v3255_v41  ;;  %1074 = vmatpush.bf16.msra.mxu1 %v3260_v48  ;;  %v4073_v62 = vld [vmem:[#allocation4 + $0x74] sm:$0xf0]  ;;  %v3191_v42 = vld [vmem:[#allocation4] sm:$0xf]  ;;  %v3199_v48 = vld [vmem:[#allocation4 + $0x8] sm:$0xf] }
  0xde   : > { %v3192_v45 = vor.u32 %v4060_v43, %v3191_v42  ;;  %v4118_v39 = vld [vmem:[#allocation4 + $0xe4] sm:$0xf]  ;;  %v3445_v42 = vld [vmem:[#allocation4 + $0xe8] sm:$0xf]  ;;  %v4121_v43 = vld [vmem:[#allocation4 + $0xf4] sm:$0xf0] }
  0xdf   : > { %1061 = vmatpush.bf16.msra.mxu0 %v3256_v44  ;;  %v4119_v46 = vld [vmem:[#allocation4 + $0xec] sm:$0xf]  ;;  %v3447_v47 = vld [vmem:[#allocation4 + $0xf8] sm:$0xf0] }
  0xe2   : > { %v4303_v0 = vpop.eup %4302 }
  0xe3   : > { %v526_v2 = vmul.f32 %v4303_v0, %v520_v1  ;;  %v3244_v1 = vor.u32 %v4070_v57, %v3241_v60  ;;  %1062 = vmatpush.bf16.msra.mxu0 %v3240_v59  ;;  %v536_v60 = vunpack.c.l.bf16 %v4541_v7 }
  0xe5   : > { %v529_v3 = vpack.c.bf16 %v526_v2, %v526_v2  ;;  %v3248_v2 = vor.u32 %v4073_v62, %v3247_v61  ;;  %1075 = vmatpush.bf16.msra.mxu1 %v3244_v1  ;;  %v3204_v61 = vor.u32 %v4059_v55, %v3201_v56  ;;  %v4117_v55 = vld [vmem:[#allocation4 + $0xd4] sm:$0xf0] }
  0xe7   : > { %530 = vst [vmem:[%s4526_s29] sm:$0xf] %v529_v3  ;;  %740 = vmatmul.bf16.vlgmr.msrb.gmra.mxu0 %v529_v3  ;;  %753 = vmatmul.bf16.vlgmr.msrb.gmra.mxu1 %v529_v3 }
  0xe8   : > { %766 = vmatmul.bf16.vlgmr.msrb.gmra.mxu2 %v529_v3  ;;  %779 = vmatmul.bf16.vlgmr.msrb.gmra.mxu3 %v529_v3  ;;  %v4071_v3 = vld [vmem:[#allocation4 + $0x6c] sm:$0xf] }
  0xe9   : > { %v3252_v8 = vor.u32 %v4071_v3, %v3249_v4  ;;  %1088 = vmatpush.bf16.msra.mxu2 %v3248_v2  ;;  %1063 = vmatpush.bf16.msra.mxu0 %v3224_v14 }
  0xea   : > { %1076 = vmatpush.bf16.msra.mxu1 %v3228_v17 }
  0xeb   : > { %1101 = vmatpush.bf16.msra.mxu3 %v3252_v8 }
  0xed   : > { %1089 = vmatpush.bf16.msra.mxu2 %v3232_v21  ;;  %1064 = vmatpush.bf16.msra.mxu0 %v3208_v29 }
  0xee   : > { %1077 = vmatpush.bf16.msra.mxu1 %v3212_v37 }
  0xef   : > { %1102 = vmatpush.bf16.msra.mxu3 %v3236_v23 }
  0xf1   : > { %1090 = vmatpush.bf16.msra.mxu2 %v3216_v35  ;;  %1065 = vmatpush.bf16.msra.mxu0 %v3192_v45  ;;  %v3446_v45 = vor.u32 %v4121_v43, %v3445_v42  ;;  %v3357_v42 = vld [vmem:[#allocation4 + $0x40] sm:$0xf]  ;;  %v4100_v43 = vld [vmem:[#allocation4 + $0x4c] sm:$0xf0] }
  0xf2   : > { %1078 = vmatpush.bf16.msra.mxu1 %v3196_v51  ;;  %v4114_v51 = vld [vmem:[#allocation4 + $0xc4] sm:$0xf] }
  0xf3   : > { %1103 = vmatpush.bf16.msra.mxu3 %v3220_v40 }
  0xf7   : > { %1104 = vmatpush.bf16.msra.mxu3 %v3204_v61 }
 0x164   : > { %v741_v63 = vpop.f32.mrf.mxu0  ;;  %v754_v0 = vpop.f32.mrf.mxu1 }
 0x165   : > { %v784_v5 = vadd.f32 %v741_v63, %v534_v52  ;;  %v785_v6 = vadd.f32 %v754_v0, %v535_v53  ;;  %v4061_v52 = vld [vmem:[#allocation4 + $0x14] sm:$0xf0] }
 0x166   : > { %v3200_v54 = vor.u32 %v4061_v52, %v3199_v48  ;;  %v3450_v48 = vor.u32 %v4119_v46, %v3447_v47  ;;  %v3358_v47 = vor.u32 %v4100_v43, %v3357_v42 }
 0x167   : > { %v3183_v12 = vmul.f32 -1.442695, %v784_v5  ;;  %v3184_v13 = vmul.f32 -1.442695, %v785_v6 }
 0x168   : > { %1091 = vmatpush.bf16.msra.mxu2 %v3200_v54  ;;  %1423 = vmatpush.bf16.msrb.mxu3 %v3450_v48  ;;  %v3429_v54 = vld [vmem:[#allocation4 + $0xc8] sm:$0xf]  ;;  %v3359_v48 = vld [vmem:[#allocation4 + $0x50] sm:$0xf0] }
 0x169   : > { %4304 = vpow2.f32 %v3183_v12 }
 0x16a   : > { %4306 = vpow2.f32 %v3184_v13 }
 0x16b   : > { %v767_v27 = vpop.f32.mrf.mxu2  ;;  %v780_v28 = vpop.f32.mrf.mxu3 }
 0x16c   : > { %v787_v33 = vadd.f32 %v780_v28, %v537_v16  ;;  %v743_v34 = vpop.f32.mrf.mxu0  ;;  %v756_v36 = vpop.f32.mrf.mxu1  ;;  %v786_v1 = vadd.f32 %v767_v27, %v536_v60  ;;  %1410 = vmatpush.bf16.msrb.mxu2 %v3446_v45  ;;  %v3431_v60 = vld [vmem:[#allocation4 + $0xd8] sm:$0xf0] }
 0x16e   : > { %v3185_v41 = vmul.f32 -1.442695, %v787_v33 }
 0x16f   : > { %v4305_v44 = vpop.eup %4304 }
 0x170   : > { %v4307_v49 = vpop.eup %4306  ;;  %v795_v50 = vadd.f32 1.0, %v4305_v44  ;;  %4308 = vpow2.f32 %v3185_v41  ;;  %v3439_v41 = vld [vmem:[#allocation4 + $0xf0] sm:$0xf0] }
 0x171   : > { %v796_v53 = vadd.f32 1.0, %v4307_v49  ;;  %v3442_v44 = vor.u32 %v4118_v39, %v3439_v41  ;;  %v3421_v49 = vld [vmem:[#allocation4 + $0xc0] sm:$0xf] }
 0x172   : > { %4310 = vrcp.f32 %v795_v50  ;;  %v808_v8 = vand.u32 2147483648, %v795_v50  ;;  %v806_v11 = vand.u32 2147483647, %v795_v50  ;;  %vm802_vm14 = vweird.f32 %v795_v50 }
 0x173   : > { %4312 = vrcp.f32 %v796_v53  ;;  %v769_v57 = vpop.f32.mrf.mxu2  ;;  %v782_v59 = vpop.f32.mrf.mxu3  ;;  %v823_v9 = vand.u32 2147483648, %v796_v53  ;;  %v821_v7 = vand.u32 2147483647, %v796_v53  ;;  %vm817_vm15 = vweird.f32 %v796_v53  ;;  %1397 = vmatpush.bf16.msrb.mxu1 %v3442_v44  ;;  %v4098_v44 = vld [vmem:[#allocation4 + $0x44] sm:$0xf] }
 0x174   : > { %v809_v15 = vor.u32 1.1754944e-38, %v808_v8  ;;  %vm807_vm2 = vcmp.eq.f32.partialorder %v806_v11, 8.507059e+37  ;;  %v3430_v57 = vor.u32 %v4117_v55, %v3429_v54  ;;  %v4115_v59 = vld [vmem:[#allocation4 + $0xcc] sm:$0xf]  ;;  %v3367_v55 = vld [vmem:[#allocation4 + $0x58] sm:$0xf0] }
 0x175   : > { %v824_v18 = vor.u32 1.1754944e-38, %v823_v9  ;;  %vm822_vm3 = vcmp.eq.f32.partialorder %v821_v7, 8.507059e+37  ;;  %v3434_v61 = vor.u32 %v4115_v59, %v3431_v60  ;;  %v4111_v8 = vld [vmem:[#allocation4 + $0xac] sm:$0xf]  ;;  %v3415_v9 = vld [vmem:[#allocation4 + $0xb8] sm:$0xf0] }
 0x176   : > { %v4309_v62 = vpop.eup %4308  ;;  %1411 = vmatpush.bf16.msrb.mxu2 %v3430_v57  ;;  %v3418_v11 = vor.u32 %v4111_v8, %v3415_v9  ;;  %v4108_v7 = vld [vmem:[#allocation4 + $0x8c] sm:$0xf0]  ;;  %v3341_v57 = vld [vmem:[#allocation4 + $0x20] sm:$0xf]  ;;  %v4094_v60 = vld [vmem:[#allocation4 + $0x24] sm:$0xf] }
 0x177   : > { %v831_v63 = vadd.f32 1.0, %v4309_v62  ;;  %v3405_v62 = vld [vmem:[#allocation4 + $0xa0] sm:$0xf]  ;;  %1424 = vmatpush.bf16.msrb.mxu3 %v3434_v61  ;;  %v4096_v59 = vld [vmem:[#allocation4 + $0x2c] sm:$0xf0] }
 0x178   : > { %v4311_v0 = vpop.eup %4310  ;;  %v4095_v9 = vld [vmem:[#allocation4 + $0x2c] sm:$0xf] }
 0x179   : > { %v4313_v2 = vpop.eup %4312  ;;  %v798_v3 = vmul.f32 %v4311_v0, %v795_v50  ;;  %4314 = vrcp.f32 %v831_v63  ;;  %vm803_vm12 = vweird.f32 %v4311_v0  ;;  %v843_v30 = vand.u32 2147483648, %v831_v63  ;;  %v4116_v50 = vld [vmem:[#allocation4 + $0xcc] sm:$0xf0] }
 0x17a   : > { %v813_v4 = vmul.f32 %v4313_v2, %v796_v53  ;;  %4316 = vtanh.f32 %v786_v1  ;;  %vm818_vm13 = vweird.f32 %v4313_v2  ;;  %vm804_vm0 = vmor %vm802_vm14, %vm803_vm12  ;;  %vm837_vm5 = vweird.f32 %v831_v63  ;;  %v3423_v53 = vld [vmem:[#allocation4 + $0xd0] sm:$0xf0] }
 0x17b   : > { %v799_v5 = vsub.f32 1.0, %v798_v3  ;;  %vm819_vm1 = vmor %vm817_vm15, %vm818_vm13  ;;  %v841_v31 = vand.u32 2147483647, %v831_v63  ;;  %v844_v33 = vor.u32 1.1754944e-38, %v843_v30  ;;  %v3422_v52 = vor.u32 %v4116_v50, %v3421_v49  ;;  %v3413_v3 = vld [vmem:[#allocation4 + $0xa8] sm:$0xf]  ;;  %1425 = vmatpush.bf16.msrb.mxu3 %v3418_v11 }
 0x17c   : > { %v814_v6 = vsub.f32 1.0, %v813_v4  ;;  %v3426_v56 = vor.u32 %v4114_v51, %v3423_v53  ;;  %v4113_v4 = vld [vmem:[#allocation4 + $0xb4] sm:$0xf0]  ;;  %v3375_v30 = vld [vmem:[#allocation4 + $0x70] sm:$0xf0]  ;;  %v3362_v50 = vor.u32 %v4098_v44, %v3359_v48 }
 0x17d   : > { %v800_v10 = vmul.f32 %v4311_v0, %v799_v5  ;;  %vm842_vm7 = vcmp.eq.f32.partialorder %v841_v31, 8.507059e+37  ;;  %v3381_v31 = vld [vmem:[#allocation4 + $0x68] sm:$0xf]  ;;  %v4099_v53 = vld [vmem:[#allocation4 + $0x4c] sm:$0xf] }
 0x17e   : > { %v815_v12 = vmul.f32 %v4313_v2, %v814_v6  ;;  %1398 = vmatpush.bf16.msrb.mxu1 %v3426_v56  ;;  %v3414_v6 = vor.u32 %v4113_v4, %v3413_v3  ;;  %v3365_v51 = vld [vmem:[#allocation4 + $0x48] sm:$0xf]  ;;  %v3370_v56 = vor.u32 %v4099_v53, %v3367_v55 }
 0x17f   : > { %v4315_v13 = vpop.eup %4314  ;;  %v801_v14 = vadd.f32 %v4311_v0, %v800_v10  ;;  %v3187_v10 = vld [vmem:[%s4521_s26 + $0x20] sm:$0xff] }
 0x180   : > { %v816_v16 = vadd.f32 %v4313_v2, %v815_v12  ;;  %v833_v17 = vmul.f32 %v4315_v13, %v831_v63  ;;  %v4317_v20 = vpop.eup %4316  ;;  %vm838_vm4 = vweird.f32 %v4315_v13  ;;  %v4112_v63 = vld [vmem:[#allocation4 + $0xac] sm:$0xf0]  ;;  %1412 = vmatpush.bf16.msrb.mxu2 %v3414_v6  ;;  %v3389_v12 = vld [vmem:[#allocation4 + $0x80] sm:$0xf] }
 0x181   : > { %v805_v19 = vsel %vm804_vm0, %v4311_v0, %v801_v14  ;;  %vm839_vm6 = vmor %vm837_vm5, %vm838_vm4  ;;  %v4110_v0 = vld [vmem:[#allocation4 + $0xa4] sm:$0xf]  ;;  %v3406_v1 = vor.u32 %v4112_v63, %v3405_v62  ;;  %v3390_v14 = vor.u32 %v4108_v7, %v3389_v12  ;;  %v3342_v63 = vor.u32 %v4096_v59, %v3341_v57  ;;  %v3325_v7 = vld [vmem:[#allocation4] sm:$0xf] }
 0x182   : > { %v810_v21 = vsel %vm807_vm2, %v809_v15, %v805_v19  ;;  %v820_v22 = vsel %vm819_vm1, %v4313_v2, %v816_v16  ;;  %v834_v23 = vsub.f32 1.0, %v833_v17  ;;  %v3407_v2 = vld [vmem:[#allocation4 + $0xb0] sm:$0xf0]  ;;  %v3397_v16 = vld [vmem:[#allocation4 + $0x88] sm:$0xf] }
 0x183   : > { %v825_v24 = vsel %vm822_vm3, %v824_v18, %v820_v22  ;;  %v848_v25 = vmul.f32 %v4317_v20, %v810_v21  ;;  %v3410_v5 = vor.u32 %v4110_v0, %v3407_v2  ;;  %v3391_v15 = vld [vmem:[#allocation4 + $0x90] sm:$0xf0]  ;;  %v4109_v17 = vld [vmem:[#allocation4 + $0x94] sm:$0xf0]  ;;  %v4107_v20 = vld [vmem:[#allocation4 + $0x8c] sm:$0xf]  ;;  %v860_v22 = vunpack.c.l.bf16 %v3187_v10 }
 0x184   : > { %v847_v26 = vmul.f32 %v825_v24, %v4535_v58  ;;  %v835_v27 = vmul.f32 %v4315_v13, %v834_v23  ;;  %v3437_v58 = vld [vmem:[#allocation4 + $0xe0] sm:$0xf]  ;;  %v3398_v19 = vor.u32 %v4109_v17, %v3397_v16  ;;  %v3399_v21 = vld [vmem:[#allocation4 + $0x98] sm:$0xf0]  ;;  %v861_v23 = vunpack.c.h.bf16 %v3187_v10  ;;  %v3343_v0 = vld [vmem:[#allocation4 + $0x30] sm:$0xf0] }
 0x185   : > { %v3438_v40 = vor.u32 %v4120_v38, %v3437_v58  ;;  %1399 = vmatpush.bf16.msrb.mxu1 %v3410_v5  ;;  %v3402_v24 = vor.u32 %v4107_v20, %v3399_v21  ;;  %v3383_v58 = vld [vmem:[#allocation4 + $0x78] sm:$0xf0]  ;;  %v4097_v2 = vld [vmem:[#allocation4 + $0x34] sm:$0xf0]  ;;  %v3346_v6 = vor.u32 %v4094_v60, %v3343_v0  ;;  %v4090_v16 = vld [vmem:[#allocation4 + $0x4] sm:$0xf] }
 0x186   : > { %v4546_v28 = vadd.f32 %v848_v25, %v847_v26  ;;  %v836_v29 = vadd.f32 %v4315_v13, %v835_v27  ;;  %1413 = vmatpush.bf16.msrb.mxu2 %v3398_v19  ;;  %v3373_v25 = vld [vmem:[#allocation4 + $0x60] sm:$0xf]  ;;  %v4104_v26 = vld [vmem:[#allocation4 + $0x6c] sm:$0xf0]  ;;  %v4102_v27 = vld [vmem:[#allocation4 + $0x64] sm:$0xf] }
 0x187   : > { %1384 = vmatpush.bf16.msrb.mxu0 %v3438_v40  ;;  %1426 = vmatpush.bf16.msrb.mxu3 %v3402_v24  ;;  %v4552_v40 = vld [vmem:[%s4521_s26 + $0x28] sm:$0xff]  ;;  %v3327_v17 = vld [vmem:[#allocation4 + $0x10] sm:$0xf0] }
 0x188   : > { %4318 = vtanh.f32 %v4546_v28  ;;  %v840_v32 = vsel %vm839_vm6, %v4315_v13, %v836_v29  ;;  %v4106_v13 = vld [vmem:[#allocation4 + $0x84] sm:$0xf]  ;;  %v3374_v29 = vor.u32 %v4104_v26, %v3373_v25  ;;  %v863_v49 = vunpack.c.h.bf16 %v4552_v40  ;;  %v3351_v10 = vld [vmem:[#allocation4 + $0x38] sm:$0xf0]  ;;  %v4091_v25 = vld [vmem:[#allocation4 + $0xc] sm:$0xf] }
 0x189   : > { %v845_v36 = vsel %vm842_vm7, %v844_v33, %v840_v32  ;;  %v3394_v18 = vor.u32 %v4106_v13, %v3391_v15  ;;  %v4105_v32 = vld [vmem:[#allocation4 + $0x74] sm:$0xf0]  ;;  %v3354_v11 = vor.u32 %v4095_v9, %v3351_v10  ;;  %v4092_v13 = vld [vmem:[#allocation4 + $0xc] sm:$0xf0]  ;;  %v3330_v21 = vor.u32 %v4090_v16, %v3327_v17  ;;  %v3335_v26 = vld [vmem:[#allocation4 + $0x18] sm:$0xf0] }
 0x18a   : > { %v3326_v15 = vor.u32 %v4092_v13, %v3325_v7  ;;  %v4152_v9 = vld [vmem:[#allocation4 + $0xec] sm:$0xf0]  ;;  %v4150_v10 = vld [vmem:[#allocation4 + $0xe4] sm:$0xf]  ;;  %v3579_v7 = vld [vmem:[#allocation4 + $0xe8] sm:$0xf] }
 0x18b   : > { %1385 = vmatpush.bf16.msrb.mxu0 %v3422_v52  ;;  %1400 = vmatpush.bf16.msrb.mxu1 %v3394_v18  ;;  %v4101_v52 = vld [vmem:[#allocation4 + $0x54] sm:$0xf0]  ;;  %v3333_v18 = vld [vmem:[#allocation4 + $0x8] sm:$0xf]  ;;  %v4151_v16 = vld [vmem:[#allocation4 + $0xec] sm:$0xf] }
 0x18c   : > { %v3366_v54 = vor.u32 %v4101_v52, %v3365_v51  ;;  %v4153_v13 = vld [vmem:[#allocation4 + $0xf4] sm:$0xf0]  ;;  %v3581_v17 = vld [vmem:[#allocation4 + $0xf8] sm:$0xf0] }
 0x18e   : > { %v4319_v34 = vpop.eup %4318 }
 0x18f   : > { %v851_v37 = vmul.f32 %v4319_v34, %v845_v36  ;;  %1386 = vmatpush.bf16.msrb.mxu0 %v3406_v1  ;;  %v3378_v36 = vor.u32 %v4102_v27, %v3375_v30  ;;  %v3349_v1 = vld [vmem:[#allocation4 + $0x28] sm:$0xf]  ;;  %v862_v30 = vunpack.c.l.bf16 %v4552_v40 }
 0x190   : > { %v3350_v8 = vor.u32 %v4097_v2, %v3349_v1 }
 0x191   : > { %v854_v35 = vpack.c.bf16 %v851_v37, %v851_v37  ;;  %v3382_v37 = vor.u32 %v4105_v32, %v3381_v31  ;;  %1401 = vmatpush.bf16.msrb.mxu1 %v3378_v36  ;;  %v3338_v31 = vor.u32 %v4091_v25, %v3335_v26  ;;  %v4149_v25 = vld [vmem:[#allocation4 + $0xd4] sm:$0xf0] }
 0x193   : > { %3186 = vst [vmem:[%s4526_s29 + $0x4] sm:$0xf] %v854_v35  ;;  %1066 = vmatmul.bf16.vlgmr.msra.gmra.mxu0 %v854_v35  ;;  %1079 = vmatmul.bf16.vlgmr.msra.gmra.mxu1 %v854_v35 }
 0x194   : > { %1092 = vmatmul.bf16.vlgmr.msra.gmra.mxu2 %v854_v35  ;;  %1105 = vmatmul.bf16.vlgmr.msra.gmra.mxu3 %v854_v35  ;;  %v4103_v35 = vld [vmem:[#allocation4 + $0x6c] sm:$0xf] }
 0x195   : > { %1387 = vmatpush.bf16.msrb.mxu0 %v3390_v14  ;;  %v3386_v41 = vor.u32 %v4103_v35, %v3383_v58  ;;  %1414 = vmatpush.bf16.msrb.mxu2 %v3382_v37 }
 0x196   : > { %1402 = vmatpush.bf16.msrb.mxu1 %v3362_v50 }
 0x197   : > { %1427 = vmatpush.bf16.msrb.mxu3 %v3386_v41 }
 0x199   : > { %1388 = vmatpush.bf16.msrb.mxu0 %v3374_v29  ;;  %1415 = vmatpush.bf16.msrb.mxu2 %v3366_v54 }
 0x19a   : > { %1403 = vmatpush.bf16.msrb.mxu1 %v3346_v6 }
 0x19b   : > { %1428 = vmatpush.bf16.msrb.mxu3 %v3370_v56 }
 0x19d   : > { %1389 = vmatpush.bf16.msrb.mxu0 %v3358_v47  ;;  %1416 = vmatpush.bf16.msrb.mxu2 %v3350_v8 }
 0x19e   : > { %1404 = vmatpush.bf16.msrb.mxu1 %v3330_v21  ;;  %v4146_v21 = vld [vmem:[#allocation4 + $0xc4] sm:$0xf] }
 0x19f   : > { %1429 = vmatpush.bf16.msrb.mxu3 %v3354_v11 }
 0x1a1   : > { %1390 = vmatpush.bf16.msrb.mxu0 %v3342_v63 }
 0x1a3   : > { %1430 = vmatpush.bf16.msrb.mxu3 %v3338_v31 }
 0x1a5   : > { %1391 = vmatpush.bf16.msrb.mxu0 %v3326_v15  ;;  %v3580_v15 = vor.u32 %v4153_v13, %v3579_v7  ;;  %v3491_v7 = vld [vmem:[#allocation4 + $0x40] sm:$0xf]  ;;  %v4132_v13 = vld [vmem:[#allocation4 + $0x4c] sm:$0xf0] }
 0x210   : > { %v1067_v33 = vpop.f32.mrf.mxu0  ;;  %v1080_v34 = vpop.f32.mrf.mxu1 }
 0x211   : > { %v1110_v38 = vadd.f32 %v1067_v33, %v860_v22  ;;  %v1111_v39 = vadd.f32 %v1080_v34, %v861_v23  ;;  %v4093_v22 = vld [vmem:[#allocation4 + $0x14] sm:$0xf0] }
 0x212   : > { %v3334_v24 = vor.u32 %v4093_v22, %v3333_v18  ;;  %v3584_v18 = vor.u32 %v4151_v16, %v3581_v17  ;;  %v3492_v17 = vor.u32 %v4132_v13, %v3491_v7 }
 0x213   : > { %v3317_v45 = vmul.f32 -1.442695, %v1110_v38  ;;  %v3318_v46 = vmul.f32 -1.442695, %v1111_v39 }
 0x214   : > { %1417 = vmatpush.bf16.msrb.mxu2 %v3334_v24  ;;  %1749 = vmatpush.bf16.msra.mxu3 %v3584_v18  ;;  %v3563_v24 = vld [vmem:[#allocation4 + $0xc8] sm:$0xf]  ;;  %v3493_v18 = vld [vmem:[#allocation4 + $0x50] sm:$0xf0] }
 0x215   : > { %4320 = vpow2.f32 %v3317_v45 }
 0x216   : > { %4322 = vpow2.f32 %v3318_v46 }
 0x217   : > { %v1093_v61 = vpop.f32.mrf.mxu2  ;;  %v1106_v62 = vpop.f32.mrf.mxu3 }
 0x218   : > { %v1113_v3 = vadd.f32 %v1106_v62, %v863_v49  ;;  %v1069_v4 = vpop.f32.mrf.mxu0  ;;  %v1082_v5 = vpop.f32.mrf.mxu1  ;;  %v1112_v36 = vadd.f32 %v1093_v61, %v862_v30  ;;  %1736 = vmatpush.bf16.msra.mxu2 %v3580_v15  ;;  %v3565_v30 = vld [vmem:[#allocation4 + $0xd8] sm:$0xf0] }
 0x21a   : > { %v3319_v12 = vmul.f32 -1.442695, %v1113_v3 }
 0x21b   : > { %v4321_v14 = vpop.eup %4320 }
 0x21c   : > { %v4323_v19 = vpop.eup %4322  ;;  %v1121_v20 = vadd.f32 1.0, %v4321_v14  ;;  %4324 = vpow2.f32 %v3319_v12  ;;  %v3573_v12 = vld [vmem:[#allocation4 + $0xf0] sm:$0xf0] }
 0x21d   : > { %v1122_v23 = vadd.f32 1.0, %v4323_v19  ;;  %v3576_v14 = vor.u32 %v4150_v10, %v3573_v12  ;;  %v3555_v19 = vld [vmem:[#allocation4 + $0xc0] sm:$0xf] }
 0x21e   : > { %4326 = vrcp.f32 %v1121_v20  ;;  %v1134_v41 = vand.u32 2147483648, %v1121_v20  ;;  %v1132_v44 = vand.u32 2147483647, %v1121_v20  ;;  %vm1128_vm10 = vweird.f32 %v1121_v20 }
 0x21f   : > { %4328 = vrcp.f32 %v1122_v23  ;;  %v1095_v27 = vpop.f32.mrf.mxu2  ;;  %v1108_v29 = vpop.f32.mrf.mxu3  ;;  %v1149_v42 = vand.u32 2147483648, %v1122_v23  ;;  %v1147_v40 = vand.u32 2147483647, %v1122_v23  ;;  %vm1143_vm11 = vweird.f32 %v1122_v23  ;;  %1723 = vmatpush.bf16.msra.mxu1 %v3576_v14  ;;  %v4130_v14 = vld [vmem:[#allocation4 + $0x44] sm:$0xf] }
 0x220   : > { %v1135_v48 = vor.u32 1.1754944e-38, %v1134_v41  ;;  %vm1133_vm14 = vcmp.eq.f32.partialorder %v1132_v44, 8.507059e+37  ;;  %v3564_v27 = vor.u32 %v4149_v25, %v3563_v24  ;;  %v4147_v29 = vld [vmem:[#allocation4 + $0xcc] sm:$0xf]  ;;  %v3501_v25 = vld [vmem:[#allocation4 + $0x58] sm:$0xf0] }
 0x221   : > { %v1150_v51 = vor.u32 1.1754944e-38, %v1149_v42  ;;  %vm1148_vm15 = vcmp.eq.f32.partialorder %v1147_v40, 8.507059e+37  ;;  %v3568_v31 = vor.u32 %v4147_v29, %v3565_v30  ;;  %v4143_v41 = vld [vmem:[#allocation4 + $0xac] sm:$0xf]  ;;  %v3549_v42 = vld [vmem:[#allocation4 + $0xb8] sm:$0xf0] }
 0x222   : > { %v4325_v32 = vpop.eup %4324  ;;  %1737 = vmatpush.bf16.msra.mxu2 %v3564_v27  ;;  %v3552_v44 = vor.u32 %v4143_v41, %v3549_v42  ;;  %v4140_v40 = vld [vmem:[#allocation4 + $0x8c] sm:$0xf0]  ;;  %v3475_v27 = vld [vmem:[#allocation4 + $0x20] sm:$0xf]  ;;  %v4126_v30 = vld [vmem:[#allocation4 + $0x24] sm:$0xf] }
 0x223   : > { %v1157_v33 = vadd.f32 1.0, %v4325_v32  ;;  %v3539_v32 = vld [vmem:[#allocation4 + $0xa0] sm:$0xf]  ;;  %1750 = vmatpush.bf16.msra.mxu3 %v3568_v31  ;;  %v4128_v29 = vld [vmem:[#allocation4 + $0x2c] sm:$0xf0] }
 0x224   : > { %v4327_v34 = vpop.eup %4326  ;;  %v4127_v42 = vld [vmem:[#allocation4 + $0x2c] sm:$0xf] }
 0x225   : > { %v4329_v37 = vpop.eup %4328  ;;  %v1124_v35 = vmul.f32 %v4327_v34, %v1121_v20  ;;  %4330 = vrcp.f32 %v1157_v33  ;;  %vm1129_vm8 = vweird.f32 %v4327_v34  ;;  %v1169_v0 = vand.u32 2147483648, %v1157_v33  ;;  %v4148_v20 = vld [vmem:[#allocation4 + $0xcc] sm:$0xf0] }
 0x226   : > { %v1139_v58 = vmul.f32 %v4329_v37, %v1122_v23  ;;  %4332 = vtanh.f32 %v1112_v36  ;;  %vm1144_vm9 = vweird.f32 %v4329_v37  ;;  %vm1130_vm12 = vmor %vm1128_vm10, %vm1129_vm8  ;;  %vm1163_vm1 = vweird.f32 %v1157_v33  ;;  %v3557_v23 = vld [vmem:[#allocation4 + $0xd0] sm:$0xf0] }
 0x227   : > { %v1125_v38 = vsub.f32 1.0, %v1124_v35  ;;  %vm1145_vm13 = vmor %vm1143_vm11, %vm1144_vm9  ;;  %v1167_v1 = vand.u32 2147483647, %v1157_v33  ;;  %v1170_v3 = vor.u32 1.1754944e-38, %v1169_v0  ;;  %v3556_v22 = vor.u32 %v4148_v20, %v3555_v19  ;;  %v3547_v35 = vld [vmem:[#allocation4 + $0xa8] sm:$0xf]  ;;  %1751 = vmatpush.bf16.msra.mxu3 %v3552_v44 }
 0x228   : > { %v1140_v39 = vsub.f32 1.0, %v1139_v58  ;;  %v3560_v26 = vor.u32 %v4146_v21, %v3557_v23  ;;  %v4145_v58 = vld [vmem:[#allocation4 + $0xb4] sm:$0xf0]  ;;  %v3509_v0 = vld [vmem:[#allocation4 + $0x70] sm:$0xf0]  ;;  %v3496_v20 = vor.u32 %v4130_v14, %v3493_v18 }
 0x229   : > { %v1126_v43 = vmul.f32 %v4327_v34, %v1125_v38  ;;  %vm1168_vm3 = vcmp.eq.f32.partialorder %v1167_v1, 8.507059e+37  ;;  %v3515_v1 = vld [vmem:[#allocation4 + $0x68] sm:$0xf]  ;;  %v4131_v23 = vld [vmem:[#allocation4 + $0x4c] sm:$0xf] }
 0x22a   : > { %v1141_v45 = vmul.f32 %v4329_v37, %v1140_v39  ;;  %1724 = vmatpush.bf16.msra.mxu1 %v3560_v26  ;;  %v3548_v39 = vor.u32 %v4145_v58, %v3547_v35  ;;  %v3499_v21 = vld [vmem:[#allocation4 + $0x48] sm:$0xf]  ;;  %v3504_v26 = vor.u32 %v4131_v23, %v3501_v25 }
 0x22b   : > { %v4331_v46 = vpop.eup %4330  ;;  %v1127_v47 = vadd.f32 %v4327_v34, %v1126_v43  ;;  %v3321_v43 = vld [vmem:[%s4521_s26 + $0x30] sm:$0xff] }
 0x22c   : > { %v1142_v49 = vadd.f32 %v4329_v37, %v1141_v45  ;;  %v1159_v50 = vmul.f32 %v4331_v46, %v1157_v33  ;;  %v4333_v53 = vpop.eup %4332  ;;  %vm1164_vm0 = vweird.f32 %v4331_v46  ;;  %v4144_v33 = vld [vmem:[#allocation4 + $0xac] sm:$0xf0]  ;;  %1738 = vmatpush.bf16.msra.mxu2 %v3548_v39  ;;  %v3523_v45 = vld [vmem:[#allocation4 + $0x80] sm:$0xf] }
 0x22d   : > { %v1131_v52 = vsel %vm1130_vm12, %v4327_v34, %v1127_v47  ;;  %vm1165_vm2 = vmor %vm1163_vm1, %vm1164_vm0  ;;  %v4142_v34 = vld [vmem:[#allocation4 + $0xa4] sm:$0xf]  ;;  %v3540_v36 = vor.u32 %v4144_v33, %v3539_v32  ;;  %v3524_v47 = vor.u32 %v4140_v40, %v3523_v45  ;;  %v3476_v33 = vor.u32 %v4128_v29, %v3475_v27  ;;  %v3459_v40 = vld [vmem:[#allocation4] sm:$0xf] }
 0x22e   : > { %v1136_v54 = vsel %vm1133_vm14, %v1135_v48, %v1131_v52  ;;  %v1146_v55 = vsel %vm1145_vm13, %v4329_v37, %v1142_v49  ;;  %v1160_v56 = vsub.f32 1.0, %v1159_v50  ;;  %v3541_v37 = vld [vmem:[#allocation4 + $0xb0] sm:$0xf0]  ;;  %v3531_v49 = vld [vmem:[#allocation4 + $0x88] sm:$0xf] }
 0x22f   : > { %v1151_v57 = vsel %vm1148_vm15, %v1150_v51, %v1146_v55  ;;  %v1174_v59 = vmul.f32 %v4333_v53, %v1136_v54  ;;  %v3544_v38 = vor.u32 %v4142_v34, %v3541_v37  ;;  %v3525_v48 = vld [vmem:[#allocation4 + $0x90] sm:$0xf0]  ;;  %v4141_v50 = vld [vmem:[#allocation4 + $0x94] sm:$0xf0]  ;;  %v4139_v53 = vld [vmem:[#allocation4 + $0x8c] sm:$0xf]  ;;  %v1186_v55 = vunpack.c.l.bf16 %v3321_v43 }
 0x230   : > { %v1173_v60 = vmul.f32 %v1151_v57, %v4546_v28  ;;  %v1161_v61 = vmul.f32 %v4331_v46, %v1160_v56  ;;  %v3571_v28 = vld [vmem:[#allocation4 + $0xe0] sm:$0xf]  ;;  %v3532_v52 = vor.u32 %v4141_v50, %v3531_v49  ;;  %v3533_v54 = vld [vmem:[#allocation4 + $0x98] sm:$0xf0]  ;;  %v1187_v56 = vunpack.c.h.bf16 %v3321_v43  ;;  %v3477_v34 = vld [vmem:[#allocation4 + $0x30] sm:$0xf0] }
 0x231   : > { %v3572_v11 = vor.u32 %v4152_v9, %v3571_v28  ;;  %1725 = vmatpush.bf16.msra.mxu1 %v3544_v38  ;;  %v3536_v57 = vor.u32 %v4139_v53, %v3533_v54  ;;  %v3517_v28 = vld [vmem:[#allocation4 + $0x78] sm:$0xf0]  ;;  %v4129_v37 = vld [vmem:[#allocation4 + $0x34] sm:$0xf0]  ;;  %v3480_v39 = vor.u32 %v4126_v30, %v3477_v34  ;;  %v4122_v49 = vld [vmem:[#allocation4 + $0x4] sm:$0xf] }
 0x232   : > { %v4557_v62 = vadd.f32 %v1174_v59, %v1173_v60  ;;  %v1162_v63 = vadd.f32 %v4331_v46, %v1161_v61  ;;  %1739 = vmatpush.bf16.msra.mxu2 %v3532_v52  ;;  %v3507_v59 = vld [vmem:[#allocation4 + $0x60] sm:$0xf]  ;;  %v4136_v60 = vld [vmem:[#allocation4 + $0x6c] sm:$0xf0]  ;;  %v4134_v61 = vld [vmem:[#allocation4 + $0x64] sm:$0xf] }
 0x233   : > { %1710 = vmatpush.bf16.msra.mxu0 %v3572_v11  ;;  %1752 = vmatpush.bf16.msra.mxu3 %v3536_v57  ;;  %v4563_v11 = vld [vmem:[%s4521_s26 + $0x38] sm:$0xff]  ;;  %v3485_v43 = vld [vmem:[#allocation4 + $0x38] sm:$0xf0]  ;;  %v3461_v50 = vld [vmem:[#allocation4 + $0x10] sm:$0xf0] }
 0x234   : > { %4334 = vtanh.f32 %v4557_v62  ;;  %v1166_v2 = vsel %vm1165_vm2, %v4331_v46, %v1162_v63  ;;  %v4138_v46 = vld [vmem:[#allocation4 + $0x84] sm:$0xf]  ;;  %v3508_v63 = vor.u32 %v4136_v60, %v3507_v59  ;;  %v1189_v19 = vunpack.c.h.bf16 %v4563_v11  ;;  %v4123_v59 = vld [vmem:[#allocation4 + $0xc] sm:$0xf]  ;;  %v3469_v60 = vld [vmem:[#allocation4 + $0x18] sm:$0xf0] }
 0x235   : > { %v1171_v5 = vsel %vm1168_vm3, %v1170_v3, %v1166_v2  ;;  %v3528_v51 = vor.u32 %v4138_v46, %v3525_v48  ;;  %v4137_v2 = vld [vmem:[#allocation4 + $0x74] sm:$0xf0]  ;;  %v3488_v44 = vor.u32 %v4127_v42, %v3485_v43  ;;  %v4124_v46 = vld [vmem:[#allocation4 + $0xc] sm:$0xf0]  ;;  %v3464_v54 = vor.u32 %v4122_v49, %v3461_v50  ;;  %v4182_v43 = vld [vmem:[#allocation4 + $0xe4] sm:$0xf] }
 0x236   : > { %v3460_v48 = vor.u32 %v4124_v46, %v3459_v40  ;;  %v4184_v42 = vld [vmem:[#allocation4 + $0xec] sm:$0xf0]  ;;  %v3713_v40 = vld [vmem:[#allocation4 + $0xe8] sm:$0xf]  ;;  %v4185_v46 = vld [vmem:[#allocation4 + $0xf4] sm:$0xf0] }
 0x237   : > { %1711 = vmatpush.bf16.msra.mxu0 %v3556_v22  ;;  %1726 = vmatpush.bf16.msra.mxu1 %v3528_v51  ;;  %v4133_v22 = vld [vmem:[#allocation4 + $0x54] sm:$0xf0]  ;;  %v3467_v51 = vld [vmem:[#allocation4 + $0x8] sm:$0xf]  ;;  %v4183_v49 = vld [vmem:[#allocation4 + $0xec] sm:$0xf] }
 0x238   : > { %v3500_v24 = vor.u32 %v4133_v22, %v3499_v21  ;;  %v3715_v50 = vld [vmem:[#allocation4 + $0xf8] sm:$0xf0] }
 0x23a   : > { %v4335_v4 = vpop.eup %4334 }
 0x23b   : > { %v1177_v6 = vmul.f32 %v4335_v4, %v1171_v5  ;;  %1712 = vmatpush.bf16.msra.mxu0 %v3540_v36  ;;  %v3512_v5 = vor.u32 %v4134_v61, %v3509_v0  ;;  %v3483_v36 = vld [vmem:[#allocation4 + $0x28] sm:$0xf]  ;;  %v1188_v0 = vunpack.c.l.bf16 %v4563_v11 }
 0x23c   : > { %v3484_v41 = vor.u32 %v4129_v37, %v3483_v36 }
 0x23d   : > { %v1180_v8 = vpack.c.bf16 %v1177_v6, %v1177_v6  ;;  %v3516_v6 = vor.u32 %v4137_v2, %v3515_v1  ;;  %1727 = vmatpush.bf16.msra.mxu1 %v3512_v5  ;;  %v3472_v1 = vor.u32 %v4123_v59, %v3469_v60  ;;  %v4181_v59 = vld [vmem:[#allocation4 + $0xd4] sm:$0xf0] }
 0x23f   : > { %3320 = vst [vmem:[%s4526_s29 + $0x8] sm:$0xf] %v1180_v8  ;;  %1392 = vmatmul.bf16.vlgmr.msrb.gmra.mxu0 %v1180_v8  ;;  %1405 = vmatmul.bf16.vlgmr.msrb.gmra.mxu1 %v1180_v8 }
 0x240   : > { %1418 = vmatmul.bf16.vlgmr.msrb.gmra.mxu2 %v1180_v8  ;;  %1431 = vmatmul.bf16.vlgmr.msrb.gmra.mxu3 %v1180_v8  ;;  %v4135_v8 = vld [vmem:[#allocation4 + $0x6c] sm:$0xf] }
 0x241   : > { %1713 = vmatpush.bf16.msra.mxu0 %v3524_v47  ;;  %v3520_v12 = vor.u32 %v4135_v8, %v3517_v28  ;;  %1740 = vmatpush.bf16.msra.mxu2 %v3516_v6 }
 0x242   : > { %1728 = vmatpush.bf16.msra.mxu1 %v3496_v20 }
 0x243   : > { %1753 = vmatpush.bf16.msra.mxu3 %v3520_v12 }
 0x245   : > { %1714 = vmatpush.bf16.msra.mxu0 %v3508_v63  ;;  %1741 = vmatpush.bf16.msra.mxu2 %v3500_v24 }
 0x246   : > { %1729 = vmatpush.bf16.msra.mxu1 %v3480_v39 }
 0x247   : > { %1754 = vmatpush.bf16.msra.mxu3 %v3504_v26 }
 0x249   : > { %1715 = vmatpush.bf16.msra.mxu0 %v3492_v17  ;;  %1742 = vmatpush.bf16.msra.mxu2 %v3484_v41 }
 0x24a   : > { %1730 = vmatpush.bf16.msra.mxu1 %v3464_v54  ;;  %v4178_v54 = vld [vmem:[#allocation4 + $0xc4] sm:$0xf] }
 0x24b   : > { %1755 = vmatpush.bf16.msra.mxu3 %v3488_v44 }
 0x24d   : > { %1716 = vmatpush.bf16.msra.mxu0 %v3476_v33 }
 0x24f   : > { %1756 = vmatpush.bf16.msra.mxu3 %v3472_v1 }
 0x251   : > { %1717 = vmatpush.bf16.msra.mxu0 %v3460_v48  ;;  %v3714_v48 = vor.u32 %v4185_v46, %v3713_v40  ;;  %v3625_v40 = vld [vmem:[#allocation4 + $0x40] sm:$0xf]  ;;  %v4164_v46 = vld [vmem:[#allocation4 + $0x4c] sm:$0xf0] }
 0x2bc   : > { %v1393_v3 = vpop.f32.mrf.mxu0  ;;  %v1406_v4 = vpop.f32.mrf.mxu1 }
 0x2bd   : > { %v1436_v9 = vadd.f32 %v1393_v3, %v1186_v55  ;;  %v1437_v10 = vadd.f32 %v1406_v4, %v1187_v56  ;;  %v4125_v55 = vld [vmem:[#allocation4 + $0x14] sm:$0xf0] }
 0x2be   : > { %v3468_v57 = vor.u32 %v4125_v55, %v3467_v51  ;;  %v3718_v51 = vor.u32 %v4183_v49, %v3715_v50  ;;  %v3626_v50 = vor.u32 %v4164_v46, %v3625_v40 }
 0x2bf   : > { %v3451_v15 = vmul.f32 -1.442695, %v1436_v9  ;;  %v3452_v16 = vmul.f32 -1.442695, %v1437_v10 }
 0x2c0   : > { %1743 = vmatpush.bf16.msra.mxu2 %v3468_v57  ;;  %2075 = vmatpush.bf16.msrb.mxu3 %v3718_v51  ;;  %v3697_v57 = vld [vmem:[#allocation4 + $0xc8] sm:$0xf]  ;;  %v3627_v51 = vld [vmem:[#allocation4 + $0x50] sm:$0xf0] }
 0x2c1   : > { %4336 = vpow2.f32 %v3451_v15 }
 0x2c2   : > { %4338 = vpow2.f32 %v3452_v16 }
 0x2c3   : > { %v1419_v31 = vpop.f32.mrf.mxu2  ;;  %v1432_v32 = vpop.f32.mrf.mxu3 }
 0x2c4   : > { %v1439_v35 = vadd.f32 %v1432_v32, %v1189_v19  ;;  %v1395_v58 = vpop.f32.mrf.mxu0  ;;  %v1408_v38 = vpop.f32.mrf.mxu1  ;;  %v1438_v5 = vadd.f32 %v1419_v31, %v1188_v0  ;;  %2062 = vmatpush.bf16.msrb.mxu2 %v3714_v48  ;;  %v3699_v0 = vld [vmem:[#allocation4 + $0xd8] sm:$0xf0] }
 0x2c6   : > { %v3453_v45 = vmul.f32 -1.442695, %v1439_v35 }
 0x2c7   : > { %v4337_v47 = vpop.eup %4336 }
 0x2c8   : > { %v4339_v52 = vpop.eup %4338  ;;  %v1447_v53 = vadd.f32 1.0, %v4337_v47  ;;  %4340 = vpow2.f32 %v3453_v45  ;;  %v3707_v45 = vld [vmem:[#allocation4 + $0xf0] sm:$0xf0] }
 0x2c9   : > { %v1448_v56 = vadd.f32 1.0, %v4339_v52  ;;  %v3710_v47 = vor.u32 %v4182_v43, %v3707_v45  ;;  %v3689_v52 = vld [vmem:[#allocation4 + $0xc0] sm:$0xf] }
 0x2ca   : > { %4342 = vrcp.f32 %v1447_v53  ;;  %v1460_v12 = vand.u32 2147483648, %v1447_v53  ;;  %v1458_v14 = vand.u32 2147483647, %v1447_v53  ;;  %vm1454_vm6 = vweird.f32 %v1447_v53 }
 0x2cb   : > { %4344 = vrcp.f32 %v1448_v56  ;;  %v1421_v61 = vpop.f32.mrf.mxu2  ;;  %v1434_v63 = vpop.f32.mrf.mxu3  ;;  %v1475_v7 = vand.u32 2147483648, %v1448_v56  ;;  %v1473_v11 = vand.u32 2147483647, %v1448_v56  ;;  %vm1469_vm7 = vweird.f32 %v1448_v56  ;;  %2049 = vmatpush.bf16.msrb.mxu1 %v3710_v47  ;;  %v4162_v47 = vld [vmem:[#allocation4 + $0x44] sm:$0xf] }
 0x2cc   : > { %v1461_v18 = vor.u32 1.1754944e-38, %v1460_v12  ;;  %vm1459_vm10 = vcmp.eq.f32.partialorder %v1458_v14, 8.507059e+37  ;;  %v3698_v61 = vor.u32 %v4181_v59, %v3697_v57  ;;  %v4179_v63 = vld [vmem:[#allocation4 + $0xcc] sm:$0xf]  ;;  %v3635_v59 = vld [vmem:[#allocation4 + $0x58] sm:$0xf0] }
 0x2cd   : > { %v1476_v21 = vor.u32 1.1754944e-38, %v1475_v7  ;;  %vm1474_vm11 = vcmp.eq.f32.partialorder %v1473_v11, 8.507059e+37  ;;  %v3702_v1 = vor.u32 %v4179_v63, %v3699_v0  ;;  %v4175_v12 = vld [vmem:[#allocation4 + $0xac] sm:$0xf]  ;;  %v3683_v7 = vld [vmem:[#allocation4 + $0xb8] sm:$0xf0] }
 0x2ce   : > { %v4341_v2 = vpop.eup %4340  ;;  %2063 = vmatpush.bf16.msrb.mxu2 %v3698_v61  ;;  %v3686_v14 = vor.u32 %v4175_v12, %v3683_v7  ;;  %v4172_v11 = vld [vmem:[#allocation4 + $0x8c] sm:$0xf0]  ;;  %v3609_v61 = vld [vmem:[#allocation4 + $0x20] sm:$0xf]  ;;  %v4158_v0 = vld [vmem:[#allocation4 + $0x24] sm:$0xf] }
 0x2cf   : > { %v1483_v3 = vadd.f32 1.0, %v4341_v2  ;;  %v3673_v2 = vld [vmem:[#allocation4 + $0xa0] sm:$0xf]  ;;  %2076 = vmatpush.bf16.msrb.mxu3 %v3702_v1  ;;  %v4160_v63 = vld [vmem:[#allocation4 + $0x2c] sm:$0xf0] }
 0x2d0   : > { %v4343_v4 = vpop.eup %4342  ;;  %v4159_v7 = vld [vmem:[#allocation4 + $0x2c] sm:$0xf] }
 0x2d1   : > { %v4345_v6 = vpop.eup %4344  ;;  %v1450_v8 = vmul.f32 %v4343_v4, %v1447_v53  ;;  %4346 = vrcp.f32 %v1483_v3  ;;  %vm1455_vm4 = vweird.f32 %v4343_v4  ;;  %v1495_v34 = vand.u32 2147483648, %v1483_v3  ;;  %v4180_v53 = vld [vmem:[#allocation4 + $0xcc] sm:$0xf0] }
 0x2d2   : > { %v1465_v28 = vmul.f32 %v4345_v6, %v1448_v56  ;;  %4348 = vtanh.f32 %v1438_v5  ;;  %vm1470_vm5 = vweird.f32 %v4345_v6  ;;  %vm1456_vm8 = vmor %vm1454_vm6, %vm1455_vm4  ;;  %vm1489_vm13 = vweird.f32 %v1483_v3  ;;  %v3691_v56 = vld [vmem:[#allocation4 + $0xd0] sm:$0xf0] }
 0x2d3   : > { %v1451_v9 = vsub.f32 1.0, %v1450_v8  ;;  %vm1471_vm9 = vmor %vm1469_vm7, %vm1470_vm5  ;;  %v1493_v36 = vand.u32 2147483647, %v1483_v3  ;;  %v1496_v35 = vor.u32 1.1754944e-38, %v1495_v34  ;;  %v3690_v55 = vor.u32 %v4180_v53, %v3689_v52  ;;  %v3681_v8 = vld [vmem:[#allocation4 + $0xa8] sm:$0xf]  ;;  %2077 = vmatpush.bf16.msrb.mxu3 %v3686_v14 }
 0x2d4   : > { %v1466_v10 = vsub.f32 1.0, %v1465_v28  ;;  %v3694_v60 = vor.u32 %v4178_v54, %v3691_v56  ;;  %v4177_v28 = vld [vmem:[#allocation4 + $0xb4] sm:$0xf0]  ;;  %v3643_v34 = vld [vmem:[#allocation4 + $0x70] sm:$0xf0]  ;;  %v3630_v53 = vor.u32 %v4162_v47, %v3627_v51 }
 0x2d5   : > { %v1452_v13 = vmul.f32 %v4343_v4, %v1451_v9  ;;  %vm1494_vm15 = vcmp.eq.f32.partialorder %v1493_v36, 8.507059e+37  ;;  %v3649_v36 = vld [vmem:[#allocation4 + $0x68] sm:$0xf]  ;;  %v4163_v56 = vld [vmem:[#allocation4 + $0x4c] sm:$0xf] }
 0x2d6   : > { %v1467_v15 = vmul.f32 %v4345_v6, %v1466_v10  ;;  %2050 = vmatpush.bf16.msrb.mxu1 %v3694_v60  ;;  %v3682_v10 = vor.u32 %v4177_v28, %v3681_v8  ;;  %v3633_v54 = vld [vmem:[#allocation4 + $0x48] sm:$0xf]  ;;  %v3638_v60 = vor.u32 %v4163_v56, %v3635_v59 }
 0x2d7   : > { %v4347_v16 = vpop.eup %4346  ;;  %v1453_v17 = vadd.f32 %v4343_v4, %v1452_v13  ;;  %v3455_v13 = vld [vmem:[%s4521_s26 + $0x40] sm:$0xff] }
 0x2d8   : > { %v1468_v19 = vadd.f32 %v4345_v6, %v1467_v15  ;;  %v1485_v20 = vmul.f32 %v4347_v16, %v1483_v3  ;;  %v4349_v23 = vpop.eup %4348  ;;  %vm1490_vm12 = vweird.f32 %v4347_v16  ;;  %v4176_v3 = vld [vmem:[#allocation4 + $0xac] sm:$0xf0]  ;;  %2064 = vmatpush.bf16.msrb.mxu2 %v3682_v10  ;;  %v3657_v15 = vld [vmem:[#allocation4 + $0x80] sm:$0xf] }
 0x2d9   : > { %v1457_v22 = vsel %vm1456_vm8, %v4343_v4, %v1453_v17  ;;  %vm1491_vm14 = vmor %vm1489_vm13, %vm1490_vm12  ;;  %v4174_v4 = vld [vmem:[#allocation4 + $0xa4] sm:$0xf]  ;;  %v3674_v5 = vor.u32 %v4176_v3, %v3673_v2  ;;  %v3658_v17 = vor.u32 %v4172_v11, %v3657_v15  ;;  %v3610_v3 = vor.u32 %v4160_v63, %v3609_v61  ;;  %v3593_v11 = vld [vmem:[#allocation4] sm:$0xf] }
 0x2da   : > { %v1462_v24 = vsel %vm1459_vm10, %v1461_v18, %v1457_v22  ;;  %v1472_v25 = vsel %vm1471_vm9, %v4345_v6, %v1468_v19  ;;  %v1486_v26 = vsub.f32 1.0, %v1485_v20  ;;  %v3675_v6 = vld [vmem:[#allocation4 + $0xb0] sm:$0xf0]  ;;  %v3665_v19 = vld [vmem:[#allocation4 + $0x88] sm:$0xf] }
 0x2db   : > { %v1477_v27 = vsel %vm1474_vm11, %v1476_v21, %v1472_v25  ;;  %v1500_v29 = vmul.f32 %v4349_v23, %v1462_v24  ;;  %v3678_v9 = vor.u32 %v4174_v4, %v3675_v6  ;;  %v3659_v18 = vld [vmem:[#allocation4 + $0x90] sm:$0xf0]  ;;  %v4173_v20 = vld [vmem:[#allocation4 + $0x94] sm:$0xf0]  ;;  %v4171_v23 = vld [vmem:[#allocation4 + $0x8c] sm:$0xf]  ;;  %v1512_v25 = vunpack.c.l.bf16 %v3455_v13 }
 0x2dc   : > { %v1499_v30 = vmul.f32 %v1477_v27, %v4557_v62  ;;  %v1487_v31 = vmul.f32 %v4347_v16, %v1486_v26  ;;  %v3705_v62 = vld [vmem:[#allocation4 + $0xe0] sm:$0xf]  ;;  %v3666_v22 = vor.u32 %v4173_v20, %v3665_v19  ;;  %v3667_v24 = vld [vmem:[#allocation4 + $0x98] sm:$0xf0]  ;;  %v1513_v26 = vunpack.c.h.bf16 %v3455_v13  ;;  %v3611_v4 = vld [vmem:[#allocation4 + $0x30] sm:$0xf0] }
 0x2dd   : > { %v3706_v44 = vor.u32 %v4184_v42, %v3705_v62  ;;  %2051 = vmatpush.bf16.msrb.mxu1 %v3678_v9  ;;  %v3670_v27 = vor.u32 %v4171_v23, %v3667_v24  ;;  %v3651_v62 = vld [vmem:[#allocation4 + $0x78] sm:$0xf0]  ;;  %v4161_v6 = vld [vmem:[#allocation4 + $0x34] sm:$0xf0]  ;;  %v3614_v10 = vor.u32 %v4158_v0, %v3611_v4  ;;  %v4154_v19 = vld [vmem:[#allocation4 + $0x4] sm:$0xf] }
 0x2de   : > { %v4568_v32 = vadd.f32 %v1500_v29, %v1499_v30  ;;  %v1488_v33 = vadd.f32 %v4347_v16, %v1487_v31  ;;  %2065 = vmatpush.bf16.msrb.mxu2 %v3666_v22  ;;  %v3641_v29 = vld [vmem:[#allocation4 + $0x60] sm:$0xf]  ;;  %v4168_v30 = vld [vmem:[#allocation4 + $0x6c] sm:$0xf0]  ;;  %v4166_v31 = vld [vmem:[#allocation4 + $0x64] sm:$0xf] }
 0x2df   : > { %2036 = vmatpush.bf16.msrb.mxu0 %v3706_v44  ;;  %2078 = vmatpush.bf16.msrb.mxu3 %v3670_v27  ;;  %v4574_v44 = vld [vmem:[%s4521_s26 + $0x48] sm:$0xff]  ;;  %v3595_v20 = vld [vmem:[#allocation4 + $0x10] sm:$0xf0] }
 0x2e0   : > { %4350 = vtanh.f32 %v4568_v32  ;;  %v1492_v37 = vsel %vm1491_vm14, %v4347_v16, %v1488_v33  ;;  %v4170_v16 = vld [vmem:[#allocation4 + $0x84] sm:$0xf]  ;;  %v3642_v33 = vor.u32 %v4168_v30, %v3641_v29  ;;  %v1515_v52 = vunpack.c.h.bf16 %v4574_v44  ;;  %v3619_v13 = vld [vmem:[#allocation4 + $0x38] sm:$0xf0]  ;;  %v4155_v29 = vld [vmem:[#allocation4 + $0xc] sm:$0xf] }
 0x2e1   : > { %v1497_v38 = vsel %vm1494_vm15, %v1496_v35, %v1492_v37  ;;  %v3662_v21 = vor.u32 %v4170_v16, %v3659_v18  ;;  %v4169_v37 = vld [vmem:[#allocation4 + $0x74] sm:$0xf0]  ;;  %v3622_v14 = vor.u32 %v4159_v7, %v3619_v13  ;;  %v4156_v16 = vld [vmem:[#allocation4 + $0xc] sm:$0xf0]  ;;  %v3598_v24 = vor.u32 %v4154_v19, %v3595_v20  ;;  %v3603_v30 = vld [vmem:[#allocation4 + $0x18] sm:$0xf0] }
 0x2e2   : > { %v3594_v18 = vor.u32 %v4156_v16, %v3593_v11  ;;  %v4216_v7 = vld [vmem:[#allocation4 + $0xec] sm:$0xf0]  ;;  %v4214_v13 = vld [vmem:[#allocation4 + $0xe4] sm:$0xf]  ;;  %v3847_v11 = vld [vmem:[#allocation4 + $0xe8] sm:$0xf] }
 0x2e3   : > { %2037 = vmatpush.bf16.msrb.mxu0 %v3690_v55  ;;  %2052 = vmatpush.bf16.msrb.mxu1 %v3662_v21  ;;  %v4165_v55 = vld [vmem:[#allocation4 + $0x54] sm:$0xf0]  ;;  %v3601_v21 = vld [vmem:[#allocation4 + $0x8] sm:$0xf]  ;;  %v4215_v19 = vld [vmem:[#allocation4 + $0xec] sm:$0xf] }
 0x2e4   : > { %v3634_v57 = vor.u32 %v4165_v55, %v3633_v54  ;;  %v4217_v16 = vld [vmem:[#allocation4 + $0xf4] sm:$0xf0]  ;;  %v3849_v20 = vld [vmem:[#allocation4 + $0xf8] sm:$0xf0] }
 0x2e6   : > { %v4351_v58 = vpop.eup %4350 }
 0x2e7   : > { %v1503_v39 = vmul.f32 %v4351_v58, %v1497_v38  ;;  %2038 = vmatpush.bf16.msrb.mxu0 %v3674_v5  ;;  %v3646_v38 = vor.u32 %v4166_v31, %v3643_v34  ;;  %v3617_v5 = vld [vmem:[#allocation4 + $0x28] sm:$0xf]  ;;  %v1514_v34 = vunpack.c.l.bf16 %v4574_v44 }
 0x2e8   : > { %v3618_v12 = vor.u32 %v4161_v6, %v3617_v5 }
 0x2e9   : > { %v1506_v41 = vpack.c.bf16 %v1503_v39, %v1503_v39  ;;  %v3650_v39 = vor.u32 %v4169_v37, %v3649_v36  ;;  %2053 = vmatpush.bf16.msrb.mxu1 %v3646_v38  ;;  %v3606_v36 = vor.u32 %v4155_v29, %v3603_v30  ;;  %v4213_v29 = vld [vmem:[#allocation4 + $0xd4] sm:$0xf0] }
 0x2eb   : > { %3454 = vst [vmem:[%s4526_s29 + $0xc] sm:$0xf] %v1506_v41  ;;  %1718 = vmatmul.bf16.vlgmr.msra.gmra.mxu0 %v1506_v41  ;;  %1731 = vmatmul.bf16.vlgmr.msra.gmra.mxu1 %v1506_v41 }
 0x2ec   : > { %1744 = vmatmul.bf16.vlgmr.msra.gmra.mxu2 %v1506_v41  ;;  %1757 = vmatmul.bf16.vlgmr.msra.gmra.mxu3 %v1506_v41  ;;  %v4167_v41 = vld [vmem:[#allocation4 + $0x6c] sm:$0xf] }
 0x2ed   : > { %2039 = vmatpush.bf16.msrb.mxu0 %v3658_v17  ;;  %v3654_v45 = vor.u32 %v4167_v41, %v3651_v62  ;;  %2066 = vmatpush.bf16.msrb.mxu2 %v3650_v39 }
 0x2ee   : > { %2054 = vmatpush.bf16.msrb.mxu1 %v3630_v53 }
 0x2ef   : > { %2079 = vmatpush.bf16.msrb.mxu3 %v3654_v45 }
 0x2f1   : > { %2040 = vmatpush.bf16.msrb.mxu0 %v3642_v33  ;;  %2067 = vmatpush.bf16.msrb.mxu2 %v3634_v57 }
 0x2f2   : > { %2055 = vmatpush.bf16.msrb.mxu1 %v3614_v10 }
 0x2f3   : > { %2080 = vmatpush.bf16.msrb.mxu3 %v3638_v60 }
 0x2f5   : > { %2041 = vmatpush.bf16.msrb.mxu0 %v3626_v50  ;;  %2068 = vmatpush.bf16.msrb.mxu2 %v3618_v12 }
 0x2f6   : > { %2056 = vmatpush.bf16.msrb.mxu1 %v3598_v24  ;;  %v4210_v24 = vld [vmem:[#allocation4 + $0xc4] sm:$0xf] }
 0x2f7   : > { %2081 = vmatpush.bf16.msrb.mxu3 %v3622_v14 }
 0x2f9   : > { %2042 = vmatpush.bf16.msrb.mxu0 %v3610_v3 }
 0x2fb   : > { %2082 = vmatpush.bf16.msrb.mxu3 %v3606_v36 }
 0x2fd   : > { %2043 = vmatpush.bf16.msrb.mxu0 %v3594_v18  ;;  %v3848_v18 = vor.u32 %v4217_v16, %v3847_v11  ;;  %v3759_v11 = vld [vmem:[#allocation4 + $0x40] sm:$0xf]  ;;  %v4196_v16 = vld [vmem:[#allocation4 + $0x4c] sm:$0xf0] }
 0x368   : > { %v1719_v35 = vpop.f32.mrf.mxu0  ;;  %v1732_v58 = vpop.f32.mrf.mxu1 }
 0x369   : > { %v1762_v42 = vadd.f32 %v1719_v35, %v1512_v25  ;;  %v1763_v43 = vadd.f32 %v1732_v58, %v1513_v26  ;;  %v4157_v25 = vld [vmem:[#allocation4 + $0x14] sm:$0xf0] }
 0x36a   : > { %v3602_v27 = vor.u32 %v4157_v25, %v3601_v21  ;;  %v3852_v21 = vor.u32 %v4215_v19, %v3849_v20  ;;  %v3760_v20 = vor.u32 %v4196_v16, %v3759_v11 }
 0x36b   : > { %v3585_v48 = vmul.f32 -1.442695, %v1762_v42  ;;  %v3586_v49 = vmul.f32 -1.442695, %v1763_v43 }
 0x36c   : > { %2069 = vmatpush.bf16.msrb.mxu2 %v3602_v27  ;;  %2401 = vmatpush.bf16.msra.mxu3 %v3852_v21  ;;  %v3831_v27 = vld [vmem:[#allocation4 + $0xc8] sm:$0xf]  ;;  %v3761_v21 = vld [vmem:[#allocation4 + $0x50] sm:$0xf0] }
 0x36d   : > { %4352 = vpow2.f32 %v3585_v48 }
 0x36e   : > { %4354 = vpow2.f32 %v3586_v49 }
 0x36f   : > { %v1745_v1 = vpop.f32.mrf.mxu2  ;;  %v1758_v2 = vpop.f32.mrf.mxu3 }
 0x370   : > { %v1765_v8 = vadd.f32 %v1758_v2, %v1515_v52  ;;  %v1721_v28 = vpop.f32.mrf.mxu0  ;;  %v1734_v9 = vpop.f32.mrf.mxu1  ;;  %v1764_v38 = vadd.f32 %v1745_v1, %v1514_v34  ;;  %2388 = vmatpush.bf16.msra.mxu2 %v3848_v18  ;;  %v3833_v34 = vld [vmem:[#allocation4 + $0xd8] sm:$0xf0] }
 0x372   : > { %v3587_v15 = vmul.f32 -1.442695, %v1765_v8 }
 0x373   : > { %v4353_v17 = vpop.eup %4352 }
 0x374   : > { %v4355_v22 = vpop.eup %4354  ;;  %v1773_v23 = vadd.f32 1.0, %v4353_v17  ;;  %4356 = vpow2.f32 %v3587_v15  ;;  %v3841_v15 = vld [vmem:[#allocation4 + $0xf0] sm:$0xf0] }
 0x375   : > { %v1774_v26 = vadd.f32 1.0, %v4355_v22  ;;  %v3844_v17 = vor.u32 %v4214_v13, %v3841_v15  ;;  %v3823_v22 = vld [vmem:[#allocation4 + $0xc0] sm:$0xf] }
 0x376   : > { %4358 = vrcp.f32 %v1773_v23  ;;  %v1786_v45 = vand.u32 2147483648, %v1773_v23  ;;  %v1784_v47 = vand.u32 2147483647, %v1773_v23  ;;  %vm1780_vm2 = vweird.f32 %v1773_v23 }
 0x377   : > { %4360 = vrcp.f32 %v1774_v26  ;;  %v1747_v31 = vpop.f32.mrf.mxu2  ;;  %v1760_v33 = vpop.f32.mrf.mxu3  ;;  %v1801_v40 = vand.u32 2147483648, %v1774_v26  ;;  %v1799_v44 = vand.u32 2147483647, %v1774_v26  ;;  %vm1795_vm3 = vweird.f32 %v1774_v26  ;;  %2375 = vmatpush.bf16.msra.mxu1 %v3844_v17  ;;  %v4194_v17 = vld [vmem:[#allocation4 + $0x44] sm:$0xf] }
 0x378   : > { %v1787_v51 = vor.u32 1.1754944e-38, %v1786_v45  ;;  %vm1785_vm6 = vcmp.eq.f32.partialorder %v1784_v47, 8.507059e+37  ;;  %v3832_v31 = vor.u32 %v4213_v29, %v3831_v27  ;;  %v4211_v33 = vld [vmem:[#allocation4 + $0xcc] sm:$0xf]  ;;  %v3769_v29 = vld [vmem:[#allocation4 + $0x58] sm:$0xf0] }
 0x379   : > { %v1802_v54 = vor.u32 1.1754944e-38, %v1801_v40  ;;  %vm1800_vm7 = vcmp.eq.f32.partialorder %v1799_v44, 8.507059e+37  ;;  %v3836_v36 = vor.u32 %v4211_v33, %v3833_v34  ;;  %v4207_v45 = vld [vmem:[#allocation4 + $0xac] sm:$0xf]  ;;  %v3817_v40 = vld [vmem:[#allocation4 + $0xb8] sm:$0xf0] }
 0x37a   : > { %v4357_v37 = vpop.eup %4356  ;;  %2389 = vmatpush.bf16.msra.mxu2 %v3832_v31  ;;  %v3820_v47 = vor.u32 %v4207_v45, %v3817_v40  ;;  %v4204_v44 = vld [vmem:[#allocation4 + $0x8c] sm:$0xf0]  ;;  %v3743_v31 = vld [vmem:[#allocation4 + $0x20] sm:$0xf]  ;;  %v4190_v34 = vld [vmem:[#allocation4 + $0x24] sm:$0xf] }
 0x37b   : > { %v1809_v35 = vadd.f32 1.0, %v4357_v37  ;;  %v3807_v37 = vld [vmem:[#allocation4 + $0xa0] sm:$0xf]  ;;  %2402 = vmatpush.bf16.msra.mxu3 %v3836_v36  ;;  %v4192_v33 = vld [vmem:[#allocation4 + $0x2c] sm:$0xf0] }
 0x37c   : > { %v4359_v58 = vpop.eup %4358  ;;  %v4191_v40 = vld [vmem:[#allocation4 + $0x2c] sm:$0xf] }
 0x37d   : > { %v4361_v39 = vpop.eup %4360  ;;  %v1776_v41 = vmul.f32 %v4359_v58, %v1773_v23  ;;  %4362 = vrcp.f32 %v1809_v35  ;;  %vm1781_vm0 = vweird.f32 %v4359_v58  ;;  %v1821_v4 = vand.u32 2147483648, %v1809_v35  ;;  %v4212_v23 = vld [vmem:[#allocation4 + $0xcc] sm:$0xf0] }
 0x37e   : > { %v1791_v62 = vmul.f32 %v4361_v39, %v1774_v26  ;;  %4364 = vtanh.f32 %v1764_v38  ;;  %vm1796_vm1 = vweird.f32 %v4361_v39  ;;  %vm1782_vm4 = vmor %vm1780_vm2, %vm1781_vm0  ;;  %vm1815_vm9 = vweird.f32 %v1809_v35  ;;  %v3825_v26 = vld [vmem:[#allocation4 + $0xd0] sm:$0xf0] }
 0x37f   : > { %v1777_v42 = vsub.f32 1.0, %v1776_v41  ;;  %vm1797_vm5 = vmor %vm1795_vm3, %vm1796_vm1  ;;  %v1819_v5 = vand.u32 2147483647, %v1809_v35  ;;  %v1822_v8 = vor.u32 1.1754944e-38, %v1821_v4  ;;  %v3824_v25 = vor.u32 %v4212_v23, %v3823_v22  ;;  %v3815_v41 = vld [vmem:[#allocation4 + $0xa8] sm:$0xf]  ;;  %2403 = vmatpush.bf16.msra.mxu3 %v3820_v47 }
 0x380   : > { %v1792_v43 = vsub.f32 1.0, %v1791_v62  ;;  %v3828_v30 = vor.u32 %v4210_v24, %v3825_v26  ;;  %v4209_v62 = vld [vmem:[#allocation4 + $0xb4] sm:$0xf0]  ;;  %v3777_v4 = vld [vmem:[#allocation4 + $0x70] sm:$0xf0]  ;;  %v3764_v23 = vor.u32 %v4194_v17, %v3761_v21 }
 0x381   : > { %v1778_v46 = vmul.f32 %v4359_v58, %v1777_v42  ;;  %vm1820_vm11 = vcmp.eq.f32.partialorder %v1819_v5, 8.507059e+37  ;;  %v3783_v5 = vld [vmem:[#allocation4 + $0x68] sm:$0xf]  ;;  %v4195_v26 = vld [vmem:[#allocation4 + $0x4c] sm:$0xf] }
 0x382   : > { %v1793_v48 = vmul.f32 %v4361_v39, %v1792_v43  ;;  %2376 = vmatpush.bf16.msra.mxu1 %v3828_v30  ;;  %v3816_v43 = vor.u32 %v4209_v62, %v3815_v41  ;;  %v3767_v24 = vld [vmem:[#allocation4 + $0x48] sm:$0xf]  ;;  %v3772_v30 = vor.u32 %v4195_v26, %v3769_v29 }
 0x383   : > { %v4363_v49 = vpop.eup %4362  ;;  %v1779_v50 = vadd.f32 %v4359_v58, %v1778_v46  ;;  %v3589_v46 = vld [vmem:[%s4521_s26 + $0x50] sm:$0xff] }
 0x384   : > { %v1794_v52 = vadd.f32 %v4361_v39, %v1793_v48  ;;  %v1811_v53 = vmul.f32 %v4363_v49, %v1809_v35  ;;  %v4365_v56 = vpop.eup %4364  ;;  %vm1816_vm8 = vweird.f32 %v4363_v49  ;;  %v4208_v35 = vld [vmem:[#allocation4 + $0xac] sm:$0xf0]  ;;  %2390 = vmatpush.bf16.msra.mxu2 %v3816_v43  ;;  %v3791_v48 = vld [vmem:[#allocation4 + $0x80] sm:$0xf] }
 0x385   : > { %v1783_v55 = vsel %vm1782_vm4, %v4359_v58, %v1779_v50  ;;  %vm1817_vm10 = vmor %vm1815_vm9, %vm1816_vm8  ;;  %v4206_v58 = vld [vmem:[#allocation4 + $0xa4] sm:$0xf]  ;;  %v3808_v38 = vor.u32 %v4208_v35, %v3807_v37  ;;  %v3792_v50 = vor.u32 %v4204_v44, %v3791_v48  ;;  %v3744_v35 = vor.u32 %v4192_v33, %v3743_v31  ;;  %v3727_v44 = vld [vmem:[#allocation4] sm:$0xf] }
 0x386   : > { %v1788_v57 = vsel %vm1785_vm6, %v1787_v51, %v1783_v55  ;;  %v1798_v59 = vsel %vm1797_vm5, %v4361_v39, %v1794_v52  ;;  %v1812_v60 = vsub.f32 1.0, %v1811_v53  ;;  %v3809_v39 = vld [vmem:[#allocation4 + $0xb0] sm:$0xf0]  ;;  %v3799_v52 = vld [vmem:[#allocation4 + $0x88] sm:$0xf] }
 0x387   : > { %v1803_v61 = vsel %vm1800_vm7, %v1802_v54, %v1798_v59  ;;  %v1826_v63 = vmul.f32 %v4365_v56, %v1788_v57  ;;  %v3812_v42 = vor.u32 %v4206_v58, %v3809_v39  ;;  %v3793_v51 = vld [vmem:[#allocation4 + $0x90] sm:$0xf0]  ;;  %v4205_v53 = vld [vmem:[#allocation4 + $0x94] sm:$0xf0]  ;;  %v4203_v56 = vld [vmem:[#allocation4 + $0x8c] sm:$0xf]  ;;  %v1838_v59 = vunpack.c.l.bf16 %v3589_v46 }
 0x388   : > { %v1825_v0 = vmul.f32 %v1803_v61, %v4568_v32  ;;  %v1813_v1 = vmul.f32 %v4363_v49, %v1812_v60  ;;  %v3839_v32 = vld [vmem:[#allocation4 + $0xe0] sm:$0xf]  ;;  %v3800_v55 = vor.u32 %v4205_v53, %v3799_v52  ;;  %v3801_v57 = vld [vmem:[#allocation4 + $0x98] sm:$0xf0]  ;;  %v1839_v60 = vunpack.c.h.bf16 %v3589_v46  ;;  %v3745_v58 = vld [vmem:[#allocation4 + $0x30] sm:$0xf0] }
 0x389   : > { %v3840_v14 = vor.u32 %v4216_v7, %v3839_v32  ;;  %2377 = vmatpush.bf16.msra.mxu1 %v3812_v42  ;;  %v3804_v61 = vor.u32 %v4203_v56, %v3801_v57  ;;  %v3785_v32 = vld [vmem:[#allocation4 + $0x78] sm:$0xf0]  ;;  %v4193_v39 = vld [vmem:[#allocation4 + $0x34] sm:$0xf0]  ;;  %v3748_v43 = vor.u32 %v4190_v34, %v3745_v58  ;;  %v4186_v52 = vld [vmem:[#allocation4 + $0x4] sm:$0xf] }
 0x38a   : > { %v4579_v2 = vadd.f32 %v1826_v63, %v1825_v0  ;;  %v1814_v3 = vadd.f32 %v4363_v49, %v1813_v1  ;;  %2391 = vmatpush.bf16.msra.mxu2 %v3800_v55  ;;  %v3775_v63 = vld [vmem:[#allocation4 + $0x60] sm:$0xf]  ;;  %v4200_v0 = vld [vmem:[#allocation4 + $0x6c] sm:$0xf0]  ;;  %v4198_v1 = vld [vmem:[#allocation4 + $0x64] sm:$0xf] }
 0x38b   : > { %2362 = vmatpush.bf16.msra.mxu0 %v3840_v14  ;;  %2404 = vmatpush.bf16.msra.mxu3 %v3804_v61  ;;  %v4585_v14 = vld [vmem:[%s4521_s26 + $0x58] sm:$0xff]  ;;  %v3753_v46 = vld [vmem:[#allocation4 + $0x38] sm:$0xf0]  ;;  %v3729_v53 = vld [vmem:[#allocation4 + $0x10] sm:$0xf0] }
 0x38c   : > { %4366 = vtanh.f32 %v4579_v2  ;;  %v1818_v6 = vsel %vm1817_vm10, %v4363_v49, %v1814_v3  ;;  %v4202_v49 = vld [vmem:[#allocation4 + $0x84] sm:$0xf]  ;;  %v3776_v3 = vor.u32 %v4200_v0, %v3775_v63  ;;  %v1841_v22 = vunpack.c.h.bf16 %v4585_v14  ;;  %v4187_v63 = vld [vmem:[#allocation4 + $0xc] sm:$0xf]  ;;  %v3737_v0 = vld [vmem:[#allocation4 + $0x18] sm:$0xf0] }
 0x38d   : > { %v1823_v9 = vsel %vm1820_vm11, %v1822_v8, %v1818_v6  ;;  %v3796_v54 = vor.u32 %v4202_v49, %v3793_v51  ;;  %v4201_v6 = vld [vmem:[#allocation4 + $0x74] sm:$0xf0]  ;;  %v3756_v47 = vor.u32 %v4191_v40, %v3753_v46  ;;  %v4188_v49 = vld [vmem:[#allocation4 + $0xc] sm:$0xf0]  ;;  %v3732_v57 = vor.u32 %v4186_v52, %v3729_v53  ;;  %v4246_v46 = vld [vmem:[#allocation4 + $0xe4] sm:$0xf] }
 0x38e   : > { %v3728_v51 = vor.u32 %v4188_v49, %v3727_v44  ;;  %v4248_v40 = vld [vmem:[#allocation4 + $0xec] sm:$0xf0]  ;;  %v3981_v44 = vld [vmem:[#allocation4 + $0xe8] sm:$0xf]  ;;  %v4249_v49 = vld [vmem:[#allocation4 + $0xf4] sm:$0xf0] }
 0x38f   : > { %2363 = vmatpush.bf16.msra.mxu0 %v3824_v25  ;;  %2378 = vmatpush.bf16.msra.mxu1 %v3796_v54  ;;  %v4197_v25 = vld [vmem:[#allocation4 + $0x54] sm:$0xf0]  ;;  %v3735_v54 = vld [vmem:[#allocation4 + $0x8] sm:$0xf]  ;;  %v4247_v52 = vld [vmem:[#allocation4 + $0xec] sm:$0xf] }
 0x390   : > { %v3768_v27 = vor.u32 %v4197_v25, %v3767_v24  ;;  %v3983_v53 = vld [vmem:[#allocation4 + $0xf8] sm:$0xf0] }
 0x392   : > { %v4367_v28 = vpop.eup %4366 }
 0x393   : > { %v1829_v10 = vmul.f32 %v4367_v28, %v1823_v9  ;;  %2364 = vmatpush.bf16.msra.mxu0 %v3808_v38  ;;  %v3780_v9 = vor.u32 %v4198_v1, %v3777_v4  ;;  %v3751_v38 = vld [vmem:[#allocation4 + $0x28] sm:$0xf]  ;;  %v1840_v4 = vunpack.c.l.bf16 %v4585_v14 }
 0x394   : > { %v3752_v45 = vor.u32 %v4193_v39, %v3751_v38 }
 0x395   : > { %v1832_v12 = vpack.c.bf16 %v1829_v10, %v1829_v10  ;;  %v3784_v10 = vor.u32 %v4201_v6, %v3783_v5  ;;  %2379 = vmatpush.bf16.msra.mxu1 %v3780_v9  ;;  %v3740_v5 = vor.u32 %v4187_v63, %v3737_v0  ;;  %v4245_v63 = vld [vmem:[#allocation4 + $0xd4] sm:$0xf0] }
 0x397   : > { %3588 = vst [vmem:[%s4526_s29 + $0x10] sm:$0xf] %v1832_v12  ;;  %2044 = vmatmul.bf16.vlgmr.msrb.gmra.mxu0 %v1832_v12  ;;  %2057 = vmatmul.bf16.vlgmr.msrb.gmra.mxu1 %v1832_v12 }
 0x398   : > { %2070 = vmatmul.bf16.vlgmr.msrb.gmra.mxu2 %v1832_v12  ;;  %2083 = vmatmul.bf16.vlgmr.msrb.gmra.mxu3 %v1832_v12  ;;  %v4199_v12 = vld [vmem:[#allocation4 + $0x6c] sm:$0xf] }
 0x399   : > { %2365 = vmatpush.bf16.msra.mxu0 %v3792_v50  ;;  %v3788_v15 = vor.u32 %v4199_v12, %v3785_v32  ;;  %2392 = vmatpush.bf16.msra.mxu2 %v3784_v10 }
 0x39a   : > { %2380 = vmatpush.bf16.msra.mxu1 %v3764_v23 }
 0x39b   : > { %2405 = vmatpush.bf16.msra.mxu3 %v3788_v15 }
 0x39d   : > { %2366 = vmatpush.bf16.msra.mxu0 %v3776_v3  ;;  %2393 = vmatpush.bf16.msra.mxu2 %v3768_v27 }
 0x39e   : > { %2381 = vmatpush.bf16.msra.mxu1 %v3748_v43 }
 0x39f   : > { %2406 = vmatpush.bf16.msra.mxu3 %v3772_v30 }
 0x3a1   : > { %2367 = vmatpush.bf16.msra.mxu0 %v3760_v20  ;;  %2394 = vmatpush.bf16.msra.mxu2 %v3752_v45 }
 0x3a2   : > { %2382 = vmatpush.bf16.msra.mxu1 %v3732_v57  ;;  %v4242_v57 = vld [vmem:[#allocation4 + $0xc4] sm:$0xf] }
 0x3a3   : > { %2407 = vmatpush.bf16.msra.mxu3 %v3756_v47 }
 0x3a5   : > { %2368 = vmatpush.bf16.msra.mxu0 %v3744_v35 }
 0x3a7   : > { %2408 = vmatpush.bf16.msra.mxu3 %v3740_v5 }
 0x3a9   : > { %2369 = vmatpush.bf16.msra.mxu0 %v3728_v51  ;;  %v3982_v51 = vor.u32 %v4249_v49, %v3981_v44  ;;  %v3893_v44 = vld [vmem:[#allocation4 + $0x40] sm:$0xf]  ;;  %v4228_v49 = vld [vmem:[#allocation4 + $0x4c] sm:$0xf0] }
 0x414   : > { %v2045_v8 = vpop.f32.mrf.mxu0  ;;  %v2058_v28 = vpop.f32.mrf.mxu1 }
 0x415   : > { %v2088_v7 = vadd.f32 %v2045_v8, %v1838_v59  ;;  %v2089_v13 = vadd.f32 %v2058_v28, %v1839_v60  ;;  %v4189_v59 = vld [vmem:[#allocation4 + $0x14] sm:$0xf0] }
 0x416   : > { %v3736_v61 = vor.u32 %v4189_v59, %v3735_v54  ;;  %v3986_v54 = vor.u32 %v4247_v52, %v3983_v53  ;;  %v3894_v53 = vor.u32 %v4228_v49, %v3893_v44 }
 0x417   : > { %v3719_v18 = vmul.f32 -1.442695, %v2088_v7  ;;  %v3720_v19 = vmul.f32 -1.442695, %v2089_v13 }
 0x418   : > { %2395 = vmatpush.bf16.msra.mxu2 %v3736_v61  ;;  %2727 = vmatpush.bf16.msrb.mxu3 %v3986_v54  ;;  %v3965_v61 = vld [vmem:[#allocation4 + $0xc8] sm:$0xf]  ;;  %v3895_v54 = vld [vmem:[#allocation4 + $0x50] sm:$0xf0] }
 0x419   : > { %4368 = vpow2.f32 %v3719_v18 }
 0x41a   : > { %4370 = vpow2.f32 %v3720_v19 }
 0x41b   : > { %v2071_v36 = vpop.f32.mrf.mxu2  ;;  %v2084_v37 = vpop.f32.mrf.mxu3 }
 0x41c   : > { %v2091_v41 = vadd.f32 %v2084_v37, %v1841_v22  ;;  %v2047_v62 = vpop.f32.mrf.mxu0  ;;  %v2060_v42 = vpop.f32.mrf.mxu1  ;;  %v2090_v9 = vadd.f32 %v2071_v36, %v1840_v4  ;;  %2714 = vmatpush.bf16.msrb.mxu2 %v3982_v51  ;;  %v3967_v4 = vld [vmem:[#allocation4 + $0xd8] sm:$0xf0] }
 0x41e   : > { %v3721_v48 = vmul.f32 -1.442695, %v2091_v41 }
 0x41f   : > { %v4369_v50 = vpop.eup %4368 }
 0x420   : > { %v4371_v55 = vpop.eup %4370  ;;  %v2099_v56 = vadd.f32 1.0, %v4369_v50  ;;  %4372 = vpow2.f32 %v3721_v48  ;;  %v3975_v48 = vld [vmem:[#allocation4 + $0xf0] sm:$0xf0] }
 0x421   : > { %v2100_v60 = vadd.f32 1.0, %v4371_v55  ;;  %v3978_v50 = vor.u32 %v4246_v46, %v3975_v48  ;;  %v3957_v55 = vld [vmem:[#allocation4 + $0xc0] sm:$0xf] }
 0x422   : > { %4374 = vrcp.f32 %v2099_v56  ;;  %v2112_v15 = vand.u32 2147483648, %v2099_v56  ;;  %v2110_v17 = vand.u32 2147483647, %v2099_v56  ;;  %vm2106_vm14 = vweird.f32 %v2099_v56 }
 0x423   : > { %4376 = vrcp.f32 %v2100_v60  ;;  %v2073_v1 = vpop.f32.mrf.mxu2  ;;  %v2086_v3 = vpop.f32.mrf.mxu3  ;;  %v2127_v11 = vand.u32 2147483648, %v2100_v60  ;;  %v2125_v14 = vand.u32 2147483647, %v2100_v60  ;;  %vm2121_vm15 = vweird.f32 %v2100_v60  ;;  %2701 = vmatpush.bf16.msrb.mxu1 %v3978_v50  ;;  %v4226_v50 = vld [vmem:[#allocation4 + $0x44] sm:$0xf] }
 0x424   : > { %v2113_v21 = vor.u32 1.1754944e-38, %v2112_v15  ;;  %vm2111_vm2 = vcmp.eq.f32.partialorder %v2110_v17, 8.507059e+37  ;;  %v3966_v1 = vor.u32 %v4245_v63, %v3965_v61  ;;  %v4243_v3 = vld [vmem:[#allocation4 + $0xcc] sm:$0xf]  ;;  %v3903_v63 = vld [vmem:[#allocation4 + $0x58] sm:$0xf0] }
 0x425   : > { %v2128_v24 = vor.u32 1.1754944e-38, %v2127_v11  ;;  %vm2126_vm3 = vcmp.eq.f32.partialorder %v2125_v14, 8.507059e+37  ;;  %v3970_v5 = vor.u32 %v4243_v3, %v3967_v4  ;;  %v4239_v15 = vld [vmem:[#allocation4 + $0xac] sm:$0xf]  ;;  %v3951_v11 = vld [vmem:[#allocation4 + $0xb8] sm:$0xf0] }
 0x426   : > { %v4373_v6 = vpop.eup %4372  ;;  %2715 = vmatpush.bf16.msrb.mxu2 %v3966_v1  ;;  %v3954_v17 = vor.u32 %v4239_v15, %v3951_v11  ;;  %v4236_v14 = vld [vmem:[#allocation4 + $0x8c] sm:$0xf0]  ;;  %v3877_v1 = vld [vmem:[#allocation4 + $0x20] sm:$0xf]  ;;  %v4222_v4 = vld [vmem:[#allocation4 + $0x24] sm:$0xf] }
 0x427   : > { %v2135_v8 = vadd.f32 1.0, %v4373_v6  ;;  %v3941_v6 = vld [vmem:[#allocation4 + $0xa0] sm:$0xf]  ;;  %2728 = vmatpush.bf16.msrb.mxu3 %v3970_v5  ;;  %v4224_v3 = vld [vmem:[#allocation4 + $0x2c] sm:$0xf0] }
 0x428   : > { %v4375_v28 = vpop.eup %4374  ;;  %v4223_v11 = vld [vmem:[#allocation4 + $0x2c] sm:$0xf] }
 0x429   : > { %v4377_v10 = vpop.eup %4376  ;;  %v2102_v12 = vmul.f32 %v4375_v28, %v2099_v56  ;;  %4378 = vrcp.f32 %v2135_v8  ;;  %vm2107_vm12 = vweird.f32 %v4375_v28  ;;  %v2147_v58 = vand.u32 2147483648, %v2135_v8  ;;  %v4244_v56 = vld [vmem:[#allocation4 + $0xcc] sm:$0xf0] }
 0x42a   : > { %v2117_v32 = vmul.f32 %v4377_v10, %v2100_v60  ;;  %4380 = vtanh.f32 %v2090_v9  ;;  %vm2122_vm13 = vweird.f32 %v4377_v10  ;;  %vm2108_vm0 = vmor %vm2106_vm14, %vm2107_vm12  ;;  %vm2141_vm5 = vweird.f32 %v2135_v8  ;;  %v3959_v60 = vld [vmem:[#allocation4 + $0xd0] sm:$0xf0] }
 0x42b   : > { %v2103_v7 = vsub.f32 1.0, %v2102_v12  ;;  %vm2123_vm1 = vmor %vm2121_vm15, %vm2122_vm13  ;;  %v2145_v38 = vand.u32 2147483647, %v2135_v8  ;;  %v2148_v41 = vor.u32 1.1754944e-38, %v2147_v58  ;;  %v3958_v59 = vor.u32 %v4244_v56, %v3957_v55  ;;  %v3949_v12 = vld [vmem:[#allocation4 + $0xa8] sm:$0xf]  ;;  %2729 = vmatpush.bf16.msrb.mxu3 %v3954_v17 }
 0x42c   : > { %v2118_v13 = vsub.f32 1.0, %v2117_v32  ;;  %v3962_v0 = vor.u32 %v4242_v57, %v3959_v60  ;;  %v4241_v32 = vld [vmem:[#allocation4 + $0xb4] sm:$0xf0]  ;;  %v3911_v58 = vld [vmem:[#allocation4 + $0x70] sm:$0xf0]  ;;  %v3898_v56 = vor.u32 %v4226_v50, %v3895_v54 }
 0x42d   : > { %v2104_v16 = vmul.f32 %v4375_v28, %v2103_v7  ;;  %vm2146_vm7 = vcmp.eq.f32.partialorder %v2145_v38, 8.507059e+37  ;;  %v3917_v38 = vld [vmem:[#allocation4 + $0x68] sm:$0xf]  ;;  %v4227_v60 = vld [vmem:[#allocation4 + $0x4c] sm:$0xf] }
 0x42e   : > { %v2119_v18 = vmul.f32 %v4377_v10, %v2118_v13  ;;  %2702 = vmatpush.bf16.msrb.mxu1 %v3962_v0  ;;  %v3950_v13 = vor.u32 %v4241_v32, %v3949_v12  ;;  %v3901_v57 = vld [vmem:[#allocation4 + $0x48] sm:$0xf]  ;;  %v3906_v0 = vor.u32 %v4227_v60, %v3903_v63 }
 0x42f   : > { %v4379_v19 = vpop.eup %4378  ;;  %v2105_v20 = vadd.f32 %v4375_v28, %v2104_v16  ;;  %v3723_v16 = vld [vmem:[%s4521_s26 + $0x60] sm:$0xff] }
 0x430   : > { %v2120_v22 = vadd.f32 %v4377_v10, %v2119_v18  ;;  %v2137_v23 = vmul.f32 %v4379_v19, %v2135_v8  ;;  %v4381_v26 = vpop.eup %4380  ;;  %vm2142_vm4 = vweird.f32 %v4379_v19  ;;  %v4240_v8 = vld [vmem:[#allocation4 + $0xac] sm:$0xf0]  ;;  %2716 = vmatpush.bf16.msrb.mxu2 %v3950_v13  ;;  %v3925_v18 = vld [vmem:[#allocation4 + $0x80] sm:$0xf] }
 0x431   : > { %v2109_v25 = vsel %vm2108_vm0, %v4375_v28, %v2105_v20  ;;  %vm2143_vm6 = vmor %vm2141_vm5, %vm2142_vm4  ;;  %v4238_v28 = vld [vmem:[#allocation4 + $0xa4] sm:$0xf]  ;;  %v3942_v9 = vor.u32 %v4240_v8, %v3941_v6  ;;  %v3926_v20 = vor.u32 %v4236_v14, %v3925_v18  ;;  %v3878_v8 = vor.u32 %v4224_v3, %v3877_v1  ;;  %v3861_v14 = vld [vmem:[#allocation4] sm:$0xf] }
 0x432   : > { %v2114_v27 = vsel %vm2111_vm2, %v2113_v21, %v2109_v25  ;;  %v2124_v29 = vsel %vm2123_vm1, %v4377_v10, %v2120_v22  ;;  %v2138_v30 = vsub.f32 1.0, %v2137_v23  ;;  %v3943_v10 = vld [vmem:[#allocation4 + $0xb0] sm:$0xf0]  ;;  %v3933_v22 = vld [vmem:[#allocation4 + $0x88] sm:$0xf] }
 0x433   : > { %v2129_v31 = vsel %vm2126_vm3, %v2128_v24, %v2124_v29  ;;  %v2152_v33 = vmul.f32 %v4381_v26, %v2114_v27  ;;  %v3946_v7 = vor.u32 %v4238_v28, %v3943_v10  ;;  %v3927_v21 = vld [vmem:[#allocation4 + $0x90] sm:$0xf0]  ;;  %v4237_v23 = vld [vmem:[#allocation4 + $0x94] sm:$0xf0]  ;;  %v4235_v26 = vld [vmem:[#allocation4 + $0x8c] sm:$0xf]  ;;  %v2164_v29 = vunpack.c.l.bf16 %v3723_v16 }
 0x434   : > { %v2151_v34 = vmul.f32 %v2129_v31, %v4579_v2  ;;  %v2139_v36 = vmul.f32 %v4379_v19, %v2138_v30  ;;  %v3973_v2 = vld [vmem:[#allocation4 + $0xe0] sm:$0xf]  ;;  %v3934_v25 = vor.u32 %v4237_v23, %v3933_v22  ;;  %v3935_v27 = vld [vmem:[#allocation4 + $0x98] sm:$0xf0]  ;;  %v2165_v30 = vunpack.c.h.bf16 %v3723_v16  ;;  %v3879_v28 = vld [vmem:[#allocation4 + $0x30] sm:$0xf0] }
 0x435   : > { %v3974_v47 = vor.u32 %v4248_v40, %v3973_v2  ;;  %2703 = vmatpush.bf16.msrb.mxu1 %v3946_v7  ;;  %v3938_v31 = vor.u32 %v4235_v26, %v3935_v27  ;;  %v3919_v2 = vld [vmem:[#allocation4 + $0x78] sm:$0xf0]  ;;  %v4225_v10 = vld [vmem:[#allocation4 + $0x34] sm:$0xf0]  ;;  %v3882_v13 = vor.u32 %v4222_v4, %v3879_v28  ;;  %v4218_v22 = vld [vmem:[#allocation4 + $0x4] sm:$0xf] }
 0x436   : > { %v4590_v37 = vadd.f32 %v2152_v33, %v2151_v34  ;;  %v2140_v35 = vadd.f32 %v4379_v19, %v2139_v36  ;;  %2717 = vmatpush.bf16.msrb.mxu2 %v3934_v25  ;;  %v3909_v33 = vld [vmem:[#allocation4 + $0x60] sm:$0xf]  ;;  %v4232_v34 = vld [vmem:[#allocation4 + $0x6c] sm:$0xf0]  ;;  %v4230_v36 = vld [vmem:[#allocation4 + $0x64] sm:$0xf] }
 0x437   : > { %2688 = vmatpush.bf16.msrb.mxu0 %v3974_v47  ;;  %2730 = vmatpush.bf16.msrb.mxu3 %v3938_v31  ;;  %v4596_v47 = vld [vmem:[%s4521_s26 + $0x68] sm:$0xff]  ;;  %v3863_v23 = vld [vmem:[#allocation4 + $0x10] sm:$0xf0] }
 0x438   : > { %4382 = vtanh.f32 %v4590_v37  ;;  %v2144_v39 = vsel %vm2143_vm6, %v4379_v19, %v2140_v35  ;;  %v4234_v19 = vld [vmem:[#allocation4 + $0x84] sm:$0xf]  ;;  %v3910_v35 = vor.u32 %v4232_v34, %v3909_v33  ;;  %v2167_v55 = vunpack.c.h.bf16 %v4596_v47  ;;  %v3887_v16 = vld [vmem:[#allocation4 + $0x38] sm:$0xf0]  ;;  %v4219_v33 = vld [vmem:[#allocation4 + $0xc] sm:$0xf] }
 0x439   : > { %v2149_v42 = vsel %vm2146_vm7, %v2148_v41, %v2144_v39  ;;  %v3930_v24 = vor.u32 %v4234_v19, %v3927_v21  ;;  %v4233_v39 = vld [vmem:[#allocation4 + $0x74] sm:$0xf0]  ;;  %v3890_v17 = vor.u32 %v4223_v11, %v3887_v16  ;;  %v4220_v19 = vld [vmem:[#allocation4 + $0xc] sm:$0xf0]  ;;  %v3866_v27 = vor.u32 %v4218_v22, %v3863_v23  ;;  %v3871_v34 = vld [vmem:[#allocation4 + $0x18] sm:$0xf0] }
 0x43a   : > { %v3862_v21 = vor.u32 %v4220_v19, %v3861_v14 }
 0x43b   : > { %2689 = vmatpush.bf16.msrb.mxu0 %v3958_v59  ;;  %2704 = vmatpush.bf16.msrb.mxu1 %v3930_v24  ;;  %v4229_v59 = vld [vmem:[#allocation4 + $0x54] sm:$0xf0]  ;;  %v3869_v24 = vld [vmem:[#allocation4 + $0x8] sm:$0xf] }
 0x43c   : > { %v3902_v61 = vor.u32 %v4229_v59, %v3901_v57 }
 0x43e   : > { %v4383_v62 = vpop.eup %4382 }
 0x43f   : > { %v2155_v43 = vmul.f32 %v4383_v62, %v2149_v42  ;;  %2690 = vmatpush.bf16.msrb.mxu0 %v3942_v9  ;;  %v3914_v42 = vor.u32 %v4230_v36, %v3911_v58  ;;  %v3885_v9 = vld [vmem:[#allocation4 + $0x28] sm:$0xf]  ;;  %v2166_v58 = vunpack.c.l.bf16 %v4596_v47 }
 0x440   : > { %v3886_v15 = vor.u32 %v4225_v10, %v3885_v9 }
 0x441   : > { %v2158_v45 = vpack.c.bf16 %v2155_v43, %v2155_v43  ;;  %v3918_v43 = vor.u32 %v4233_v39, %v3917_v38  ;;  %2705 = vmatpush.bf16.msrb.mxu1 %v3914_v42  ;;  %v3874_v38 = vor.u32 %v4219_v33, %v3871_v34 }
 0x443   : > { %3722 = vst [vmem:[%s4526_s29 + $0x14] sm:$0xf] %v2158_v45  ;;  %2370 = vmatmul.bf16.vlgmr.msra.gmra.mxu0 %v2158_v45  ;;  %2383 = vmatmul.bf16.vlgmr.msra.gmra.mxu1 %v2158_v45 }
 0x444   : > { %2396 = vmatmul.bf16.vlgmr.msra.gmra.mxu2 %v2158_v45  ;;  %2409 = vmatmul.bf16.vlgmr.msra.gmra.mxu3 %v2158_v45  ;;  %v4231_v45 = vld [vmem:[#allocation4 + $0x6c] sm:$0xf] }
 0x445   : > { %2691 = vmatpush.bf16.msrb.mxu0 %v3926_v20  ;;  %v3922_v48 = vor.u32 %v4231_v45, %v3919_v2  ;;  %2718 = vmatpush.bf16.msrb.mxu2 %v3918_v43 }
 0x446   : > { %2706 = vmatpush.bf16.msrb.mxu1 %v3898_v56 }
 0x447   : > { %2731 = vmatpush.bf16.msrb.mxu3 %v3922_v48 }
 0x449   : > { %2692 = vmatpush.bf16.msrb.mxu0 %v3910_v35  ;;  %2719 = vmatpush.bf16.msrb.mxu2 %v3902_v61 }
 0x44a   : > { %2707 = vmatpush.bf16.msrb.mxu1 %v3882_v13 }
 0x44b   : > { %2732 = vmatpush.bf16.msrb.mxu3 %v3906_v0 }
 0x44d   : > { %2693 = vmatpush.bf16.msrb.mxu0 %v3894_v53  ;;  %2720 = vmatpush.bf16.msrb.mxu2 %v3886_v15  ;;  %v3857_v15 = vld [vmem:[%s4521_s26 + $0x70] sm:$0xff] }
 0x44e   : > { %2708 = vmatpush.bf16.msrb.mxu1 %v3866_v27  ;;  %v2490_v11 = vunpack.c.l.bf16 %v3857_v15  ;;  %v2491_v16 = vunpack.c.h.bf16 %v3857_v15 }
 0x44f   : > { %2733 = vmatpush.bf16.msrb.mxu3 %v3890_v17 }
 0x451   : > { %2694 = vmatpush.bf16.msrb.mxu0 %v3878_v8 }
 0x453   : > { %2734 = vmatpush.bf16.msrb.mxu3 %v3874_v38 }
 0x455   : > { %2695 = vmatpush.bf16.msrb.mxu0 %v3862_v21 }
 0x4c0   : > { %v2371_v41 = vpop.f32.mrf.mxu0  ;;  %v2384_v62 = vpop.f32.mrf.mxu1 }
 0x4c1   : > { %v2414_v40 = vadd.f32 %v2371_v41, %v2164_v29  ;;  %v2415_v46 = vadd.f32 %v2384_v62, %v2165_v30  ;;  %v4221_v29 = vld [vmem:[#allocation4 + $0x14] sm:$0xf0] }
 0x4c2   : > { %v3870_v31 = vor.u32 %v4221_v29, %v3869_v24 }
 0x4c3   : > { %v3853_v51 = vmul.f32 -1.442695, %v2414_v40  ;;  %v3854_v52 = vmul.f32 -1.442695, %v2415_v46 }
 0x4c4   : > { %2721 = vmatpush.bf16.msrb.mxu2 %v3870_v31 }
 0x4c5   : > { %4384 = vpow2.f32 %v3853_v51 }
 0x4c6   : > { %4386 = vpow2.f32 %v3854_v52 }
 0x4c7   : > { %v2397_v5 = vpop.f32.mrf.mxu2  ;;  %v2410_v6 = vpop.f32.mrf.mxu3 }
 0x4c8   : > { %v2417_v12 = vadd.f32 %v2410_v6, %v2167_v55  ;;  %v2373_v32 = vpop.f32.mrf.mxu0  ;;  %v2386_v7 = vpop.f32.mrf.mxu1  ;;  %v2416_v42 = vadd.f32 %v2397_v5, %v2166_v58 }
 0x4ca   : > { %v3855_v18 = vmul.f32 -1.442695, %v2417_v12 }
 0x4cb   : > { %v4385_v20 = vpop.eup %4384 }
 0x4cc   : > { %v4387_v25 = vpop.eup %4386  ;;  %v2425_v26 = vadd.f32 1.0, %v4385_v20  ;;  %4388 = vpow2.f32 %v3855_v18  ;;  %v3858_v20 = vld [vmem:[%s4521_s26 + $0x78] sm:$0xff] }
 0x4cd   : > { %v2426_v30 = vadd.f32 1.0, %v4387_v25  ;;  %v2493_v23 = vunpack.c.h.bf16 %v3858_v20  ;;  %v2492_v38 = vunpack.c.l.bf16 %v3858_v20 }
 0x4ce   : > { %4390 = vrcp.f32 %v2425_v26  ;;  %v2438_v48 = vand.u32 2147483648, %v2425_v26  ;;  %v2436_v50 = vand.u32 2147483647, %v2425_v26  ;;  %vm2432_vm10 = vweird.f32 %v2425_v26 }
 0x4cf   : > { %4392 = vrcp.f32 %v2426_v30  ;;  %v2399_v36 = vpop.f32.mrf.mxu2  ;;  %v2412_v35 = vpop.f32.mrf.mxu3  ;;  %v2453_v44 = vand.u32 2147483648, %v2426_v30  ;;  %v2451_v47 = vand.u32 2147483647, %v2426_v30  ;;  %vm2447_vm11 = vweird.f32 %v2426_v30 }
 0x4d0   : > { %v2439_v54 = vor.u32 1.1754944e-38, %v2438_v48  ;;  %vm2437_vm14 = vcmp.eq.f32.partialorder %v2436_v50, 8.507059e+37 }
 0x4d1   : > { %v2454_v57 = vor.u32 1.1754944e-38, %v2453_v44  ;;  %vm2452_vm15 = vcmp.eq.f32.partialorder %v2451_v47, 8.507059e+37 }
 0x4d2   : > { %v4389_v39 = vpop.eup %4388 }
 0x4d3   : > { %v2461_v41 = vadd.f32 1.0, %v4389_v39 }
 0x4d4   : > { %v4391_v62 = vpop.eup %4390 }
 0x4d5   : > { %v4393_v43 = vpop.eup %4392  ;;  %v2428_v45 = vmul.f32 %v4391_v62, %v2425_v26  ;;  %4394 = vrcp.f32 %v2461_v41  ;;  %vm2433_vm8 = vweird.f32 %v4391_v62  ;;  %v2473_v28 = vand.u32 2147483648, %v2461_v41 }
 0x4d6   : > { %v2443_v2 = vmul.f32 %v4393_v43, %v2426_v30  ;;  %4396 = vtanh.f32 %v2416_v42  ;;  %vm2448_vm9 = vweird.f32 %v4393_v43  ;;  %vm2434_vm12 = vmor %vm2432_vm10, %vm2433_vm8  ;;  %vm2467_vm1 = vweird.f32 %v2461_v41 }
 0x4d7   : > { %v2429_v40 = vsub.f32 1.0, %v2428_v45  ;;  %vm2449_vm13 = vmor %vm2447_vm11, %vm2448_vm9  ;;  %v2471_v9 = vand.u32 2147483647, %v2461_v41  ;;  %v2474_v12 = vor.u32 1.1754944e-38, %v2473_v28 }
 0x4d8   : > { %v2444_v46 = vsub.f32 1.0, %v2443_v2 }
 0x4d9   : > { %v2430_v49 = vmul.f32 %v4391_v62, %v2429_v40  ;;  %vm2472_vm3 = vcmp.eq.f32.partialorder %v2471_v9, 8.507059e+37 }
 0x4da   : > { %v2445_v51 = vmul.f32 %v4393_v43, %v2444_v46 }
 0x4db   : > { %v4395_v52 = vpop.eup %4394  ;;  %v2431_v53 = vadd.f32 %v4391_v62, %v2430_v49 }
 0x4dc   : > { %v2446_v55 = vadd.f32 %v4393_v43, %v2445_v51  ;;  %v2463_v56 = vmul.f32 %v4395_v52, %v2461_v41  ;;  %v4397_v60 = vpop.eup %4396  ;;  %vm2468_vm0 = vweird.f32 %v4395_v52 }
 0x4dd   : > { %v2435_v59 = vsel %vm2434_vm12, %v4391_v62, %v2431_v53  ;;  %vm2469_vm2 = vmor %vm2467_vm1, %vm2468_vm0 }
 0x4de   : > { %v2440_v61 = vsel %vm2437_vm14, %v2439_v54, %v2435_v59  ;;  %v2450_v63 = vsel %vm2449_vm13, %v4393_v43, %v2446_v55  ;;  %v2464_v0 = vsub.f32 1.0, %v2463_v56 }
 0x4df   : > { %v2455_v1 = vsel %vm2452_vm15, %v2454_v57, %v2450_v63  ;;  %v2478_v3 = vmul.f32 %v4397_v60, %v2440_v61 }
 0x4e0   : > { %v2477_v4 = vmul.f32 %v2455_v1, %v4590_v37  ;;  %v2465_v5 = vmul.f32 %v4395_v52, %v2464_v0 }
 0x4e2   : > { %v4601_v6 = vadd.f32 %v2478_v3, %v2477_v4  ;;  %v2466_v8 = vadd.f32 %v4395_v52, %v2465_v5 }
 0x4e4   : > { %4398 = vtanh.f32 %v4601_v6  ;;  %v2470_v10 = vsel %vm2469_vm2, %v4395_v52, %v2466_v8 }
 0x4e5   : > { %v2475_v7 = vsel %vm2472_vm3, %v2474_v12, %v2470_v10 }
 0x4ea   : > { %v4399_v32 = vpop.eup %4398 }
 0x4eb   : > { %v2481_v37 = vmul.f32 %v4399_v32, %v2475_v7 }
 0x4ed   : > { %v2484_v13 = vpack.c.bf16 %v2481_v37, %v2481_v37 }
 0x4ef   : > { %3856 = vst [vmem:[%s4526_s29 + $0x18] sm:$0xf] %v2484_v13  ;;  %2696 = vmatmul.bf16.vlgmr.msrb.gmra.mxu0 %v2484_v13  ;;  %2709 = vmatmul.bf16.vlgmr.msrb.gmra.mxu1 %v2484_v13 }
 0x4f0   : > { %2722 = vmatmul.bf16.vlgmr.msrb.gmra.mxu2 %v2484_v13  ;;  %2735 = vmatmul.bf16.vlgmr.msrb.gmra.mxu3 %v2484_v13 }
 0x56c   : > { %v2697_v17 = vpop.f32.mrf.mxu0  ;;  %v2710_v18 = vpop.f32.mrf.mxu1 }
 0x56d   : > { %v2740_v14 = vadd.f32 %v2697_v17, %v2490_v11  ;;  %v2741_v19 = vadd.f32 %v2710_v18, %v2491_v16 }
 0x56f   : > { %v3987_v21 = vmul.f32 -1.442695, %v2740_v14  ;;  %v3988_v22 = vmul.f32 -1.442695, %v2741_v19 }
 0x571   : > { %4400 = vpow2.f32 %v3987_v21 }
 0x572   : > { %4402 = vpow2.f32 %v3988_v22 }
 0x573   : > { %v2723_v24 = vpop.f32.mrf.mxu2  ;;  %v2736_v25 = vpop.f32.mrf.mxu3 }
 0x574   : > { %v2743_v26 = vadd.f32 %v2736_v25, %v2493_v23  ;;  %v2699_v27 = vpop.f32.mrf.mxu0  ;;  %v2712_v29 = vpop.f32.mrf.mxu1  ;;  %v2742_v42 = vadd.f32 %v2723_v24, %v2492_v38 }
 0x576   : > { %v3989_v30 = vmul.f32 -1.442695, %v2743_v26 }
 0x577   : > { %v4401_v31 = vpop.eup %4400 }
 0x578   : > { %v4403_v33 = vpop.eup %4402  ;;  %v2751_v34 = vadd.f32 1.0, %v4401_v31  ;;  %4404 = vpow2.f32 %v3989_v30 }
 0x579   : > { %v2752_v36 = vadd.f32 1.0, %v4403_v33 }
 0x57a   : > { %4406 = vrcp.f32 %v2751_v34  ;;  %v2764_v48 = vand.u32 2147483648, %v2751_v34  ;;  %v2762_v50 = vand.u32 2147483647, %v2751_v34  ;;  %vm2758_vm6 = vweird.f32 %v2751_v34 }
 0x57b   : > { %4408 = vrcp.f32 %v2752_v36  ;;  %v2725_v35 = vpop.f32.mrf.mxu2  ;;  %v2738_v58 = vpop.f32.mrf.mxu3  ;;  %v2779_v44 = vand.u32 2147483648, %v2752_v36  ;;  %v2777_v47 = vand.u32 2147483647, %v2752_v36  ;;  %vm2773_vm7 = vweird.f32 %v2752_v36 }
 0x57c   : > { %v2765_v54 = vor.u32 1.1754944e-38, %v2764_v48  ;;  %vm2763_vm10 = vcmp.eq.f32.partialorder %v2762_v50, 8.507059e+37 }
 0x57d   : > { %v2780_v57 = vor.u32 1.1754944e-38, %v2779_v44  ;;  %vm2778_vm11 = vcmp.eq.f32.partialorder %v2777_v47, 8.507059e+37 }
 0x57e   : > { %v4405_v39 = vpop.eup %4404 }
 0x57f   : > { %v2787_v41 = vadd.f32 1.0, %v4405_v39 }
 0x580   : > { %v4407_v62 = vpop.eup %4406 }
 0x581   : > { %v4409_v43 = vpop.eup %4408  ;;  %v2754_v45 = vmul.f32 %v4407_v62, %v2751_v34  ;;  %4410 = vrcp.f32 %v2787_v41  ;;  %vm2759_vm4 = vweird.f32 %v4407_v62  ;;  %v2799_v9 = vand.u32 2147483648, %v2787_v41 }
 0x582   : > { %v2769_v2 = vmul.f32 %v4409_v43, %v2752_v36  ;;  %4412 = vtanh.f32 %v2742_v42  ;;  %vm2774_vm5 = vweird.f32 %v4409_v43  ;;  %vm2760_vm8 = vmor %vm2758_vm6, %vm2759_vm4  ;;  %vm2793_vm13 = vweird.f32 %v2787_v41 }
 0x583   : > { %v2755_v40 = vsub.f32 1.0, %v2754_v45  ;;  %vm2775_vm9 = vmor %vm2773_vm7, %vm2774_vm5  ;;  %v2797_v10 = vand.u32 2147483647, %v2787_v41  ;;  %v2800_v32 = vor.u32 1.1754944e-38, %v2799_v9 }
 0x584   : > { %v2770_v46 = vsub.f32 1.0, %v2769_v2 }
 0x585   : > { %v2756_v49 = vmul.f32 %v4407_v62, %v2755_v40  ;;  %vm2798_vm15 = vcmp.eq.f32.partialorder %v2797_v10, 8.507059e+37 }
 0x586   : > { %v2771_v51 = vmul.f32 %v4409_v43, %v2770_v46 }
 0x587   : > { %v4411_v52 = vpop.eup %4410  ;;  %v2757_v53 = vadd.f32 %v4407_v62, %v2756_v49 }
 0x588   : > { %v2772_v55 = vadd.f32 %v4409_v43, %v2771_v51  ;;  %v2789_v56 = vmul.f32 %v4411_v52, %v2787_v41  ;;  %v4413_v60 = vpop.eup %4412  ;;  %vm2794_vm12 = vweird.f32 %v4411_v52 }
 0x589   : > { %v2761_v59 = vsel %vm2760_vm8, %v4407_v62, %v2757_v53  ;;  %vm2795_vm14 = vmor %vm2793_vm13, %vm2794_vm12 }
 0x58a   : > { %v2766_v61 = vsel %vm2763_vm10, %v2765_v54, %v2761_v59  ;;  %v2776_v63 = vsel %vm2775_vm9, %v4409_v43, %v2772_v55  ;;  %v2790_v0 = vsub.f32 1.0, %v2789_v56 }
 0x58b   : > { %v2781_v1 = vsel %vm2778_vm11, %v2780_v57, %v2776_v63  ;;  %v2804_v3 = vmul.f32 %v4413_v60, %v2766_v61 }
 0x58c   : > { %v2803_v4 = vmul.f32 %v2781_v1, %v4601_v6  ;;  %v2791_v5 = vmul.f32 %v4411_v52, %v2790_v0 }
 0x58e   : > { %v2805_v8 = vadd.f32 %v2804_v3, %v2803_v4  ;;  %v2792_v28 = vadd.f32 %v4411_v52, %v2791_v5 }
 0x590   : > { %4414 = vtanh.f32 %v2805_v8  ;;  %2809 = vst [vmem:[#allocation3] sm:$0xff] %v2805_v8  ;;  %v2796_v12 = vsel %vm2795_vm14, %v4411_v52, %v2792_v28 }
 0x591   : > { %v2801_v37 = vsel %vm2798_vm15, %v2800_v32, %v2796_v12 }
 0x596   : > { %v4415_v7 = vpop.eup %4414 }
 0x597   : > { %v2807_v13 = vmul.f32 %v4415_v7, %v2801_v37 }
 0x599   : > { %2808 = vst [vmem:[#allocation2] sm:$0xff] %v2807_v13  ;;  %v2810_v15 = vpack.c.bf16 %v2807_v13, %v2807_v13 }
 0x59b   : > { %3990 = vst [vmem:[%s4526_s29 + $0x1c] sm:$0xf] %v2810_v15 }
 0x59c PF: > { %s13_s11 = sadd.s32 1, %s4472_s11   ;;  %s4621_s9 = smov %s4468_s10 }
 0x59d   : > { %p10_p9 = scmp.ge.s32.totalorder %s13_s11, 4   ;;  %s4622_s10 = smov %s4624_s13 }
 0x59f   :  { %12 = sbr.rel (!%p10_p9) target bundleno = 2 (0x2), region = 81 }
 0x5a4   :  { %2841 = vsyncpa [#allocation5], 1 }
 0x5a5   :  { %2843 = vsyncpa [#allocation5 + $0x1], 1 }

// kernel: qmodel_forward.7
= control target key start
LH: loop header
LB: loop body
LE: loop exit
PB: predicated region body
PF: predicated region fallthrough
CT: control target
= control target key end

     0   :  { %9 = vsyncpa [#allocation5], 0  ;;  %s4850_s0 = inlined_call_operand.vmem [shape: bf16[16,8,512], index: 0, kind: input, shape index: {}]   ;;  %s4851_s1 = inlined_call_operand.hbm [shape: bf16[128,512], index: 1, kind: input, shape index: {}]   ;;  %s4852_s2 = inlined_call_operand.hbm [shape: bf16[128,128], index: 2, kind: input, shape index: {}]   ;;  %s4853_s3 = inlined_call_operand.vmem [shape: f32[1,128], index: 3, kind: input, shape index: {}]   ;;  %s4854_s4 = inlined_call_operand.vmem [shape: f32[8,128], index: 4, kind: output, shape index: {}]  }
   0x1   :  { %10 = vsyncpa [#allocation7], 0  ;;  %s4706_s15 = smov 0   ;;  %s4708_s16 = smov 0  }
   0x2   :  { %s4710_s17 = smov 0  }
   0x3 LB: > { %s3028_s18 = sadd.s32 4294967295, %s4672_s17   ;;  %s25_s19 = sadd.s32 1, %s4668_s16  ;;  %s4672_s17 = sphi %s4710_s17, %s16_s17   ;;  %s4668_s16 = sphi %s4708_s16, %s4858_s16   ;;  %s4664_s15 = sphi %s4706_s15, %s4857_s15  }
   0x4   : > { %p26_p0 = scmp.ge.s32.totalorder %s25_s19, 2  ;;  %p3029_p1 = scmp.ge.s32.totalorder %s4672_s17, 1 }
   0x5   : > { %p150_p2 = scmp.lt.s32.totalorder %s4672_s17, 3  ;;  %p4731_p4 = scmp.eq.s32.totalorder %s3028_s18, 0 }
   0x6   : > { %s4860_s19 = smov (%p26_p0, %s25_s19), 0  ;;  %s161_s24 = sshll.u32 %s4851_s1, 4  ;;  %s162_s24 = int_to_ptr.hbm [resolvable:$true] %s161_s24 }
   0x7   : > { %p4727_p3 = pnand %p3029_p1, %p150_p2  ;;  %s4674_s25 = smov [#allocation4]  }
   0x8   : > { %s163_s26 = sshll.u32 %s4674_s25, 4  ;;  %s175_s29 = sshll.u32 %s4852_s2, 4  ;;  %s164_s26 = int_to_ptr.vmem [resolvable:$true] %s163_s26  ;;  %s176_s29 = int_to_ptr.hbm [resolvable:$true] %s175_s29 }
   0x9   : > { %p4411_p5 = pneg %p4727_p3  ;;  %s4675_s30 = smov 256  }
   0xa   : > { %s4676_s5 = smov 16   ;;  %s4677_s6 = smov [#allocation6]  }
   0xb   : > { %p4412_p6 = pnand %p4731_p4, %p4411_p5  ;;  %s177_s7 = sshll.u32 %s4677_s6, 4  ;;  %s178_s7 = int_to_ptr.vmem [resolvable:$true] %s177_s7 }
   0xc   : > { %s4678_s8 = smov 64   ;;  %s4679_s9 = smov 4  }
   0xd   : > { %4414 = dma.hbm_to_vmem [thread:$0]  (!%p4412_p6), %s162_s24, 4096, %s164_s26, [#allocation5], %s4675_s30, %s4675_s30, %s4676_s5  }
   0xe   : > { %4417 = dma.hbm_to_vmem [thread:$0]  (!%p4412_p6), %s176_s29, 1024, %s178_s7, [#allocation7], %s4678_s8, %s4678_s8, %s4679_s9  }
   0xf   : > { %210 = sbr.rel (%p4727_p3) target bundleno = 1608 (0x648), region = 36 }
  0x14   : > { %4655 = dma.done.wait (%p4731_p4), [#allocation5], 4096  }
  0x15   : > { %4657 = vsyncadd (%p4731_p4), [#allocation5], 4294963200 }
  0x16   : > { %4659 = dma.done.wait (%p4731_p4), [#allocation7], 1024  }
  0x17   : > { %4661 = vsyncadd (%p4731_p4), [#allocation7], 4294966272  ;;  %s3036_s10 = sshll.u32 %s4664_s15, 3  ;;  %p3039_p8 = scmp.ne.s32.totalorder %s4664_s15, 0 }
  0x18   : > { %p247_p7 = scmp.lt.s32.totalorder %s3036_s10, 15 }
  0x19   : > { %264 = sbr.rel (%p3039_p8) target bundleno = 33 (0x21), region = 48 }
  0x1a   : > { %s4862_s10 = smov (!%p247_p7, %s3036_s10), 15 }
  0x1b   : > { %s4138_s11 = sshll.u32 %s4862_s10, 4 }
  0x1c   : > { %s4759_s14 = scalar_lea.vmem %s4850_s0, %s4138_s11 }
  0x1e   : > { %v4680_v0 = vmov 0.0  }
  0x1f   : > { %265 = vst [vmem:[#allocation2] sm:$0xff] %v4680_v0 }
  0x20   : > { %266 = vst [vmem:[#allocation3] sm:$0xff] %v4680_v0 }
  0x21 PF: > { %v3154_v1 = vld [vmem:[#allocation4 + $0xe0] sm:$0xf]  ;;  %v4169_v2 = vld [vmem:[#allocation4 + $0xec] sm:$0xf0]  ;;  %v4167_v3 = vld [vmem:[#allocation4 + $0xe4] sm:$0xf] }
  0x22   : > { %v3155_v4 = vor.u32 %v4169_v2, %v3154_v1  ;;  %v3156_v5 = vld [vmem:[#allocation4 + $0xf0] sm:$0xf0]  ;;  %v4168_v6 = vld [vmem:[#allocation4 + $0xec] sm:$0xf]  ;;  %v3164_v7 = vld [vmem:[#allocation4 + $0xf8] sm:$0xf0] }
  0x23   : > { %v3159_v8 = vor.u32 %v4167_v3, %v3156_v5  ;;  %v3167_v9 = vor.u32 %v4168_v6, %v3164_v7  ;;  %v3138_v10 = vld [vmem:[#allocation4 + $0xc0] sm:$0xf]  ;;  %v4165_v11 = vld [vmem:[#allocation4 + $0xcc] sm:$0xf0]  ;;  %v4163_v12 = vld [vmem:[#allocation4 + $0xc4] sm:$0xf] }
  0x24   : > { %467 = vmatpush.bf16.msra.mxu0 %v3155_v4  ;;  %v3139_v13 = vor.u32 %v4165_v11, %v3138_v10  ;;  %v3140_v14 = vld [vmem:[#allocation4 + $0xd0] sm:$0xf0]  ;;  %v4164_v15 = vld [vmem:[#allocation4 + $0xcc] sm:$0xf]  ;;  %v3148_v16 = vld [vmem:[#allocation4 + $0xd8] sm:$0xf0] }
  0x25   : > { %480 = vmatpush.bf16.msra.mxu1 %v3159_v8  ;;  %506 = vmatpush.bf16.msra.mxu3 %v3167_v9  ;;  %v3143_v17 = vor.u32 %v4163_v12, %v3140_v14  ;;  %v3151_v18 = vor.u32 %v4164_v15, %v3148_v16  ;;  %v3162_v19 = vld [vmem:[#allocation4 + $0xe8] sm:$0xf]  ;;  %v4170_v20 = vld [vmem:[#allocation4 + $0xf4] sm:$0xf0]  ;;  %v3122_v21 = vld [vmem:[#allocation4 + $0xa0] sm:$0xf] }
  0x26   : > { %v3163_v22 = vor.u32 %v4170_v20, %v3162_v19  ;;  %v4161_v23 = vld [vmem:[#allocation4 + $0xac] sm:$0xf0]  ;;  %v4159_v24 = vld [vmem:[#allocation4 + $0xa4] sm:$0xf]  ;;  %v3124_v25 = vld [vmem:[#allocation4 + $0xb0] sm:$0xf0] }
  0x27   : > { %v4160_v26 = vld [vmem:[#allocation4 + $0xac] sm:$0xf]  ;;  %v3132_v27 = vld [vmem:[#allocation4 + $0xb8] sm:$0xf0]  ;;  %v3146_v28 = vld [vmem:[#allocation4 + $0xc8] sm:$0xf]  ;;  %v3123_v29 = vor.u32 %v4161_v23, %v3122_v21  ;;  %v3127_v33 = vor.u32 %v4159_v24, %v3124_v25 }
  0x28   : > { %468 = vmatpush.bf16.msra.mxu0 %v3139_v13  ;;  %493 = vmatpush.bf16.msra.mxu2 %v3163_v22  ;;  %v4166_v30 = vld [vmem:[#allocation4 + $0xd4] sm:$0xf0]  ;;  %v3106_v31 = vld [vmem:[#allocation4 + $0x80] sm:$0xf]  ;;  %v4157_v32 = vld [vmem:[#allocation4 + $0x8c] sm:$0xf0]  ;;  %v3135_v34 = vor.u32 %v4160_v26, %v3132_v27 }
  0x29   : > { %481 = vmatpush.bf16.msra.mxu1 %v3143_v17  ;;  %507 = vmatpush.bf16.msra.mxu3 %v3151_v18  ;;  %v3147_v35 = vor.u32 %v4166_v30, %v3146_v28  ;;  %v4155_v36 = vld [vmem:[#allocation4 + $0x84] sm:$0xf]  ;;  %v3108_v37 = vld [vmem:[#allocation4 + $0x90] sm:$0xf0]  ;;  %v4156_v38 = vld [vmem:[#allocation4 + $0x8c] sm:$0xf]  ;;  %v3107_v42 = vor.u32 %v4157_v32, %v3106_v31 }
  0x2a   : > { %v3116_v39 = vld [vmem:[#allocation4 + $0x98] sm:$0xf0]  ;;  %v3130_v40 = vld [vmem:[#allocation4 + $0xa8] sm:$0xf]  ;;  %v4162_v41 = vld [vmem:[#allocation4 + $0xb4] sm:$0xf0]  ;;  %v3111_v46 = vor.u32 %v4155_v36, %v3108_v37 }
  0x2b   : > { %v3131_v43 = vor.u32 %v4162_v41, %v3130_v40  ;;  %v3090_v44 = vld [vmem:[#allocation4 + $0x60] sm:$0xf]  ;;  %v4153_v45 = vld [vmem:[#allocation4 + $0x6c] sm:$0xf0]  ;;  %v3119_v47 = vor.u32 %v4156_v38, %v3116_v39  ;;  %v4151_v48 = vld [vmem:[#allocation4 + $0x64] sm:$0xf] }
  0x2c   : > { %469 = vmatpush.bf16.msra.mxu0 %v3123_v29  ;;  %494 = vmatpush.bf16.msra.mxu2 %v3147_v35  ;;  %v3114_v49 = vld [vmem:[#allocation4 + $0x88] sm:$0xf]  ;;  %v4158_v50 = vld [vmem:[#allocation4 + $0x94] sm:$0xf0]  ;;  %v3092_v51 = vld [vmem:[#allocation4 + $0x70] sm:$0xf0]  ;;  %v3091_v54 = vor.u32 %v4153_v45, %v3090_v44 }
  0x2d   : > { %482 = vmatpush.bf16.msra.mxu1 %v3127_v33  ;;  %508 = vmatpush.bf16.msra.mxu3 %v3135_v34  ;;  %v4152_v52 = vld [vmem:[#allocation4 + $0x6c] sm:$0xf]  ;;  %v3100_v53 = vld [vmem:[#allocation4 + $0x78] sm:$0xf0]  ;;  %v3115_v55 = vor.u32 %v4158_v50, %v3114_v49  ;;  %v3074_v56 = vld [vmem:[#allocation4 + $0x40] sm:$0xf]  ;;  %v3095_v58 = vor.u32 %v4151_v48, %v3092_v51 }
  0x2e   : > { %v4149_v57 = vld [vmem:[#allocation4 + $0x4c] sm:$0xf0]  ;;  %v3103_v59 = vor.u32 %v4152_v52, %v3100_v53  ;;  %v4147_v60 = vld [vmem:[#allocation4 + $0x44] sm:$0xf]  ;;  %v3098_v61 = vld [vmem:[#allocation4 + $0x68] sm:$0xf] }
  0x2f   : > { %v4154_v62 = vld [vmem:[#allocation4 + $0x74] sm:$0xf0]  ;;  %v3076_v63 = vld [vmem:[#allocation4 + $0x50] sm:$0xf0]  ;;  %v4148_v0 = vld [vmem:[#allocation4 + $0x4c] sm:$0xf]  ;;  %v3075_v2 = vor.u32 %v4149_v57, %v3074_v56 }
  0x30   : > { %470 = vmatpush.bf16.msra.mxu0 %v3107_v42  ;;  %495 = vmatpush.bf16.msra.mxu2 %v3131_v43  ;;  %v3084_v1 = vld [vmem:[#allocation4 + $0x58] sm:$0xf0]  ;;  %v3099_v3 = vor.u32 %v4154_v62, %v3098_v61  ;;  %v3058_v4 = vld [vmem:[#allocation4 + $0x20] sm:$0xf]  ;;  %v4145_v5 = vld [vmem:[#allocation4 + $0x2c] sm:$0xf0]  ;;  %v3079_v6 = vor.u32 %v4147_v60, %v3076_v63 }
  0x31   : > { %483 = vmatpush.bf16.msra.mxu1 %v3111_v46  ;;  %509 = vmatpush.bf16.msra.mxu3 %v3119_v47  ;;  %v3087_v7 = vor.u32 %v4148_v0, %v3084_v1  ;;  %v4143_v8 = vld [vmem:[#allocation4 + $0x24] sm:$0xf]  ;;  %v3082_v9 = vld [vmem:[#allocation4 + $0x48] sm:$0xf]  ;;  %v4150_v10 = vld [vmem:[#allocation4 + $0x54] sm:$0xf0]  ;;  %v3059_v14 = vor.u32 %v4145_v5, %v3058_v4 }
  0x32   : > { %v3060_v11 = vld [vmem:[#allocation4 + $0x30] sm:$0xf0]  ;;  %v4144_v12 = vld [vmem:[#allocation4 + $0x2c] sm:$0xf]  ;;  %v3068_v13 = vld [vmem:[#allocation4 + $0x38] sm:$0xf0]  ;;  %v3083_v15 = vor.u32 %v4150_v10, %v3082_v9 }
  0x33   : > { %v3042_v16 = vld [vmem:[#allocation4] sm:$0xf]  ;;  %v4141_v17 = vld [vmem:[#allocation4 + $0xc] sm:$0xf0]  ;;  %v3063_v18 = vor.u32 %v4143_v8, %v3060_v11  ;;  %v3071_v19 = vor.u32 %v4144_v12, %v3068_v13  ;;  %v4139_v20 = vld [vmem:[#allocation4 + $0x4] sm:$0xf] }
  0x34   : > { %471 = vmatpush.bf16.msra.mxu0 %v3091_v54  ;;  %496 = vmatpush.bf16.msra.mxu2 %v3115_v55  ;;  %v3066_v21 = vld [vmem:[#allocation4 + $0x28] sm:$0xf]  ;;  %v4146_v22 = vld [vmem:[#allocation4 + $0x34] sm:$0xf0]  ;;  %v3044_v23 = vld [vmem:[#allocation4 + $0x10] sm:$0xf0]  ;;  %v3043_v26 = vor.u32 %v4141_v17, %v3042_v16 }
  0x35   : > { %484 = vmatpush.bf16.msra.mxu1 %v3095_v58  ;;  %510 = vmatpush.bf16.msra.mxu3 %v3103_v59  ;;  %v4140_v24 = vld [vmem:[#allocation4 + $0xc] sm:$0xf]  ;;  %v3052_v25 = vld [vmem:[#allocation4 + $0x18] sm:$0xf0]  ;;  %v273_v27 = vld [vmem:[#allocation2] sm:$0xff]  ;;  %v3067_v28 = vor.u32 %v4146_v22, %v3066_v21  ;;  %v3047_v29 = vor.u32 %v4139_v20, %v3044_v23  ;;  %p4102_p9 = scmp.ne.s32.totalorder %s4664_s15, 1 }
  0x36   : > { %v3055_v30 = vor.u32 %v4140_v24, %v3052_v25  ;;  %v3050_v31 = vld [vmem:[#allocation4 + $0x8] sm:$0xf]  ;;  %v4142_v32 = vld [vmem:[#allocation4 + $0x14] sm:$0xf0]  ;;  %v274_v33 = vpack.c.bf16 %v273_v27, %v273_v27  ;;  %v3287_v35 = vld [vmem:[#allocation4 + $0xe0] sm:$0xf] }
  0x37   : > { %v3051_v34 = vor.u32 %v4142_v32, %v3050_v31  ;;  %v4201_v36 = vld [vmem:[#allocation4 + $0xec] sm:$0xf0]  ;;  %v4199_v37 = vld [vmem:[#allocation4 + $0xe4] sm:$0xf]  ;;  %v3289_v39 = vld [vmem:[#allocation4 + $0xf0] sm:$0xf0] }
  0x38   : > { %472 = vmatpush.bf16.msra.mxu0 %v3075_v2  ;;  %497 = vmatpush.bf16.msra.mxu2 %v3099_v3  ;;  %v3288_v38 = vor.u32 %v4201_v36, %v3287_v35  ;;  %v3295_v40 = vld [vmem:[#allocation4 + $0xe8] sm:$0xf]  ;;  %v4202_v41 = vld [vmem:[#allocation4 + $0xf4] sm:$0xf0]  ;;  %v3292_v42 = vor.u32 %v4199_v37, %v3289_v39  ;;  %v4200_v44 = vld [vmem:[#allocation4 + $0xec] sm:$0xf] }
  0x39   : > { %485 = vmatpush.bf16.msra.mxu1 %v3079_v6  ;;  %511 = vmatpush.bf16.msra.mxu3 %v3087_v7  ;;  %v3296_v43 = vor.u32 %v4202_v41, %v3295_v40  ;;  %v3297_v45 = vld [vmem:[#allocation4 + $0xf8] sm:$0xf0]  ;;  %v3271_v47 = vld [vmem:[#allocation4 + $0xc0] sm:$0xf]  ;;  %v4197_v48 = vld [vmem:[#allocation4 + $0xcc] sm:$0xf0] }
  0x3a   : > { %v3300_v46 = vor.u32 %v4200_v44, %v3297_v45  ;;  %v4195_v49 = vld [vmem:[#allocation4 + $0xc4] sm:$0xf]  ;;  %v3272_v50 = vor.u32 %v4197_v48, %v3271_v47  ;;  %v3273_v51 = vld [vmem:[#allocation4 + $0xd0] sm:$0xf0]  ;;  %v3279_v52 = vld [vmem:[#allocation4 + $0xc8] sm:$0xf] }
  0x3b   : > { %v4198_v53 = vld [vmem:[#allocation4 + $0xd4] sm:$0xf0]  ;;  %v3276_v54 = vor.u32 %v4195_v49, %v3273_v51  ;;  %v4196_v56 = vld [vmem:[#allocation4 + $0xcc] sm:$0xf]  ;;  %v3281_v57 = vld [vmem:[#allocation4 + $0xd8] sm:$0xf0] }
  0x3c   : > { %473 = vmatpush.bf16.msra.mxu0 %v3059_v14  ;;  %498 = vmatpush.bf16.msra.mxu2 %v3083_v15  ;;  %v3280_v55 = vor.u32 %v4198_v53, %v3279_v52  ;;  %v3284_v58 = vor.u32 %v4196_v56, %v3281_v57  ;;  %v3255_v59 = vld [vmem:[#allocation4 + $0xa0] sm:$0xf]  ;;  %v4193_v60 = vld [vmem:[#allocation4 + $0xac] sm:$0xf0]  ;;  %v4191_v61 = vld [vmem:[#allocation4 + $0xa4] sm:$0xf] }
  0x3d   : > { %486 = vmatpush.bf16.msra.mxu1 %v3063_v18  ;;  %512 = vmatpush.bf16.msra.mxu3 %v3071_v19  ;;  %v3256_v62 = vor.u32 %v4193_v60, %v3255_v59  ;;  %v3257_v63 = vld [vmem:[#allocation4 + $0xb0] sm:$0xf0]  ;;  %v3263_v0 = vld [vmem:[#allocation4 + $0xa8] sm:$0xf]  ;;  %v4194_v1 = vld [vmem:[#allocation4 + $0xb4] sm:$0xf0] }
  0x3e   : > { %v3260_v2 = vor.u32 %v4191_v61, %v3257_v63  ;;  %v3264_v3 = vor.u32 %v4194_v1, %v3263_v0  ;;  %v4192_v4 = vld [vmem:[#allocation4 + $0xac] sm:$0xf]  ;;  %v3265_v5 = vld [vmem:[#allocation4 + $0xb8] sm:$0xf0]  ;;  %v267_v6 = vld [vmem:[%s4759_s14] sm:$0xff] }
  0x3f   : > { %v3268_v7 = vor.u32 %v4192_v4, %v3265_v5  ;;  %v3239_v8 = vld [vmem:[#allocation4 + $0x80] sm:$0xf]  ;;  %v4189_v9 = vld [vmem:[#allocation4 + $0x8c] sm:$0xf0]  ;;  %v4187_v10 = vld [vmem:[#allocation4 + $0x84] sm:$0xf]  ;;  %v269_v19 = vunpack.c.l.bf16 %v267_v6  ;;  %v270_v21 = vunpack.c.h.bf16 %v267_v6 }
  0x40   : > { %474 = vmatpush.bf16.msra.mxu0 %v3043_v26  ;;  %499 = vmatpush.bf16.msra.mxu2 %v3067_v28  ;;  %v3240_v11 = vor.u32 %v4189_v9, %v3239_v8  ;;  %v3241_v12 = vld [vmem:[#allocation4 + $0x90] sm:$0xf0]  ;;  %v3247_v13 = vld [vmem:[#allocation4 + $0x88] sm:$0xf]  ;;  %v4190_v14 = vld [vmem:[#allocation4 + $0x94] sm:$0xf0] }
  0x41   : > { %487 = vmatpush.bf16.msra.mxu1 %v3047_v29  ;;  %513 = vmatpush.bf16.msra.mxu3 %v3055_v30  ;;  %v3244_v15 = vor.u32 %v4187_v10, %v3241_v12  ;;  %v3248_v16 = vor.u32 %v4190_v14, %v3247_v13  ;;  %v4188_v17 = vld [vmem:[#allocation4 + $0x8c] sm:$0xf]  ;;  %v3249_v18 = vld [vmem:[#allocation4 + $0x98] sm:$0xf0]  ;;  %v3223_v22 = vld [vmem:[#allocation4 + $0x60] sm:$0xf] }
  0x42   : > { %v3252_v20 = vor.u32 %v4188_v17, %v3249_v18  ;;  %v4185_v23 = vld [vmem:[#allocation4 + $0x6c] sm:$0xf0]  ;;  %v4183_v24 = vld [vmem:[#allocation4 + $0x64] sm:$0xf]  ;;  %v3225_v26 = vld [vmem:[#allocation4 + $0x70] sm:$0xf0] }
  0x43   : > { %475 = vmatmul.bf16.vlgmr.msra.gmra.mxu0 %v274_v33  ;;  %v3224_v25 = vor.u32 %v4185_v23, %v3223_v22  ;;  %v3231_v27 = vld [vmem:[#allocation4 + $0x68] sm:$0xf]  ;;  %v3228_v29 = vor.u32 %v4183_v24, %v3225_v26  ;;  %v4186_v30 = vld [vmem:[#allocation4 + $0x74] sm:$0xf0]  ;;  %v4184_v31 = vld [vmem:[#allocation4 + $0x6c] sm:$0xf] }
  0x44   : > { %488 = vmatmul.bf16.vlgmr.msra.gmra.mxu1 %v274_v33  ;;  %514 = vmatmul.bf16.vlgmr.msra.gmra.mxu3 %v274_v33  ;;  %v3233_v32 = vld [vmem:[#allocation4 + $0x78] sm:$0xf0]  ;;  %v3232_v36 = vor.u32 %v4186_v30, %v3231_v27  ;;  %v3207_v39 = vld [vmem:[#allocation4 + $0x40] sm:$0xf]  ;;  %v4181_v40 = vld [vmem:[#allocation4 + $0x4c] sm:$0xf0] }
  0x45   : > { %500 = vmatpush.bf16.msra.mxu2 %v3051_v34  ;;  %790 = vmatpush.bf16.msrb.mxu0 %v3288_v38  ;;  %v4764_v35 = vld [vmem:[%s4759_s14 + $0x8] sm:$0xff]  ;;  %v3236_v37 = vor.u32 %v4184_v31, %v3233_v32  ;;  %v4179_v41 = vld [vmem:[#allocation4 + $0x44] sm:$0xf]  ;;  %v3209_v44 = vld [vmem:[#allocation4 + $0x50] sm:$0xf0] }
  0x46   : > { %803 = vmatpush.bf16.msrb.mxu1 %v3292_v42  ;;  %829 = vmatpush.bf16.msrb.mxu3 %v3300_v46  ;;  %v3215_v45 = vld [vmem:[#allocation4 + $0x48] sm:$0xf]  ;;  %v272_v47 = vunpack.c.h.bf16 %v4764_v35  ;;  %v3212_v48 = vor.u32 %v4179_v41, %v3209_v44  ;;  %v4182_v49 = vld [vmem:[#allocation4 + $0x54] sm:$0xf0]  ;;  %v3217_v52 = vld [vmem:[#allocation4 + $0x58] sm:$0xf0]  ;;  %v271_v23 = vunpack.c.l.bf16 %v4764_v35 }
  0x47   : > { %v3216_v51 = vor.u32 %v4182_v49, %v3215_v45  ;;  %v4175_v56 = vld [vmem:[#allocation4 + $0x24] sm:$0xf]  ;;  %v3193_v59 = vld [vmem:[#allocation4 + $0x30] sm:$0xf0]  ;;  %v3199_v60 = vld [vmem:[#allocation4 + $0x28] sm:$0xf] }
  0x48   : > { %501 = vmatmul.bf16.vlgmr.msra.gmra.mxu2 %v274_v33  ;;  %v4178_v61 = vld [vmem:[#allocation4 + $0x34] sm:$0xf0]  ;;  %v3196_v0 = vor.u32 %v4175_v56, %v3193_v59  ;;  %v4173_v8 = vld [vmem:[#allocation4 + $0xc] sm:$0xf0]  ;;  %v4171_v12 = vld [vmem:[#allocation4 + $0x4] sm:$0xf] }
  0x49   : > { %816 = vmatpush.bf16.msrb.mxu2 %v3296_v43  ;;  %791 = vmatpush.bf16.msrb.mxu0 %v3272_v50  ;;  %v3208_v43 = vor.u32 %v4181_v40, %v3207_v39  ;;  %v4180_v50 = vld [vmem:[#allocation4 + $0x4c] sm:$0xf]  ;;  %v3200_v1 = vor.u32 %v4178_v61, %v3199_v60  ;;  %v3177_v13 = vld [vmem:[#allocation4 + $0x10] sm:$0xf0]  ;;  %v3183_v14 = vld [vmem:[#allocation4 + $0x8] sm:$0xf] }
  0x4a   : > { %804 = vmatpush.bf16.msrb.mxu1 %v3276_v54  ;;  %830 = vmatpush.bf16.msrb.mxu3 %v3284_v58  ;;  %v3220_v53 = vor.u32 %v4180_v50, %v3217_v52  ;;  %v3191_v54 = vld [vmem:[#allocation4 + $0x20] sm:$0xf]  ;;  %v3180_v17 = vor.u32 %v4171_v12, %v3177_v13  ;;  %v4174_v18 = vld [vmem:[#allocation4 + $0x14] sm:$0xf0]  ;;  %v3185_v22 = vld [vmem:[#allocation4 + $0x18] sm:$0xf0] }
  0x4b   : > { %v523_v49 = vld [vmem:[#allocation3] sm:$0xff]  ;;  %v4232_v13 = vld [vmem:[#allocation4 + $0xec] sm:$0xf] }
  0x4d   : > { %817 = vmatpush.bf16.msrb.mxu2 %v3280_v55  ;;  %792 = vmatpush.bf16.msrb.mxu0 %v3256_v62  ;;  %v4177_v55 = vld [vmem:[#allocation4 + $0x2c] sm:$0xf0] }
  0x4e   : > { %805 = vmatpush.bf16.msrb.mxu1 %v3260_v2  ;;  %831 = vmatpush.bf16.msrb.mxu3 %v3268_v7  ;;  %v3192_v58 = vor.u32 %v4177_v55, %v3191_v54  ;;  %v4176_v2 = vld [vmem:[#allocation4 + $0x2c] sm:$0xf]  ;;  %v3175_v7 = vld [vmem:[#allocation4] sm:$0xf] }
  0x51   : > { %818 = vmatpush.bf16.msrb.mxu2 %v3264_v3  ;;  %793 = vmatpush.bf16.msrb.mxu0 %v3240_v11  ;;  %v3201_v3 = vld [vmem:[#allocation4 + $0x38] sm:$0xf0]  ;;  %v3176_v11 = vor.u32 %v4173_v8, %v3175_v7  ;;  %v3422_v8 = vld [vmem:[#allocation4 + $0xf0] sm:$0xf0] }
  0x52   : > { %806 = vmatpush.bf16.msrb.mxu1 %v3244_v15  ;;  %832 = vmatpush.bf16.msrb.mxu3 %v3252_v20  ;;  %v3204_v5 = vor.u32 %v4176_v2, %v3201_v3  ;;  %v3184_v20 = vor.u32 %v4174_v18, %v3183_v14  ;;  %v3430_v14 = vld [vmem:[#allocation4 + $0xf8] sm:$0xf0]  ;;  %v4227_v18 = vld [vmem:[#allocation4 + $0xc4] sm:$0xf] }
  0x55   : > { %819 = vmatpush.bf16.msrb.mxu2 %v3248_v16  ;;  %794 = vmatpush.bf16.msrb.mxu0 %v3224_v25 }
  0x56   : > { %807 = vmatpush.bf16.msrb.mxu1 %v3228_v29  ;;  %833 = vmatpush.bf16.msrb.mxu3 %v3236_v37 }
  0x59   : > { %820 = vmatpush.bf16.msrb.mxu2 %v3232_v36  ;;  %795 = vmatpush.bf16.msrb.mxu0 %v3208_v43 }
  0x5a   : > { %808 = vmatpush.bf16.msrb.mxu1 %v3212_v48  ;;  %834 = vmatpush.bf16.msrb.mxu3 %v3220_v53 }
  0x5d   : > { %821 = vmatpush.bf16.msrb.mxu2 %v3216_v51  ;;  %796 = vmatpush.bf16.msrb.mxu0 %v3192_v58 }
  0x5e   : > { %809 = vmatpush.bf16.msrb.mxu1 %v3196_v0  ;;  %835 = vmatpush.bf16.msrb.mxu3 %v3204_v5  ;;  %v4233_v5 = vld [vmem:[#allocation4 + $0xec] sm:$0xf0] }
  0x61   : > { %822 = vmatpush.bf16.msrb.mxu2 %v3200_v1  ;;  %797 = vmatpush.bf16.msrb.mxu0 %v3176_v11 }
  0x62   : > { %810 = vmatpush.bf16.msrb.mxu1 %v3180_v17  ;;  %v4229_v17 = vld [vmem:[#allocation4 + $0xcc] sm:$0xf0] }
  0x65   : > { %823 = vmatpush.bf16.msrb.mxu2 %v3184_v20  ;;  %v3406_v20 = vld [vmem:[#allocation4 + $0xd0] sm:$0xf0] }
  0xc0   : > { %v476_v28 = vpop.f32.mrf.mxu0 }
  0xc1   : > { %v519_v33 = vadd.f32 %v476_v28, %v269_v19  ;;  %v489_v34 = vpop.f32.mrf.mxu1 }
  0xc2   : > { %v520_v38 = vadd.f32 %v489_v34, %v270_v21  ;;  %v4172_v21 = vld [vmem:[#allocation4 + $0xc] sm:$0xf] }
  0xc3   : > { %v3168_v42 = vmul.f32 -1.442695, %v519_v33  ;;  %v3188_v25 = vor.u32 %v4172_v21, %v3185_v22  ;;  %v3412_v21 = vld [vmem:[#allocation4 + $0xc8] sm:$0xf]  ;;  %v4230_v22 = vld [vmem:[#allocation4 + $0xd4] sm:$0xf0] }
  0xc4   : > { %v3169_v46 = vmul.f32 -1.442695, %v520_v38 }
  0xc5   : > { %4453 = vpow2.f32 %v3168_v42  ;;  %836 = vmatpush.bf16.msrb.mxu3 %v3188_v25  ;;  %v4228_v25 = vld [vmem:[#allocation4 + $0xcc] sm:$0xf] }
  0xc6   : > { %4455 = vpow2.f32 %v3169_v46 }
  0xc7   : > { %v515_v57 = vpop.f32.mrf.mxu3 }
  0xc8   : > { %v522_v62 = vadd.f32 %v515_v57, %v272_v47  ;;  %v478_v63 = vpop.f32.mrf.mxu0 }
  0xc9   : > { %v491_v4 = vpop.f32.mrf.mxu1 }
  0xca   : > { %v3170_v6 = vmul.f32 -1.442695, %v522_v62  ;;  %v3420_v4 = vld [vmem:[#allocation4 + $0xe0] sm:$0xf] }
  0xcb   : > { %v4454_v9 = vpop.eup %4453  ;;  %v502_v10 = vpop.f32.mrf.mxu2  ;;  %v3421_v7 = vor.u32 %v4233_v5, %v3420_v4  ;;  %v3366_v4 = vld [vmem:[#allocation4 + $0x78] sm:$0xf0] }
  0xcc   : > { %v4456_v15 = vpop.eup %4455  ;;  %v530_v16 = vadd.f32 1.0, %v4454_v9  ;;  %4457 = vpow2.f32 %v3170_v6  ;;  %v521_v27 = vadd.f32 %v502_v10, %v271_v23  ;;  %v4231_v6 = vld [vmem:[#allocation4 + $0xe4] sm:$0xf]  ;;  %v3428_v9 = vld [vmem:[#allocation4 + $0xe8] sm:$0xf]  ;;  %v3409_v23 = vor.u32 %v4227_v18, %v3406_v20 }
  0xcd   : > { %v531_v19 = vadd.f32 1.0, %v4456_v15  ;;  %v4234_v10 = vld [vmem:[#allocation4 + $0xf4] sm:$0xf0]  ;;  %v3425_v11 = vor.u32 %v4231_v6, %v3422_v8  ;;  %1113 = vmatpush.bf16.msra.mxu0 %v3421_v7  ;;  %v3433_v15 = vor.u32 %v4232_v13, %v3430_v14  ;;  %v4773_v7 = vld [vmem:[%s4759_s14 + $0x18] sm:$0xff] }
  0xce   : > { %4459 = vrcp.f32 %v530_v16  ;;  %v543_v37 = vand.u32 2147483648, %v530_v16  ;;  %v541_v39 = vand.u32 2147483647, %v530_v16  ;;  %vm537_vm2 = vweird.f32 %v530_v16  ;;  %v3348_v18 = vld [vmem:[#allocation4 + $0x48] sm:$0xf] }
  0xcf   : > { %4461 = vrcp.f32 %v531_v19  ;;  %v517_v24 = vpop.f32.mrf.mxu3  ;;  %v558_v35 = vand.u32 2147483648, %v531_v19  ;;  %v556_v41 = vand.u32 2147483647, %v531_v19  ;;  %vm552_vm3 = vweird.f32 %v531_v19  ;;  %1126 = vmatpush.bf16.msra.mxu1 %v3425_v11  ;;  %1152 = vmatpush.bf16.msra.mxu3 %v3433_v15  ;;  %v4211_v11 = vld [vmem:[#allocation4 + $0x44] sm:$0xf] }
  0xd0   : > { %v544_v46 = vor.u32 1.1754944e-38, %v543_v37  ;;  %vm542_vm6 = vcmp.eq.f32.partialorder %v541_v39, 8.507059e+37  ;;  %v3429_v12 = vor.u32 %v4234_v10, %v3428_v9  ;;  %v3413_v24 = vor.u32 %v4230_v22, %v3412_v21  ;;  %v3171_v39 = vld [vmem:[%s4759_s14 + $0x10] sm:$0xff]  ;;  %v4213_v10 = vld [vmem:[#allocation4 + $0x4c] sm:$0xf0] }
  0xd1   : > { %v559_v48 = vor.u32 1.1754944e-38, %v558_v35  ;;  %vm557_vm7 = vcmp.eq.f32.partialorder %v556_v41, 8.507059e+37  ;;  %v4224_v35 = vld [vmem:[#allocation4 + $0xac] sm:$0xf]  ;;  %v3372_v41 = vld [vmem:[#allocation4 + $0x80] sm:$0xf] }
  0xd2   : > { %v4458_v26 = vpop.eup %4457  ;;  %1139 = vmatpush.bf16.msra.mxu2 %v3429_v12  ;;  %v3340_v9 = vld [vmem:[#allocation4 + $0x40] sm:$0xf]  ;;  %v3342_v15 = vld [vmem:[#allocation4 + $0x50] sm:$0xf0]  ;;  %v4212_v20 = vld [vmem:[#allocation4 + $0x4c] sm:$0xf] }
  0xd3   : > { %v566_v28 = vadd.f32 1.0, %v4458_v26  ;;  %v504_v29 = vpop.f32.mrf.mxu2  ;;  %v3414_v26 = vld [vmem:[#allocation4 + $0xd8] sm:$0xf0]  ;;  %1127 = vmatpush.bf16.msra.mxu1 %v3409_v23  ;;  %v3341_v14 = vor.u32 %v4213_v10, %v3340_v9 }
  0xd4   : > { %v4460_v30 = vpop.eup %4459  ;;  %v4225_v29 = vld [vmem:[#allocation4 + $0xac] sm:$0xf0]  ;;  %v3350_v22 = vld [vmem:[#allocation4 + $0x58] sm:$0xf0] }
  0xd5   : > { %v4462_v31 = vpop.eup %4461  ;;  %v533_v32 = vmul.f32 %v4460_v30, %v530_v16  ;;  %4463 = vrcp.f32 %v566_v28  ;;  %vm538_vm0 = vweird.f32 %v4460_v30  ;;  %v578_v60 = vand.u32 2147483648, %v566_v28  ;;  %v3404_v16 = vld [vmem:[#allocation4 + $0xc0] sm:$0xf] }
  0xd6   : > { %v548_v33 = vmul.f32 %v4462_v31, %v531_v19  ;;  %4465 = vtanh.f32 %v521_v27  ;;  %vm553_vm1 = vweird.f32 %v4462_v31  ;;  %vm539_vm4 = vmor %vm537_vm2, %vm538_vm0  ;;  %vm572_vm9 = vweird.f32 %v566_v28  ;;  %1140 = vmatpush.bf16.msra.mxu2 %v3413_v24  ;;  %v3324_v24 = vld [vmem:[#allocation4 + $0x20] sm:$0xf] }
  0xd7   : > { %v534_v34 = vsub.f32 1.0, %v533_v32  ;;  %vm554_vm5 = vmor %vm552_vm3, %vm553_vm1  ;;  %v576_v61 = vand.u32 2147483647, %v566_v28  ;;  %v579_v63 = vor.u32 1.1754944e-38, %v578_v60  ;;  %v3405_v19 = vor.u32 %v4229_v17, %v3404_v16  ;;  %v3390_v32 = vld [vmem:[#allocation4 + $0xb0] sm:$0xf0] }
  0xd8   : > { %v549_v36 = vsub.f32 1.0, %v548_v33  ;;  %v3417_v27 = vor.u32 %v4228_v25, %v3414_v26  ;;  %v3396_v33 = vld [vmem:[#allocation4 + $0xa8] sm:$0xf]  ;;  %v3358_v60 = vld [vmem:[#allocation4 + $0x70] sm:$0xf0]  ;;  %v595_v16 = vunpack.c.h.bf16 %v4773_v7  ;;  %v3345_v17 = vor.u32 %v4211_v11, %v3342_v15 }
  0xd9   : > { %v535_v38 = vmul.f32 %v4460_v30, %v534_v34  ;;  %vm577_vm11 = vcmp.eq.f32.partialorder %v576_v61, 8.507059e+37  ;;  %1114 = vmatpush.bf16.msra.mxu0 %v3405_v19  ;;  %v4226_v34 = vld [vmem:[#allocation4 + $0xb4] sm:$0xf0]  ;;  %v3364_v61 = vld [vmem:[#allocation4 + $0x68] sm:$0xf]  ;;  %v3353_v23 = vor.u32 %v4212_v20, %v3350_v22 }
  0xda   : > { %v550_v40 = vmul.f32 %v4462_v31, %v549_v36  ;;  %1153 = vmatpush.bf16.msra.mxu3 %v3417_v27  ;;  %v3397_v37 = vor.u32 %v4226_v34, %v3396_v33  ;;  %v4214_v19 = vld [vmem:[#allocation4 + $0x54] sm:$0xf0]  ;;  %v4209_v25 = vld [vmem:[#allocation4 + $0x2c] sm:$0xf0]  ;;  %v4207_v26 = vld [vmem:[#allocation4 + $0x24] sm:$0xf] }
  0xdb   : > { %v4464_v42 = vpop.eup %4463  ;;  %v536_v43 = vadd.f32 %v4460_v30, %v535_v38  ;;  %v3398_v38 = vld [vmem:[#allocation4 + $0xb8] sm:$0xf0]  ;;  %v3349_v21 = vor.u32 %v4214_v19, %v3348_v18 }
  0xdc   : > { %v4466_v44 = vpop.eup %4465  ;;  %v568_v45 = vmul.f32 %v4464_v42, %v566_v28  ;;  %v551_v47 = vadd.f32 %v4462_v31, %v550_v40  ;;  %vm573_vm8 = vweird.f32 %v4464_v42  ;;  %v3388_v28 = vld [vmem:[#allocation4 + $0xa0] sm:$0xf]  ;;  %v3401_v40 = vor.u32 %v4224_v35, %v3398_v38  ;;  %1141 = vmatpush.bf16.msra.mxu2 %v3397_v37  ;;  %v4208_v38 = vld [vmem:[#allocation4 + $0x2c] sm:$0xf] }
  0xdd   : > { %v540_v50 = vsel %vm539_vm4, %v4460_v30, %v536_v43  ;;  %vm574_vm10 = vmor %vm572_vm9, %vm573_vm8  ;;  %v4223_v30 = vld [vmem:[#allocation4 + $0xa4] sm:$0xf] }
  0xde   : > { %v569_v51 = vsub.f32 1.0, %v568_v45  ;;  %v545_v52 = vsel %vm542_vm6, %v544_v46, %v540_v50  ;;  %v555_v53 = vsel %vm554_vm5, %v4462_v31, %v551_v47  ;;  %v3389_v31 = vor.u32 %v4225_v29, %v3388_v28  ;;  %v4219_v43 = vld [vmem:[#allocation4 + $0x84] sm:$0xf]  ;;  %1154 = vmatpush.bf16.msra.mxu3 %v3401_v40  ;;  %v3374_v45 = vld [vmem:[#allocation4 + $0x90] sm:$0xf0] }
  0xdf   : > { %v560_v54 = vsel %vm557_vm7, %v559_v48, %v555_v53  ;;  %v583_v55 = vmul.f32 %v4466_v44, %v545_v52  ;;  %v3393_v36 = vor.u32 %v4223_v30, %v3390_v32  ;;  %v3380_v46 = vld [vmem:[#allocation4 + $0x88] sm:$0xf]  ;;  %v4222_v47 = vld [vmem:[#allocation4 + $0x94] sm:$0xf0]  ;;  %v3377_v48 = vor.u32 %v4219_v43, %v3374_v45  ;;  %v4220_v50 = vld [vmem:[#allocation4 + $0x8c] sm:$0xf] }
  0xe0   : > { %v570_v56 = vmul.f32 %v4464_v42, %v569_v51  ;;  %v582_v57 = vmul.f32 %v560_v54, %v523_v49  ;;  %1115 = vmatpush.bf16.msra.mxu0 %v3389_v31  ;;  %v3381_v49 = vor.u32 %v4222_v47, %v3380_v46  ;;  %v3382_v51 = vld [vmem:[#allocation4 + $0x98] sm:$0xf0]  ;;  %v592_v52 = vunpack.c.l.bf16 %v3171_v39  ;;  %v3326_v30 = vld [vmem:[#allocation4 + $0x30] sm:$0xf0]  ;;  %v3332_v31 = vld [vmem:[#allocation4 + $0x28] sm:$0xf] }
  0xe1   : > { %1128 = vmatpush.bf16.msra.mxu1 %v3393_v36  ;;  %v593_v53 = vunpack.c.h.bf16 %v3171_v39  ;;  %v3385_v54 = vor.u32 %v4220_v50, %v3382_v51  ;;  %v3325_v29 = vor.u32 %v4209_v25, %v3324_v24  ;;  %v4210_v32 = vld [vmem:[#allocation4 + $0x34] sm:$0xf0]  ;;  %v3329_v37 = vor.u32 %v4207_v26, %v3326_v30  ;;  %v3334_v39 = vld [vmem:[#allocation4 + $0x38] sm:$0xf0]  ;;  %v4205_v43 = vld [vmem:[#allocation4 + $0xc] sm:$0xf0] }
  0xe2   : > { %v4768_v58 = vadd.f32 %v583_v55, %v582_v57  ;;  %v571_v59 = vadd.f32 %v4464_v42, %v570_v56  ;;  %1142 = vmatpush.bf16.msra.mxu2 %v3381_v49  ;;  %v3356_v55 = vld [vmem:[#allocation4 + $0x60] sm:$0xf]  ;;  %v4217_v56 = vld [vmem:[#allocation4 + $0x6c] sm:$0xf0]  ;;  %v4215_v57 = vld [vmem:[#allocation4 + $0x64] sm:$0xf]  ;;  %v3333_v35 = vor.u32 %v4210_v32, %v3332_v31  ;;  %v3337_v40 = vor.u32 %v4208_v38, %v3334_v39 }
  0xe3   : > { %1155 = vmatpush.bf16.msra.mxu3 %v3385_v54  ;;  %v4203_v46 = vld [vmem:[#allocation4 + $0x4] sm:$0xf]  ;;  %v3310_v47 = vld [vmem:[#allocation4 + $0x10] sm:$0xf0]  ;;  %v4265_v38 = vld [vmem:[#allocation4 + $0xec] sm:$0xf0] }
  0xe4   : > { %4467 = vtanh.f32 %v4768_v58  ;;  %v575_v62 = vsel %vm574_vm10, %v4464_v42, %v571_v59  ;;  %v4221_v42 = vld [vmem:[#allocation4 + $0x8c] sm:$0xf0]  ;;  %v3357_v59 = vor.u32 %v4217_v56, %v3356_v55  ;;  %v3313_v51 = vor.u32 %v4203_v46, %v3310_v47  ;;  %v4204_v55 = vld [vmem:[#allocation4 + $0xc] sm:$0xf]  ;;  %v3318_v56 = vld [vmem:[#allocation4 + $0x18] sm:$0xf0] }
  0xe5   : > { %v580_v1 = vsel %vm577_vm11, %v579_v63, %v575_v62  ;;  %v3373_v44 = vor.u32 %v4221_v42, %v3372_v41  ;;  %1129 = vmatpush.bf16.msra.mxu1 %v3377_v48  ;;  %v4218_v62 = vld [vmem:[#allocation4 + $0x74] sm:$0xf0]  ;;  %v3308_v42 = vld [vmem:[#allocation4] sm:$0xf]  ;;  %v3316_v48 = vld [vmem:[#allocation4 + $0x8] sm:$0xf] }
  0xe6   : > { %v3309_v45 = vor.u32 %v4205_v43, %v3308_v42  ;;  %v4263_v39 = vld [vmem:[#allocation4 + $0xe4] sm:$0xf]  ;;  %v3561_v42 = vld [vmem:[#allocation4 + $0xe8] sm:$0xf]  ;;  %v4266_v43 = vld [vmem:[#allocation4 + $0xf4] sm:$0xf0] }
  0xe7   : > { %1116 = vmatpush.bf16.msra.mxu0 %v3373_v44  ;;  %v4264_v46 = vld [vmem:[#allocation4 + $0xec] sm:$0xf]  ;;  %v3563_v47 = vld [vmem:[#allocation4 + $0xf8] sm:$0xf0] }
  0xea   : > { %v4468_v0 = vpop.eup %4467 }
  0xeb   : > { %v586_v2 = vmul.f32 %v4468_v0, %v580_v1  ;;  %v3361_v1 = vor.u32 %v4215_v57, %v3358_v60  ;;  %1117 = vmatpush.bf16.msra.mxu0 %v3357_v59  ;;  %v594_v60 = vunpack.c.l.bf16 %v4773_v7 }
  0xed   : > { %v597_v3 = vpack.c.bf16 %v586_v2, %v586_v2  ;;  %v3365_v2 = vor.u32 %v4218_v62, %v3364_v61  ;;  %1130 = vmatpush.bf16.msra.mxu1 %v3361_v1  ;;  %v3321_v61 = vor.u32 %v4204_v55, %v3318_v56  ;;  %v4262_v55 = vld [vmem:[#allocation4 + $0xd4] sm:$0xf0] }
  0xef   : > { %798 = vmatmul.bf16.vlgmr.msrb.gmra.mxu0 %v597_v3  ;;  %811 = vmatmul.bf16.vlgmr.msrb.gmra.mxu1 %v597_v3 }
  0xf0   : > { %824 = vmatmul.bf16.vlgmr.msrb.gmra.mxu2 %v597_v3  ;;  %837 = vmatmul.bf16.vlgmr.msrb.gmra.mxu3 %v597_v3  ;;  %v4216_v3 = vld [vmem:[#allocation4 + $0x6c] sm:$0xf] }
  0xf1   : > { %v3369_v8 = vor.u32 %v4216_v3, %v3366_v4  ;;  %1143 = vmatpush.bf16.msra.mxu2 %v3365_v2  ;;  %1118 = vmatpush.bf16.msra.mxu0 %v3341_v14 }
  0xf2   : > { %1131 = vmatpush.bf16.msra.mxu1 %v3345_v17 }
  0xf3   : > { %1156 = vmatpush.bf16.msra.mxu3 %v3369_v8 }
  0xf5   : > { %1144 = vmatpush.bf16.msra.mxu2 %v3349_v21  ;;  %1119 = vmatpush.bf16.msra.mxu0 %v3325_v29 }
  0xf6   : > { %1132 = vmatpush.bf16.msra.mxu1 %v3329_v37 }
  0xf7   : > { %1157 = vmatpush.bf16.msra.mxu3 %v3353_v23 }
  0xf9   : > { %1145 = vmatpush.bf16.msra.mxu2 %v3333_v35  ;;  %1120 = vmatpush.bf16.msra.mxu0 %v3309_v45  ;;  %v3562_v45 = vor.u32 %v4266_v43, %v3561_v42  ;;  %v3473_v42 = vld [vmem:[#allocation4 + $0x40] sm:$0xf]  ;;  %v4245_v43 = vld [vmem:[#allocation4 + $0x4c] sm:$0xf0] }
  0xfa   : > { %1133 = vmatpush.bf16.msra.mxu1 %v3313_v51  ;;  %v4259_v51 = vld [vmem:[#allocation4 + $0xc4] sm:$0xf] }
  0xfb   : > { %1158 = vmatpush.bf16.msra.mxu3 %v3337_v40 }
  0xff   : > { %1159 = vmatpush.bf16.msra.mxu3 %v3321_v61 }
 0x16c   : > { %v799_v63 = vpop.f32.mrf.mxu0  ;;  %v812_v0 = vpop.f32.mrf.mxu1 }
 0x16d   : > { %v842_v5 = vadd.f32 %v799_v63, %v592_v52  ;;  %v843_v6 = vadd.f32 %v812_v0, %v593_v53  ;;  %v4206_v52 = vld [vmem:[#allocation4 + $0x14] sm:$0xf0] }
 0x16e   : > { %v3317_v54 = vor.u32 %v4206_v52, %v3316_v48  ;;  %v3566_v48 = vor.u32 %v4264_v46, %v3563_v47  ;;  %v3474_v47 = vor.u32 %v4245_v43, %v3473_v42 }
 0x16f   : > { %v3301_v12 = vmul.f32 -1.442695, %v842_v5  ;;  %v3302_v13 = vmul.f32 -1.442695, %v843_v6 }
 0x170   : > { %1146 = vmatpush.bf16.msra.mxu2 %v3317_v54  ;;  %1475 = vmatpush.bf16.msrb.mxu3 %v3566_v48  ;;  %v3545_v54 = vld [vmem:[#allocation4 + $0xc8] sm:$0xf]  ;;  %v3475_v48 = vld [vmem:[#allocation4 + $0x50] sm:$0xf0] }
 0x171   : > { %4469 = vpow2.f32 %v3301_v12 }
 0x172   : > { %4471 = vpow2.f32 %v3302_v13 }
 0x173   : > { %v825_v27 = vpop.f32.mrf.mxu2  ;;  %v838_v28 = vpop.f32.mrf.mxu3 }
 0x174   : > { %v845_v33 = vadd.f32 %v838_v28, %v595_v16  ;;  %v801_v34 = vpop.f32.mrf.mxu0  ;;  %v814_v36 = vpop.f32.mrf.mxu1  ;;  %v844_v1 = vadd.f32 %v825_v27, %v594_v60  ;;  %1462 = vmatpush.bf16.msrb.mxu2 %v3562_v45  ;;  %v3547_v60 = vld [vmem:[#allocation4 + $0xd8] sm:$0xf0] }
 0x176   : > { %v3303_v41 = vmul.f32 -1.442695, %v845_v33 }
 0x177   : > { %v4470_v44 = vpop.eup %4469 }
 0x178   : > { %v4472_v49 = vpop.eup %4471  ;;  %v853_v50 = vadd.f32 1.0, %v4470_v44  ;;  %4473 = vpow2.f32 %v3303_v41  ;;  %v3555_v41 = vld [vmem:[#allocation4 + $0xf0] sm:$0xf0] }
 0x179   : > { %v854_v53 = vadd.f32 1.0, %v4472_v49  ;;  %v3558_v44 = vor.u32 %v4263_v39, %v3555_v41  ;;  %v3537_v49 = vld [vmem:[#allocation4 + $0xc0] sm:$0xf] }
 0x17a   : > { %4475 = vrcp.f32 %v853_v50  ;;  %v866_v8 = vand.u32 2147483648, %v853_v50  ;;  %v864_v11 = vand.u32 2147483647, %v853_v50  ;;  %vm860_vm14 = vweird.f32 %v853_v50 }
 0x17b   : > { %4477 = vrcp.f32 %v854_v53  ;;  %v827_v57 = vpop.f32.mrf.mxu2  ;;  %v840_v59 = vpop.f32.mrf.mxu3  ;;  %v881_v9 = vand.u32 2147483648, %v854_v53  ;;  %v879_v7 = vand.u32 2147483647, %v854_v53  ;;  %vm875_vm15 = vweird.f32 %v854_v53  ;;  %1449 = vmatpush.bf16.msrb.mxu1 %v3558_v44  ;;  %v4243_v44 = vld [vmem:[#allocation4 + $0x44] sm:$0xf] }
 0x17c   : > { %v867_v15 = vor.u32 1.1754944e-38, %v866_v8  ;;  %vm865_vm2 = vcmp.eq.f32.partialorder %v864_v11, 8.507059e+37  ;;  %v3546_v57 = vor.u32 %v4262_v55, %v3545_v54  ;;  %v4260_v59 = vld [vmem:[#allocation4 + $0xcc] sm:$0xf]  ;;  %v3483_v55 = vld [vmem:[#allocation4 + $0x58] sm:$0xf0] }
 0x17d   : > { %v882_v18 = vor.u32 1.1754944e-38, %v881_v9  ;;  %vm880_vm3 = vcmp.eq.f32.partialorder %v879_v7, 8.507059e+37  ;;  %v3550_v61 = vor.u32 %v4260_v59, %v3547_v60  ;;  %v4256_v8 = vld [vmem:[#allocation4 + $0xac] sm:$0xf]  ;;  %v3531_v9 = vld [vmem:[#allocation4 + $0xb8] sm:$0xf0] }
 0x17e   : > { %v4474_v62 = vpop.eup %4473  ;;  %1463 = vmatpush.bf16.msrb.mxu2 %v3546_v57  ;;  %v3534_v11 = vor.u32 %v4256_v8, %v3531_v9  ;;  %v4253_v7 = vld [vmem:[#allocation4 + $0x8c] sm:$0xf0]  ;;  %v3457_v57 = vld [vmem:[#allocation4 + $0x20] sm:$0xf]  ;;  %v4239_v60 = vld [vmem:[#allocation4 + $0x24] sm:$0xf] }
 0x17f   : > { %v889_v63 = vadd.f32 1.0, %v4474_v62  ;;  %v3521_v62 = vld [vmem:[#allocation4 + $0xa0] sm:$0xf]  ;;  %1476 = vmatpush.bf16.msrb.mxu3 %v3550_v61  ;;  %v4241_v59 = vld [vmem:[#allocation4 + $0x2c] sm:$0xf0] }
 0x180   : > { %v4476_v0 = vpop.eup %4475  ;;  %v4240_v9 = vld [vmem:[#allocation4 + $0x2c] sm:$0xf] }
 0x181   : > { %v4478_v2 = vpop.eup %4477  ;;  %v856_v3 = vmul.f32 %v4476_v0, %v853_v50  ;;  %4479 = vrcp.f32 %v889_v63  ;;  %vm861_vm12 = vweird.f32 %v4476_v0  ;;  %v901_v30 = vand.u32 2147483648, %v889_v63  ;;  %v4261_v50 = vld [vmem:[#allocation4 + $0xcc] sm:$0xf0] }
 0x182   : > { %v871_v4 = vmul.f32 %v4478_v2, %v854_v53  ;;  %4481 = vtanh.f32 %v844_v1  ;;  %vm876_vm13 = vweird.f32 %v4478_v2  ;;  %vm862_vm0 = vmor %vm860_vm14, %vm861_vm12  ;;  %vm895_vm5 = vweird.f32 %v889_v63  ;;  %v3539_v53 = vld [vmem:[#allocation4 + $0xd0] sm:$0xf0] }
 0x183   : > { %v857_v5 = vsub.f32 1.0, %v856_v3  ;;  %vm877_vm1 = vmor %vm875_vm15, %vm876_vm13  ;;  %v899_v31 = vand.u32 2147483647, %v889_v63  ;;  %v902_v33 = vor.u32 1.1754944e-38, %v901_v30  ;;  %v3538_v52 = vor.u32 %v4261_v50, %v3537_v49  ;;  %v3529_v3 = vld [vmem:[#allocation4 + $0xa8] sm:$0xf]  ;;  %1477 = vmatpush.bf16.msrb.mxu3 %v3534_v11 }
 0x184   : > { %v872_v6 = vsub.f32 1.0, %v871_v4  ;;  %v3542_v56 = vor.u32 %v4259_v51, %v3539_v53  ;;  %v4258_v4 = vld [vmem:[#allocation4 + $0xb4] sm:$0xf0]  ;;  %v3491_v30 = vld [vmem:[#allocation4 + $0x70] sm:$0xf0]  ;;  %v3478_v50 = vor.u32 %v4243_v44, %v3475_v48 }
 0x185   : > { %v858_v10 = vmul.f32 %v4476_v0, %v857_v5  ;;  %vm900_vm7 = vcmp.eq.f32.partialorder %v899_v31, 8.507059e+37  ;;  %v3497_v31 = vld [vmem:[#allocation4 + $0x68] sm:$0xf]  ;;  %v4244_v53 = vld [vmem:[#allocation4 + $0x4c] sm:$0xf] }
 0x186   : > { %v873_v12 = vmul.f32 %v4478_v2, %v872_v6  ;;  %1450 = vmatpush.bf16.msrb.mxu1 %v3542_v56  ;;  %v3530_v6 = vor.u32 %v4258_v4, %v3529_v3  ;;  %v3481_v51 = vld [vmem:[#allocation4 + $0x48] sm:$0xf]  ;;  %v3486_v56 = vor.u32 %v4244_v53, %v3483_v55 }
 0x187   : > { %v4480_v13 = vpop.eup %4479  ;;  %v859_v14 = vadd.f32 %v4476_v0, %v858_v10  ;;  %v3304_v10 = vld [vmem:[%s4759_s14 + $0x20] sm:$0xff] }
 0x188   : > { %v874_v16 = vadd.f32 %v4478_v2, %v873_v12  ;;  %v891_v17 = vmul.f32 %v4480_v13, %v889_v63  ;;  %v4482_v20 = vpop.eup %4481  ;;  %vm896_vm4 = vweird.f32 %v4480_v13  ;;  %v4257_v63 = vld [vmem:[#allocation4 + $0xac] sm:$0xf0]  ;;  %1464 = vmatpush.bf16.msrb.mxu2 %v3530_v6  ;;  %v3505_v12 = vld [vmem:[#allocation4 + $0x80] sm:$0xf] }
 0x189   : > { %v863_v19 = vsel %vm862_vm0, %v4476_v0, %v859_v14  ;;  %vm897_vm6 = vmor %vm895_vm5, %vm896_vm4  ;;  %v4255_v0 = vld [vmem:[#allocation4 + $0xa4] sm:$0xf]  ;;  %v3522_v1 = vor.u32 %v4257_v63, %v3521_v62  ;;  %v3506_v14 = vor.u32 %v4253_v7, %v3505_v12  ;;  %v3458_v63 = vor.u32 %v4241_v59, %v3457_v57  ;;  %v3441_v7 = vld [vmem:[#allocation4] sm:$0xf] }
 0x18a   : > { %v868_v21 = vsel %vm865_vm2, %v867_v15, %v863_v19  ;;  %v878_v22 = vsel %vm877_vm1, %v4478_v2, %v874_v16  ;;  %v892_v23 = vsub.f32 1.0, %v891_v17  ;;  %v3523_v2 = vld [vmem:[#allocation4 + $0xb0] sm:$0xf0]  ;;  %v3513_v16 = vld [vmem:[#allocation4 + $0x88] sm:$0xf] }
 0x18b   : > { %v883_v24 = vsel %vm880_vm3, %v882_v18, %v878_v22  ;;  %v906_v25 = vmul.f32 %v4482_v20, %v868_v21  ;;  %v3526_v5 = vor.u32 %v4255_v0, %v3523_v2  ;;  %v3507_v15 = vld [vmem:[#allocation4 + $0x90] sm:$0xf0]  ;;  %v4254_v17 = vld [vmem:[#allocation4 + $0x94] sm:$0xf0]  ;;  %v4252_v20 = vld [vmem:[#allocation4 + $0x8c] sm:$0xf]  ;;  %v915_v22 = vunpack.c.l.bf16 %v3304_v10 }
 0x18c   : > { %v905_v26 = vmul.f32 %v883_v24, %v4768_v58  ;;  %v893_v27 = vmul.f32 %v4480_v13, %v892_v23  ;;  %v3553_v58 = vld [vmem:[#allocation4 + $0xe0] sm:$0xf]  ;;  %v3514_v19 = vor.u32 %v4254_v17, %v3513_v16  ;;  %v3515_v21 = vld [vmem:[#allocation4 + $0x98] sm:$0xf0]  ;;  %v916_v23 = vunpack.c.h.bf16 %v3304_v10  ;;  %v3459_v0 = vld [vmem:[#allocation4 + $0x30] sm:$0xf0] }
 0x18d   : > { %v3554_v40 = vor.u32 %v4265_v38, %v3553_v58  ;;  %1451 = vmatpush.bf16.msrb.mxu1 %v3526_v5  ;;  %v3518_v24 = vor.u32 %v4252_v20, %v3515_v21  ;;  %v3499_v58 = vld [vmem:[#allocation4 + $0x78] sm:$0xf0]  ;;  %v4242_v2 = vld [vmem:[#allocation4 + $0x34] sm:$0xf0]  ;;  %v3462_v6 = vor.u32 %v4239_v60, %v3459_v0  ;;  %v4235_v16 = vld [vmem:[#allocation4 + $0x4] sm:$0xf] }
 0x18e   : > { %v4778_v28 = vadd.f32 %v906_v25, %v905_v26  ;;  %v894_v29 = vadd.f32 %v4480_v13, %v893_v27  ;;  %1465 = vmatpush.bf16.msrb.mxu2 %v3514_v19  ;;  %v3489_v25 = vld [vmem:[#allocation4 + $0x60] sm:$0xf]  ;;  %v4249_v26 = vld [vmem:[#allocation4 + $0x6c] sm:$0xf0]  ;;  %v4247_v27 = vld [vmem:[#allocation4 + $0x64] sm:$0xf] }
 0x18f   : > { %1436 = vmatpush.bf16.msrb.mxu0 %v3554_v40  ;;  %1478 = vmatpush.bf16.msrb.mxu3 %v3518_v24  ;;  %v4783_v40 = vld [vmem:[%s4759_s14 + $0x28] sm:$0xff]  ;;  %v3443_v17 = vld [vmem:[#allocation4 + $0x10] sm:$0xf0] }
 0x190   : > { %4483 = vtanh.f32 %v4778_v28  ;;  %v898_v32 = vsel %vm897_vm6, %v4480_v13, %v894_v29  ;;  %v4251_v13 = vld [vmem:[#allocation4 + $0x84] sm:$0xf]  ;;  %v3490_v29 = vor.u32 %v4249_v26, %v3489_v25  ;;  %v918_v49 = vunpack.c.h.bf16 %v4783_v40  ;;  %v3467_v10 = vld [vmem:[#allocation4 + $0x38] sm:$0xf0]  ;;  %v4236_v25 = vld [vmem:[#allocation4 + $0xc] sm:$0xf] }
 0x191   : > { %v903_v36 = vsel %vm900_vm7, %v902_v33, %v898_v32  ;;  %v3510_v18 = vor.u32 %v4251_v13, %v3507_v15  ;;  %v4250_v32 = vld [vmem:[#allocation4 + $0x74] sm:$0xf0]  ;;  %v3470_v11 = vor.u32 %v4240_v9, %v3467_v10  ;;  %v4237_v13 = vld [vmem:[#allocation4 + $0xc] sm:$0xf0]  ;;  %v3446_v21 = vor.u32 %v4235_v16, %v3443_v17  ;;  %v3451_v26 = vld [vmem:[#allocation4 + $0x18] sm:$0xf0] }
 0x192   : > { %v3442_v15 = vor.u32 %v4237_v13, %v3441_v7  ;;  %v4297_v9 = vld [vmem:[#allocation4 + $0xec] sm:$0xf0]  ;;  %v4295_v10 = vld [vmem:[#allocation4 + $0xe4] sm:$0xf]  ;;  %v3694_v7 = vld [vmem:[#allocation4 + $0xe8] sm:$0xf] }
 0x193   : > { %1437 = vmatpush.bf16.msrb.mxu0 %v3538_v52  ;;  %1452 = vmatpush.bf16.msrb.mxu1 %v3510_v18  ;;  %v4246_v52 = vld [vmem:[#allocation4 + $0x54] sm:$0xf0]  ;;  %v3449_v18 = vld [vmem:[#allocation4 + $0x8] sm:$0xf]  ;;  %v4296_v16 = vld [vmem:[#allocation4 + $0xec] sm:$0xf] }
 0x194   : > { %v3482_v54 = vor.u32 %v4246_v52, %v3481_v51  ;;  %v4298_v13 = vld [vmem:[#allocation4 + $0xf4] sm:$0xf0]  ;;  %v3696_v17 = vld [vmem:[#allocation4 + $0xf8] sm:$0xf0] }
 0x196   : > { %v4484_v34 = vpop.eup %4483 }
 0x197   : > { %v909_v37 = vmul.f32 %v4484_v34, %v903_v36  ;;  %1438 = vmatpush.bf16.msrb.mxu0 %v3522_v1  ;;  %v3494_v36 = vor.u32 %v4247_v27, %v3491_v30  ;;  %v3465_v1 = vld [vmem:[#allocation4 + $0x28] sm:$0xf]  ;;  %v917_v30 = vunpack.c.l.bf16 %v4783_v40 }
 0x198   : > { %v3466_v8 = vor.u32 %v4242_v2, %v3465_v1 }
 0x199   : > { %v920_v35 = vpack.c.bf16 %v909_v37, %v909_v37  ;;  %v3498_v37 = vor.u32 %v4250_v32, %v3497_v31  ;;  %1453 = vmatpush.bf16.msrb.mxu1 %v3494_v36  ;;  %v3454_v31 = vor.u32 %v4236_v25, %v3451_v26  ;;  %v4294_v25 = vld [vmem:[#allocation4 + $0xd4] sm:$0xf0] }
 0x19b   : > { %1121 = vmatmul.bf16.vlgmr.msra.gmra.mxu0 %v920_v35  ;;  %1134 = vmatmul.bf16.vlgmr.msra.gmra.mxu1 %v920_v35 }
 0x19c   : > { %1147 = vmatmul.bf16.vlgmr.msra.gmra.mxu2 %v920_v35  ;;  %1160 = vmatmul.bf16.vlgmr.msra.gmra.mxu3 %v920_v35  ;;  %v4248_v35 = vld [vmem:[#allocation4 + $0x6c] sm:$0xf] }
 0x19d   : > { %1439 = vmatpush.bf16.msrb.mxu0 %v3506_v14  ;;  %v3502_v41 = vor.u32 %v4248_v35, %v3499_v58  ;;  %1466 = vmatpush.bf16.msrb.mxu2 %v3498_v37 }
 0x19e   : > { %1454 = vmatpush.bf16.msrb.mxu1 %v3478_v50 }
 0x19f   : > { %1479 = vmatpush.bf16.msrb.mxu3 %v3502_v41 }
 0x1a1   : > { %1440 = vmatpush.bf16.msrb.mxu0 %v3490_v29  ;;  %1467 = vmatpush.bf16.msrb.mxu2 %v3482_v54 }
 0x1a2   : > { %1455 = vmatpush.bf16.msrb.mxu1 %v3462_v6 }
 0x1a3   : > { %1480 = vmatpush.bf16.msrb.mxu3 %v3486_v56 }
 0x1a5   : > { %1441 = vmatpush.bf16.msrb.mxu0 %v3474_v47  ;;  %1468 = vmatpush.bf16.msrb.mxu2 %v3466_v8 }
 0x1a6   : > { %1456 = vmatpush.bf16.msrb.mxu1 %v3446_v21  ;;  %v4291_v21 = vld [vmem:[#allocation4 + $0xc4] sm:$0xf] }
 0x1a7   : > { %1481 = vmatpush.bf16.msrb.mxu3 %v3470_v11 }
 0x1a9   : > { %1442 = vmatpush.bf16.msrb.mxu0 %v3458_v63 }
 0x1ab   : > { %1482 = vmatpush.bf16.msrb.mxu3 %v3454_v31 }
 0x1ad   : > { %1443 = vmatpush.bf16.msrb.mxu0 %v3442_v15  ;;  %v3695_v15 = vor.u32 %v4298_v13, %v3694_v7  ;;  %v3606_v7 = vld [vmem:[#allocation4 + $0x40] sm:$0xf]  ;;  %v4277_v13 = vld [vmem:[#allocation4 + $0x4c] sm:$0xf0] }
 0x218   : > { %v1122_v33 = vpop.f32.mrf.mxu0  ;;  %v1135_v34 = vpop.f32.mrf.mxu1 }
 0x219   : > { %v1165_v38 = vadd.f32 %v1122_v33, %v915_v22  ;;  %v1166_v39 = vadd.f32 %v1135_v34, %v916_v23  ;;  %v4238_v22 = vld [vmem:[#allocation4 + $0x14] sm:$0xf0] }
 0x21a   : > { %v3450_v24 = vor.u32 %v4238_v22, %v3449_v18  ;;  %v3699_v18 = vor.u32 %v4296_v16, %v3696_v17  ;;  %v3607_v17 = vor.u32 %v4277_v13, %v3606_v7 }
 0x21b   : > { %v3434_v45 = vmul.f32 -1.442695, %v1165_v38  ;;  %v3435_v46 = vmul.f32 -1.442695, %v1166_v39 }
 0x21c   : > { %1469 = vmatpush.bf16.msrb.mxu2 %v3450_v24  ;;  %1798 = vmatpush.bf16.msra.mxu3 %v3699_v18  ;;  %v3678_v24 = vld [vmem:[#allocation4 + $0xc8] sm:$0xf]  ;;  %v3608_v18 = vld [vmem:[#allocation4 + $0x50] sm:$0xf0] }
 0x21d   : > { %4485 = vpow2.f32 %v3434_v45 }
 0x21e   : > { %4487 = vpow2.f32 %v3435_v46 }
 0x21f   : > { %v1148_v61 = vpop.f32.mrf.mxu2  ;;  %v1161_v62 = vpop.f32.mrf.mxu3 }
 0x220   : > { %v1168_v3 = vadd.f32 %v1161_v62, %v918_v49  ;;  %v1124_v4 = vpop.f32.mrf.mxu0  ;;  %v1137_v5 = vpop.f32.mrf.mxu1  ;;  %v1167_v36 = vadd.f32 %v1148_v61, %v917_v30  ;;  %1785 = vmatpush.bf16.msra.mxu2 %v3695_v15  ;;  %v3680_v30 = vld [vmem:[#allocation4 + $0xd8] sm:$0xf0] }
 0x222   : > { %v3436_v12 = vmul.f32 -1.442695, %v1168_v3 }
 0x223   : > { %v4486_v14 = vpop.eup %4485 }
 0x224   : > { %v4488_v19 = vpop.eup %4487  ;;  %v1176_v20 = vadd.f32 1.0, %v4486_v14  ;;  %4489 = vpow2.f32 %v3436_v12  ;;  %v3688_v12 = vld [vmem:[#allocation4 + $0xf0] sm:$0xf0] }
 0x225   : > { %v1177_v23 = vadd.f32 1.0, %v4488_v19  ;;  %v3691_v14 = vor.u32 %v4295_v10, %v3688_v12  ;;  %v3670_v19 = vld [vmem:[#allocation4 + $0xc0] sm:$0xf] }
 0x226   : > { %4491 = vrcp.f32 %v1176_v20  ;;  %v1189_v41 = vand.u32 2147483648, %v1176_v20  ;;  %v1187_v44 = vand.u32 2147483647, %v1176_v20  ;;  %vm1183_vm10 = vweird.f32 %v1176_v20 }
 0x227   : > { %4493 = vrcp.f32 %v1177_v23  ;;  %v1150_v27 = vpop.f32.mrf.mxu2  ;;  %v1163_v29 = vpop.f32.mrf.mxu3  ;;  %v1204_v42 = vand.u32 2147483648, %v1177_v23  ;;  %v1202_v40 = vand.u32 2147483647, %v1177_v23  ;;  %vm1198_vm11 = vweird.f32 %v1177_v23  ;;  %1772 = vmatpush.bf16.msra.mxu1 %v3691_v14  ;;  %v4275_v14 = vld [vmem:[#allocation4 + $0x44] sm:$0xf] }
 0x228   : > { %v1190_v48 = vor.u32 1.1754944e-38, %v1189_v41  ;;  %vm1188_vm14 = vcmp.eq.f32.partialorder %v1187_v44, 8.507059e+37  ;;  %v3679_v27 = vor.u32 %v4294_v25, %v3678_v24  ;;  %v4292_v29 = vld [vmem:[#allocation4 + $0xcc] sm:$0xf]  ;;  %v3616_v25 = vld [vmem:[#allocation4 + $0x58] sm:$0xf0] }
 0x229   : > { %v1205_v51 = vor.u32 1.1754944e-38, %v1204_v42  ;;  %vm1203_vm15 = vcmp.eq.f32.partialorder %v1202_v40, 8.507059e+37  ;;  %v3683_v31 = vor.u32 %v4292_v29, %v3680_v30  ;;  %v4288_v41 = vld [vmem:[#allocation4 + $0xac] sm:$0xf]  ;;  %v3664_v42 = vld [vmem:[#allocation4 + $0xb8] sm:$0xf0] }
 0x22a   : > { %v4490_v32 = vpop.eup %4489  ;;  %1786 = vmatpush.bf16.msra.mxu2 %v3679_v27  ;;  %v3667_v44 = vor.u32 %v4288_v41, %v3664_v42  ;;  %v4285_v40 = vld [vmem:[#allocation4 + $0x8c] sm:$0xf0]  ;;  %v3590_v27 = vld [vmem:[#allocation4 + $0x20] sm:$0xf]  ;;  %v4271_v30 = vld [vmem:[#allocation4 + $0x24] sm:$0xf] }
 0x22b   : > { %v1212_v33 = vadd.f32 1.0, %v4490_v32  ;;  %v3654_v32 = vld [vmem:[#allocation4 + $0xa0] sm:$0xf]  ;;  %1799 = vmatpush.bf16.msra.mxu3 %v3683_v31  ;;  %v4273_v29 = vld [vmem:[#allocation4 + $0x2c] sm:$0xf0] }
 0x22c   : > { %v4492_v34 = vpop.eup %4491  ;;  %v4272_v42 = vld [vmem:[#allocation4 + $0x2c] sm:$0xf] }
 0x22d   : > { %v4494_v37 = vpop.eup %4493  ;;  %v1179_v35 = vmul.f32 %v4492_v34, %v1176_v20  ;;  %4495 = vrcp.f32 %v1212_v33  ;;  %vm1184_vm8 = vweird.f32 %v4492_v34  ;;  %v1224_v0 = vand.u32 2147483648, %v1212_v33  ;;  %v4293_v20 = vld [vmem:[#allocation4 + $0xcc] sm:$0xf0] }
 0x22e   : > { %v1194_v58 = vmul.f32 %v4494_v37, %v1177_v23  ;;  %4497 = vtanh.f32 %v1167_v36  ;;  %vm1199_vm9 = vweird.f32 %v4494_v37  ;;  %vm1185_vm12 = vmor %vm1183_vm10, %vm1184_vm8  ;;  %vm1218_vm1 = vweird.f32 %v1212_v33  ;;  %v3672_v23 = vld [vmem:[#allocation4 + $0xd0] sm:$0xf0] }
 0x22f   : > { %v1180_v38 = vsub.f32 1.0, %v1179_v35  ;;  %vm1200_vm13 = vmor %vm1198_vm11, %vm1199_vm9  ;;  %v1222_v1 = vand.u32 2147483647, %v1212_v33  ;;  %v1225_v3 = vor.u32 1.1754944e-38, %v1224_v0  ;;  %v3671_v22 = vor.u32 %v4293_v20, %v3670_v19  ;;  %v3662_v35 = vld [vmem:[#allocation4 + $0xa8] sm:$0xf]  ;;  %1800 = vmatpush.bf16.msra.mxu3 %v3667_v44 }
 0x230   : > { %v1195_v39 = vsub.f32 1.0, %v1194_v58  ;;  %v3675_v26 = vor.u32 %v4291_v21, %v3672_v23  ;;  %v4290_v58 = vld [vmem:[#allocation4 + $0xb4] sm:$0xf0]  ;;  %v3624_v0 = vld [vmem:[#allocation4 + $0x70] sm:$0xf0]  ;;  %v3611_v20 = vor.u32 %v4275_v14, %v3608_v18 }
 0x231   : > { %v1181_v43 = vmul.f32 %v4492_v34, %v1180_v38  ;;  %vm1223_vm3 = vcmp.eq.f32.partialorder %v1222_v1, 8.507059e+37  ;;  %v3630_v1 = vld [vmem:[#allocation4 + $0x68] sm:$0xf]  ;;  %v4276_v23 = vld [vmem:[#allocation4 + $0x4c] sm:$0xf] }
 0x232   : > { %v1196_v45 = vmul.f32 %v4494_v37, %v1195_v39  ;;  %1773 = vmatpush.bf16.msra.mxu1 %v3675_v26  ;;  %v3663_v39 = vor.u32 %v4290_v58, %v3662_v35  ;;  %v3614_v21 = vld [vmem:[#allocation4 + $0x48] sm:$0xf]  ;;  %v3619_v26 = vor.u32 %v4276_v23, %v3616_v25 }
 0x233   : > { %v4496_v46 = vpop.eup %4495  ;;  %v1182_v47 = vadd.f32 %v4492_v34, %v1181_v43  ;;  %v3437_v43 = vld [vmem:[%s4759_s14 + $0x30] sm:$0xff] }
 0x234   : > { %v1197_v49 = vadd.f32 %v4494_v37, %v1196_v45  ;;  %v1214_v50 = vmul.f32 %v4496_v46, %v1212_v33  ;;  %v4498_v53 = vpop.eup %4497  ;;  %vm1219_vm0 = vweird.f32 %v4496_v46  ;;  %v4289_v33 = vld [vmem:[#allocation4 + $0xac] sm:$0xf0]  ;;  %1787 = vmatpush.bf16.msra.mxu2 %v3663_v39  ;;  %v3638_v45 = vld [vmem:[#allocation4 + $0x80] sm:$0xf] }
 0x235   : > { %v1186_v52 = vsel %vm1185_vm12, %v4492_v34, %v1182_v47  ;;  %vm1220_vm2 = vmor %vm1218_vm1, %vm1219_vm0  ;;  %v4287_v34 = vld [vmem:[#allocation4 + $0xa4] sm:$0xf]  ;;  %v3655_v36 = vor.u32 %v4289_v33, %v3654_v32  ;;  %v3639_v47 = vor.u32 %v4285_v40, %v3638_v45  ;;  %v3591_v33 = vor.u32 %v4273_v29, %v3590_v27  ;;  %v3574_v40 = vld [vmem:[#allocation4] sm:$0xf] }
 0x236   : > { %v1191_v54 = vsel %vm1188_vm14, %v1190_v48, %v1186_v52  ;;  %v1201_v55 = vsel %vm1200_vm13, %v4494_v37, %v1197_v49  ;;  %v1215_v56 = vsub.f32 1.0, %v1214_v50  ;;  %v3656_v37 = vld [vmem:[#allocation4 + $0xb0] sm:$0xf0]  ;;  %v3646_v49 = vld [vmem:[#allocation4 + $0x88] sm:$0xf] }
 0x237   : > { %v1206_v57 = vsel %vm1203_vm15, %v1205_v51, %v1201_v55  ;;  %v1229_v59 = vmul.f32 %v4498_v53, %v1191_v54  ;;  %v3659_v38 = vor.u32 %v4287_v34, %v3656_v37  ;;  %v3640_v48 = vld [vmem:[#allocation4 + $0x90] sm:$0xf0]  ;;  %v4286_v50 = vld [vmem:[#allocation4 + $0x94] sm:$0xf0]  ;;  %v4284_v53 = vld [vmem:[#allocation4 + $0x8c] sm:$0xf]  ;;  %v1238_v55 = vunpack.c.l.bf16 %v3437_v43 }
 0x238   : > { %v1228_v60 = vmul.f32 %v1206_v57, %v4778_v28  ;;  %v1216_v61 = vmul.f32 %v4496_v46, %v1215_v56  ;;  %v3686_v28 = vld [vmem:[#allocation4 + $0xe0] sm:$0xf]  ;;  %v3647_v52 = vor.u32 %v4286_v50, %v3646_v49  ;;  %v3648_v54 = vld [vmem:[#allocation4 + $0x98] sm:$0xf0]  ;;  %v1239_v56 = vunpack.c.h.bf16 %v3437_v43  ;;  %v3592_v34 = vld [vmem:[#allocation4 + $0x30] sm:$0xf0] }
 0x239   : > { %v3687_v11 = vor.u32 %v4297_v9, %v3686_v28  ;;  %1774 = vmatpush.bf16.msra.mxu1 %v3659_v38  ;;  %v3651_v57 = vor.u32 %v4284_v53, %v3648_v54  ;;  %v3632_v28 = vld [vmem:[#allocation4 + $0x78] sm:$0xf0]  ;;  %v4274_v37 = vld [vmem:[#allocation4 + $0x34] sm:$0xf0]  ;;  %v3595_v39 = vor.u32 %v4271_v30, %v3592_v34  ;;  %v4267_v49 = vld [vmem:[#allocation4 + $0x4] sm:$0xf] }
 0x23a   : > { %v4788_v62 = vadd.f32 %v1229_v59, %v1228_v60  ;;  %v1217_v63 = vadd.f32 %v4496_v46, %v1216_v61  ;;  %1788 = vmatpush.bf16.msra.mxu2 %v3647_v52  ;;  %v3622_v59 = vld [vmem:[#allocation4 + $0x60] sm:$0xf]  ;;  %v4281_v60 = vld [vmem:[#allocation4 + $0x6c] sm:$0xf0]  ;;  %v4279_v61 = vld [vmem:[#allocation4 + $0x64] sm:$0xf] }
 0x23b   : > { %1759 = vmatpush.bf16.msra.mxu0 %v3687_v11  ;;  %1801 = vmatpush.bf16.msra.mxu3 %v3651_v57  ;;  %v4793_v11 = vld [vmem:[%s4759_s14 + $0x38] sm:$0xff]  ;;  %v3600_v43 = vld [vmem:[#allocation4 + $0x38] sm:$0xf0]  ;;  %v3576_v50 = vld [vmem:[#allocation4 + $0x10] sm:$0xf0] }
 0x23c   : > { %4499 = vtanh.f32 %v4788_v62  ;;  %v1221_v2 = vsel %vm1220_vm2, %v4496_v46, %v1217_v63  ;;  %v4283_v46 = vld [vmem:[#allocation4 + $0x84] sm:$0xf]  ;;  %v3623_v63 = vor.u32 %v4281_v60, %v3622_v59  ;;  %v1241_v19 = vunpack.c.h.bf16 %v4793_v11  ;;  %v4268_v59 = vld [vmem:[#allocation4 + $0xc] sm:$0xf]  ;;  %v3584_v60 = vld [vmem:[#allocation4 + $0x18] sm:$0xf0] }
 0x23d   : > { %v1226_v5 = vsel %vm1223_vm3, %v1225_v3, %v1221_v2  ;;  %v3643_v51 = vor.u32 %v4283_v46, %v3640_v48  ;;  %v4282_v2 = vld [vmem:[#allocation4 + $0x74] sm:$0xf0]  ;;  %v3603_v44 = vor.u32 %v4272_v42, %v3600_v43  ;;  %v4269_v46 = vld [vmem:[#allocation4 + $0xc] sm:$0xf0]  ;;  %v3579_v54 = vor.u32 %v4267_v49, %v3576_v50  ;;  %v4327_v43 = vld [vmem:[#allocation4 + $0xe4] sm:$0xf] }
 0x23e   : > { %v3575_v48 = vor.u32 %v4269_v46, %v3574_v40  ;;  %v4329_v42 = vld [vmem:[#allocation4 + $0xec] sm:$0xf0]  ;;  %v3827_v40 = vld [vmem:[#allocation4 + $0xe8] sm:$0xf]  ;;  %v4330_v46 = vld [vmem:[#allocation4 + $0xf4] sm:$0xf0] }
 0x23f   : > { %1760 = vmatpush.bf16.msra.mxu0 %v3671_v22  ;;  %1775 = vmatpush.bf16.msra.mxu1 %v3643_v51  ;;  %v4278_v22 = vld [vmem:[#allocation4 + $0x54] sm:$0xf0]  ;;  %v3582_v51 = vld [vmem:[#allocation4 + $0x8] sm:$0xf]  ;;  %v4328_v49 = vld [vmem:[#allocation4 + $0xec] sm:$0xf] }
 0x240   : > { %v3615_v24 = vor.u32 %v4278_v22, %v3614_v21  ;;  %v3829_v50 = vld [vmem:[#allocation4 + $0xf8] sm:$0xf0] }
 0x242   : > { %v4500_v4 = vpop.eup %4499 }
 0x243   : > { %v1232_v6 = vmul.f32 %v4500_v4, %v1226_v5  ;;  %1761 = vmatpush.bf16.msra.mxu0 %v3655_v36  ;;  %v3627_v5 = vor.u32 %v4279_v61, %v3624_v0  ;;  %v3598_v36 = vld [vmem:[#allocation4 + $0x28] sm:$0xf]  ;;  %v1240_v0 = vunpack.c.l.bf16 %v4793_v11 }
 0x244   : > { %v3599_v41 = vor.u32 %v4274_v37, %v3598_v36 }
 0x245   : > { %v1243_v8 = vpack.c.bf16 %v1232_v6, %v1232_v6  ;;  %v3631_v6 = vor.u32 %v4282_v2, %v3630_v1  ;;  %1776 = vmatpush.bf16.msra.mxu1 %v3627_v5  ;;  %v3587_v1 = vor.u32 %v4268_v59, %v3584_v60  ;;  %v4326_v59 = vld [vmem:[#allocation4 + $0xd4] sm:$0xf0] }
 0x247   : > { %1444 = vmatmul.bf16.vlgmr.msrb.gmra.mxu0 %v1243_v8  ;;  %1457 = vmatmul.bf16.vlgmr.msrb.gmra.mxu1 %v1243_v8 }
 0x248   : > { %1470 = vmatmul.bf16.vlgmr.msrb.gmra.mxu2 %v1243_v8  ;;  %1483 = vmatmul.bf16.vlgmr.msrb.gmra.mxu3 %v1243_v8  ;;  %v4280_v8 = vld [vmem:[#allocation4 + $0x6c] sm:$0xf] }
 0x249   : > { %1762 = vmatpush.bf16.msra.mxu0 %v3639_v47  ;;  %v3635_v12 = vor.u32 %v4280_v8, %v3632_v28  ;;  %1789 = vmatpush.bf16.msra.mxu2 %v3631_v6 }
 0x24a   : > { %1777 = vmatpush.bf16.msra.mxu1 %v3611_v20 }
 0x24b   : > { %1802 = vmatpush.bf16.msra.mxu3 %v3635_v12 }
 0x24d   : > { %1763 = vmatpush.bf16.msra.mxu0 %v3623_v63  ;;  %1790 = vmatpush.bf16.msra.mxu2 %v3615_v24 }
 0x24e   : > { %1778 = vmatpush.bf16.msra.mxu1 %v3595_v39 }
 0x24f   : > { %1803 = vmatpush.bf16.msra.mxu3 %v3619_v26 }
 0x251   : > { %1764 = vmatpush.bf16.msra.mxu0 %v3607_v17  ;;  %1791 = vmatpush.bf16.msra.mxu2 %v3599_v41 }
 0x252   : > { %1779 = vmatpush.bf16.msra.mxu1 %v3579_v54  ;;  %v4323_v54 = vld [vmem:[#allocation4 + $0xc4] sm:$0xf] }
 0x253   : > { %1804 = vmatpush.bf16.msra.mxu3 %v3603_v44 }
 0x255   : > { %1765 = vmatpush.bf16.msra.mxu0 %v3591_v33 }
 0x257   : > { %1805 = vmatpush.bf16.msra.mxu3 %v3587_v1 }
 0x259   : > { %1766 = vmatpush.bf16.msra.mxu0 %v3575_v48  ;;  %v3828_v48 = vor.u32 %v4330_v46, %v3827_v40  ;;  %v3739_v40 = vld [vmem:[#allocation4 + $0x40] sm:$0xf]  ;;  %v4309_v46 = vld [vmem:[#allocation4 + $0x4c] sm:$0xf0] }
 0x2c4   : > { %v1445_v3 = vpop.f32.mrf.mxu0  ;;  %v1458_v4 = vpop.f32.mrf.mxu1 }
 0x2c5   : > { %v1488_v9 = vadd.f32 %v1445_v3, %v1238_v55  ;;  %v1489_v10 = vadd.f32 %v1458_v4, %v1239_v56  ;;  %v4270_v55 = vld [vmem:[#allocation4 + $0x14] sm:$0xf0] }
 0x2c6   : > { %v3583_v57 = vor.u32 %v4270_v55, %v3582_v51  ;;  %v3832_v51 = vor.u32 %v4328_v49, %v3829_v50  ;;  %v3740_v50 = vor.u32 %v4309_v46, %v3739_v40 }
 0x2c7   : > { %v3567_v15 = vmul.f32 -1.442695, %v1488_v9  ;;  %v3568_v16 = vmul.f32 -1.442695, %v1489_v10 }
 0x2c8   : > { %1792 = vmatpush.bf16.msra.mxu2 %v3583_v57  ;;  %2121 = vmatpush.bf16.msrb.mxu3 %v3832_v51  ;;  %v3811_v57 = vld [vmem:[#allocation4 + $0xc8] sm:$0xf]  ;;  %v3741_v51 = vld [vmem:[#allocation4 + $0x50] sm:$0xf0] }
 0x2c9   : > { %4501 = vpow2.f32 %v3567_v15 }
 0x2ca   : > { %4503 = vpow2.f32 %v3568_v16 }
 0x2cb   : > { %v1471_v31 = vpop.f32.mrf.mxu2  ;;  %v1484_v32 = vpop.f32.mrf.mxu3 }
 0x2cc   : > { %v1491_v35 = vadd.f32 %v1484_v32, %v1241_v19  ;;  %v1447_v58 = vpop.f32.mrf.mxu0  ;;  %v1460_v38 = vpop.f32.mrf.mxu1  ;;  %v1490_v5 = vadd.f32 %v1471_v31, %v1240_v0  ;;  %2108 = vmatpush.bf16.msrb.mxu2 %v3828_v48  ;;  %v3813_v0 = vld [vmem:[#allocation4 + $0xd8] sm:$0xf0] }
 0x2ce   : > { %v3569_v45 = vmul.f32 -1.442695, %v1491_v35 }
 0x2cf   : > { %v4502_v47 = vpop.eup %4501 }
 0x2d0   : > { %v4504_v52 = vpop.eup %4503  ;;  %v1499_v53 = vadd.f32 1.0, %v4502_v47  ;;  %4505 = vpow2.f32 %v3569_v45  ;;  %v3821_v45 = vld [vmem:[#allocation4 + $0xf0] sm:$0xf0] }
 0x2d1   : > { %v1500_v56 = vadd.f32 1.0, %v4504_v52  ;;  %v3824_v47 = vor.u32 %v4327_v43, %v3821_v45  ;;  %v3803_v52 = vld [vmem:[#allocation4 + $0xc0] sm:$0xf] }
 0x2d2   : > { %4507 = vrcp.f32 %v1499_v53  ;;  %v1512_v12 = vand.u32 2147483648, %v1499_v53  ;;  %v1510_v14 = vand.u32 2147483647, %v1499_v53  ;;  %vm1506_vm6 = vweird.f32 %v1499_v53 }
 0x2d3   : > { %4509 = vrcp.f32 %v1500_v56  ;;  %v1473_v61 = vpop.f32.mrf.mxu2  ;;  %v1486_v63 = vpop.f32.mrf.mxu3  ;;  %v1527_v7 = vand.u32 2147483648, %v1500_v56  ;;  %v1525_v11 = vand.u32 2147483647, %v1500_v56  ;;  %vm1521_vm7 = vweird.f32 %v1500_v56  ;;  %2095 = vmatpush.bf16.msrb.mxu1 %v3824_v47  ;;  %v4307_v47 = vld [vmem:[#allocation4 + $0x44] sm:$0xf] }
 0x2d4   : > { %v1513_v18 = vor.u32 1.1754944e-38, %v1512_v12  ;;  %vm1511_vm10 = vcmp.eq.f32.partialorder %v1510_v14, 8.507059e+37  ;;  %v3812_v61 = vor.u32 %v4326_v59, %v3811_v57  ;;  %v4324_v63 = vld [vmem:[#allocation4 + $0xcc] sm:$0xf]  ;;  %v3749_v59 = vld [vmem:[#allocation4 + $0x58] sm:$0xf0] }
 0x2d5   : > { %v1528_v21 = vor.u32 1.1754944e-38, %v1527_v7  ;;  %vm1526_vm11 = vcmp.eq.f32.partialorder %v1525_v11, 8.507059e+37  ;;  %v3816_v1 = vor.u32 %v4324_v63, %v3813_v0  ;;  %v4320_v12 = vld [vmem:[#allocation4 + $0xac] sm:$0xf]  ;;  %v3797_v7 = vld [vmem:[#allocation4 + $0xb8] sm:$0xf0] }
 0x2d6   : > { %v4506_v2 = vpop.eup %4505  ;;  %2109 = vmatpush.bf16.msrb.mxu2 %v3812_v61  ;;  %v3800_v14 = vor.u32 %v4320_v12, %v3797_v7  ;;  %v4317_v11 = vld [vmem:[#allocation4 + $0x8c] sm:$0xf0]  ;;  %v3723_v61 = vld [vmem:[#allocation4 + $0x20] sm:$0xf]  ;;  %v4303_v0 = vld [vmem:[#allocation4 + $0x24] sm:$0xf] }
 0x2d7   : > { %v1535_v3 = vadd.f32 1.0, %v4506_v2  ;;  %v3787_v2 = vld [vmem:[#allocation4 + $0xa0] sm:$0xf]  ;;  %2122 = vmatpush.bf16.msrb.mxu3 %v3816_v1  ;;  %v4305_v63 = vld [vmem:[#allocation4 + $0x2c] sm:$0xf0] }
 0x2d8   : > { %v4508_v4 = vpop.eup %4507  ;;  %v4304_v7 = vld [vmem:[#allocation4 + $0x2c] sm:$0xf] }
 0x2d9   : > { %v4510_v6 = vpop.eup %4509  ;;  %v1502_v8 = vmul.f32 %v4508_v4, %v1499_v53  ;;  %4511 = vrcp.f32 %v1535_v3  ;;  %vm1507_vm4 = vweird.f32 %v4508_v4  ;;  %v1547_v34 = vand.u32 2147483648, %v1535_v3  ;;  %v4325_v53 = vld [vmem:[#allocation4 + $0xcc] sm:$0xf0] }
 0x2da   : > { %v1517_v28 = vmul.f32 %v4510_v6, %v1500_v56  ;;  %4513 = vtanh.f32 %v1490_v5  ;;  %vm1522_vm5 = vweird.f32 %v4510_v6  ;;  %vm1508_vm8 = vmor %vm1506_vm6, %vm1507_vm4  ;;  %vm1541_vm13 = vweird.f32 %v1535_v3  ;;  %v3805_v56 = vld [vmem:[#allocation4 + $0xd0] sm:$0xf0] }
 0x2db   : > { %v1503_v9 = vsub.f32 1.0, %v1502_v8  ;;  %vm1523_vm9 = vmor %vm1521_vm7, %vm1522_vm5  ;;  %v1545_v36 = vand.u32 2147483647, %v1535_v3  ;;  %v1548_v35 = vor.u32 1.1754944e-38, %v1547_v34  ;;  %v3804_v55 = vor.u32 %v4325_v53, %v3803_v52  ;;  %v3795_v8 = vld [vmem:[#allocation4 + $0xa8] sm:$0xf]  ;;  %2123 = vmatpush.bf16.msrb.mxu3 %v3800_v14 }
 0x2dc   : > { %v1518_v10 = vsub.f32 1.0, %v1517_v28  ;;  %v3808_v60 = vor.u32 %v4323_v54, %v3805_v56  ;;  %v4322_v28 = vld [vmem:[#allocation4 + $0xb4] sm:$0xf0]  ;;  %v3757_v34 = vld [vmem:[#allocation4 + $0x70] sm:$0xf0]  ;;  %v3744_v53 = vor.u32 %v4307_v47, %v3741_v51 }
 0x2dd   : > { %v1504_v13 = vmul.f32 %v4508_v4, %v1503_v9  ;;  %vm1546_vm15 = vcmp.eq.f32.partialorder %v1545_v36, 8.507059e+37  ;;  %v3763_v36 = vld [vmem:[#allocation4 + $0x68] sm:$0xf]  ;;  %v4308_v56 = vld [vmem:[#allocation4 + $0x4c] sm:$0xf] }
 0x2de   : > { %v1519_v15 = vmul.f32 %v4510_v6, %v1518_v10  ;;  %2096 = vmatpush.bf16.msrb.mxu1 %v3808_v60  ;;  %v3796_v10 = vor.u32 %v4322_v28, %v3795_v8  ;;  %v3747_v54 = vld [vmem:[#allocation4 + $0x48] sm:$0xf]  ;;  %v3752_v60 = vor.u32 %v4308_v56, %v3749_v59 }
 0x2df   : > { %v4512_v16 = vpop.eup %4511  ;;  %v1505_v17 = vadd.f32 %v4508_v4, %v1504_v13  ;;  %v3570_v13 = vld [vmem:[%s4759_s14 + $0x40] sm:$0xff] }
 0x2e0   : > { %v1520_v19 = vadd.f32 %v4510_v6, %v1519_v15  ;;  %v1537_v20 = vmul.f32 %v4512_v16, %v1535_v3  ;;  %v4514_v23 = vpop.eup %4513  ;;  %vm1542_vm12 = vweird.f32 %v4512_v16  ;;  %v4321_v3 = vld [vmem:[#allocation4 + $0xac] sm:$0xf0]  ;;  %2110 = vmatpush.bf16.msrb.mxu2 %v3796_v10  ;;  %v3771_v15 = vld [vmem:[#allocation4 + $0x80] sm:$0xf] }
 0x2e1   : > { %v1509_v22 = vsel %vm1508_vm8, %v4508_v4, %v1505_v17  ;;  %vm1543_vm14 = vmor %vm1541_vm13, %vm1542_vm12  ;;  %v4319_v4 = vld [vmem:[#allocation4 + $0xa4] sm:$0xf]  ;;  %v3788_v5 = vor.u32 %v4321_v3, %v3787_v2  ;;  %v3772_v17 = vor.u32 %v4317_v11, %v3771_v15  ;;  %v3724_v3 = vor.u32 %v4305_v63, %v3723_v61  ;;  %v3707_v11 = vld [vmem:[#allocation4] sm:$0xf] }
 0x2e2   : > { %v1514_v24 = vsel %vm1511_vm10, %v1513_v18, %v1509_v22  ;;  %v1524_v25 = vsel %vm1523_vm9, %v4510_v6, %v1520_v19  ;;  %v1538_v26 = vsub.f32 1.0, %v1537_v20  ;;  %v3789_v6 = vld [vmem:[#allocation4 + $0xb0] sm:$0xf0]  ;;  %v3779_v19 = vld [vmem:[#allocation4 + $0x88] sm:$0xf] }
 0x2e3   : > { %v1529_v27 = vsel %vm1526_vm11, %v1528_v21, %v1524_v25  ;;  %v1552_v29 = vmul.f32 %v4514_v23, %v1514_v24  ;;  %v3792_v9 = vor.u32 %v4319_v4, %v3789_v6  ;;  %v3773_v18 = vld [vmem:[#allocation4 + $0x90] sm:$0xf0]  ;;  %v4318_v20 = vld [vmem:[#allocation4 + $0x94] sm:$0xf0]  ;;  %v4316_v23 = vld [vmem:[#allocation4 + $0x8c] sm:$0xf]  ;;  %v1561_v25 = vunpack.c.l.bf16 %v3570_v13 }
 0x2e4   : > { %v1551_v30 = vmul.f32 %v1529_v27, %v4788_v62  ;;  %v1539_v31 = vmul.f32 %v4512_v16, %v1538_v26  ;;  %v3819_v62 = vld [vmem:[#allocation4 + $0xe0] sm:$0xf]  ;;  %v3780_v22 = vor.u32 %v4318_v20, %v3779_v19  ;;  %v3781_v24 = vld [vmem:[#allocation4 + $0x98] sm:$0xf0]  ;;  %v1562_v26 = vunpack.c.h.bf16 %v3570_v13  ;;  %v3725_v4 = vld [vmem:[#allocation4 + $0x30] sm:$0xf0] }
 0x2e5   : > { %v3820_v44 = vor.u32 %v4329_v42, %v3819_v62  ;;  %2097 = vmatpush.bf16.msrb.mxu1 %v3792_v9  ;;  %v3784_v27 = vor.u32 %v4316_v23, %v3781_v24  ;;  %v3765_v62 = vld [vmem:[#allocation4 + $0x78] sm:$0xf0]  ;;  %v4306_v6 = vld [vmem:[#allocation4 + $0x34] sm:$0xf0]  ;;  %v3728_v10 = vor.u32 %v4303_v0, %v3725_v4  ;;  %v4299_v19 = vld [vmem:[#allocation4 + $0x4] sm:$0xf] }
 0x2e6   : > { %v4798_v32 = vadd.f32 %v1552_v29, %v1551_v30  ;;  %v1540_v33 = vadd.f32 %v4512_v16, %v1539_v31  ;;  %2111 = vmatpush.bf16.msrb.mxu2 %v3780_v22  ;;  %v3755_v29 = vld [vmem:[#allocation4 + $0x60] sm:$0xf]  ;;  %v4313_v30 = vld [vmem:[#allocation4 + $0x6c] sm:$0xf0]  ;;  %v4311_v31 = vld [vmem:[#allocation4 + $0x64] sm:$0xf] }
 0x2e7   : > { %2082 = vmatpush.bf16.msrb.mxu0 %v3820_v44  ;;  %2124 = vmatpush.bf16.msrb.mxu3 %v3784_v27  ;;  %v4803_v44 = vld [vmem:[%s4759_s14 + $0x48] sm:$0xff]  ;;  %v3709_v20 = vld [vmem:[#allocation4 + $0x10] sm:$0xf0] }
 0x2e8   : > { %4515 = vtanh.f32 %v4798_v32  ;;  %v1544_v37 = vsel %vm1543_vm14, %v4512_v16, %v1540_v33  ;;  %v4315_v16 = vld [vmem:[#allocation4 + $0x84] sm:$0xf]  ;;  %v3756_v33 = vor.u32 %v4313_v30, %v3755_v29  ;;  %v1564_v52 = vunpack.c.h.bf16 %v4803_v44  ;;  %v3733_v13 = vld [vmem:[#allocation4 + $0x38] sm:$0xf0]  ;;  %v4300_v29 = vld [vmem:[#allocation4 + $0xc] sm:$0xf] }
 0x2e9   : > { %v1549_v38 = vsel %vm1546_vm15, %v1548_v35, %v1544_v37  ;;  %v3776_v21 = vor.u32 %v4315_v16, %v3773_v18  ;;  %v4314_v37 = vld [vmem:[#allocation4 + $0x74] sm:$0xf0]  ;;  %v3736_v14 = vor.u32 %v4304_v7, %v3733_v13  ;;  %v4301_v16 = vld [vmem:[#allocation4 + $0xc] sm:$0xf0]  ;;  %v3712_v24 = vor.u32 %v4299_v19, %v3709_v20  ;;  %v3717_v30 = vld [vmem:[#allocation4 + $0x18] sm:$0xf0] }
 0x2ea   : > { %v3708_v18 = vor.u32 %v4301_v16, %v3707_v11  ;;  %v4361_v7 = vld [vmem:[#allocation4 + $0xec] sm:$0xf0]  ;;  %v4359_v13 = vld [vmem:[#allocation4 + $0xe4] sm:$0xf]  ;;  %v3960_v11 = vld [vmem:[#allocation4 + $0xe8] sm:$0xf] }
 0x2eb   : > { %2083 = vmatpush.bf16.msrb.mxu0 %v3804_v55  ;;  %2098 = vmatpush.bf16.msrb.mxu1 %v3776_v21  ;;  %v4310_v55 = vld [vmem:[#allocation4 + $0x54] sm:$0xf0]  ;;  %v3715_v21 = vld [vmem:[#allocation4 + $0x8] sm:$0xf]  ;;  %v4360_v19 = vld [vmem:[#allocation4 + $0xec] sm:$0xf] }
 0x2ec   : > { %v3748_v57 = vor.u32 %v4310_v55, %v3747_v54  ;;  %v4362_v16 = vld [vmem:[#allocation4 + $0xf4] sm:$0xf0]  ;;  %v3962_v20 = vld [vmem:[#allocation4 + $0xf8] sm:$0xf0] }
 0x2ee   : > { %v4516_v58 = vpop.eup %4515 }
 0x2ef   : > { %v1555_v39 = vmul.f32 %v4516_v58, %v1549_v38  ;;  %2084 = vmatpush.bf16.msrb.mxu0 %v3788_v5  ;;  %v3760_v38 = vor.u32 %v4311_v31, %v3757_v34  ;;  %v3731_v5 = vld [vmem:[#allocation4 + $0x28] sm:$0xf]  ;;  %v1563_v34 = vunpack.c.l.bf16 %v4803_v44 }
 0x2f0   : > { %v3732_v12 = vor.u32 %v4306_v6, %v3731_v5 }
 0x2f1   : > { %v1566_v41 = vpack.c.bf16 %v1555_v39, %v1555_v39  ;;  %v3764_v39 = vor.u32 %v4314_v37, %v3763_v36  ;;  %2099 = vmatpush.bf16.msrb.mxu1 %v3760_v38  ;;  %v3720_v36 = vor.u32 %v4300_v29, %v3717_v30  ;;  %v4358_v29 = vld [vmem:[#allocation4 + $0xd4] sm:$0xf0] }
 0x2f3   : > { %1767 = vmatmul.bf16.vlgmr.msra.gmra.mxu0 %v1566_v41  ;;  %1780 = vmatmul.bf16.vlgmr.msra.gmra.mxu1 %v1566_v41 }
 0x2f4   : > { %1793 = vmatmul.bf16.vlgmr.msra.gmra.mxu2 %v1566_v41  ;;  %1806 = vmatmul.bf16.vlgmr.msra.gmra.mxu3 %v1566_v41  ;;  %v4312_v41 = vld [vmem:[#allocation4 + $0x6c] sm:$0xf] }
 0x2f5   : > { %2085 = vmatpush.bf16.msrb.mxu0 %v3772_v17  ;;  %v3768_v45 = vor.u32 %v4312_v41, %v3765_v62  ;;  %2112 = vmatpush.bf16.msrb.mxu2 %v3764_v39 }
 0x2f6   : > { %2100 = vmatpush.bf16.msrb.mxu1 %v3744_v53 }
 0x2f7   : > { %2125 = vmatpush.bf16.msrb.mxu3 %v3768_v45 }
 0x2f9   : > { %2086 = vmatpush.bf16.msrb.mxu0 %v3756_v33  ;;  %2113 = vmatpush.bf16.msrb.mxu2 %v3748_v57 }
 0x2fa   : > { %2101 = vmatpush.bf16.msrb.mxu1 %v3728_v10 }
 0x2fb   : > { %2126 = vmatpush.bf16.msrb.mxu3 %v3752_v60 }
 0x2fd   : > { %2087 = vmatpush.bf16.msrb.mxu0 %v3740_v50  ;;  %2114 = vmatpush.bf16.msrb.mxu2 %v3732_v12 }
 0x2fe   : > { %2102 = vmatpush.bf16.msrb.mxu1 %v3712_v24  ;;  %v4355_v24 = vld [vmem:[#allocation4 + $0xc4] sm:$0xf] }
 0x2ff   : > { %2127 = vmatpush.bf16.msrb.mxu3 %v3736_v14 }
 0x301   : > { %2088 = vmatpush.bf16.msrb.mxu0 %v3724_v3 }
 0x303   : > { %2128 = vmatpush.bf16.msrb.mxu3 %v3720_v36 }
 0x305   : > { %2089 = vmatpush.bf16.msrb.mxu0 %v3708_v18  ;;  %v3961_v18 = vor.u32 %v4362_v16, %v3960_v11  ;;  %v3872_v11 = vld [vmem:[#allocation4 + $0x40] sm:$0xf]  ;;  %v4341_v16 = vld [vmem:[#allocation4 + $0x4c] sm:$0xf0] }
 0x370   : > { %v1768_v35 = vpop.f32.mrf.mxu0  ;;  %v1781_v58 = vpop.f32.mrf.mxu1 }
 0x371   : > { %v1811_v42 = vadd.f32 %v1768_v35, %v1561_v25  ;;  %v1812_v43 = vadd.f32 %v1781_v58, %v1562_v26  ;;  %v4302_v25 = vld [vmem:[#allocation4 + $0x14] sm:$0xf0] }
 0x372   : > { %v3716_v27 = vor.u32 %v4302_v25, %v3715_v21  ;;  %v3965_v21 = vor.u32 %v4360_v19, %v3962_v20  ;;  %v3873_v20 = vor.u32 %v4341_v16, %v3872_v11 }
 0x373   : > { %v3700_v48 = vmul.f32 -1.442695, %v1811_v42  ;;  %v3701_v49 = vmul.f32 -1.442695, %v1812_v43 }
 0x374   : > { %2115 = vmatpush.bf16.msrb.mxu2 %v3716_v27  ;;  %2444 = vmatpush.bf16.msra.mxu3 %v3965_v21  ;;  %v3944_v27 = vld [vmem:[#allocation4 + $0xc8] sm:$0xf]  ;;  %v3874_v21 = vld [vmem:[#allocation4 + $0x50] sm:$0xf0] }
 0x375   : > { %4517 = vpow2.f32 %v3700_v48 }
 0x376   : > { %4519 = vpow2.f32 %v3701_v49 }
 0x377   : > { %v1794_v1 = vpop.f32.mrf.mxu2  ;;  %v1807_v2 = vpop.f32.mrf.mxu3 }
 0x378   : > { %v1814_v8 = vadd.f32 %v1807_v2, %v1564_v52  ;;  %v1770_v28 = vpop.f32.mrf.mxu0  ;;  %v1783_v9 = vpop.f32.mrf.mxu1  ;;  %v1813_v38 = vadd.f32 %v1794_v1, %v1563_v34  ;;  %2431 = vmatpush.bf16.msra.mxu2 %v3961_v18  ;;  %v3946_v34 = vld [vmem:[#allocation4 + $0xd8] sm:$0xf0] }
 0x37a   : > { %v3702_v15 = vmul.f32 -1.442695, %v1814_v8 }
 0x37b   : > { %v4518_v17 = vpop.eup %4517 }
 0x37c   : > { %v4520_v22 = vpop.eup %4519  ;;  %v1822_v23 = vadd.f32 1.0, %v4518_v17  ;;  %4521 = vpow2.f32 %v3702_v15  ;;  %v3954_v15 = vld [vmem:[#allocation4 + $0xf0] sm:$0xf0] }
 0x37d   : > { %v1823_v26 = vadd.f32 1.0, %v4520_v22  ;;  %v3957_v17 = vor.u32 %v4359_v13, %v3954_v15  ;;  %v3936_v22 = vld [vmem:[#allocation4 + $0xc0] sm:$0xf] }
 0x37e   : > { %4523 = vrcp.f32 %v1822_v23  ;;  %v1835_v45 = vand.u32 2147483648, %v1822_v23  ;;  %v1833_v47 = vand.u32 2147483647, %v1822_v23  ;;  %vm1829_vm2 = vweird.f32 %v1822_v23 }
 0x37f   : > { %4525 = vrcp.f32 %v1823_v26  ;;  %v1796_v31 = vpop.f32.mrf.mxu2  ;;  %v1809_v33 = vpop.f32.mrf.mxu3  ;;  %v1850_v40 = vand.u32 2147483648, %v1823_v26  ;;  %v1848_v44 = vand.u32 2147483647, %v1823_v26  ;;  %vm1844_vm3 = vweird.f32 %v1823_v26  ;;  %2418 = vmatpush.bf16.msra.mxu1 %v3957_v17  ;;  %v4339_v17 = vld [vmem:[#allocation4 + $0x44] sm:$0xf] }
 0x380   : > { %v1836_v51 = vor.u32 1.1754944e-38, %v1835_v45  ;;  %vm1834_vm6 = vcmp.eq.f32.partialorder %v1833_v47, 8.507059e+37  ;;  %v3945_v31 = vor.u32 %v4358_v29, %v3944_v27  ;;  %v4356_v33 = vld [vmem:[#allocation4 + $0xcc] sm:$0xf]  ;;  %v3882_v29 = vld [vmem:[#allocation4 + $0x58] sm:$0xf0] }
 0x381   : > { %v1851_v54 = vor.u32 1.1754944e-38, %v1850_v40  ;;  %vm1849_vm7 = vcmp.eq.f32.partialorder %v1848_v44, 8.507059e+37  ;;  %v3949_v36 = vor.u32 %v4356_v33, %v3946_v34  ;;  %v4352_v45 = vld [vmem:[#allocation4 + $0xac] sm:$0xf]  ;;  %v3930_v40 = vld [vmem:[#allocation4 + $0xb8] sm:$0xf0] }
 0x382   : > { %v4522_v37 = vpop.eup %4521  ;;  %2432 = vmatpush.bf16.msra.mxu2 %v3945_v31  ;;  %v3933_v47 = vor.u32 %v4352_v45, %v3930_v40  ;;  %v4349_v44 = vld [vmem:[#allocation4 + $0x8c] sm:$0xf0]  ;;  %v3856_v31 = vld [vmem:[#allocation4 + $0x20] sm:$0xf]  ;;  %v4335_v34 = vld [vmem:[#allocation4 + $0x24] sm:$0xf] }
 0x383   : > { %v1858_v35 = vadd.f32 1.0, %v4522_v37  ;;  %v3920_v37 = vld [vmem:[#allocation4 + $0xa0] sm:$0xf]  ;;  %2445 = vmatpush.bf16.msra.mxu3 %v3949_v36  ;;  %v4337_v33 = vld [vmem:[#allocation4 + $0x2c] sm:$0xf0] }
 0x384   : > { %v4524_v58 = vpop.eup %4523  ;;  %v4336_v40 = vld [vmem:[#allocation4 + $0x2c] sm:$0xf] }
 0x385   : > { %v4526_v39 = vpop.eup %4525  ;;  %v1825_v41 = vmul.f32 %v4524_v58, %v1822_v23  ;;  %4527 = vrcp.f32 %v1858_v35  ;;  %vm1830_vm0 = vweird.f32 %v4524_v58  ;;  %v1870_v4 = vand.u32 2147483648, %v1858_v35  ;;  %v4357_v23 = vld [vmem:[#allocation4 + $0xcc] sm:$0xf0] }
 0x386   : > { %v1840_v62 = vmul.f32 %v4526_v39, %v1823_v26  ;;  %4529 = vtanh.f32 %v1813_v38  ;;  %vm1845_vm1 = vweird.f32 %v4526_v39  ;;  %vm1831_vm4 = vmor %vm1829_vm2, %vm1830_vm0  ;;  %vm1864_vm9 = vweird.f32 %v1858_v35  ;;  %v3938_v26 = vld [vmem:[#allocation4 + $0xd0] sm:$0xf0] }
 0x387   : > { %v1826_v42 = vsub.f32 1.0, %v1825_v41  ;;  %vm1846_vm5 = vmor %vm1844_vm3, %vm1845_vm1  ;;  %v1868_v5 = vand.u32 2147483647, %v1858_v35  ;;  %v1871_v8 = vor.u32 1.1754944e-38, %v1870_v4  ;;  %v3937_v25 = vor.u32 %v4357_v23, %v3936_v22  ;;  %v3928_v41 = vld [vmem:[#allocation4 + $0xa8] sm:$0xf]  ;;  %2446 = vmatpush.bf16.msra.mxu3 %v3933_v47 }
 0x388   : > { %v1841_v43 = vsub.f32 1.0, %v1840_v62  ;;  %v3941_v30 = vor.u32 %v4355_v24, %v3938_v26  ;;  %v4354_v62 = vld [vmem:[#allocation4 + $0xb4] sm:$0xf0]  ;;  %v3890_v4 = vld [vmem:[#allocation4 + $0x70] sm:$0xf0]  ;;  %v3877_v23 = vor.u32 %v4339_v17, %v3874_v21 }
 0x389   : > { %v1827_v46 = vmul.f32 %v4524_v58, %v1826_v42  ;;  %vm1869_vm11 = vcmp.eq.f32.partialorder %v1868_v5, 8.507059e+37  ;;  %v3896_v5 = vld [vmem:[#allocation4 + $0x68] sm:$0xf]  ;;  %v4340_v26 = vld [vmem:[#allocation4 + $0x4c] sm:$0xf] }
 0x38a   : > { %v1842_v48 = vmul.f32 %v4526_v39, %v1841_v43  ;;  %2419 = vmatpush.bf16.msra.mxu1 %v3941_v30  ;;  %v3929_v43 = vor.u32 %v4354_v62, %v3928_v41  ;;  %v3880_v24 = vld [vmem:[#allocation4 + $0x48] sm:$0xf]  ;;  %v3885_v30 = vor.u32 %v4340_v26, %v3882_v29 }
 0x38b   : > { %v4528_v49 = vpop.eup %4527  ;;  %v1828_v50 = vadd.f32 %v4524_v58, %v1827_v46  ;;  %v3703_v46 = vld [vmem:[%s4759_s14 + $0x50] sm:$0xff] }
 0x38c   : > { %v1843_v52 = vadd.f32 %v4526_v39, %v1842_v48  ;;  %v1860_v53 = vmul.f32 %v4528_v49, %v1858_v35  ;;  %v4530_v56 = vpop.eup %4529  ;;  %vm1865_vm8 = vweird.f32 %v4528_v49  ;;  %v4353_v35 = vld [vmem:[#allocation4 + $0xac] sm:$0xf0]  ;;  %2433 = vmatpush.bf16.msra.mxu2 %v3929_v43  ;;  %v3904_v48 = vld [vmem:[#allocation4 + $0x80] sm:$0xf] }
 0x38d   : > { %v1832_v55 = vsel %vm1831_vm4, %v4524_v58, %v1828_v50  ;;  %vm1866_vm10 = vmor %vm1864_vm9, %vm1865_vm8  ;;  %v4351_v58 = vld [vmem:[#allocation4 + $0xa4] sm:$0xf]  ;;  %v3921_v38 = vor.u32 %v4353_v35, %v3920_v37  ;;  %v3905_v50 = vor.u32 %v4349_v44, %v3904_v48  ;;  %v3857_v35 = vor.u32 %v4337_v33, %v3856_v31  ;;  %v3840_v44 = vld [vmem:[#allocation4] sm:$0xf] }
 0x38e   : > { %v1837_v57 = vsel %vm1834_vm6, %v1836_v51, %v1832_v55  ;;  %v1847_v59 = vsel %vm1846_vm5, %v4526_v39, %v1843_v52  ;;  %v1861_v60 = vsub.f32 1.0, %v1860_v53  ;;  %v3922_v39 = vld [vmem:[#allocation4 + $0xb0] sm:$0xf0]  ;;  %v3912_v52 = vld [vmem:[#allocation4 + $0x88] sm:$0xf] }
 0x38f   : > { %v1852_v61 = vsel %vm1849_vm7, %v1851_v54, %v1847_v59  ;;  %v1875_v63 = vmul.f32 %v4530_v56, %v1837_v57  ;;  %v3925_v42 = vor.u32 %v4351_v58, %v3922_v39  ;;  %v3906_v51 = vld [vmem:[#allocation4 + $0x90] sm:$0xf0]  ;;  %v4350_v53 = vld [vmem:[#allocation4 + $0x94] sm:$0xf0]  ;;  %v4348_v56 = vld [vmem:[#allocation4 + $0x8c] sm:$0xf]  ;;  %v1884_v59 = vunpack.c.l.bf16 %v3703_v46 }
 0x390   : > { %v1874_v0 = vmul.f32 %v1852_v61, %v4798_v32  ;;  %v1862_v1 = vmul.f32 %v4528_v49, %v1861_v60  ;;  %v3952_v32 = vld [vmem:[#allocation4 + $0xe0] sm:$0xf]  ;;  %v3913_v55 = vor.u32 %v4350_v53, %v3912_v52  ;;  %v3914_v57 = vld [vmem:[#allocation4 + $0x98] sm:$0xf0]  ;;  %v1885_v60 = vunpack.c.h.bf16 %v3703_v46  ;;  %v3858_v58 = vld [vmem:[#allocation4 + $0x30] sm:$0xf0] }
 0x391   : > { %v3953_v14 = vor.u32 %v4361_v7, %v3952_v32  ;;  %2420 = vmatpush.bf16.msra.mxu1 %v3925_v42  ;;  %v3917_v61 = vor.u32 %v4348_v56, %v3914_v57  ;;  %v3898_v32 = vld [vmem:[#allocation4 + $0x78] sm:$0xf0]  ;;  %v4338_v39 = vld [vmem:[#allocation4 + $0x34] sm:$0xf0]  ;;  %v3861_v43 = vor.u32 %v4335_v34, %v3858_v58  ;;  %v4331_v52 = vld [vmem:[#allocation4 + $0x4] sm:$0xf] }
 0x392   : > { %v4808_v2 = vadd.f32 %v1875_v63, %v1874_v0  ;;  %v1863_v3 = vadd.f32 %v4528_v49, %v1862_v1  ;;  %2434 = vmatpush.bf16.msra.mxu2 %v3913_v55  ;;  %v3888_v63 = vld [vmem:[#allocation4 + $0x60] sm:$0xf]  ;;  %v4345_v0 = vld [vmem:[#allocation4 + $0x6c] sm:$0xf0]  ;;  %v4343_v1 = vld [vmem:[#allocation4 + $0x64] sm:$0xf] }
 0x393   : > { %2405 = vmatpush.bf16.msra.mxu0 %v3953_v14  ;;  %2447 = vmatpush.bf16.msra.mxu3 %v3917_v61  ;;  %v4813_v14 = vld [vmem:[%s4759_s14 + $0x58] sm:$0xff]  ;;  %v3866_v46 = vld [vmem:[#allocation4 + $0x38] sm:$0xf0]  ;;  %v3842_v53 = vld [vmem:[#allocation4 + $0x10] sm:$0xf0] }
 0x394   : > { %4531 = vtanh.f32 %v4808_v2  ;;  %v1867_v6 = vsel %vm1866_vm10, %v4528_v49, %v1863_v3  ;;  %v4347_v49 = vld [vmem:[#allocation4 + $0x84] sm:$0xf]  ;;  %v3889_v3 = vor.u32 %v4345_v0, %v3888_v63  ;;  %v1887_v22 = vunpack.c.h.bf16 %v4813_v14  ;;  %v4332_v63 = vld [vmem:[#allocation4 + $0xc] sm:$0xf]  ;;  %v3850_v0 = vld [vmem:[#allocation4 + $0x18] sm:$0xf0] }
 0x395   : > { %v1872_v9 = vsel %vm1869_vm11, %v1871_v8, %v1867_v6  ;;  %v3909_v54 = vor.u32 %v4347_v49, %v3906_v51  ;;  %v4346_v6 = vld [vmem:[#allocation4 + $0x74] sm:$0xf0]  ;;  %v3869_v47 = vor.u32 %v4336_v40, %v3866_v46  ;;  %v4333_v49 = vld [vmem:[#allocation4 + $0xc] sm:$0xf0]  ;;  %v3845_v57 = vor.u32 %v4331_v52, %v3842_v53  ;;  %v4391_v46 = vld [vmem:[#allocation4 + $0xe4] sm:$0xf] }
 0x396   : > { %v3841_v51 = vor.u32 %v4333_v49, %v3840_v44  ;;  %v4393_v40 = vld [vmem:[#allocation4 + $0xec] sm:$0xf0]  ;;  %v4093_v44 = vld [vmem:[#allocation4 + $0xe8] sm:$0xf]  ;;  %v4394_v49 = vld [vmem:[#allocation4 + $0xf4] sm:$0xf0] }
 0x397   : > { %2406 = vmatpush.bf16.msra.mxu0 %v3937_v25  ;;  %2421 = vmatpush.bf16.msra.mxu1 %v3909_v54  ;;  %v4342_v25 = vld [vmem:[#allocation4 + $0x54] sm:$0xf0]  ;;  %v3848_v54 = vld [vmem:[#allocation4 + $0x8] sm:$0xf]  ;;  %v4392_v52 = vld [vmem:[#allocation4 + $0xec] sm:$0xf] }
 0x398   : > { %v3881_v27 = vor.u32 %v4342_v25, %v3880_v24  ;;  %v4095_v53 = vld [vmem:[#allocation4 + $0xf8] sm:$0xf0] }
 0x39a   : > { %v4532_v28 = vpop.eup %4531 }
 0x39b   : > { %v1878_v10 = vmul.f32 %v4532_v28, %v1872_v9  ;;  %2407 = vmatpush.bf16.msra.mxu0 %v3921_v38  ;;  %v3893_v9 = vor.u32 %v4343_v1, %v3890_v4  ;;  %v3864_v38 = vld [vmem:[#allocation4 + $0x28] sm:$0xf]  ;;  %v1886_v4 = vunpack.c.l.bf16 %v4813_v14 }
 0x39c   : > { %v3865_v45 = vor.u32 %v4338_v39, %v3864_v38 }
 0x39d   : > { %v1889_v12 = vpack.c.bf16 %v1878_v10, %v1878_v10  ;;  %v3897_v10 = vor.u32 %v4346_v6, %v3896_v5  ;;  %2422 = vmatpush.bf16.msra.mxu1 %v3893_v9  ;;  %v3853_v5 = vor.u32 %v4332_v63, %v3850_v0  ;;  %v4390_v63 = vld [vmem:[#allocation4 + $0xd4] sm:$0xf0] }
 0x39f   : > { %2090 = vmatmul.bf16.vlgmr.msrb.gmra.mxu0 %v1889_v12  ;;  %2103 = vmatmul.bf16.vlgmr.msrb.gmra.mxu1 %v1889_v12 }
 0x3a0   : > { %2116 = vmatmul.bf16.vlgmr.msrb.gmra.mxu2 %v1889_v12  ;;  %2129 = vmatmul.bf16.vlgmr.msrb.gmra.mxu3 %v1889_v12  ;;  %v4344_v12 = vld [vmem:[#allocation4 + $0x6c] sm:$0xf] }
 0x3a1   : > { %2408 = vmatpush.bf16.msra.mxu0 %v3905_v50  ;;  %v3901_v15 = vor.u32 %v4344_v12, %v3898_v32  ;;  %2435 = vmatpush.bf16.msra.mxu2 %v3897_v10 }
 0x3a2   : > { %2423 = vmatpush.bf16.msra.mxu1 %v3877_v23 }
 0x3a3   : > { %2448 = vmatpush.bf16.msra.mxu3 %v3901_v15 }
 0x3a5   : > { %2409 = vmatpush.bf16.msra.mxu0 %v3889_v3  ;;  %2436 = vmatpush.bf16.msra.mxu2 %v3881_v27 }
 0x3a6   : > { %2424 = vmatpush.bf16.msra.mxu1 %v3861_v43 }
 0x3a7   : > { %2449 = vmatpush.bf16.msra.mxu3 %v3885_v30 }
 0x3a9   : > { %2410 = vmatpush.bf16.msra.mxu0 %v3873_v20  ;;  %2437 = vmatpush.bf16.msra.mxu2 %v3865_v45 }
 0x3aa   : > { %2425 = vmatpush.bf16.msra.mxu1 %v3845_v57  ;;  %v4387_v57 = vld [vmem:[#allocation4 + $0xc4] sm:$0xf] }
 0x3ab   : > { %2450 = vmatpush.bf16.msra.mxu3 %v3869_v47 }
 0x3ad   : > { %2411 = vmatpush.bf16.msra.mxu0 %v3857_v35 }
 0x3af   : > { %2451 = vmatpush.bf16.msra.mxu3 %v3853_v5 }
 0x3b1   : > { %2412 = vmatpush.bf16.msra.mxu0 %v3841_v51  ;;  %v4094_v51 = vor.u32 %v4394_v49, %v4093_v44  ;;  %v4005_v44 = vld [vmem:[#allocation4 + $0x40] sm:$0xf]  ;;  %v4373_v49 = vld [vmem:[#allocation4 + $0x4c] sm:$0xf0] }
 0x41c   : > { %v2091_v8 = vpop.f32.mrf.mxu0  ;;  %v2104_v28 = vpop.f32.mrf.mxu1 }
 0x41d   : > { %v2134_v7 = vadd.f32 %v2091_v8, %v1884_v59  ;;  %v2135_v13 = vadd.f32 %v2104_v28, %v1885_v60  ;;  %v4334_v59 = vld [vmem:[#allocation4 + $0x14] sm:$0xf0] }
 0x41e   : > { %v3849_v61 = vor.u32 %v4334_v59, %v3848_v54  ;;  %v4098_v54 = vor.u32 %v4392_v52, %v4095_v53  ;;  %v4006_v53 = vor.u32 %v4373_v49, %v4005_v44 }
 0x41f   : > { %v3833_v18 = vmul.f32 -1.442695, %v2134_v7  ;;  %v3834_v19 = vmul.f32 -1.442695, %v2135_v13 }
 0x420   : > { %2438 = vmatpush.bf16.msra.mxu2 %v3849_v61  ;;  %2767 = vmatpush.bf16.msrb.mxu3 %v4098_v54  ;;  %v4077_v61 = vld [vmem:[#allocation4 + $0xc8] sm:$0xf]  ;;  %v4007_v54 = vld [vmem:[#allocation4 + $0x50] sm:$0xf0] }
 0x421   : > { %4533 = vpow2.f32 %v3833_v18 }
 0x422   : > { %4535 = vpow2.f32 %v3834_v19 }
 0x423   : > { %v2117_v36 = vpop.f32.mrf.mxu2  ;;  %v2130_v37 = vpop.f32.mrf.mxu3 }
 0x424   : > { %v2137_v41 = vadd.f32 %v2130_v37, %v1887_v22  ;;  %v2093_v62 = vpop.f32.mrf.mxu0  ;;  %v2106_v42 = vpop.f32.mrf.mxu1  ;;  %v2136_v9 = vadd.f32 %v2117_v36, %v1886_v4  ;;  %2754 = vmatpush.bf16.msrb.mxu2 %v4094_v51  ;;  %v4079_v4 = vld [vmem:[#allocation4 + $0xd8] sm:$0xf0] }
 0x426   : > { %v3835_v48 = vmul.f32 -1.442695, %v2137_v41 }
 0x427   : > { %v4534_v50 = vpop.eup %4533 }
 0x428   : > { %v4536_v55 = vpop.eup %4535  ;;  %v2145_v56 = vadd.f32 1.0, %v4534_v50  ;;  %4537 = vpow2.f32 %v3835_v48  ;;  %v4087_v48 = vld [vmem:[#allocation4 + $0xf0] sm:$0xf0] }
 0x429   : > { %v2146_v60 = vadd.f32 1.0, %v4536_v55  ;;  %v4090_v50 = vor.u32 %v4391_v46, %v4087_v48  ;;  %v4069_v55 = vld [vmem:[#allocation4 + $0xc0] sm:$0xf] }
 0x42a   : > { %4539 = vrcp.f32 %v2145_v56  ;;  %v2158_v15 = vand.u32 2147483648, %v2145_v56  ;;  %v2156_v17 = vand.u32 2147483647, %v2145_v56  ;;  %vm2152_vm14 = vweird.f32 %v2145_v56 }
 0x42b   : > { %4541 = vrcp.f32 %v2146_v60  ;;  %v2119_v1 = vpop.f32.mrf.mxu2  ;;  %v2132_v3 = vpop.f32.mrf.mxu3  ;;  %v2173_v11 = vand.u32 2147483648, %v2146_v60  ;;  %v2171_v14 = vand.u32 2147483647, %v2146_v60  ;;  %vm2167_vm15 = vweird.f32 %v2146_v60  ;;  %2741 = vmatpush.bf16.msrb.mxu1 %v4090_v50  ;;  %v4371_v50 = vld [vmem:[#allocation4 + $0x44] sm:$0xf] }
 0x42c   : > { %v2159_v21 = vor.u32 1.1754944e-38, %v2158_v15  ;;  %vm2157_vm2 = vcmp.eq.f32.partialorder %v2156_v17, 8.507059e+37  ;;  %v4078_v1 = vor.u32 %v4390_v63, %v4077_v61  ;;  %v4388_v3 = vld [vmem:[#allocation4 + $0xcc] sm:$0xf]  ;;  %v4015_v63 = vld [vmem:[#allocation4 + $0x58] sm:$0xf0] }
 0x42d   : > { %v2174_v24 = vor.u32 1.1754944e-38, %v2173_v11  ;;  %vm2172_vm3 = vcmp.eq.f32.partialorder %v2171_v14, 8.507059e+37  ;;  %v4082_v5 = vor.u32 %v4388_v3, %v4079_v4  ;;  %v4384_v15 = vld [vmem:[#allocation4 + $0xac] sm:$0xf]  ;;  %v4063_v11 = vld [vmem:[#allocation4 + $0xb8] sm:$0xf0] }
 0x42e   : > { %v4538_v6 = vpop.eup %4537  ;;  %2755 = vmatpush.bf16.msrb.mxu2 %v4078_v1  ;;  %v4066_v17 = vor.u32 %v4384_v15, %v4063_v11  ;;  %v4381_v14 = vld [vmem:[#allocation4 + $0x8c] sm:$0xf0]  ;;  %v3989_v1 = vld [vmem:[#allocation4 + $0x20] sm:$0xf]  ;;  %v4367_v4 = vld [vmem:[#allocation4 + $0x24] sm:$0xf] }
 0x42f   : > { %v2181_v8 = vadd.f32 1.0, %v4538_v6  ;;  %v4053_v6 = vld [vmem:[#allocation4 + $0xa0] sm:$0xf]  ;;  %2768 = vmatpush.bf16.msrb.mxu3 %v4082_v5  ;;  %v4369_v3 = vld [vmem:[#allocation4 + $0x2c] sm:$0xf0] }
 0x430   : > { %v4540_v28 = vpop.eup %4539  ;;  %v4368_v11 = vld [vmem:[#allocation4 + $0x2c] sm:$0xf] }
 0x431   : > { %v4542_v10 = vpop.eup %4541  ;;  %v2148_v12 = vmul.f32 %v4540_v28, %v2145_v56  ;;  %4543 = vrcp.f32 %v2181_v8  ;;  %vm2153_vm12 = vweird.f32 %v4540_v28  ;;  %v2193_v58 = vand.u32 2147483648, %v2181_v8  ;;  %v4389_v56 = vld [vmem:[#allocation4 + $0xcc] sm:$0xf0] }
 0x432   : > { %v2163_v32 = vmul.f32 %v4542_v10, %v2146_v60  ;;  %4545 = vtanh.f32 %v2136_v9  ;;  %vm2168_vm13 = vweird.f32 %v4542_v10  ;;  %vm2154_vm0 = vmor %vm2152_vm14, %vm2153_vm12  ;;  %vm2187_vm5 = vweird.f32 %v2181_v8  ;;  %v4071_v60 = vld [vmem:[#allocation4 + $0xd0] sm:$0xf0] }
 0x433   : > { %v2149_v7 = vsub.f32 1.0, %v2148_v12  ;;  %vm2169_vm1 = vmor %vm2167_vm15, %vm2168_vm13  ;;  %v2191_v38 = vand.u32 2147483647, %v2181_v8  ;;  %v2194_v41 = vor.u32 1.1754944e-38, %v2193_v58  ;;  %v4070_v59 = vor.u32 %v4389_v56, %v4069_v55  ;;  %v4061_v12 = vld [vmem:[#allocation4 + $0xa8] sm:$0xf]  ;;  %2769 = vmatpush.bf16.msrb.mxu3 %v4066_v17 }
 0x434   : > { %v2164_v13 = vsub.f32 1.0, %v2163_v32  ;;  %v4074_v0 = vor.u32 %v4387_v57, %v4071_v60  ;;  %v4386_v32 = vld [vmem:[#allocation4 + $0xb4] sm:$0xf0]  ;;  %v4023_v58 = vld [vmem:[#allocation4 + $0x70] sm:$0xf0]  ;;  %v4010_v56 = vor.u32 %v4371_v50, %v4007_v54 }
 0x435   : > { %v2150_v16 = vmul.f32 %v4540_v28, %v2149_v7  ;;  %vm2192_vm7 = vcmp.eq.f32.partialorder %v2191_v38, 8.507059e+37  ;;  %v4029_v38 = vld [vmem:[#allocation4 + $0x68] sm:$0xf]  ;;  %v4372_v60 = vld [vmem:[#allocation4 + $0x4c] sm:$0xf] }
 0x436   : > { %v2165_v18 = vmul.f32 %v4542_v10, %v2164_v13  ;;  %2742 = vmatpush.bf16.msrb.mxu1 %v4074_v0  ;;  %v4062_v13 = vor.u32 %v4386_v32, %v4061_v12  ;;  %v4013_v57 = vld [vmem:[#allocation4 + $0x48] sm:$0xf]  ;;  %v4018_v0 = vor.u32 %v4372_v60, %v4015_v63 }
 0x437   : > { %v4544_v19 = vpop.eup %4543  ;;  %v2151_v20 = vadd.f32 %v4540_v28, %v2150_v16  ;;  %v3836_v16 = vld [vmem:[%s4759_s14 + $0x60] sm:$0xff] }
 0x438   : > { %v2166_v22 = vadd.f32 %v4542_v10, %v2165_v18  ;;  %v2183_v23 = vmul.f32 %v4544_v19, %v2181_v8  ;;  %v4546_v26 = vpop.eup %4545  ;;  %vm2188_vm4 = vweird.f32 %v4544_v19  ;;  %v4385_v8 = vld [vmem:[#allocation4 + $0xac] sm:$0xf0]  ;;  %2756 = vmatpush.bf16.msrb.mxu2 %v4062_v13  ;;  %v4037_v18 = vld [vmem:[#allocation4 + $0x80] sm:$0xf] }
 0x439   : > { %v2155_v25 = vsel %vm2154_vm0, %v4540_v28, %v2151_v20  ;;  %vm2189_vm6 = vmor %vm2187_vm5, %vm2188_vm4  ;;  %v4383_v28 = vld [vmem:[#allocation4 + $0xa4] sm:$0xf]  ;;  %v4054_v9 = vor.u32 %v4385_v8, %v4053_v6  ;;  %v4038_v20 = vor.u32 %v4381_v14, %v4037_v18  ;;  %v3990_v8 = vor.u32 %v4369_v3, %v3989_v1  ;;  %v3973_v14 = vld [vmem:[#allocation4] sm:$0xf] }
 0x43a   : > { %v2160_v27 = vsel %vm2157_vm2, %v2159_v21, %v2155_v25  ;;  %v2170_v29 = vsel %vm2169_vm1, %v4542_v10, %v2166_v22  ;;  %v2184_v30 = vsub.f32 1.0, %v2183_v23  ;;  %v4055_v10 = vld [vmem:[#allocation4 + $0xb0] sm:$0xf0]  ;;  %v4045_v22 = vld [vmem:[#allocation4 + $0x88] sm:$0xf] }
 0x43b   : > { %v2175_v31 = vsel %vm2172_vm3, %v2174_v24, %v2170_v29  ;;  %v2198_v33 = vmul.f32 %v4546_v26, %v2160_v27  ;;  %v4058_v7 = vor.u32 %v4383_v28, %v4055_v10  ;;  %v4039_v21 = vld [vmem:[#allocation4 + $0x90] sm:$0xf0]  ;;  %v4382_v23 = vld [vmem:[#allocation4 + $0x94] sm:$0xf0]  ;;  %v4380_v26 = vld [vmem:[#allocation4 + $0x8c] sm:$0xf]  ;;  %v2207_v29 = vunpack.c.l.bf16 %v3836_v16 }
 0x43c   : > { %v2197_v34 = vmul.f32 %v2175_v31, %v4808_v2  ;;  %v2185_v36 = vmul.f32 %v4544_v19, %v2184_v30  ;;  %v4085_v2 = vld [vmem:[#allocation4 + $0xe0] sm:$0xf]  ;;  %v4046_v25 = vor.u32 %v4382_v23, %v4045_v22  ;;  %v4047_v27 = vld [vmem:[#allocation4 + $0x98] sm:$0xf0]  ;;  %v2208_v30 = vunpack.c.h.bf16 %v3836_v16  ;;  %v3991_v28 = vld [vmem:[#allocation4 + $0x30] sm:$0xf0] }
 0x43d   : > { %v4086_v47 = vor.u32 %v4393_v40, %v4085_v2  ;;  %2743 = vmatpush.bf16.msrb.mxu1 %v4058_v7  ;;  %v4050_v31 = vor.u32 %v4380_v26, %v4047_v27  ;;  %v4031_v2 = vld [vmem:[#allocation4 + $0x78] sm:$0xf0]  ;;  %v4370_v10 = vld [vmem:[#allocation4 + $0x34] sm:$0xf0]  ;;  %v3994_v13 = vor.u32 %v4367_v4, %v3991_v28  ;;  %v4363_v22 = vld [vmem:[#allocation4 + $0x4] sm:$0xf] }
 0x43e   : > { %v4818_v37 = vadd.f32 %v2198_v33, %v2197_v34  ;;  %v2186_v35 = vadd.f32 %v4544_v19, %v2185_v36  ;;  %2757 = vmatpush.bf16.msrb.mxu2 %v4046_v25  ;;  %v4021_v33 = vld [vmem:[#allocation4 + $0x60] sm:$0xf]  ;;  %v4377_v34 = vld [vmem:[#allocation4 + $0x6c] sm:$0xf0]  ;;  %v4375_v36 = vld [vmem:[#allocation4 + $0x64] sm:$0xf] }
 0x43f   : > { %2728 = vmatpush.bf16.msrb.mxu0 %v4086_v47  ;;  %2770 = vmatpush.bf16.msrb.mxu3 %v4050_v31  ;;  %v4823_v47 = vld [vmem:[%s4759_s14 + $0x68] sm:$0xff]  ;;  %v3975_v23 = vld [vmem:[#allocation4 + $0x10] sm:$0xf0] }
 0x440   : > { %4547 = vtanh.f32 %v4818_v37  ;;  %v2190_v39 = vsel %vm2189_vm6, %v4544_v19, %v2186_v35  ;;  %v4379_v19 = vld [vmem:[#allocation4 + $0x84] sm:$0xf]  ;;  %v4022_v35 = vor.u32 %v4377_v34, %v4021_v33  ;;  %v2210_v55 = vunpack.c.h.bf16 %v4823_v47  ;;  %v3999_v16 = vld [vmem:[#allocation4 + $0x38] sm:$0xf0]  ;;  %v4364_v33 = vld [vmem:[#allocation4 + $0xc] sm:$0xf] }
 0x441   : > { %v2195_v42 = vsel %vm2192_vm7, %v2194_v41, %v2190_v39  ;;  %v4042_v24 = vor.u32 %v4379_v19, %v4039_v21  ;;  %v4378_v39 = vld [vmem:[#allocation4 + $0x74] sm:$0xf0]  ;;  %v4002_v17 = vor.u32 %v4368_v11, %v3999_v16  ;;  %v4365_v19 = vld [vmem:[#allocation4 + $0xc] sm:$0xf0]  ;;  %v3978_v27 = vor.u32 %v4363_v22, %v3975_v23  ;;  %v3983_v34 = vld [vmem:[#allocation4 + $0x18] sm:$0xf0] }
 0x442   : > { %v3974_v21 = vor.u32 %v4365_v19, %v3973_v14 }
 0x443   : > { %2729 = vmatpush.bf16.msrb.mxu0 %v4070_v59  ;;  %2744 = vmatpush.bf16.msrb.mxu1 %v4042_v24  ;;  %v4374_v59 = vld [vmem:[#allocation4 + $0x54] sm:$0xf0]  ;;  %v3981_v24 = vld [vmem:[#allocation4 + $0x8] sm:$0xf] }
 0x444   : > { %v4014_v61 = vor.u32 %v4374_v59, %v4013_v57 }
 0x446   : > { %v4548_v62 = vpop.eup %4547 }
 0x447   : > { %v2201_v43 = vmul.f32 %v4548_v62, %v2195_v42  ;;  %2730 = vmatpush.bf16.msrb.mxu0 %v4054_v9  ;;  %v4026_v42 = vor.u32 %v4375_v36, %v4023_v58  ;;  %v3997_v9 = vld [vmem:[#allocation4 + $0x28] sm:$0xf]  ;;  %v2209_v58 = vunpack.c.l.bf16 %v4823_v47 }
 0x448   : > { %v3998_v15 = vor.u32 %v4370_v10, %v3997_v9 }
 0x449   : > { %v2212_v45 = vpack.c.bf16 %v2201_v43, %v2201_v43  ;;  %v4030_v43 = vor.u32 %v4378_v39, %v4029_v38  ;;  %2745 = vmatpush.bf16.msrb.mxu1 %v4026_v42  ;;  %v3986_v38 = vor.u32 %v4364_v33, %v3983_v34 }
 0x44b   : > { %2413 = vmatmul.bf16.vlgmr.msra.gmra.mxu0 %v2212_v45  ;;  %2426 = vmatmul.bf16.vlgmr.msra.gmra.mxu1 %v2212_v45 }
 0x44c   : > { %2439 = vmatmul.bf16.vlgmr.msra.gmra.mxu2 %v2212_v45  ;;  %2452 = vmatmul.bf16.vlgmr.msra.gmra.mxu3 %v2212_v45  ;;  %v4376_v45 = vld [vmem:[#allocation4 + $0x6c] sm:$0xf] }
 0x44d   : > { %2731 = vmatpush.bf16.msrb.mxu0 %v4038_v20  ;;  %v4034_v48 = vor.u32 %v4376_v45, %v4031_v2  ;;  %2758 = vmatpush.bf16.msrb.mxu2 %v4030_v43 }
 0x44e   : > { %2746 = vmatpush.bf16.msrb.mxu1 %v4010_v56 }
 0x44f   : > { %2771 = vmatpush.bf16.msrb.mxu3 %v4034_v48 }
 0x451   : > { %2732 = vmatpush.bf16.msrb.mxu0 %v4022_v35  ;;  %2759 = vmatpush.bf16.msrb.mxu2 %v4014_v61 }
 0x452   : > { %2747 = vmatpush.bf16.msrb.mxu1 %v3994_v13 }
 0x453   : > { %2772 = vmatpush.bf16.msrb.mxu3 %v4018_v0 }
 0x455   : > { %2733 = vmatpush.bf16.msrb.mxu0 %v4006_v53  ;;  %2760 = vmatpush.bf16.msrb.mxu2 %v3998_v15  ;;  %v3969_v15 = vld [vmem:[%s4759_s14 + $0x70] sm:$0xff] }
 0x456   : > { %2748 = vmatpush.bf16.msrb.mxu1 %v3978_v27  ;;  %v2530_v11 = vunpack.c.l.bf16 %v3969_v15  ;;  %v2531_v16 = vunpack.c.h.bf16 %v3969_v15 }
 0x457   : > { %2773 = vmatpush.bf16.msrb.mxu3 %v4002_v17 }
 0x459   : > { %2734 = vmatpush.bf16.msrb.mxu0 %v3990_v8 }
 0x45b   : > { %2774 = vmatpush.bf16.msrb.mxu3 %v3986_v38 }
 0x45d   : > { %2735 = vmatpush.bf16.msrb.mxu0 %v3974_v21 }
 0x4c8   : > { %v2414_v41 = vpop.f32.mrf.mxu0  ;;  %v2427_v62 = vpop.f32.mrf.mxu1 }
 0x4c9   : > { %v2457_v40 = vadd.f32 %v2414_v41, %v2207_v29  ;;  %v2458_v46 = vadd.f32 %v2427_v62, %v2208_v30  ;;  %v4366_v29 = vld [vmem:[#allocation4 + $0x14] sm:$0xf0] }
 0x4ca   : > { %v3982_v31 = vor.u32 %v4366_v29, %v3981_v24 }
 0x4cb   : > { %v3966_v51 = vmul.f32 -1.442695, %v2457_v40  ;;  %v3967_v52 = vmul.f32 -1.442695, %v2458_v46 }
 0x4cc   : > { %2761 = vmatpush.bf16.msrb.mxu2 %v3982_v31 }
 0x4cd   : > { %4549 = vpow2.f32 %v3966_v51 }
 0x4ce   : > { %4551 = vpow2.f32 %v3967_v52 }
 0x4cf   : > { %v2440_v5 = vpop.f32.mrf.mxu2  ;;  %v2453_v6 = vpop.f32.mrf.mxu3 }
 0x4d0   : > { %v2460_v12 = vadd.f32 %v2453_v6, %v2210_v55  ;;  %v2416_v32 = vpop.f32.mrf.mxu0  ;;  %v2429_v7 = vpop.f32.mrf.mxu1  ;;  %v2459_v42 = vadd.f32 %v2440_v5, %v2209_v58 }
 0x4d2   : > { %v3968_v18 = vmul.f32 -1.442695, %v2460_v12 }
 0x4d3   : > { %v4550_v20 = vpop.eup %4549 }
 0x4d4   : > { %v4552_v25 = vpop.eup %4551  ;;  %v2468_v26 = vadd.f32 1.0, %v4550_v20  ;;  %4553 = vpow2.f32 %v3968_v18  ;;  %v3970_v20 = vld [vmem:[%s4759_s14 + $0x78] sm:$0xff] }
 0x4d5   : > { %v2469_v30 = vadd.f32 1.0, %v4552_v25  ;;  %v2533_v23 = vunpack.c.h.bf16 %v3970_v20  ;;  %v2532_v38 = vunpack.c.l.bf16 %v3970_v20 }
 0x4d6   : > { %4555 = vrcp.f32 %v2468_v26  ;;  %v2481_v48 = vand.u32 2147483648, %v2468_v26  ;;  %v2479_v50 = vand.u32 2147483647, %v2468_v26  ;;  %vm2475_vm10 = vweird.f32 %v2468_v26 }
 0x4d7   : > { %4557 = vrcp.f32 %v2469_v30  ;;  %v2442_v36 = vpop.f32.mrf.mxu2  ;;  %v2455_v35 = vpop.f32.mrf.mxu3  ;;  %v2496_v44 = vand.u32 2147483648, %v2469_v30  ;;  %v2494_v47 = vand.u32 2147483647, %v2469_v30  ;;  %vm2490_vm11 = vweird.f32 %v2469_v30 }
 0x4d8   : > { %v2482_v54 = vor.u32 1.1754944e-38, %v2481_v48  ;;  %vm2480_vm14 = vcmp.eq.f32.partialorder %v2479_v50, 8.507059e+37 }
 0x4d9   : > { %v2497_v57 = vor.u32 1.1754944e-38, %v2496_v44  ;;  %vm2495_vm15 = vcmp.eq.f32.partialorder %v2494_v47, 8.507059e+37 }
 0x4da   : > { %v4554_v39 = vpop.eup %4553 }
 0x4db   : > { %v2504_v41 = vadd.f32 1.0, %v4554_v39 }
 0x4dc   : > { %v4556_v62 = vpop.eup %4555 }
 0x4dd   : > { %v4558_v43 = vpop.eup %4557  ;;  %v2471_v45 = vmul.f32 %v4556_v62, %v2468_v26  ;;  %4559 = vrcp.f32 %v2504_v41  ;;  %vm2476_vm8 = vweird.f32 %v4556_v62  ;;  %v2516_v28 = vand.u32 2147483648, %v2504_v41 }
 0x4de   : > { %v2486_v2 = vmul.f32 %v4558_v43, %v2469_v30  ;;  %4561 = vtanh.f32 %v2459_v42  ;;  %vm2491_vm9 = vweird.f32 %v4558_v43  ;;  %vm2477_vm12 = vmor %vm2475_vm10, %vm2476_vm8  ;;  %vm2510_vm1 = vweird.f32 %v2504_v41 }
 0x4df   : > { %v2472_v40 = vsub.f32 1.0, %v2471_v45  ;;  %vm2492_vm13 = vmor %vm2490_vm11, %vm2491_vm9  ;;  %v2514_v9 = vand.u32 2147483647, %v2504_v41  ;;  %v2517_v12 = vor.u32 1.1754944e-38, %v2516_v28 }
 0x4e0   : > { %v2487_v46 = vsub.f32 1.0, %v2486_v2 }
 0x4e1   : > { %v2473_v49 = vmul.f32 %v4556_v62, %v2472_v40  ;;  %vm2515_vm3 = vcmp.eq.f32.partialorder %v2514_v9, 8.507059e+37 }
 0x4e2   : > { %v2488_v51 = vmul.f32 %v4558_v43, %v2487_v46 }
 0x4e3   : > { %v4560_v52 = vpop.eup %4559  ;;  %v2474_v53 = vadd.f32 %v4556_v62, %v2473_v49 }
 0x4e4   : > { %v2489_v55 = vadd.f32 %v4558_v43, %v2488_v51  ;;  %v2506_v56 = vmul.f32 %v4560_v52, %v2504_v41  ;;  %v4562_v60 = vpop.eup %4561  ;;  %vm2511_vm0 = vweird.f32 %v4560_v52 }
 0x4e5   : > { %v2478_v59 = vsel %vm2477_vm12, %v4556_v62, %v2474_v53  ;;  %vm2512_vm2 = vmor %vm2510_vm1, %vm2511_vm0 }
 0x4e6   : > { %v2483_v61 = vsel %vm2480_vm14, %v2482_v54, %v2478_v59  ;;  %v2493_v63 = vsel %vm2492_vm13, %v4558_v43, %v2489_v55  ;;  %v2507_v0 = vsub.f32 1.0, %v2506_v56 }
 0x4e7   : > { %v2498_v1 = vsel %vm2495_vm15, %v2497_v57, %v2493_v63  ;;  %v2521_v3 = vmul.f32 %v4562_v60, %v2483_v61 }
 0x4e8   : > { %v2520_v4 = vmul.f32 %v2498_v1, %v4818_v37  ;;  %v2508_v5 = vmul.f32 %v4560_v52, %v2507_v0 }
 0x4ea   : > { %v4828_v6 = vadd.f32 %v2521_v3, %v2520_v4  ;;  %v2509_v8 = vadd.f32 %v4560_v52, %v2508_v5 }
 0x4ec   : > { %4563 = vtanh.f32 %v4828_v6  ;;  %v2513_v10 = vsel %vm2512_vm2, %v4560_v52, %v2509_v8 }
 0x4ed   : > { %v2518_v7 = vsel %vm2515_vm3, %v2517_v12, %v2513_v10 }
 0x4f2   : > { %v4564_v32 = vpop.eup %4563 }
 0x4f3   : > { %v2524_v13 = vmul.f32 %v4564_v32, %v2518_v7 }
 0x4f5   : > { %v2535_v37 = vpack.c.bf16 %v2524_v13, %v2524_v13 }
 0x4f7   : > { %2736 = vmatmul.bf16.vlgmr.msrb.gmra.mxu0 %v2535_v37  ;;  %2749 = vmatmul.bf16.vlgmr.msrb.gmra.mxu1 %v2535_v37 }
 0x4f8   : > { %2762 = vmatmul.bf16.vlgmr.msrb.gmra.mxu2 %v2535_v37  ;;  %2775 = vmatmul.bf16.vlgmr.msrb.gmra.mxu3 %v2535_v37 }
 0x574   : > { %v2737_v17 = vpop.f32.mrf.mxu0  ;;  %v2750_v18 = vpop.f32.mrf.mxu1 }
 0x575   : > { %v2780_v14 = vadd.f32 %v2737_v17, %v2530_v11  ;;  %v2781_v19 = vadd.f32 %v2750_v18, %v2531_v16 }
 0x577   : > { %v4099_v21 = vmul.f32 -1.442695, %v2780_v14  ;;  %v4100_v22 = vmul.f32 -1.442695, %v2781_v19 }
 0x579   : > { %4565 = vpow2.f32 %v4099_v21 }
 0x57a   : > { %4567 = vpow2.f32 %v4100_v22 }
 0x57b   : > { %v2763_v24 = vpop.f32.mrf.mxu2  ;;  %v2776_v25 = vpop.f32.mrf.mxu3 }
 0x57c   : > { %v2783_v26 = vadd.f32 %v2776_v25, %v2533_v23  ;;  %v2739_v27 = vpop.f32.mrf.mxu0  ;;  %v2752_v29 = vpop.f32.mrf.mxu1  ;;  %v2782_v42 = vadd.f32 %v2763_v24, %v2532_v38 }
 0x57e   : > { %v4101_v30 = vmul.f32 -1.442695, %v2783_v26 }
 0x57f   : > { %v4566_v31 = vpop.eup %4565 }
 0x580   : > { %v4568_v33 = vpop.eup %4567  ;;  %v2791_v34 = vadd.f32 1.0, %v4566_v31  ;;  %4569 = vpow2.f32 %v4101_v30 }
 0x581   : > { %v2792_v36 = vadd.f32 1.0, %v4568_v33 }
 0x582   : > { %4571 = vrcp.f32 %v2791_v34  ;;  %v2804_v48 = vand.u32 2147483648, %v2791_v34  ;;  %v2802_v50 = vand.u32 2147483647, %v2791_v34  ;;  %vm2798_vm6 = vweird.f32 %v2791_v34 }
 0x583   : > { %4573 = vrcp.f32 %v2792_v36  ;;  %v2765_v35 = vpop.f32.mrf.mxu2  ;;  %v2778_v58 = vpop.f32.mrf.mxu3  ;;  %v2819_v44 = vand.u32 2147483648, %v2792_v36  ;;  %v2817_v47 = vand.u32 2147483647, %v2792_v36  ;;  %vm2813_vm7 = vweird.f32 %v2792_v36 }
 0x584   : > { %v2805_v54 = vor.u32 1.1754944e-38, %v2804_v48  ;;  %vm2803_vm10 = vcmp.eq.f32.partialorder %v2802_v50, 8.507059e+37 }
 0x585   : > { %v2820_v57 = vor.u32 1.1754944e-38, %v2819_v44  ;;  %vm2818_vm11 = vcmp.eq.f32.partialorder %v2817_v47, 8.507059e+37 }
 0x586   : > { %v4570_v39 = vpop.eup %4569 }
 0x587   : > { %v2827_v41 = vadd.f32 1.0, %v4570_v39 }
 0x588   : > { %v4572_v62 = vpop.eup %4571 }
 0x589   : > { %v4574_v43 = vpop.eup %4573  ;;  %v2794_v45 = vmul.f32 %v4572_v62, %v2791_v34  ;;  %4575 = vrcp.f32 %v2827_v41  ;;  %vm2799_vm4 = vweird.f32 %v4572_v62  ;;  %v2839_v9 = vand.u32 2147483648, %v2827_v41 }
 0x58a   : > { %v2809_v2 = vmul.f32 %v4574_v43, %v2792_v36  ;;  %4577 = vtanh.f32 %v2782_v42  ;;  %vm2814_vm5 = vweird.f32 %v4574_v43  ;;  %vm2800_vm8 = vmor %vm2798_vm6, %vm2799_vm4  ;;  %vm2833_vm13 = vweird.f32 %v2827_v41 }
 0x58b   : > { %v2795_v40 = vsub.f32 1.0, %v2794_v45  ;;  %vm2815_vm9 = vmor %vm2813_vm7, %vm2814_vm5  ;;  %v2837_v10 = vand.u32 2147483647, %v2827_v41  ;;  %v2840_v32 = vor.u32 1.1754944e-38, %v2839_v9 }
 0x58c   : > { %v2810_v46 = vsub.f32 1.0, %v2809_v2 }
 0x58d   : > { %v2796_v49 = vmul.f32 %v4572_v62, %v2795_v40  ;;  %vm2838_vm15 = vcmp.eq.f32.partialorder %v2837_v10, 8.507059e+37 }
 0x58e   : > { %v2811_v51 = vmul.f32 %v4574_v43, %v2810_v46 }
 0x58f   : > { %v4576_v52 = vpop.eup %4575  ;;  %v2797_v53 = vadd.f32 %v4572_v62, %v2796_v49 }
 0x590   : > { %v2812_v55 = vadd.f32 %v4574_v43, %v2811_v51  ;;  %v2829_v56 = vmul.f32 %v4576_v52, %v2827_v41  ;;  %v4578_v60 = vpop.eup %4577  ;;  %vm2834_vm12 = vweird.f32 %v4576_v52 }
 0x591   : > { %v2801_v59 = vsel %vm2800_vm8, %v4572_v62, %v2797_v53  ;;  %vm2835_vm14 = vmor %vm2833_vm13, %vm2834_vm12 }
 0x592   : > { %v2806_v61 = vsel %vm2803_vm10, %v2805_v54, %v2801_v59  ;;  %v2816_v63 = vsel %vm2815_vm9, %v4574_v43, %v2812_v55  ;;  %v2830_v0 = vsub.f32 1.0, %v2829_v56 }
 0x593   : > { %v2821_v1 = vsel %vm2818_vm11, %v2820_v57, %v2816_v63  ;;  %v2844_v3 = vmul.f32 %v4578_v60, %v2806_v61 }
 0x594   : > { %v2843_v4 = vmul.f32 %v2821_v1, %v4828_v6  ;;  %v2831_v5 = vmul.f32 %v4576_v52, %v2830_v0 }
 0x596   : > { %v2845_v8 = vadd.f32 %v2844_v3, %v2843_v4  ;;  %v2832_v28 = vadd.f32 %v4576_v52, %v2831_v5 }
 0x598   : > { %4579 = vtanh.f32 %v2845_v8  ;;  %2849 = vst [vmem:[#allocation3] sm:$0xff] %v2845_v8  ;;  %v2836_v12 = vsel %vm2835_vm14, %v4576_v52, %v2832_v28 }
 0x599   : > { %v2841_v13 = vsel %vm2838_vm15, %v2840_v32, %v2836_v12 }
 0x59d   : > { %2853 = sbr.rel (%p4102_p9) target bundleno = 1608 (0x648), region = 52 }
 0x59e   : > { %v4580_v7 = vpop.eup %4579 }
 0x59f   : > { %v2847_v37 = vmul.f32 %v4580_v7, %v2841_v13 }
 0x5a1   : > { %2848 = vst [vmem:[#allocation2] sm:$0xff] %v2847_v37 }
 0x5a2   : > { %v4402_v6 = vld [vmem:[#allocation6 + $0x38] sm:$0xff]  ;;  %v4401_v15 = vld [vmem:[#allocation6 + $0x30] sm:$0xff]  ;;  %v4400_v11 = vld [vmem:[#allocation6 + $0x28] sm:$0xff] }
 0x5a3   : > { %2924 = vmatpush.bf16.msra.mxu0 %v4402_v6  ;;  %v4399_v16 = vld [vmem:[#allocation6 + $0x20] sm:$0xff]  ;;  %v4398_v17 = vld [vmem:[#allocation6 + $0x18] sm:$0xff]  ;;  %v4397_v18 = vld [vmem:[#allocation6 + $0x10] sm:$0xff] }
 0x5a4   : > { %v4396_v14 = vld [vmem:[#allocation6 + $0x8] sm:$0xff]  ;;  %v4395_v19 = vld [vmem:[#allocation6] sm:$0xff]  ;;  %v4581_v22 = vld [vmem:[%s4853_s3] ss:$0 sm:$0xff] }
 0x5a7   : > { %2925 = vmatpush.bf16.msra.mxu0 %v4401_v15 }
 0x5a8   : > { %v2854_v20 = vld [vmem:[#allocation2] sm:$0xff] }
 0x5a9   : > { %v2855_v21 = vpack.c.bf16 %v2854_v20, %v2854_v20 }
 0x5ab   : > { %2926 = vmatpush.bf16.msra.mxu0 %v4400_v11 }
 0x5af   : > { %2927 = vmatpush.bf16.msra.mxu0 %v4399_v16 }
 0x5b3   : > { %2928 = vmatpush.bf16.msra.mxu0 %v4398_v17 }
 0x5b7   : > { %2929 = vmatpush.bf16.msra.mxu0 %v4397_v18 }
 0x5bb   : > { %2930 = vmatpush.bf16.msra.mxu0 %v4396_v14 }
 0x5bf   : > { %2931 = vmatpush.bf16.msra.mxu0 %v4395_v19 }
 0x5c2   : > { %2932 = vmatmul.bf16.vlgmr.msra.gmra.mxu0 %v2855_v21 }
 0x63f   : > { %v2933_v23 = vpop.f32.mrf.mxu0 }
 0x640   : > { %v2934_v24 = vadd.f32 %v4581_v22, %v2933_v23 }
 0x642   : > { %2937 = vst [vmem:[%s4854_s4] sm:$0xff] %v2934_v24 }
 0x647   : > { %v2935_v25 = vpop.f32.mrf.mxu0 }
 0x648 PF: > { %s16_s17 = sadd.s32 1, %s4672_s17   ;;  %s4857_s15 = smov %s4668_s16 }
 0x649   : > { %p13_p10 = scmp.ge.s32.totalorder %s16_s17, 4   ;;  %s4858_s16 = smov %s4860_s19 }
 0x64b   :  { %15 = sbr.rel (!%p13_p10) target bundleno = 3 (0x3), region = 90 }
 0x650   :  { %2957 = vsyncpa [#allocation5], 1 }
 0x651   :  { %2959 = vsyncpa [#allocation5 + $0x1], 1 }
 0x652   :  { %2960 = vsyncpa [#allocation7], 1 }

</bundles_post_ra>
